<compile_context>
chip_gen: v7x
topology: tpu7x:2x2x1
jax: 0.10.0
libtpu: 0.0.40
codegen_flags: <defaults>
</compile_context>

<pallas_src>
import functools
import math

import jax
import jax.numpy as jnp
from jax.experimental import pallas as pl
from jax.experimental.pallas import tpu as pltpu


# ----------------------------- Pallas kernels -----------------------------

def _ffn_kernel_resident(x_ref, w1_ref, b1_ref, w2_ref, b2_ref, o_ref):
    # x_ref: (TM, D) bf16; w1: (D, F) bf16; b1: (1, F) f32; w2: (F, D) bf16;
    # b2: (1, D) f32; o_ref: (TM, D) input dtype.
    h = jnp.dot(x_ref[...], w1_ref[...],
                preferred_element_type=jnp.float32)          # (TM, F) fp32 acc
    h = jnp.maximum(h + b1_ref[...], 0.0)                    # bias + ReLU in fp32
    # TODO(synk): dropout treated as identity (eval mode).
    h = h.astype(w2_ref.dtype)                               # bf16 back to the MXU
    acc = jnp.dot(h, w2_ref[...],
                  preferred_element_type=jnp.float32)        # (TM, D) fp32 acc
    o_ref[...] = (acc + b2_ref[...]).astype(o_ref.dtype)


def _ffn_kernel_ftiled(x_ref, w1_ref, b1_ref, w2_ref, b2_ref, o_ref, acc_ref):
    # Grid = (rows, f_chunks).  acc_ref: (TM, D) fp32 scratch, persists across
    # the inner f axis (output block index is constant along it).
    j = pl.program_id(1)

    @pl.when(j == 0)
    def _():
        acc_ref[...] = jnp.zeros_like(acc_ref)

    h = jnp.dot(x_ref[...], w1_ref[...],
                preferred_element_type=jnp.float32)          # (TM, TF) fp32
    h = jnp.maximum(h + b1_ref[...], 0.0)                    # bias + ReLU (fp32)
    acc_ref[...] += jnp.dot(h.astype(w2_ref.dtype), w2_ref[...],
                            preferred_element_type=jnp.float32)

    @pl.when(j == pl.num_programs(1) - 1)
    def _():
        o_ref[...] = (acc_ref[...] + b2_ref[...]).astype(o_ref.dtype)


# ----------------------------- Wrapper -----------------------------

def _round_up(n, m):
    return ((n + m - 1) // m) * m


def _choose_f_tile(F, cap=512):
    """Largest multiple of 128 that divides F and is <= cap (else full F)."""
    if F % 128 != 0 or F <= 128:
        return F
    tf = (min(cap, F) // 128) * 128
    while F % tf != 0:
        tf -= 128
    return max(tf, 128)


def feed_forward(x, params, *, block_rows=256, compute_dtype=jnp.bfloat16,
                 max_resident_weight_bytes=16 * 1024 * 1024):
    """x: (..., d_model) -> (..., d_model). Fused Linear/ReLU/Linear."""
    w1, b1, w2, b2 = params["w1"], params["b1"], params["w2"], params["b2"]
    D, F = w1.shape
    orig_shape = x.shape
    x2d = x.reshape(-1, D)
    M = x2d.shape[0]

    # Row tile: multiple of 8 sublanes, capped by block_rows; pad rows so the
    # grid divides evenly (every block fully in-bounds / unmasked stores).
    tm = min(block_rows, _round_up(M, 8))
    grid_m = pl.cdiv(M, tm)
    Mp = grid_m * tm
    if Mp != M:
        x2d = jnp.pad(x2d, ((0, Mp - M), (0, 0)))

    # bf16 operands for the MXU; biases stay fp32 for the VPU epilogue.
    xc = x2d.astype(compute_dtype)
    w1c = w1.astype(compute_dtype)
    w2c = w2.astype(compute_dtype)
    b1f = b1.astype(jnp.float32).reshape(1, F)
    b2f = b2.astype(jnp.float32).reshape(1, D)

    weight_bytes = (w1c.size + w2c.size) * jnp.dtype(compute_dtype).itemsize
    compiler_params_1d = pltpu.CompilerParams(
        dimension_semantics=("parallel",),
        vmem_limit_bytes=48 * 1024 * 1024,
    )

    if weight_bytes <= max_resident_weight_bytes:
        # ---- Path A: weights fully resident in VMEM (fetched once). ----
        out = pl.pallas_call(
            _ffn_kernel_resident,
            out_shape=jax.ShapeDtypeStruct((Mp, D), x.dtype),
            grid=(grid_m,),
            in_specs=[
                pl.BlockSpec((tm, D), lambda i: (i, 0)),   # activation (pipelined)
                pl.BlockSpec((D, F), lambda i: (0, 0)),    # W1 resident
                pl.BlockSpec((1, F), lambda i: (0, 0)),    # b1 resident
                pl.BlockSpec((F, D), lambda i: (0, 0)),    # W2 resident
                pl.BlockSpec((1, D), lambda i: (0, 0)),    # b2 resident
            ],
            out_specs=pl.BlockSpec((tm, D), lambda i: (i, 0)),
            compiler_params=compiler_params_1d,
        )(xc, w1c, b1f, w2c, b2f)
    else:
        # ---- Path B: d_ff tiled as an inner reduction-style axis. ----
        tf = _choose_f_tile(F)
        grid_f = F // tf
        out = pl.pallas_call(
            _ffn_kernel_ftiled,
            out_shape=jax.ShapeDtypeStruct((Mp, D), x.dtype),
            grid=(grid_m, grid_f),
            in_specs=[
                pl.BlockSpec((tm, D), lambda i, j: (i, 0)),   # activation tile
                pl.BlockSpec((D, tf), lambda i, j: (0, j)),   # W1 f-chunk
                pl.BlockSpec((1, tf), lambda i, j: (0, j)),   # b1 f-chunk
                pl.BlockSpec((tf, D), lambda i, j: (j, 0)),   # W2 f-chunk
                pl.BlockSpec((1, D), lambda i, j: (0, 0)),    # b2 resident
            ],
            out_specs=pl.BlockSpec((tm, D), lambda i, j: (i, 0)),
            scratch_shapes=[pltpu.VMEM((tm, D), jnp.float32)],
            compiler_params=pltpu.CompilerParams(
                dimension_semantics=("parallel", "arbitrary"),
                vmem_limit_bytes=48 * 1024 * 1024,
            ),
        )(xc, w1c, b1f, w2c, b2f)

    if Mp != M:
        out = out[:M]
    return out.reshape(orig_shape)


# ----------------------------- Parameter init -----------------------------

def init_params(key, d_model, d_ff):
    k1, k2, k3, k4 = jax.random.split(key, 4)
    # Matches nn.Linear default init: U(-1/sqrt(fan_in), 1/sqrt(fan_in)).
    lim1 = 1.0 / math.sqrt(d_model)
    lim2 = 1.0 / math.sqrt(d_ff)
    return dict(
        w1=jax.random.uniform(k1, (d_model, d_ff), jnp.float32, -lim1, lim1),
        b1=jax.random.uniform(k2, (d_ff,), jnp.float32, -lim1, lim1),
        w2=jax.random.uniform(k3, (d_ff, d_model), jnp.float32, -lim2, lim2),
        b2=jax.random.uniform(k4, (d_model,), jnp.float32, -lim2, lim2),
    )


# ----------------------------- Pure-JAX reference -----------------------------

def _ref_feed_forward(x, params):
    h = jnp.maximum(x @ params["w1"] + params["b1"], 0.0)
    return h @ params["w2"] + params["b2"]


# ----------------------------- Main -----------------------------

if __name__ == "__main__":
    d_model, d_ff = 512, 2048          # module defaults
    B, S = 4, 128                      # M = 512 rows -> 2 row tiles of 256

    key = jax.random.PRNGKey(0)
    k_par, k_x = jax.random.split(key)
    params = init_params(k_par, d_model, d_ff)
    x = jax.random.normal(k_x, (B, S, d_model), jnp.float32)

    ref = _ref_feed_forward(x, params)

    # Path A: resident weights (default for these sizes).
    fwd = jax.jit(functools.partial(feed_forward, block_rows=256))
    out = jax.block_until_ready(fwd(x, params))
    assert out.shape == (B, S, d_model)
    # bf16 MXU operands + fp32 accumulation -> relaxed tolerance vs fp32 ref.
    assert jnp.allclose(out, ref, atol=5e-2, rtol=5e-2), "resident path mismatch"

    # Path B: F-tiled accumulator path (forced), exercised for correctness.
    fwd_tiled = jax.jit(functools.partial(
        feed_forward, block_rows=256, max_resident_weight_bytes=0))
    out_t = jax.block_until_ready(fwd_tiled(x, params))
    assert jnp.allclose(out_t, ref, atol=5e-2, rtol=5e-2), "f-tiled path mismatch"

    print("KERNEL_OK")
</pallas_src>

<mosaic_0001>
module attributes {stable_mosaic.version = 11 : i64} {
  func.func @_ffn_kernel_resident(%arg0: i32, %arg1: memref<256x512xbf16, #tpu.memory_space<vmem>>, %arg2: memref<512x2048xbf16, #tpu.memory_space<vmem>>, %arg3: memref<1x2048xf32, #tpu.memory_space<vmem>>, %arg4: memref<2048x512xbf16, #tpu.memory_space<vmem>>, %arg5: memref<1x512xf32, #tpu.memory_space<vmem>>, %arg6: memref<256x512xf32, #tpu.memory_space<vmem>>) attributes {dimension_semantics = [#tpu.dimension_semantics<parallel>], iteration_bounds = array<i64: 2>, scalar_prefetch = 0 : i64, scratch_operands = 0 : i64, tpu.core_type = #tpu.core_type<tc>, window_params = [{transform_indices = @transform_0, window_bounds = array<i64: 256, 512>}, {pipeline_mode = #tpu.pipeline_mode<synchronous>, transform_indices = @transform_1, window_bounds = array<i64: 512, 2048>}, {pipeline_mode = #tpu.pipeline_mode<synchronous>, transform_indices = @transform_2, window_bounds = array<i64: 1, 2048>}, {pipeline_mode = #tpu.pipeline_mode<synchronous>, transform_indices = @transform_3, window_bounds = array<i64: 2048, 512>}, {pipeline_mode = #tpu.pipeline_mode<synchronous>, transform_indices = @transform_4, window_bounds = array<i64: 1, 512>}, {transform_indices = @transform_5, window_bounds = array<i64: 256, 512>}]} {
    %c0 = arith.constant 0 : index
    %c0_0 = arith.constant 0 : index
    %0 = vector.load %arg1[%c0, %c0_0] : memref<256x512xbf16, #tpu.memory_space<vmem>>, vector<256x512xbf16>
    %c0_1 = arith.constant 0 : index
    %c0_2 = arith.constant 0 : index
    %1 = vector.load %arg2[%c0_1, %c0_2] : memref<512x2048xbf16, #tpu.memory_space<vmem>>, vector<512x2048xbf16>
    %cst = arith.constant dense<0.000000e+00> : vector<256x2048xf32>
    %2 = tpu.matmul %0, %1, %cst {dimension_numbers = #tpu.dot_dimension_numbers<[1], [0], [0], [1], [0, 0, 1, 1], [], []>} : vector<256x512xbf16>, vector<512x2048xbf16>, vector<256x2048xf32> -> vector<256x2048xf32>
    %c0_3 = arith.constant 0 : index
    %c0_4 = arith.constant 0 : index
    %3 = vector.load %arg3[%c0_3, %c0_4] : memref<1x2048xf32, #tpu.memory_space<vmem>>, vector<1x2048xf32>
    %4 = vector.broadcast %3 : vector<1x2048xf32> to vector<256x2048xf32>
    %5 = arith.addf %2, %4 : vector<256x2048xf32>
    %cst_5 = arith.constant 0.000000e+00 : f32
    %6 = vector.broadcast %cst_5 : f32 to vector<256x2048xf32>
    %7 = arith.maximumf %5, %6 : vector<256x2048xf32>
    %8 = arith.truncf %7 : vector<256x2048xf32> to vector<256x2048xbf16>
    %c0_6 = arith.constant 0 : index
    %c0_7 = arith.constant 0 : index
    %9 = vector.load %arg4[%c0_6, %c0_7] : memref<2048x512xbf16, #tpu.memory_space<vmem>>, vector<2048x512xbf16>
    %cst_8 = arith.constant dense<0.000000e+00> : vector<256x512xf32>
    %10 = tpu.matmul %8, %9, %cst_8 {dimension_numbers = #tpu.dot_dimension_numbers<[1], [0], [0], [1], [0, 0, 1, 1], [], []>} : vector<256x2048xbf16>, vector<2048x512xbf16>, vector<256x512xf32> -> vector<256x512xf32>
    %c0_9 = arith.constant 0 : index
    %c0_10 = arith.constant 0 : index
    %11 = vector.load %arg5[%c0_9, %c0_10] : memref<1x512xf32, #tpu.memory_space<vmem>>, vector<1x512xf32>
    %12 = vector.broadcast %11 : vector<1x512xf32> to vector<256x512xf32>
    %13 = arith.addf %10, %12 : vector<256x512xf32>
    %c0_11 = arith.constant 0 : index
    %c0_12 = arith.constant 0 : index
    %14 = vector.load %arg6[%c0_11, %c0_12] : memref<256x512xf32, #tpu.memory_space<vmem>>, vector<256x512xf32>
    tpu.vector_store %arg6[%c0_11, %c0_12], %13 {strides = array<i32>} : memref<256x512xf32, #tpu.memory_space<vmem>>, vector<256x512xf32>,
    return
  }
  func.func @transform_0(%arg0: i32) -> (i32, i32) {
    %c0_i32 = arith.constant 0 : i32
    %c0_i32_0 = arith.constant 0 : i32
    return %arg0, %c0_i32 : i32, i32
  }
  func.func @transform_1(%arg0: i32) -> (i32, i32) {
    %c0_i32 = arith.constant 0 : i32
    %c0_i32_0 = arith.constant 0 : i32
    %c0_i32_1 = arith.constant 0 : i32
    return %c0_i32, %c0_i32_0 : i32, i32
  }
  func.func @transform_2(%arg0: i32) -> (i32, i32) {
    %c0_i32 = arith.constant 0 : i32
    %c0_i32_0 = arith.constant 0 : i32
    %c0_i32_1 = arith.constant 0 : i32
    return %c0_i32, %c0_i32_0 : i32, i32
  }
  func.func @transform_3(%arg0: i32) -> (i32, i32) {
    %c0_i32 = arith.constant 0 : i32
    %c0_i32_0 = arith.constant 0 : i32
    %c0_i32_1 = arith.constant 0 : i32
    return %c0_i32, %c0_i32_0 : i32, i32
  }
  func.func @transform_4(%arg0: i32) -> (i32, i32) {
    %c0_i32 = arith.constant 0 : i32
    %c0_i32_0 = arith.constant 0 : i32
    %c0_i32_1 = arith.constant 0 : i32
    return %c0_i32, %c0_i32_0 : i32, i32
  }
  func.func @transform_5(%arg0: i32) -> (i32, i32) {
    %c0_i32 = arith.constant 0 : i32
    %c0_i32_0 = arith.constant 0 : i32
    return %arg0, %c0_i32 : i32, i32
  }
}

</mosaic_0001>

<bundles_post_ra>
// kernel: feed_forward.1
= control target key start
LH: loop header
LB: loop body
LE: loop exit
PB: predicated region body
PF: predicated region fallthrough
CT: control target
= control target key end

     0   :  { %10 = vsyncpa [#allocation3], 0  ;;  %s24289_s0 = inlined_call_operand.vmem [shape: bf16[512,512], index: 0, kind: input, shape index: {}]   ;;  %s24290_s1 = inlined_call_operand.vmem [shape: bf16[512,2048], index: 1, kind: input, shape index: {}]   ;;  %s24291_s2 = inlined_call_operand.vmem [shape: f32[1,2048], index: 2, kind: input, shape index: {}]   ;;  %s24292_s3 = inlined_call_operand.vmem [shape: bf16[2048,512], index: 3, kind: input, shape index: {}]   ;;  %s24293_s4 = inlined_call_operand.vmem [shape: f32[1,512], index: 4, kind: input, shape index: {}]   ;;  %s24294_s5 = inlined_call_operand.hbm [shape: f32[512,512], index: 5, kind: output, shape index: {}]  }
   0x1   :  { %12 = vsyncpa [#allocation3 + $0x1], 0  ;;  %s18361_s18 = smov 0   ;;  %s18363_s19 = smov 0  }
   0x2   :  { %s18365_s20 = smov 0   ;;  %s18367_s21 = smov 0  }
   0x3 LB: > { %s18382_s22 = sadd.s32 4294967295, %s18326_s21   ;;  %s14012_s23 = sadd.s32 4294967294, %s18326_s21   ;;  %s18326_s21 = sphi %s18367_s21, %s24899_s21   ;;  %s18322_s20 = sphi %s18365_s20, %s24898_s20   ;;  %s18318_s19 = sphi %s18363_s19, %s24897_s19   ;;  %s18314_s18 = sphi %s18361_s18, %s24896_s18  }
   0x4   : > { %s18386_s24 = sadd.s32 1, %s18326_s21   ;;  %s135_s25 = sadd.s32 1, %s18322_s20 }
   0x5   : > { %s132_s26 = ssub.s32 %s18326_s21, %s18386_s24  ;;  %p145_p0 = scmp.ne.s32.totalorder %s18322_s20, %s18318_s19 }
   0x6   : > { %p133_p1 = scmp.eq.s32.totalorder %s132_s26, 0  ;;  %p146_p2 = scmp.eq.s32.totalorder %s18382_s22, 1 }
   0x7   : > { %p151_p3 = scmp.ne.s32.totalorder %s18318_s19, %s18314_s18  ;;  %p152_p4 = scmp.eq.s32.totalorder %s14012_s23, 1 }
   0x8   : > { %s18397_s27 = scalar_select %p133_p1, %s18322_s20, %s135_s25  }
   0x9   : > { %p18399_p5 = por %p146_p2, %p145_p0  ;;  %p18403_p6 = por %p152_p4, %p151_p3 }
   0xa   : > { %p14015_p7 = scmp.ge.s32.totalorder %s18326_s21, 1  ;;  %p192_p8 = scmp.lt.s32.totalorder %s18326_s21, 3 }
   0xc   : > { %p193_p9 = pnand %p14015_p7, %p192_p8 }
   0xe   : > { %196 = sbr.rel (%p193_p9) target bundleno = 2362 (0x93a), region = 40 }
  0x15   : > { %v293_v0 = vld [vmem:[%s24290_s1] sm:$0xff]  ;;  %v294_v2 = vld [vmem:[%s24290_s1 + $0x8] sm:$0xff]  ;;  %s14017_s13 = sshll.u32 %s18382_s22, 5  ;;  %s218_s12 = sand.u32 1, %s18318_s19  }
  0x16   : > { %v301_v1 = vld [vmem:[%s24290_s1 + $0x40] sm:$0xff]  ;;  %v302_v4 = vld [vmem:[%s24290_s1 + $0x48] sm:$0xff]  ;;  %p222_p10 = scmp.lt.s32.totalorder %s14017_s13, 63  ;;  %s15116_s17 = sshll.u32 %s18382_s22, 14 }
  0x17   : > { %v14085_v3 = vcombine.high %v293_v0, %v301_v1  ;;  %v14084_v5 = vcombine.low %v293_v0, %v301_v1  ;;  %v309_v6 = vld [vmem:[%s24290_s1 + $0x80] sm:$0xff]  ;;  %v14087_v8 = vcombine.high %v294_v2, %v302_v4  ;;  %v14086_v9 = vcombine.low %v294_v2, %v302_v4  ;;  %v310_v11 = vld [vmem:[%s24290_s1 + $0x88] sm:$0xff]  ;;  %s24248_s30 = scalar_lea.sflag [#allocation3], %s218_s12 }
  0x18   : > { %v317_v7 = vld [vmem:[%s24290_s1 + $0xc0] sm:$0xff]  ;;  %v318_v12 = vld [vmem:[%s24290_s1 + $0xc8] sm:$0xff]  ;;  %s24901_s13 = smov (!%p222_p10, %s14017_s13), 63 }
  0x19   : > { %v14101_v10 = vcombine.high %v309_v6, %v317_v7  ;;  %v325_v13 = vld [vmem:[%s24290_s1 + $0x100] sm:$0xff]  ;;  %3769 = vmatprep.subr.bf16.mxu0 %v14085_v3  ;;  %v14103_v14 = vcombine.high %v310_v11, %v318_v12  ;;  %v326_v16 = vld [vmem:[%s24290_s1 + $0x108] sm:$0xff]  ;;  %4155 = vmatprep.subr.bf16.mxu1 %v14087_v8  ;;  %v14100_v18 = vcombine.low %v309_v6, %v317_v7  ;;  %s15114_s7 = sshll.u32 %s24901_s13, 4  ;;  %s14016_s13 = sshll.u32 %s218_s12, 10 }
  0x1a   : > { %v333_v15 = vld [vmem:[%s24290_s1 + $0x140] sm:$0xff]  ;;  %v334_v17 = vld [vmem:[%s24290_s1 + $0x148] sm:$0xff]  ;;  %3770 = vmatpush1.bf16.msra.mxu0 %v14084_v5  ;;  %4156 = vmatpush1.bf16.msra.mxu1 %v14086_v9  ;;  %v14102_v19 = vcombine.low %v310_v11, %v318_v12  ;;  %s18497_s23 = scalar_lea.vmem %s24289_s0, %s15114_s7  ;;  %s23982_s16 = scalar_lea.vmem [#allocation2], %s14016_s13 }
  0x1b   : > { %3771 = vmatprep.subr.bf16.mxu0 %v14101_v10  ;;  %v14117_v20 = vcombine.high %v325_v13, %v333_v15  ;;  %4157 = vmatprep.subr.bf16.mxu1 %v14103_v14  ;;  %v14119_v21 = vcombine.high %v326_v16, %v334_v17  ;;  %v341_v22 = vld [vmem:[%s24290_s1 + $0x180] sm:$0xff]  ;;  %v342_v24 = vld [vmem:[%s24290_s1 + $0x188] sm:$0xff]  ;;  %v14116_v26 = vcombine.low %v325_v13, %v333_v15  ;;  %s13950_s25 = sshll.u32 %s23982_s16, 4  ;;  %s18328_s7 = smov [#allocation2]   ;;  %s24238_s25 = int_to_ptr.vmem [resolvable:$true] %s13950_s25 }
  0x1c   : > { %v349_v23 = vld [vmem:[%s24290_s1 + $0x1c0] sm:$0xff]  ;;  %v350_v25 = vld [vmem:[%s24290_s1 + $0x1c8] sm:$0xff]  ;;  %v14118_v27 = vcombine.low %v326_v16, %v334_v17  ;;  %s18264_s6 = scalar_lea.vmem %s24238_s25, 16384  ;;  %s18268_s8 = sshll.u32 %s18328_s7, 4  ;;  %s18269_s8 = int_to_ptr.vmem [resolvable:$false] %s18268_s8 }
  0x1d   : > { %v14133_v28 = vcombine.high %v341_v22, %v349_v23  ;;  %v14135_v29 = vcombine.high %v342_v24, %v350_v25  ;;  %v357_v30 = vld [vmem:[%s24290_s1 + $0x200] sm:$0xff]  ;;  %v358_v32 = vld [vmem:[%s24290_s1 + $0x208] sm:$0xff]  ;;  %v14132_v34 = vcombine.low %v341_v22, %v349_v23  ;;  %v14134_v35 = vcombine.low %v342_v24, %v350_v25  ;;  %p18265_p11 = scmp.ne.s32.totalorder %s24238_s25, %s18264_s6  ;;  %s18270_s9 = scalar_lea.vmem %s18269_s8, 32768 }
  0x1e   : > { %3772 = vmatpush1.bf16.msra.mxu0 %v14100_v18  ;;  %4158 = vmatpush1.bf16.msra.mxu1 %v14102_v19  ;;  %v365_v31 = vld [vmem:[%s24290_s1 + $0x240] sm:$0xff]  ;;  %v366_v33 = vld [vmem:[%s24290_s1 + $0x248] sm:$0xff]  ;;  %p18271_p0 = scmp.lt.s32.totalorder %s24238_s25, %s18269_s8  ;;  %p18272_p1 = scmp.lt.s32.totalorder %s18270_s9, %s18264_s6 }
  0x1f   : > { %3773 = vmatprep.subr.bf16.mxu0 %v14117_v20  ;;  %4159 = vmatprep.subr.bf16.mxu1 %v14119_v21  ;;  %v14149_v36 = vcombine.high %v357_v30, %v365_v31  ;;  %v14151_v37 = vcombine.high %v358_v32, %v366_v33  ;;  %v373_v38 = vld [vmem:[%s24290_s1 + $0x280] sm:$0xff]  ;;  %v374_v40 = vld [vmem:[%s24290_s1 + $0x288] sm:$0xff]  ;;  %v14148_v42 = vcombine.low %v357_v30, %v365_v31  ;;  %p18266_p12 = pnand %p18265_p11, %p18399_p5 }
  0x20   : > { %v381_v39 = vld [vmem:[%s24290_s1 + $0x2c0] sm:$0xff]  ;;  %v382_v41 = vld [vmem:[%s24290_s1 + $0x2c8] sm:$0xff]  ;;  %v14150_v43 = vcombine.low %v358_v32, %v366_v33  ;;  %p18273_p2 = por %p18272_p1, %p18271_p0 }
  0x21   : > { %v14165_v44 = vcombine.high %v373_v38, %v381_v39  ;;  %v14167_v45 = vcombine.high %v374_v40, %v382_v41  ;;  %v389_v46 = vld [vmem:[%s24290_s1 + $0x300] sm:$0xff]  ;;  %v390_v48 = vld [vmem:[%s24290_s1 + $0x308] sm:$0xff]  ;;  %v14164_v50 = vcombine.low %v373_v38, %v381_v39  ;;  %v14166_v51 = vcombine.low %v374_v40, %v382_v41  ;;  %p18267_p13 = pneg %p18266_p12 }
  0x22   : > { %3774 = vmatpush1.bf16.msra.mxu0 %v14116_v26  ;;  %4160 = vmatpush1.bf16.msra.mxu1 %v14118_v27  ;;  %v397_v47 = vld [vmem:[%s24290_s1 + $0x340] sm:$0xff]  ;;  %v398_v49 = vld [vmem:[%s24290_s1 + $0x348] sm:$0xff] }
  0x23   : > { %3775 = vmatprep.subr.bf16.mxu0 %v14133_v28  ;;  %4161 = vmatprep.subr.bf16.mxu1 %v14135_v29  ;;  %v14181_v52 = vcombine.high %v389_v46, %v397_v47  ;;  %v14183_v53 = vcombine.high %v390_v48, %v398_v49  ;;  %v405_v54 = vld [vmem:[%s24290_s1 + $0x380] sm:$0xff]  ;;  %v406_v57 = vld [vmem:[%s24290_s1 + $0x388] sm:$0xff]  ;;  %v14180_v59 = vcombine.low %v389_v46, %v397_v47  ;;  %p18274_p3 = pnand %p18273_p2, %p18267_p13 }
  0x24   : > { %v413_v55 = vld [vmem:[%s24290_s1 + $0x3c0] sm:$0xff]  ;;  %v414_v58 = vld [vmem:[%s24290_s1 + $0x3c8] sm:$0xff]  ;;  %v14182_v60 = vcombine.low %v390_v48, %v398_v49 }
  0x25   : > { %v17206_v56 = vld [vmem:[%s18497_s23 + $0x4] ss:$16 sps:$4 sm:$0xff]   ;;  %v14197_v61 = vcombine.high %v405_v54, %v413_v55  ;;  %v14199_v62 = vcombine.high %v406_v57, %v414_v58  ;;  %v422_v1 = vld [vmem:[%s24290_s1 + $0x408] sm:$0xff]  ;;  %v14196_v3 = vcombine.low %v405_v54, %v413_v55  ;;  %v14198_v4 = vcombine.low %v406_v57, %v414_v58 }
  0x26   : > { %3776 = vmatpush1.bf16.msra.mxu0 %v14132_v34  ;;  %4162 = vmatpush1.bf16.msra.mxu1 %v14134_v35  ;;  %v421_v63 = vld [vmem:[%s24290_s1 + $0x400] sm:$0xff]  ;;  %v430_v2 = vld [vmem:[%s24290_s1 + $0x448] sm:$0xff] }
  0x27   : > { %3777 = vmatprep.subr.bf16.mxu0 %v14149_v36  ;;  %4163 = vmatprep.subr.bf16.mxu1 %v14151_v37  ;;  %v429_v0 = vld [vmem:[%s24290_s1 + $0x440] sm:$0xff]  ;;  %v14215_v6 = vcombine.high %v422_v1, %v430_v2  ;;  %v438_v9 = vld [vmem:[%s24290_s1 + $0x488] sm:$0xff]  ;;  %v14214_v12 = vcombine.low %v422_v1, %v430_v2 }
  0x28   : > { %3801 = vmatprep.mubr.bf16.mxu0 %v17206_v56  ;;  %4187 = vmatprep.mubr.bf16.mxu1 %v17206_v56  ;;  %v14213_v5 = vcombine.high %v421_v63, %v429_v0  ;;  %v437_v7 = vld [vmem:[%s24290_s1 + $0x480] sm:$0xff]  ;;  %v446_v10 = vld [vmem:[%s24290_s1 + $0x4c8] sm:$0xff]  ;;  %v14212_v11 = vcombine.low %v421_v63, %v429_v0 }
  0x29   : > { %v445_v8 = vld [vmem:[%s24290_s1 + $0x4c0] sm:$0xff]  ;;  %v14231_v14 = vcombine.high %v438_v9, %v446_v10  ;;  %v454_v17 = vld [vmem:[%s24290_s1 + $0x508] sm:$0xff]  ;;  %v14230_v20 = vcombine.low %v438_v9, %v446_v10 }
  0x2a   : > { %3778 = vmatpush1.bf16.msra.mxu0 %v14148_v42  ;;  %4164 = vmatpush1.bf16.msra.mxu1 %v14150_v43  ;;  %v14229_v13 = vcombine.high %v437_v7, %v445_v8  ;;  %v453_v15 = vld [vmem:[%s24290_s1 + $0x500] sm:$0xff]  ;;  %v462_v18 = vld [vmem:[%s24290_s1 + $0x548] sm:$0xff]  ;;  %v14228_v19 = vcombine.low %v437_v7, %v445_v8 }
  0x2b   : > { %3779 = vmatprep.subr.bf16.mxu0 %v14165_v44  ;;  %4165 = vmatprep.subr.bf16.mxu1 %v14167_v45  ;;  %v461_v16 = vld [vmem:[%s24290_s1 + $0x540] sm:$0xff]  ;;  %v14247_v22 = vcombine.high %v454_v17, %v462_v18  ;;  %v470_v25 = vld [vmem:[%s24290_s1 + $0x588] sm:$0xff]  ;;  %v14246_v28 = vcombine.low %v454_v17, %v462_v18 }
  0x2c   : > { %v14245_v21 = vcombine.high %v453_v15, %v461_v16  ;;  %v469_v23 = vld [vmem:[%s24290_s1 + $0x580] sm:$0xff]  ;;  %v478_v26 = vld [vmem:[%s24290_s1 + $0x5c8] sm:$0xff]  ;;  %v14244_v27 = vcombine.low %v453_v15, %v461_v16 }
  0x2d   : > { %v477_v24 = vld [vmem:[%s24290_s1 + $0x5c0] sm:$0xff]  ;;  %v14263_v30 = vcombine.high %v470_v25, %v478_v26  ;;  %v486_v33 = vld [vmem:[%s24290_s1 + $0x608] sm:$0xff]  ;;  %v14262_v36 = vcombine.low %v470_v25, %v478_v26 }
  0x2e   : > { %3780 = vmatpush1.bf16.msra.mxu0 %v14164_v50  ;;  %4166 = vmatpush1.bf16.msra.mxu1 %v14166_v51  ;;  %v14261_v29 = vcombine.high %v469_v23, %v477_v24  ;;  %v485_v31 = vld [vmem:[%s24290_s1 + $0x600] sm:$0xff]  ;;  %v494_v34 = vld [vmem:[%s24290_s1 + $0x648] sm:$0xff]  ;;  %v14260_v35 = vcombine.low %v469_v23, %v477_v24  ;;  %v18654_v23 = vld [vmem:[%s24290_s1 + $0x50] sm:$0xff] }
  0x2f   : > { %3781 = vmatprep.subr.bf16.mxu0 %v14181_v52  ;;  %4167 = vmatprep.subr.bf16.mxu1 %v14183_v53  ;;  %v493_v32 = vld [vmem:[%s24290_s1 + $0x640] sm:$0xff]  ;;  %v14279_v38 = vcombine.high %v486_v33, %v494_v34  ;;  %v502_v41 = vld [vmem:[%s24290_s1 + $0x688] sm:$0xff]  ;;  %v14278_v44 = vcombine.low %v486_v33, %v494_v34  ;;  %v18659_v24 = vld [vmem:[%s24290_s1 + $0x18] sm:$0xff] }
  0x30   : > { %v14277_v37 = vcombine.high %v485_v31, %v493_v32  ;;  %v501_v39 = vld [vmem:[%s24290_s1 + $0x680] sm:$0xff]  ;;  %v510_v42 = vld [vmem:[%s24290_s1 + $0x6c8] sm:$0xff]  ;;  %v14276_v43 = vcombine.low %v485_v31, %v493_v32  ;;  %v18673_v31 = vld [vmem:[%s24290_s1 + $0x58] sm:$0xff] }
  0x31   : > { %v509_v40 = vld [vmem:[%s24290_s1 + $0x6c0] sm:$0xff]  ;;  %v14295_v46 = vcombine.high %v502_v41, %v510_v42  ;;  %v518_v49 = vld [vmem:[%s24290_s1 + $0x708] sm:$0xff]  ;;  %v14294_v52 = vcombine.low %v502_v41, %v510_v42 }
  0x32   : > { %3782 = vmatpush1.bf16.msra.mxu0 %v14180_v59  ;;  %4168 = vmatpush1.bf16.msra.mxu1 %v14182_v60  ;;  %v14293_v45 = vcombine.high %v501_v39, %v509_v40  ;;  %v517_v47 = vld [vmem:[%s24290_s1 + $0x700] sm:$0xff]  ;;  %v526_v50 = vld [vmem:[%s24290_s1 + $0x748] sm:$0xff]  ;;  %v14292_v51 = vcombine.low %v501_v39, %v509_v40 }
  0x33   : > { %3783 = vmatprep.subr.bf16.mxu0 %v14197_v61  ;;  %4169 = vmatprep.subr.bf16.mxu1 %v14199_v62  ;;  %v525_v48 = vld [vmem:[%s24290_s1 + $0x740] sm:$0xff]  ;;  %v14311_v54 = vcombine.high %v518_v49, %v526_v50  ;;  %v534_v57 = vld [vmem:[%s24290_s1 + $0x788] sm:$0xff]  ;;  %v14310_v60 = vcombine.low %v518_v49, %v526_v50 }
  0x34   : > { %v14309_v53 = vcombine.high %v517_v47, %v525_v48  ;;  %v533_v55 = vld [vmem:[%s24290_s1 + $0x780] sm:$0xff]  ;;  %v542_v58 = vld [vmem:[%s24290_s1 + $0x7c8] sm:$0xff]  ;;  %v14308_v59 = vcombine.low %v517_v47, %v525_v48 }
  0x35   : > { %v541_v56 = vld [vmem:[%s24290_s1 + $0x7c0] sm:$0xff]  ;;  %v14327_v62 = vcombine.high %v534_v57, %v542_v58  ;;  %v550_v1 = vld [vmem:[%s24290_s1 + $0x808] sm:$0xff] }
  0x36   : > { %3784 = vmatpush1.bf16.msra.mxu0 %v14196_v3  ;;  %4170 = vmatpush1.bf16.msra.mxu1 %v14198_v4  ;;  %v14325_v61 = vcombine.high %v533_v55, %v541_v56  ;;  %v549_v63 = vld [vmem:[%s24290_s1 + $0x800] sm:$0xff]  ;;  %v558_v2 = vld [vmem:[%s24290_s1 + $0x848] sm:$0xff]  ;;  %v14324_v3 = vcombine.low %v533_v55, %v541_v56  ;;  %v14326_v4 = vcombine.low %v534_v57, %v542_v58 }
  0x37   : > { %3785 = vmatprep.subr.bf16.mxu0 %v14213_v5  ;;  %4171 = vmatprep.subr.bf16.mxu1 %v14215_v6  ;;  %v557_v0 = vld [vmem:[%s24290_s1 + $0x840] sm:$0xff]  ;;  %v14343_v7 = vcombine.high %v550_v1, %v558_v2  ;;  %v14342_v16 = vcombine.low %v550_v1, %v558_v2  ;;  %v582_v17 = vld [vmem:[%s24290_s1 + $0x908] sm:$0xff] }
  0x38   : > { %v14341_v5 = vcombine.high %v549_v63, %v557_v0  ;;  %v17208_v6 = vld [vmem:[%s18497_s23] ss:$16 sps:$4 sm:$0xff]   ;;  %v17209_v9 = vld [vmem:[%s18497_s23 + $0x24] ss:$16 sps:$4 sm:$0xff]   ;;  %v590_v18 = vld [vmem:[%s24290_s1 + $0x948] sm:$0xff] }
  0x39   : > { %v565_v8 = vld [vmem:[%s24290_s1 + $0x880] sm:$0xff]  ;;  %v14375_v33 = vcombine.high %v582_v17, %v590_v18  ;;  %v598_v34 = vld [vmem:[%s24290_s1 + $0x988] sm:$0xff]  ;;  %v14374_v40 = vcombine.low %v582_v17, %v590_v18 }
  0x3a   : > { %3786 = vmatpush1.bf16.msra.mxu0 %v14212_v11  ;;  %4172 = vmatpush1.bf16.msra.mxu1 %v14214_v12  ;;  %v573_v10 = vld [vmem:[%s24290_s1 + $0x8c0] sm:$0xff]  ;;  %v566_v11 = vld [vmem:[%s24290_s1 + $0x888] sm:$0xff] }
  0x3b   : > { %3787 = vmatprep.subr.bf16.mxu0 %v14229_v13  ;;  %4173 = vmatprep.subr.bf16.mxu1 %v14231_v14  ;;  %v574_v12 = vld [vmem:[%s24290_s1 + $0x8c8] sm:$0xff]  ;;  %v14340_v13 = vcombine.low %v549_v63, %v557_v0  ;;  %v581_v14 = vld [vmem:[%s24290_s1 + $0x900] sm:$0xff] }
  0x3c   : > { %v589_v15 = vld [vmem:[%s24290_s1 + $0x940] sm:$0xff]  ;;  %v14358_v26 = vcombine.low %v566_v11, %v574_v12 }
  0x3d   : > { %v17211_v25 = vld [vmem:[%s18497_s23 + $0x20] ss:$16 sps:$4 sm:$0xff]   ;;  %v17212_v32 = vld [vmem:[%s18497_s23 + $0x44] ss:$16 sps:$4 sm:$0xff]  }
  0x3e   : > { %3788 = vmatpush1.bf16.msra.mxu0 %v14228_v19  ;;  %4174 = vmatpush1.bf16.msra.mxu1 %v14230_v20  ;;  %v14357_v19 = vcombine.high %v565_v8, %v573_v10  ;;  %v14359_v20 = vcombine.high %v566_v11, %v574_v12  ;;  %v621_v39 = vld [vmem:[%s24290_s1 + $0xa40] sm:$0xff] }
  0x3f   : > { %3789 = vmatprep.subr.bf16.mxu0 %v14245_v21  ;;  %4175 = vmatprep.subr.bf16.mxu1 %v14247_v22  ;;  %v14356_v21 = vcombine.low %v565_v8, %v573_v10  ;;  %v18649_v22 = vld [vmem:[%s24290_s1 + $0x10] sm:$0xff]  ;;  %v629_v47 = vld [vmem:[%s24290_s1 + $0xa80] sm:$0xff] }
  0x40   : > { %v637_v48 = vld [vmem:[%s24290_s1 + $0xac0] sm:$0xff] }
  0x41   : > { %v17215_v49 = vld [vmem:[%s18497_s23 + $0x64] ss:$16 sps:$4 sm:$0xff]   ;;  %v17217_v63 = vld [vmem:[%s18497_s23 + $0x60] ss:$16 sps:$4 sm:$0xff]   ;;  %v14420_v0 = vcombine.low %v629_v47, %v637_v48 }
  0x42   : > { %3790 = vmatpush1.bf16.msra.mxu0 %v14244_v27  ;;  %4176 = vmatpush1.bf16.msra.mxu1 %v14246_v28  ;;  %v14373_v27 = vcombine.high %v581_v14, %v589_v15  ;;  %v597_v28 = vld [vmem:[%s24290_s1 + $0x980] sm:$0xff] }
  0x43   : > { %3791 = vmatprep.subr.bf16.mxu0 %v14261_v29  ;;  %4177 = vmatprep.subr.bf16.mxu1 %v14263_v30  ;;  %v605_v29 = vld [vmem:[%s24290_s1 + $0x9c0] sm:$0xff]  ;;  %v14088_v30 = vcombine.low %v18649_v22, %v18654_v23 }
  0x44   : > { %v14389_v41 = vcombine.high %v597_v28, %v605_v29  ;;  %v645_v56 = vld [vmem:[%s24290_s1 + $0xb00] sm:$0xff] }
  0x45   : > { %v653_v57 = vld [vmem:[%s24290_s1 + $0xb40] sm:$0xff] }
  0x46   : > { %3792 = vmatpush1.bf16.msra.mxu0 %v14260_v35  ;;  %4178 = vmatpush1.bf16.msra.mxu1 %v14262_v36  ;;  %v606_v35 = vld [vmem:[%s24290_s1 + $0x9c8] sm:$0xff]  ;;  %v14090_v36 = vcombine.low %v18659_v24, %v18673_v31  ;;  %v661_v1 = vld [vmem:[%s24290_s1 + $0xb80] sm:$0xff] }
  0x47   : > { %3793 = vmatprep.subr.bf16.mxu0 %v14277_v37  ;;  %4179 = vmatprep.subr.bf16.mxu1 %v14279_v38  ;;  %v14372_v37 = vcombine.low %v581_v14, %v589_v15  ;;  %v613_v38 = vld [vmem:[%s24290_s1 + $0xa00] sm:$0xff]  ;;  %v14391_v42 = vcombine.high %v598_v34, %v606_v35  ;;  %v14390_v50 = vcombine.low %v598_v34, %v606_v35  ;;  %v678_v15 = vld [vmem:[%s24290_s1 + $0xc08] sm:$0xff] }
  0x48   : > { %v14404_v55 = vcombine.low %v613_v38, %v621_v39  ;;  %v669_v2 = vld [vmem:[%s24290_s1 + $0xbc0] sm:$0xff] }
  0x49   : > { %v677_v10 = vld [vmem:[%s24290_s1 + $0xc00] sm:$0xff]  ;;  %v14452_v18 = vcombine.low %v661_v1, %v669_v2 }
  0x4a   : > { %3794 = vmatpush1.bf16.msra.mxu0 %v14276_v43  ;;  %4180 = vmatpush1.bf16.msra.mxu1 %v14278_v44  ;;  %v614_v43 = vld [vmem:[%s24290_s1 + $0xa08] sm:$0xff]  ;;  %v685_v11 = vld [vmem:[%s24290_s1 + $0xc40] sm:$0xff] }
  0x4b   : > { %3795 = vmatprep.subr.bf16.mxu0 %v14293_v45  ;;  %4181 = vmatprep.subr.bf16.mxu1 %v14295_v46  ;;  %v622_v44 = vld [vmem:[%s24290_s1 + $0xa48] sm:$0xff]  ;;  %v17214_v45 = vld [vmem:[%s18497_s23 + $0x40] ss:$16 sps:$4 sm:$0xff]   ;;  %v14388_v46 = vcombine.low %v597_v28, %v605_v29 }
  0x4c   : > { %v14406_v58 = vcombine.low %v614_v43, %v622_v44  ;;  %v17220_v17 = vld [vmem:[%s18497_s23 + $0x80] ss:$16 sps:$4 sm:$0xff]   ;;  %v702_v28 = vld [vmem:[%s24290_s1 + $0xcc8] sm:$0xff] }
  0x4d   : > { %v717_v34 = vld [vmem:[%s24290_s1 + $0xd40] sm:$0xff] }
  0x4e   : > { %3796 = vmatpush1.bf16.msra.mxu0 %v14292_v51  ;;  %4182 = vmatpush1.bf16.msra.mxu1 %v14294_v52  ;;  %v14405_v51 = vcombine.high %v613_v38, %v621_v39  ;;  %v630_v52 = vld [vmem:[%s24290_s1 + $0xa88] sm:$0xff] }
  0x4f   : > { %3797 = vmatprep.subr.bf16.mxu0 %v14309_v53  ;;  %4183 = vmatprep.subr.bf16.mxu1 %v14311_v54  ;;  %v638_v53 = vld [vmem:[%s24290_s1 + $0xac8] sm:$0xff]  ;;  %v14407_v54 = vcombine.high %v614_v43, %v622_v44  ;;  %v725_v43 = vld [vmem:[%s24290_s1 + $0xd80] sm:$0xff] }
  0x50   : > { %v710_v39 = vld [vmem:[%s24290_s1 + $0xd08] sm:$0xff]  ;;  %v733_v44 = vld [vmem:[%s24290_s1 + $0xdc0] sm:$0xff] }
  0x52   : > { %3798 = vmatpush1.bf16.msra.mxu0 %v14308_v59  ;;  %4184 = vmatpush1.bf16.msra.mxu1 %v14310_v60  ;;  %v14421_v59 = vcombine.high %v629_v47, %v637_v48  ;;  %v14423_v60 = vcombine.high %v630_v52, %v638_v53  ;;  %v726_v48 = vld [vmem:[%s24290_s1 + $0xd88] sm:$0xff] }
  0x53   : > { %3799 = vmatprep.subr.bf16.mxu0 %v14325_v61  ;;  %4185 = vmatprep.subr.bf16.mxu1 %v14327_v62  ;;  %v646_v61 = vld [vmem:[%s24290_s1 + $0xb08] sm:$0xff] }
  0x54   : > { %v654_v62 = vld [vmem:[%s24290_s1 + $0xb48] sm:$0xff] }
  0x55   : > { %v14439_v8 = vcombine.high %v646_v61, %v654_v62  ;;  %v14438_v12 = vcombine.low %v646_v61, %v654_v62  ;;  %v757_v61 = vld [vmem:[%s24290_s1 + $0xe80] sm:$0xff] }
  0x56   : > { %3800 = vmatpush1.bf16.msra.mxu0 %v14324_v3  ;;  %4186 = vmatpush1.bf16.msra.mxu1 %v14326_v4  ;;  %v17218_v3 = vld [vmem:[%s18497_s23 + $0x84] ss:$16 sps:$4 sm:$0xff]   ;;  %v14422_v4 = vcombine.low %v630_v52, %v638_v53 }
  0x57   : > { %3962 = vmatprep.subr.bf16.mxu0 %v14341_v5  ;;  %4348 = vmatprep.subr.bf16.mxu1 %v14343_v7  ;;  %v14437_v5 = vcombine.high %v645_v56, %v653_v57  ;;  %v670_v7 = vld [vmem:[%s24290_s1 + $0xbc8] sm:$0xff]  ;;  %v741_v52 = vld [vmem:[%s24290_s1 + $0xe00] sm:$0xff] }
  0x58   : > { %v749_v53 = vld [vmem:[%s24290_s1 + $0xe40] sm:$0xff] }
  0x59   : > { %3802 = vmatmul.mubr.bf16.vlgmr.msra.gmra.mrb[0].mxu0 %v17208_v6  ;;  %4188 = vmatmul.mubr.bf16.vlgmr.msra.gmra.mrb[0].mxu1 %v17208_v6  ;;  %v662_v6 = vld [vmem:[%s24290_s1 + $0xb88] sm:$0xff]  ;;  %v765_v62 = vld [vmem:[%s24290_s1 + $0xec0] sm:$0xff] }
  0x5a   : > { %3963 = vmatpush1.bf16.msra.mxu0 %v14340_v13  ;;  %4349 = vmatpush1.bf16.msra.mxu1 %v14342_v16  ;;  %v14453_v13 = vcombine.high %v661_v1, %v669_v2  ;;  %v14455_v14 = vcombine.high %v662_v6, %v670_v7  ;;  %v686_v16 = vld [vmem:[%s24290_s1 + $0xc48] sm:$0xff]  ;;  %v14533_v1 = vcombine.high %v741_v52, %v749_v53 }
  0x5b   : > { %3811 = vmatprep.mubr.bf16.mxu0 %v17209_v9  ;;  %4197 = vmatprep.mubr.bf16.mxu1 %v17209_v9  ;;  %v14436_v9 = vcombine.low %v645_v56, %v653_v57  ;;  %v14471_v29 = vcombine.high %v678_v15, %v686_v16  ;;  %v14470_v35 = vcombine.low %v678_v15, %v686_v16  ;;  %v742_v57 = vld [vmem:[%s24290_s1 + $0xe08] sm:$0xff]  ;;  %v789_v15 = vld [vmem:[%s24290_s1 + $0xf80] sm:$0xff] }
  0x5c   : > { %3964 = vmatprep.subr.bf16.mxu0 %v14357_v19  ;;  %4350 = vmatprep.subr.bf16.mxu1 %v14359_v20  ;;  %v693_v19 = vld [vmem:[%s24290_s1 + $0xc80] sm:$0xff]  ;;  %v758_v2 = vld [vmem:[%s24290_s1 + $0xe88] sm:$0xff] }
  0x5d   : > { %v701_v20 = vld [vmem:[%s24290_s1 + $0xcc0] sm:$0xff] }
  0x5e   : > { %3965 = vmatpush1.bf16.msra.mxu0 %v14356_v21  ;;  %4351 = vmatpush1.bf16.msra.mxu1 %v14358_v26  ;;  %v17221_v21 = vld [vmem:[%s18497_s23 + $0xa4] ss:$16 sps:$4 sm:$0xff]   ;;  %v14469_v26 = vcombine.high %v677_v10, %v685_v11 }
  0x5f   : > { %3966 = vmatprep.subr.bf16.mxu0 %v14373_v27  ;;  %4352 = vmatprep.subr.bf16.mxu1 %v14375_v33  ;;  %v694_v27 = vld [vmem:[%s24290_s1 + $0xc88] sm:$0xff]  ;;  %v709_v33 = vld [vmem:[%s24290_s1 + $0xd00] sm:$0xff] }
  0x60   : > { %v14487_v38 = vcombine.high %v694_v27, %v702_v28  ;;  %v14501_v47 = vcombine.high %v709_v33, %v717_v34  ;;  %v797_v16 = vld [vmem:[%s24290_s1 + $0xfc0] sm:$0xff] }
  0x61   : > { %3812 = vmatmul.mubr.bf16.gmra.mrb[4].mxu0 %v17211_v25  ;;  %4198 = vmatmul.mubr.bf16.gmra.mrb[4].mxu1 %v17211_v25  ;;  %v14454_v25 = vcombine.low %v662_v6, %v670_v7  ;;  %v773_v6 = vld [vmem:[%s24290_s1 + $0xf00] sm:$0xff] }
  0x62   : > { %3821 = vmatprep.mubr.bf16.mxu0 %v17212_v32  ;;  %4207 = vmatprep.mubr.bf16.mxu1 %v17212_v32  ;;  %v14468_v32 = vcombine.low %v677_v10, %v685_v11  ;;  %v781_v7 = vld [vmem:[%s24290_s1 + $0xf40] sm:$0xff]  ;;  %v774_v11 = vld [vmem:[%s24290_s1 + $0xf08] sm:$0xff] }
  0x63   : > { %3967 = vmatpush1.bf16.msra.mxu0 %v14372_v37  ;;  %4353 = vmatpush1.bf16.msra.mxu1 %v14374_v40  ;;  %v14485_v37 = vcombine.high %v693_v19, %v701_v20  ;;  %v718_v40 = vld [vmem:[%s24290_s1 + $0xd48] sm:$0xff] }
  0x64   : > { %3968 = vmatprep.subr.bf16.mxu0 %v14389_v41  ;;  %4354 = vmatprep.subr.bf16.mxu1 %v14391_v42  ;;  %v17223_v41 = vld [vmem:[%s18497_s23 + $0xa0] ss:$16 sps:$4 sm:$0xff]   ;;  %v14484_v42 = vcombine.low %v693_v19, %v701_v20  ;;  %v14565_v19 = vcombine.high %v773_v6, %v781_v7  ;;  %v790_v20 = vld [vmem:[%s24290_s1 + $0xf88] sm:$0xff] }
  0x67   : > { %3969 = vmatpush1.bf16.msra.mxu0 %v14388_v46  ;;  %4355 = vmatpush1.bf16.msra.mxu1 %v14390_v50  ;;  %v14486_v46 = vcombine.low %v694_v27, %v702_v28  ;;  %v14503_v50 = vcombine.high %v710_v39, %v718_v40  ;;  %v14581_v28 = vcombine.high %v789_v15, %v797_v16 }
  0x68   : > { %3970 = vmatprep.subr.bf16.mxu0 %v14405_v51  ;;  %4356 = vmatprep.subr.bf16.mxu1 %v14407_v54  ;;  %v14500_v51 = vcombine.low %v709_v33, %v717_v34  ;;  %v14502_v54 = vcombine.low %v710_v39, %v718_v40  ;;  %v14580_v33 = vcombine.low %v789_v15, %v797_v16  ;;  %v17233_v34 = vld [vmem:[%s18497_s23 + $0x124] ss:$16 sps:$4 sm:$0xff]   ;;  %v17235_v39 = vld [vmem:[%s18497_s23 + $0x120] ss:$16 sps:$4 sm:$0xff]  }
  0x69   : > { %3822 = vmatmul.mubr.bf16.gmra.mrb[8].mxu0 %v17214_v45  ;;  %4208 = vmatmul.mubr.bf16.gmra.mrb[8].mxu1 %v17214_v45  ;;  %v17224_v45 = vld [vmem:[%s18497_s23 + $0xc4] ss:$16 sps:$4 sm:$0xff]  }
  0x6a   : > { %3831 = vmatprep.mubr.bf16.mxu0 %v17215_v49  ;;  %4217 = vmatprep.mubr.bf16.mxu1 %v17215_v49  ;;  %v734_v49 = vld [vmem:[%s24290_s1 + $0xdc8] sm:$0xff]  ;;  %v17236_v40 = vld [vmem:[%s18497_s23 + $0x144] ss:$16 sps:$4 sm:$0xff]  }
  0x6b   : > { %3971 = vmatpush1.bf16.msra.mxu0 %v14404_v55  ;;  %4357 = vmatpush1.bf16.msra.mxu1 %v14406_v58  ;;  %v14517_v55 = vcombine.high %v725_v43, %v733_v44  ;;  %v14519_v56 = vcombine.high %v726_v48, %v734_v49  ;;  %v750_v58 = vld [vmem:[%s24290_s1 + $0xe48] sm:$0xff]  ;;  %v359_v15 = vld [vmem:[%s24290_s1 + $0x210] sm:$0xff] }
  0x6c   : > { %3972 = vmatprep.subr.bf16.mxu0 %v14421_v59  ;;  %4358 = vmatprep.subr.bf16.mxu1 %v14423_v60  ;;  %v17226_v59 = vld [vmem:[%s18497_s23 + $0xc0] ss:$16 sps:$4 sm:$0xff]   ;;  %v14516_v60 = vcombine.low %v725_v43, %v733_v44  ;;  %v17242_v44 = vld [vmem:[%s18497_s23 + $0x184] ss:$16 sps:$4 sm:$0xff]  }
  0x6d   : > { %v17241_v43 = vld [vmem:[%s18497_s23 + $0x160] ss:$16 sps:$4 sm:$0xff]  }
  0x6e   : > { %v367_v16 = vld [vmem:[%s24290_s1 + $0x250] sm:$0xff] }
  0x6f   : > { %3973 = vmatpush1.bf16.msra.mxu0 %v14420_v0  ;;  %4359 = vmatpush1.bf16.msra.mxu1 %v14422_v4  ;;  %v14518_v0 = vcombine.low %v726_v48, %v734_v49  ;;  %v14535_v4 = vcombine.high %v742_v57, %v750_v58  ;;  %v17248_v48 = vld [vmem:[%s18497_s23 + $0x1c4] ss:$16 sps:$4 sm:$0xff]   ;;  %v17250_v49 = vld [vmem:[%s18497_s23 + $0x1c0] ss:$16 sps:$4 sm:$0xff]  }
  0x70   : > { %3974 = vmatprep.subr.bf16.mxu0 %v14437_v5  ;;  %4360 = vmatprep.subr.bf16.mxu1 %v14439_v8  ;;  %v14532_v5 = vcombine.low %v741_v52, %v749_v53  ;;  %v14534_v8 = vcombine.low %v742_v57, %v750_v58  ;;  %v17254_v52 = vld [vmem:[%s18497_s23 + $0xc] ss:$16 sps:$4 sm:$0xff]   ;;  %v17256_v53 = vld [vmem:[%s18497_s23 + $0x8] ss:$16 sps:$4 sm:$0xff]  }
  0x71   : > { %3832 = vmatmul.mubr.bf16.gmra.mrb[12].mxu0 %v17217_v63  ;;  %4218 = vmatmul.mubr.bf16.gmra.mrb[12].mxu1 %v17217_v63  ;;  %v17227_v63 = vld [vmem:[%s18497_s23 + $0xe4] ss:$16 sps:$4 sm:$0xff]   ;;  %v320_v57 = vld [vmem:[%s24290_s1 + $0xd8] sm:$0xff] }
  0x72   : > { %3841 = vmatprep.mubr.bf16.mxu0 %v17218_v3  ;;  %4227 = vmatprep.mubr.bf16.mxu1 %v17218_v3  ;;  %v766_v3 = vld [vmem:[%s24290_s1 + $0xec8] sm:$0xff] }
  0x73   : > { %3975 = vmatpush1.bf16.msra.mxu0 %v14436_v9  ;;  %4361 = vmatpush1.bf16.msra.mxu1 %v14438_v12  ;;  %v14549_v9 = vcombine.high %v757_v61, %v765_v62  ;;  %v14551_v10 = vcombine.high %v758_v2, %v766_v3  ;;  %v782_v12 = vld [vmem:[%s24290_s1 + $0xf48] sm:$0xff] }
  0x74   : > { %3976 = vmatprep.subr.bf16.mxu0 %v14453_v13  ;;  %4362 = vmatprep.subr.bf16.mxu1 %v14455_v14  ;;  %v17229_v13 = vld [vmem:[%s18497_s23 + $0xe0] ss:$16 sps:$4 sm:$0xff]   ;;  %v14548_v14 = vcombine.low %v757_v61, %v765_v62  ;;  %v14566_v27 = vcombine.low %v774_v11, %v782_v12  ;;  %v17257_v58 = vld [vmem:[%s18497_s23 + $0x2c] ss:$16 sps:$4 sm:$0xff]  }
  0x75   : > { %v328_v61 = vld [vmem:[%s24290_s1 + $0x118] sm:$0xff] }
  0x76   : > { %v336_v62 = vld [vmem:[%s24290_s1 + $0x158] sm:$0xff] }
  0x77   : > { %3977 = vmatpush1.bf16.msra.mxu0 %v14452_v18  ;;  %4363 = vmatpush1.bf16.msra.mxu1 %v14454_v25  ;;  %v14550_v18 = vcombine.low %v758_v2, %v766_v3  ;;  %v14567_v25 = vcombine.high %v774_v11, %v782_v12  ;;  %v18894_v2 = vld [vmem:[%s24290_s1 + $0x850] sm:$0xff]  ;;  %v14122_v12 = vcombine.low %v328_v61, %v336_v62 }
  0x78   : > { %3978 = vmatprep.subr.bf16.mxu0 %v14469_v26  ;;  %4364 = vmatprep.subr.bf16.mxu1 %v14471_v29  ;;  %v14564_v26 = vcombine.low %v773_v6, %v781_v7  ;;  %v18909_v6 = vld [vmem:[%s24290_s1 + $0x858] sm:$0xff]  ;;  %v343_v7 = vld [vmem:[%s24290_s1 + $0x190] sm:$0xff] }
  0x79   : > { %3842 = vmatmul.mubr.bf16.gmra.mrb[16].mxu0 %v17220_v17  ;;  %4228 = vmatmul.mubr.bf16.gmra.mrb[16].mxu1 %v17220_v17  ;;  %v17230_v17 = vld [vmem:[%s18497_s23 + $0x104] ss:$16 sps:$4 sm:$0xff]  }
  0x7a   : > { %3851 = vmatprep.mubr.bf16.mxu0 %v17221_v21  ;;  %4237 = vmatprep.mubr.bf16.mxu1 %v17221_v21  ;;  %v798_v21 = vld [vmem:[%s24290_s1 + $0xfc8] sm:$0xff] }
  0x7b   : > { %3979 = vmatpush1.bf16.msra.mxu0 %v14468_v32  ;;  %4365 = vmatpush1.bf16.msra.mxu1 %v14470_v35  ;;  %v14583_v29 = vcombine.high %v790_v20, %v798_v21  ;;  %v17232_v32 = vld [vmem:[%s18497_s23 + $0x100] ss:$16 sps:$4 sm:$0xff]   ;;  %v14582_v35 = vcombine.low %v790_v20, %v798_v21 }
  0x7c   : > { %3980 = vmatprep.subr.bf16.mxu0 %v14485_v37  ;;  %4366 = vmatprep.subr.bf16.mxu1 %v14487_v38  ;;  %v14089_v37 = vcombine.high %v18649_v22, %v18654_v23  ;;  %v14091_v38 = vcombine.high %v18659_v24, %v18673_v31  ;;  %v17259_v22 = vld [vmem:[%s18497_s23 + $0x28] ss:$16 sps:$4 sm:$0xff]   ;;  %v14123_v24 = vcombine.high %v328_v61, %v336_v62  ;;  %v375_v21 = vld [vmem:[%s24290_s1 + $0x290] sm:$0xff] }
  0x7d   : > { %v344_v31 = vld [vmem:[%s24290_s1 + $0x198] sm:$0xff] }
  0x7e   : > { %v17268_v61 = vld [vmem:[%s18497_s23 + $0x88] ss:$16 sps:$4 sm:$0xff]  }
  0x7f   : > { %3981 = vmatpush1.bf16.msra.mxu0 %v14484_v42  ;;  %4367 = vmatpush1.bf16.msra.mxu1 %v14486_v46  ;;  %v17239_v42 = vld [vmem:[%s18497_s23 + $0x164] ss:$16 sps:$4 sm:$0xff]  }
  0x80   : > { %3982 = vmatprep.subr.bf16.mxu0 %v14501_v47  ;;  %4368 = vmatprep.subr.bf16.mxu1 %v14503_v50  ;;  %v17245_v46 = vld [vmem:[%s18497_s23 + $0x1a4] ss:$16 sps:$4 sm:$0xff]   ;;  %v17247_v47 = vld [vmem:[%s18497_s23 + $0x1a0] ss:$16 sps:$4 sm:$0xff]  }
  0x81   : > { %3852 = vmatmul.mubr.bf16.gmra.mrb[20].mxu0 %v17223_v41  ;;  %4238 = vmatmul.mubr.bf16.gmra.mrb[20].mxu1 %v17223_v41  ;;  %v17238_v41 = vld [vmem:[%s18497_s23 + $0x140] ss:$16 sps:$4 sm:$0xff]   ;;  %v17251_v50 = vld [vmem:[%s18497_s23 + $0x1e4] ss:$16 sps:$4 sm:$0xff]  }
  0x82   : > { %3861 = vmatprep.mubr.bf16.mxu0 %v17224_v45  ;;  %4247 = vmatprep.mubr.bf16.mxu1 %v17224_v45  ;;  %v17244_v45 = vld [vmem:[%s18497_s23 + $0x180] ss:$16 sps:$4 sm:$0xff]  }
  0x83   : > { %3983 = vmatpush1.bf16.msra.mxu0 %v14500_v51  ;;  %4369 = vmatpush1.bf16.msra.mxu1 %v14502_v54  ;;  %v17253_v51 = vld [vmem:[%s18497_s23 + $0x1e0] ss:$16 sps:$4 sm:$0xff]  }
  0x84   : > { %3984 = vmatprep.subr.bf16.mxu0 %v14517_v55  ;;  %4370 = vmatprep.subr.bf16.mxu1 %v14519_v56  ;;  %v311_v54 = vld [vmem:[%s24290_s1 + $0x90] sm:$0xff]  ;;  %v312_v56 = vld [vmem:[%s24290_s1 + $0x98] sm:$0xff] }
  0x85   : > { %v319_v55 = vld [vmem:[%s24290_s1 + $0xd0] sm:$0xff]  ;;  %v14106_v23 = vcombine.low %v312_v56, %v320_v57 }
  0x86   : > { %v14104_v3 = vcombine.low %v311_v54, %v319_v55 }
  0x87   : > { %3985 = vmatpush1.bf16.msra.mxu0 %v14516_v60  ;;  %4371 = vmatpush1.bf16.msra.mxu1 %v14518_v0  ;;  %v335_v60 = vld [vmem:[%s24290_s1 + $0x150] sm:$0xff]  ;;  %v14107_v0 = vcombine.high %v312_v56, %v320_v57 }
  0x88   : > { %3986 = vmatprep.subr.bf16.mxu0 %v14533_v1  ;;  %4372 = vmatprep.subr.bf16.mxu1 %v14535_v4  ;;  %v18889_v1 = vld [vmem:[%s24290_s1 + $0x810] sm:$0xff] }
  0x89   : > { %3862 = vmatmul.mubr.bf16.gmra.mrb[24].mxu0 %v17226_v59  ;;  %4248 = vmatmul.mubr.bf16.gmra.mrb[24].mxu1 %v17226_v59  ;;  %v327_v59 = vld [vmem:[%s24290_s1 + $0x110] sm:$0xff]  ;;  %v14344_v4 = vcombine.low %v18889_v1, %v18894_v2 }
  0x8a   : > { %3871 = vmatprep.mubr.bf16.mxu0 %v17227_v63  ;;  %4257 = vmatprep.mubr.bf16.mxu1 %v17227_v63  ;;  %v14105_v63 = vcombine.high %v311_v54, %v319_v55  ;;  %v14120_v11 = vcombine.low %v327_v59, %v335_v60  ;;  %v423_v57 = vld [vmem:[%s24290_s1 + $0x410] sm:$0xff] }
  0x8b   : > { %3987 = vmatpush1.bf16.msra.mxu0 %v14532_v5  ;;  %4373 = vmatpush1.bf16.msra.mxu1 %v14534_v8  ;;  %v18904_v5 = vld [vmem:[%s24290_s1 + $0x818] sm:$0xff]  ;;  %v351_v8 = vld [vmem:[%s24290_s1 + $0x1d0] sm:$0xff] }
  0x8c   : > { %3988 = vmatprep.subr.bf16.mxu0 %v14549_v9  ;;  %4374 = vmatprep.subr.bf16.mxu1 %v14551_v10  ;;  %v14346_v9 = vcombine.low %v18904_v5, %v18909_v6  ;;  %v17260_v10 = vld [vmem:[%s18497_s23 + $0x4c] ss:$16 sps:$4 sm:$0xff]   ;;  %v14136_v20 = vcombine.low %v343_v7, %v351_v8 }
  0x8f   : > { %3989 = vmatpush1.bf16.msra.mxu0 %v14548_v14  ;;  %4375 = vmatpush1.bf16.msra.mxu1 %v14550_v18  ;;  %v368_v18 = vld [vmem:[%s24290_s1 + $0x258] sm:$0xff] }
  0x90   : > { %3990 = vmatprep.subr.bf16.mxu0 %v14565_v19  ;;  %4376 = vmatprep.subr.bf16.mxu1 %v14567_v25  ;;  %v17262_v19 = vld [vmem:[%s18497_s23 + $0x48] ss:$16 sps:$4 sm:$0xff]   ;;  %v383_v25 = vld [vmem:[%s24290_s1 + $0x2d0] sm:$0xff] }
  0x91   : > { %3872 = vmatmul.mubr.bf16.gmra.mrb[28].mxu0 %v17229_v13  ;;  %4258 = vmatmul.mubr.bf16.gmra.mrb[28].mxu1 %v17229_v13  ;;  %v14137_v13 = vcombine.high %v343_v7, %v351_v8  ;;  %v448_v7 = vld [vmem:[%s24290_s1 + $0x4d8] sm:$0xff] }
  0x92   : > { %3881 = vmatprep.mubr.bf16.mxu0 %v17230_v17  ;;  %4267 = vmatprep.mubr.bf16.mxu1 %v17230_v17  ;;  %v360_v17 = vld [vmem:[%s24290_s1 + $0x218] sm:$0xff] }
  0x93   : > { %3991 = vmatpush1.bf16.msra.mxu0 %v14564_v26  ;;  %4377 = vmatpush1.bf16.msra.mxu1 %v14566_v27  ;;  %v17263_v26 = vld [vmem:[%s18497_s23 + $0x6c] ss:$16 sps:$4 sm:$0xff]  }
  0x94   : > { %3992 = vmatprep.subr.bf16.mxu0 %v14581_v28  ;;  %4378 = vmatprep.subr.bf16.mxu1 %v14583_v29  ;;  %v14153_v28 = vcombine.high %v359_v15, %v367_v16  ;;  %v376_v29 = vld [vmem:[%s24290_s1 + $0x298] sm:$0xff] }
  0x97   : > { %3993 = vmatpush1.bf16.msra.mxu0 %v14580_v33  ;;  %4379 = vmatpush1.bf16.msra.mxu1 %v14582_v35  ;;  %v14155_v33 = vcombine.high %v360_v17, %v368_v18  ;;  %v14154_v35 = vcombine.low %v360_v17, %v368_v18  ;;  %v471_v17 = vld [vmem:[%s24290_s1 + $0x590] sm:$0xff] }
  0x98   : > { %4541 = vmatprep.subr.bf16.mxu0 %v14089_v37  ;;  %4927 = vmatprep.subr.bf16.mxu1 %v14091_v38  ;;  %v14169_v37 = vcombine.high %v375_v21, %v383_v25  ;;  %v479_v18 = vld [vmem:[%s24290_s1 + $0x5d0] sm:$0xff] }
  0x99   : > { %3882 = vmatmul.mubr.bf16.gmra.mrb[32].mxu0 %v17232_v32  ;;  %4268 = vmatmul.mubr.bf16.gmra.mrb[32].mxu1 %v17232_v32  ;;  %v384_v32 = vld [vmem:[%s24290_s1 + $0x2d8] sm:$0xff] }
  0x9a   : > { %3891 = vmatprep.mubr.bf16.mxu0 %v17233_v34  ;;  %4277 = vmatprep.mubr.bf16.mxu1 %v17233_v34  ;;  %v14152_v34 = vcombine.low %v359_v15, %v367_v16  ;;  %v14171_v38 = vcombine.high %v376_v29, %v384_v32  ;;  %v17271_v15 = vld [vmem:[%s18497_s23 + $0xa8] ss:$16 sps:$4 sm:$0xff]  }
  0xa1   : > { %3892 = vmatmul.mubr.bf16.gmra.mrb[36].mxu0 %v17235_v39  ;;  %4278 = vmatmul.mubr.bf16.gmra.mrb[36].mxu1 %v17235_v39  ;;  %v391_v39 = vld [vmem:[%s24290_s1 + $0x310] sm:$0xff] }
  0xa2   : > { %3901 = vmatprep.mubr.bf16.mxu0 %v17236_v40  ;;  %4287 = vmatprep.mubr.bf16.mxu1 %v17236_v40  ;;  %v399_v40 = vld [vmem:[%s24290_s1 + $0x350] sm:$0xff] }
  0xa9   : > { %3902 = vmatmul.mubr.bf16.gmra.mrb[40].mxu0 %v17238_v41  ;;  %4288 = vmatmul.mubr.bf16.gmra.mrb[40].mxu1 %v17238_v41  ;;  %v392_v41 = vld [vmem:[%s24290_s1 + $0x318] sm:$0xff] }
  0xaa   : > { %3911 = vmatprep.mubr.bf16.mxu0 %v17239_v42  ;;  %4297 = vmatprep.mubr.bf16.mxu1 %v17239_v42  ;;  %v400_v42 = vld [vmem:[%s24290_s1 + $0x358] sm:$0xff] }
  0xab   : > { %v14186_v54 = vcombine.low %v392_v41, %v400_v42 }
  0xb1   : > { %3912 = vmatmul.mubr.bf16.gmra.mrb[44].mxu0 %v17241_v43  ;;  %4298 = vmatmul.mubr.bf16.gmra.mrb[44].mxu1 %v17241_v43  ;;  %v17265_v43 = vld [vmem:[%s18497_s23 + $0x68] ss:$16 sps:$4 sm:$0xff]  }
  0xb2   : > { %3921 = vmatprep.mubr.bf16.mxu0 %v17242_v44  ;;  %4307 = vmatprep.mubr.bf16.mxu1 %v17242_v44  ;;  %v14168_v44 = vcombine.low %v375_v21, %v383_v25  ;;  %v472_v25 = vld [vmem:[%s24290_s1 + $0x598] sm:$0xff] }
  0xb9   : > { %3922 = vmatmul.mubr.bf16.gmra.mrb[48].mxu0 %v17244_v45  ;;  %4308 = vmatmul.mubr.bf16.gmra.mrb[48].mxu1 %v17244_v45  ;;  %v407_v45 = vld [vmem:[%s24290_s1 + $0x390] sm:$0xff] }
  0xba   : > { %3931 = vmatprep.mubr.bf16.mxu0 %v17245_v46  ;;  %4317 = vmatprep.mubr.bf16.mxu1 %v17245_v46  ;;  %v415_v46 = vld [vmem:[%s24290_s1 + $0x3d0] sm:$0xff] }
  0xbb   : > { %v14201_v55 = vcombine.high %v407_v45, %v415_v46  ;;  %v14200_v62 = vcombine.low %v407_v45, %v415_v46  ;;  %v504_v46 = vld [vmem:[%s24290_s1 + $0x698] sm:$0xff] }
  0xc1   : > { %3932 = vmatmul.mubr.bf16.gmra.mrb[52].mxu0 %v17247_v47  ;;  %4318 = vmatmul.mubr.bf16.gmra.mrb[52].mxu1 %v17247_v47  ;;  %v17266_v47 = vld [vmem:[%s18497_s23 + $0x8c] ss:$16 sps:$4 sm:$0xff]  }
  0xc2   : > { %3941 = vmatprep.mubr.bf16.mxu0 %v17248_v48  ;;  %4327 = vmatprep.mubr.bf16.mxu1 %v17248_v48  ;;  %v14170_v48 = vcombine.low %v376_v29, %v384_v32  ;;  %v14265_v32 = vcombine.high %v471_v17, %v479_v18 }
  0xc9   : > { %3942 = vmatmul.mubr.bf16.gmra.mrb[56].mxu0 %v17250_v49  ;;  %4328 = vmatmul.mubr.bf16.gmra.mrb[56].mxu1 %v17250_v49  ;;  %v14185_v49 = vcombine.high %v391_v39, %v399_v40 }
  0xca   : > { %3951 = vmatprep.mubr.bf16.mxu0 %v17251_v50  ;;  %4337 = vmatprep.mubr.bf16.mxu1 %v17251_v50  ;;  %v408_v50 = vld [vmem:[%s24290_s1 + $0x398] sm:$0xff] }
  0xd1   : > { %3952 = vmatmul.mubr.bf16.gmra.mrb[60].mxu0 %v17253_v51  ;;  %4338 = vmatmul.mubr.bf16.gmra.mrb[60].mxu1 %v17253_v51  ;;  %v416_v51 = vld [vmem:[%s24290_s1 + $0x3d8] sm:$0xff] }
  0xd2   : > { %3994 = vmatprep.mubr.bf16.mxu0 %v17254_v52  ;;  %4380 = vmatprep.mubr.bf16.mxu1 %v17254_v52  ;;  %v14187_v52 = vcombine.high %v392_v41, %v400_v42  ;;  %v14203_v56 = vcombine.high %v408_v50, %v416_v51  ;;  %v503_v41 = vld [vmem:[%s24290_s1 + $0x690] sm:$0xff] }
  0xd3   : > { %v511_v42 = vld [vmem:[%s24290_s1 + $0x6d0] sm:$0xff] }
  0xd9   : > { %3995 = vmatmul.mubr.bf16.vlgmr.msra.gmra.mrb[0].mxu0 %v17256_v53  ;;  %4381 = vmatmul.mubr.bf16.vlgmr.msra.gmra.mrb[0].mxu1 %v17256_v53  ;;  %v14184_v53 = vcombine.low %v391_v39, %v399_v40  ;;  %v17274_v39 = vld [vmem:[%s18497_s23 + $0xc8] ss:$16 sps:$4 sm:$0xff]   ;;  %v14264_v40 = vcombine.low %v471_v17, %v479_v18  ;;  %v17290_v18 = vld [vmem:[%s18497_s23 + $0x18c] ss:$16 sps:$4 sm:$0xff]  }
  0xda   : > { %4542 = vmatpush1.bf16.msra.mxu0 %v14088_v30  ;;  %4928 = vmatpush1.bf16.msra.mxu1 %v14090_v36  ;;  %v14121_v30 = vcombine.high %v327_v59, %v335_v60  ;;  %v352_v36 = vld [vmem:[%s24290_s1 + $0x1d8] sm:$0xff] }
  0xdb   : > { %4004 = vmatprep.mubr.bf16.mxu0 %v17257_v58  ;;  %4390 = vmatprep.mubr.bf16.mxu1 %v17257_v58  ;;  %v14139_v14 = vcombine.high %v344_v31, %v352_v36  ;;  %v14138_v27 = vcombine.low %v344_v31, %v352_v36  ;;  %v431_v58 = vld [vmem:[%s24290_s1 + $0x450] sm:$0xff]  ;;  %v424_v59 = vld [vmem:[%s24290_s1 + $0x418] sm:$0xff] }
  0xdc   : > { %4543 = vmatprep.subr.bf16.mxu0 %v14105_v63  ;;  %4929 = vmatprep.subr.bf16.mxu1 %v14107_v0  ;;  %v432_v60 = vld [vmem:[%s24290_s1 + $0x458] sm:$0xff]  ;;  %v439_v63 = vld [vmem:[%s24290_s1 + $0x490] sm:$0xff] }
  0xdd   : > { %v447_v0 = vld [vmem:[%s24290_s1 + $0x4d0] sm:$0xff]  ;;  %v14219_v8 = vcombine.high %v424_v59, %v432_v60  ;;  %v17289_v17 = vld [vmem:[%s18497_s23 + $0x168] ss:$16 sps:$4 sm:$0xff]  }
  0xde   : > { %4544 = vmatpush1.bf16.msra.mxu0 %v14104_v3  ;;  %4930 = vmatpush1.bf16.msra.mxu1 %v14106_v23  ;;  %v17269_v3 = vld [vmem:[%s18497_s23 + $0xac] ss:$16 sps:$4 sm:$0xff]   ;;  %v14217_v23 = vcombine.high %v423_v57, %v431_v58  ;;  %v14233_v31 = vcombine.high %v439_v63, %v447_v0  ;;  %v14232_v16 = vcombine.low %v439_v63, %v447_v0 }
  0xdf   : > { %4545 = vmatprep.subr.bf16.mxu0 %v14121_v30  ;;  %4931 = vmatprep.subr.bf16.mxu1 %v14123_v24  ;;  %v440_v30 = vld [vmem:[%s24290_s1 + $0x498] sm:$0xff]  ;;  %v14218_v24 = vcombine.low %v424_v59, %v432_v60  ;;  %v535_v59 = vld [vmem:[%s24290_s1 + $0x790] sm:$0xff] }
  0xe0   : > { %v14235_v36 = vcombine.high %v440_v30, %v448_v7  ;;  %v543_v60 = vld [vmem:[%s24290_s1 + $0x7d0] sm:$0xff]  ;;  %v536_v0 = vld [vmem:[%s24290_s1 + $0x798] sm:$0xff] }
  0xe1   : > { %4005 = vmatmul.mubr.bf16.gmra.mrb[4].mxu0 %v17259_v22  ;;  %4391 = vmatmul.mubr.bf16.gmra.mrb[4].mxu1 %v17259_v22  ;;  %v14202_v22 = vcombine.low %v408_v50, %v416_v51  ;;  %v14297_v51 = vcombine.high %v503_v41, %v511_v42 }
  0xe2   : > { %4014 = vmatprep.mubr.bf16.mxu0 %v17260_v10  ;;  %4400 = vmatprep.mubr.bf16.mxu1 %v17260_v10  ;;  %v14216_v10 = vcombine.low %v423_v57, %v431_v58  ;;  %v17277_v57 = vld [vmem:[%s18497_s23 + $0xe8] ss:$16 sps:$4 sm:$0xff]   ;;  %v14296_v58 = vcombine.low %v503_v41, %v511_v42 }
  0xe3   : > { %4546 = vmatpush1.bf16.msra.mxu0 %v14120_v11  ;;  %4932 = vmatpush1.bf16.msra.mxu1 %v14122_v12  ;;  %v455_v11 = vld [vmem:[%s24290_s1 + $0x510] sm:$0xff]  ;;  %v584_v42 = vld [vmem:[%s24290_s1 + $0x918] sm:$0xff] }
  0xe4   : > { %4547 = vmatprep.subr.bf16.mxu0 %v14137_v13  ;;  %4933 = vmatprep.subr.bf16.mxu1 %v14139_v14  ;;  %v463_v12 = vld [vmem:[%s24290_s1 + $0x550] sm:$0xff]  ;;  %v456_v13 = vld [vmem:[%s24290_s1 + $0x518] sm:$0xff] }
  0xe5   : > { %v464_v14 = vld [vmem:[%s24290_s1 + $0x558] sm:$0xff]  ;;  %v14249_v21 = vcombine.high %v455_v11, %v463_v12 }
  0xe6   : > { %v14250_v29 = vcombine.low %v456_v13, %v464_v14 }
  0xe7   : > { %4548 = vmatpush1.bf16.msra.mxu0 %v14136_v20  ;;  %4934 = vmatpush1.bf16.msra.mxu1 %v14138_v27  ;;  %v14234_v20 = vcombine.low %v440_v30, %v448_v7  ;;  %v14251_v27 = vcombine.high %v456_v13, %v464_v14  ;;  %v14329_v7 = vcombine.high %v535_v59, %v543_v60  ;;  %v17283_v13 = vld [vmem:[%s18497_s23 + $0x128] ss:$16 sps:$4 sm:$0xff]   ;;  %v17284_v14 = vld [vmem:[%s18497_s23 + $0x14c] ss:$16 sps:$4 sm:$0xff]  }
  0xe8   : > { %4549 = vmatprep.subr.bf16.mxu0 %v14153_v28  ;;  %4935 = vmatprep.subr.bf16.mxu1 %v14155_v33  ;;  %v14248_v28 = vcombine.low %v455_v11, %v463_v12  ;;  %v14345_v11 = vcombine.high %v18889_v1, %v18894_v2  ;;  %v14347_v12 = vcombine.high %v18904_v5, %v18909_v6  ;;  %v18072_v1 = vld [vmem:[%s18497_s23 + $0x24] ss:$16 sps:$4 sm:$0xff]  }
  0xe9   : > { %4015 = vmatmul.mubr.bf16.gmra.mrb[8].mxu0 %v17262_v19  ;;  %4401 = vmatmul.mubr.bf16.gmra.mrb[8].mxu1 %v17262_v19  ;;  %v17272_v19 = vld [vmem:[%s18497_s23 + $0xcc] ss:$16 sps:$4 sm:$0xff]   ;;  %v599_v6 = vld [vmem:[%s24290_s1 + $0x990] sm:$0xff] }
  0xea   : > { %4024 = vmatprep.mubr.bf16.mxu0 %v17263_v26  ;;  %4410 = vmatprep.mubr.bf16.mxu1 %v17263_v26  ;;  %v480_v26 = vld [vmem:[%s24290_s1 + $0x5d8] sm:$0xff] }
  0xeb   : > { %4550 = vmatpush1.bf16.msra.mxu0 %v14152_v34  ;;  %4936 = vmatpush1.bf16.msra.mxu1 %v14154_v35  ;;  %v14267_v33 = vcombine.high %v472_v25, %v480_v26  ;;  %v487_v34 = vld [vmem:[%s24290_s1 + $0x610] sm:$0xff] }
  0xec   : > { %4551 = vmatprep.subr.bf16.mxu0 %v14169_v37  ;;  %4937 = vmatprep.subr.bf16.mxu1 %v14171_v38  ;;  %v495_v35 = vld [vmem:[%s24290_s1 + $0x650] sm:$0xff]  ;;  %v488_v37 = vld [vmem:[%s24290_s1 + $0x618] sm:$0xff] }
  0xed   : > { %v496_v38 = vld [vmem:[%s24290_s1 + $0x658] sm:$0xff]  ;;  %v14281_v45 = vcombine.high %v487_v34, %v495_v35 }
  0xee   : > { %v14282_v50 = vcombine.low %v488_v37, %v496_v38 }
  0xef   : > { %4552 = vmatpush1.bf16.msra.mxu0 %v14168_v44  ;;  %4938 = vmatpush1.bf16.msra.mxu1 %v14170_v48  ;;  %v14266_v44 = vcombine.low %v472_v25, %v480_v26  ;;  %v14283_v48 = vcombine.high %v488_v37, %v496_v38  ;;  %v17296_v25 = vld [vmem:[%s18497_s23 + $0x1cc] ss:$16 sps:$4 sm:$0xff]   ;;  %v17298_v26 = vld [vmem:[%s18497_s23 + $0x1c8] ss:$16 sps:$4 sm:$0xff]   ;;  %v583_v38 = vld [vmem:[%s24290_s1 + $0x910] sm:$0xff] }
  0xf0   : > { %4553 = vmatprep.subr.bf16.mxu0 %v14185_v49  ;;  %4939 = vmatprep.subr.bf16.mxu1 %v14187_v52  ;;  %v14280_v49 = vcombine.low %v487_v34, %v495_v35  ;;  %v568_v34 = vld [vmem:[%s24290_s1 + $0x898] sm:$0xff] }
  0xf1   : > { %4025 = vmatmul.mubr.bf16.gmra.mrb[12].mxu0 %v17265_v43  ;;  %4411 = vmatmul.mubr.bf16.gmra.mrb[12].mxu1 %v17265_v43  ;;  %v17275_v43 = vld [vmem:[%s18497_s23 + $0xec] ss:$16 sps:$4 sm:$0xff]  }
  0xf2   : > { %4034 = vmatprep.mubr.bf16.mxu0 %v17266_v47  ;;  %4420 = vmatprep.mubr.bf16.mxu1 %v17266_v47  ;;  %v512_v47 = vld [vmem:[%s24290_s1 + $0x6d8] sm:$0xff] }
  0xf3   : > { %4554 = vmatpush1.bf16.msra.mxu0 %v14184_v53  ;;  %4940 = vmatpush1.bf16.msra.mxu1 %v14186_v54  ;;  %v14299_v52 = vcombine.high %v504_v46, %v512_v47  ;;  %v519_v53 = vld [vmem:[%s24290_s1 + $0x710] sm:$0xff]  ;;  %v576_v35 = vld [vmem:[%s24290_s1 + $0x8d8] sm:$0xff] }
  0xf4   : > { %4555 = vmatprep.subr.bf16.mxu0 %v14201_v55  ;;  %4941 = vmatprep.subr.bf16.mxu1 %v14203_v56  ;;  %v527_v54 = vld [vmem:[%s24290_s1 + $0x750] sm:$0xff]  ;;  %v520_v55 = vld [vmem:[%s24290_s1 + $0x718] sm:$0xff]  ;;  %v14363_v41 = vcombine.high %v568_v34, %v576_v35  ;;  %v14362_v2 = vcombine.low %v568_v34, %v576_v35 }
  0xf5   : > { %v528_v56 = vld [vmem:[%s24290_s1 + $0x758] sm:$0xff]  ;;  %v14313_v63 = vcombine.high %v519_v53, %v527_v54  ;;  %v679_v35 = vld [vmem:[%s24290_s1 + $0xc10] sm:$0xff] }
  0xf6   : > { %v14314_v30 = vcombine.low %v520_v55, %v528_v56 }
  0xf7   : > { %4556 = vmatpush1.bf16.msra.mxu0 %v14200_v62  ;;  %4942 = vmatpush1.bf16.msra.mxu1 %v14202_v22  ;;  %v14298_v62 = vcombine.low %v504_v46, %v512_v47  ;;  %v14315_v22 = vcombine.high %v520_v55, %v528_v56  ;;  %v19142_v46 = vld [vmem:[%s24290_s1 + $0x60] sm:$0xff]  ;;  %v19147_v47 = vld [vmem:[%s24290_s1 + $0x28] sm:$0xff] }
  0xf8   : > { %4557 = vmatprep.subr.bf16.mxu0 %v14217_v23  ;;  %4943 = vmatprep.subr.bf16.mxu1 %v14219_v8  ;;  %v14312_v23 = vcombine.low %v519_v53, %v527_v54  ;;  %v18073_v56 = vld [vmem:[%s18497_s23 + $0x20] ss:$16 sps:$4 sm:$0xff]  }
  0xf9   : > { %4035 = vmatmul.mubr.bf16.gmra.mrb[16].mxu0 %v17268_v61  ;;  %4421 = vmatmul.mubr.bf16.gmra.mrb[16].mxu1 %v17268_v61  ;;  %v17278_v61 = vld [vmem:[%s18497_s23 + $0x10c] ss:$16 sps:$4 sm:$0xff]  }
  0xfa   : > { %4044 = vmatprep.mubr.bf16.mxu0 %v17269_v3  ;;  %4430 = vmatprep.mubr.bf16.mxu1 %v17269_v3  ;;  %v544_v3 = vld [vmem:[%s24290_s1 + $0x7d8] sm:$0xff] }
  0xfb   : > { %4558 = vmatpush1.bf16.msra.mxu0 %v14216_v10  ;;  %4944 = vmatpush1.bf16.msra.mxu1 %v14218_v24  ;;  %v14331_v8 = vcombine.high %v536_v0, %v544_v3  ;;  %v17280_v10 = vld [vmem:[%s18497_s23 + $0x108] ss:$16 sps:$4 sm:$0xff]   ;;  %v14328_v24 = vcombine.low %v535_v59, %v543_v60  ;;  %v623_v59 = vld [vmem:[%s24290_s1 + $0xa50] sm:$0xff] }
  0xfc   : > { %4559 = vmatprep.subr.bf16.mxu0 %v14233_v31  ;;  %4945 = vmatprep.subr.bf16.mxu1 %v14235_v36  ;;  %v17281_v31 = vld [vmem:[%s18497_s23 + $0x12c] ss:$16 sps:$4 sm:$0xff]   ;;  %v14330_v36 = vcombine.low %v536_v0, %v544_v3  ;;  %v18074_v60 = vld [vmem:[%s18497_s23 + $0x44] ss:$16 sps:$4 sm:$0xff]  }
  0xff   : > { %4560 = vmatpush1.bf16.msra.mxu0 %v14232_v16  ;;  %4946 = vmatpush1.bf16.msra.mxu1 %v14234_v20  ;;  %v17287_v16 = vld [vmem:[%s18497_s23 + $0x16c] ss:$16 sps:$4 sm:$0xff]  }
 0x100   : > { %4561 = vmatprep.subr.bf16.mxu0 %v14249_v21  ;;  %4947 = vmatprep.subr.bf16.mxu1 %v14251_v27  ;;  %v17293_v20 = vld [vmem:[%s18497_s23 + $0x1ac] ss:$16 sps:$4 sm:$0xff]   ;;  %v17295_v21 = vld [vmem:[%s18497_s23 + $0x1a8] ss:$16 sps:$4 sm:$0xff]  }
 0x101   : > { %4045 = vmatmul.mubr.bf16.gmra.mrb[20].mxu0 %v17271_v15  ;;  %4431 = vmatmul.mubr.bf16.gmra.mrb[20].mxu1 %v17271_v15  ;;  %v17286_v15 = vld [vmem:[%s18497_s23 + $0x148] ss:$16 sps:$4 sm:$0xff]   ;;  %v17299_v27 = vld [vmem:[%s18497_s23 + $0x1ec] ss:$16 sps:$4 sm:$0xff]  }
 0x102   : > { %4054 = vmatprep.mubr.bf16.mxu0 %v17272_v19  ;;  %4440 = vmatprep.mubr.bf16.mxu1 %v17272_v19  ;;  %v17292_v19 = vld [vmem:[%s18497_s23 + $0x188] ss:$16 sps:$4 sm:$0xff]  }
 0x103   : > { %4562 = vmatpush1.bf16.msra.mxu0 %v14248_v28  ;;  %4948 = vmatpush1.bf16.msra.mxu1 %v14250_v29  ;;  %v17301_v28 = vld [vmem:[%s18497_s23 + $0x1e8] ss:$16 sps:$4 sm:$0xff]   ;;  %v18070_v29 = vld [vmem:[%s18497_s23 + $0x4] ss:$16 sps:$4 sm:$0xff]  }
 0x104   : > { %4563 = vmatprep.subr.bf16.mxu0 %v14265_v32  ;;  %4949 = vmatprep.subr.bf16.mxu1 %v14267_v33  ;;  %v567_v32 = vld [vmem:[%s24290_s1 + $0x890] sm:$0xff] }
 0x105   : > { %v575_v33 = vld [vmem:[%s24290_s1 + $0x8d0] sm:$0xff] }
 0x106   : > { %v14361_v37 = vcombine.high %v567_v32, %v575_v33 }
 0x107   : > { %4564 = vmatpush1.bf16.msra.mxu0 %v14264_v40  ;;  %4950 = vmatpush1.bf16.msra.mxu1 %v14266_v44  ;;  %v18071_v40 = vld [vmem:[%s18497_s23] ss:$16 sps:$4 sm:$0xff]   ;;  %v14360_v44 = vcombine.low %v567_v32, %v575_v33 }
 0x108   : > { %4565 = vmatprep.subr.bf16.mxu0 %v14281_v45  ;;  %4951 = vmatprep.subr.bf16.mxu1 %v14283_v48  ;;  %v19137_v45 = vld [vmem:[%s24290_s1 + $0x20] sm:$0xff] }
 0x109   : > { %4055 = vmatmul.mubr.bf16.gmra.mrb[24].mxu0 %v17274_v39  ;;  %4441 = vmatmul.mubr.bf16.gmra.mrb[24].mxu1 %v17274_v39  ;;  %v591_v39 = vld [vmem:[%s24290_s1 + $0x950] sm:$0xff]  ;;  %v14092_v48 = vcombine.low %v19137_v45, %v19142_v46 }
 0x10a   : > { %4064 = vmatprep.mubr.bf16.mxu0 %v17275_v43  ;;  %4450 = vmatprep.mubr.bf16.mxu1 %v17275_v43  ;;  %v592_v43 = vld [vmem:[%s24290_s1 + $0x958] sm:$0xff]  ;;  %v14376_v53 = vcombine.low %v583_v38, %v591_v39  ;;  %v18077_v33 = vld [vmem:[%s18497_s23 + $0x60] ss:$16 sps:$4 sm:$0xff]  }
 0x10b   : > { %4566 = vmatpush1.bf16.msra.mxu0 %v14280_v49  ;;  %4952 = vmatpush1.bf16.msra.mxu1 %v14282_v50  ;;  %v19158_v49 = vld [vmem:[%s24290_s1 + $0x68] sm:$0xff]  ;;  %v14379_v50 = vcombine.high %v584_v42, %v592_v43  ;;  %v14378_v54 = vcombine.low %v584_v42, %v592_v43 }
 0x10c   : > { %4567 = vmatprep.subr.bf16.mxu0 %v14297_v51  ;;  %4953 = vmatprep.subr.bf16.mxu1 %v14299_v52  ;;  %v14094_v5 = vcombine.low %v19147_v47, %v19158_v49  ;;  %v600_v51 = vld [vmem:[%s24290_s1 + $0x998] sm:$0xff] }
 0x10d   : > { %v608_v52 = vld [vmem:[%s24290_s1 + $0x9d8] sm:$0xff] }
 0x10e   : > { %v14394_v0 = vcombine.low %v600_v51, %v608_v52 }
 0x10f   : > { %4568 = vmatpush1.bf16.msra.mxu0 %v14296_v58  ;;  %4954 = vmatpush1.bf16.msra.mxu1 %v14298_v62  ;;  %v615_v58 = vld [vmem:[%s24290_s1 + $0xa10] sm:$0xff]  ;;  %v624_v62 = vld [vmem:[%s24290_s1 + $0xa58] sm:$0xff] }
 0x110   : > { %4569 = vmatprep.subr.bf16.mxu0 %v14313_v63  ;;  %4955 = vmatprep.subr.bf16.mxu1 %v14315_v22  ;;  %v14409_v3 = vcombine.high %v615_v58, %v623_v59 }
 0x111   : > { %4065 = vmatmul.mubr.bf16.gmra.mrb[28].mxu0 %v17277_v57  ;;  %4451 = vmatmul.mubr.bf16.gmra.mrb[28].mxu1 %v17277_v57  ;;  %v14395_v57 = vcombine.high %v600_v51, %v608_v52  ;;  %v18079_v52 = vld [vmem:[%s18497_s23 + $0x80] ss:$16 sps:$4 sm:$0xff]  }
 0x112   : > { %4074 = vmatprep.mubr.bf16.mxu0 %v17278_v61  ;;  %4460 = vmatprep.mubr.bf16.mxu1 %v17278_v61  ;;  %v616_v61 = vld [vmem:[%s24290_s1 + $0xa18] sm:$0xff] }
 0x113   : > { %4570 = vmatpush1.bf16.msra.mxu0 %v14312_v23  ;;  %4956 = vmatpush1.bf16.msra.mxu1 %v14314_v30  ;;  %v14411_v22 = vcombine.high %v616_v61, %v624_v62  ;;  %v631_v23 = vld [vmem:[%s24290_s1 + $0xa90] sm:$0xff] }
 0x114   : > { %4571 = vmatprep.subr.bf16.mxu0 %v14329_v7  ;;  %4957 = vmatprep.subr.bf16.mxu1 %v14331_v8  ;;  %v639_v30 = vld [vmem:[%s24290_s1 + $0xad0] sm:$0xff]  ;;  %v632_v7 = vld [vmem:[%s24290_s1 + $0xa98] sm:$0xff] }
 0x115   : > { %v640_v8 = vld [vmem:[%s24290_s1 + $0xad8] sm:$0xff] }
 0x117   : > { %4572 = vmatpush1.bf16.msra.mxu0 %v14328_v24  ;;  %4958 = vmatpush1.bf16.msra.mxu1 %v14330_v36  ;;  %v14410_v24 = vcombine.low %v616_v61, %v624_v62  ;;  %v18075_v36 = vld [vmem:[%s18497_s23 + $0x40] ss:$16 sps:$4 sm:$0xff]  }
 0x118   : > { %4734 = vmatprep.subr.bf16.mxu0 %v14345_v11  ;;  %5120 = vmatprep.subr.bf16.mxu1 %v14347_v12  ;;  %v14427_v11 = vcombine.high %v632_v7, %v640_v8  ;;  %v647_v12 = vld [vmem:[%s24290_s1 + $0xb10] sm:$0xff] }
 0x119   : > { %4075 = vmatmul.mubr.bf16.gmra.mrb[32].mxu0 %v17280_v10  ;;  %4461 = vmatmul.mubr.bf16.gmra.mrb[32].mxu1 %v17280_v10  ;;  %v14408_v10 = vcombine.low %v615_v58, %v623_v59  ;;  %v720_v58 = vld [vmem:[%s24290_s1 + $0xd58] sm:$0xff] }
 0x11a   : > { %4084 = vmatprep.mubr.bf16.mxu0 %v17281_v31  ;;  %4470 = vmatprep.mubr.bf16.mxu1 %v17281_v31  ;;  %v14425_v31 = vcombine.high %v631_v23, %v639_v30 }
 0x121   : > { %4085 = vmatmul.mubr.bf16.gmra.mrb[36].mxu0 %v17283_v13  ;;  %4471 = vmatmul.mubr.bf16.gmra.mrb[36].mxu1 %v17283_v13  ;;  %v655_v13 = vld [vmem:[%s24290_s1 + $0xb50] sm:$0xff] }
 0x122   : > { %4094 = vmatprep.mubr.bf16.mxu0 %v17284_v14  ;;  %4480 = vmatprep.mubr.bf16.mxu1 %v17284_v14  ;;  %v18076_v14 = vld [vmem:[%s18497_s23 + $0x64] ss:$16 sps:$4 sm:$0xff]  }
 0x129   : > { %4095 = vmatmul.mubr.bf16.gmra.mrb[40].mxu0 %v17286_v15  ;;  %4481 = vmatmul.mubr.bf16.gmra.mrb[40].mxu1 %v17286_v15  ;;  %v648_v15 = vld [vmem:[%s24290_s1 + $0xb18] sm:$0xff] }
 0x12a   : > { %4104 = vmatprep.mubr.bf16.mxu0 %v17287_v16  ;;  %4490 = vmatprep.mubr.bf16.mxu1 %v17287_v16  ;;  %v656_v16 = vld [vmem:[%s24290_s1 + $0xb58] sm:$0xff] }
 0x131   : > { %4105 = vmatmul.mubr.bf16.gmra.mrb[44].mxu0 %v17289_v17  ;;  %4491 = vmatmul.mubr.bf16.gmra.mrb[44].mxu1 %v17289_v17  ;;  %v14424_v17 = vcombine.low %v631_v23, %v639_v30 }
 0x132   : > { %4114 = vmatprep.mubr.bf16.mxu0 %v17290_v18  ;;  %4500 = vmatprep.mubr.bf16.mxu1 %v17290_v18  ;;  %v14426_v18 = vcombine.low %v632_v7, %v640_v8  ;;  %v18081_v8 = vld [vmem:[%s18497_s23 + $0xa0] ss:$16 sps:$4 sm:$0xff]  }
 0x139   : > { %4115 = vmatmul.mubr.bf16.gmra.mrb[48].mxu0 %v17292_v19  ;;  %4501 = vmatmul.mubr.bf16.gmra.mrb[48].mxu1 %v17292_v19  ;;  %v14441_v19 = vcombine.high %v647_v12, %v655_v13 }
 0x13a   : > { %4124 = vmatprep.mubr.bf16.mxu0 %v17293_v20  ;;  %4510 = vmatprep.mubr.bf16.mxu1 %v17293_v20  ;;  %v14443_v20 = vcombine.high %v648_v15, %v656_v16 }
 0x141   : > { %4125 = vmatmul.mubr.bf16.gmra.mrb[52].mxu0 %v17295_v21  ;;  %4511 = vmatmul.mubr.bf16.gmra.mrb[52].mxu1 %v17295_v21  ;;  %v663_v21 = vld [vmem:[%s24290_s1 + $0xb90] sm:$0xff] }
 0x142   : > { %4134 = vmatprep.mubr.bf16.mxu0 %v17296_v25  ;;  %4520 = vmatprep.mubr.bf16.mxu1 %v17296_v25  ;;  %v671_v25 = vld [vmem:[%s24290_s1 + $0xbd0] sm:$0xff] }
 0x143   : > { %v14457_v32 = vcombine.high %v663_v21, %v671_v25 }
 0x149   : > { %4135 = vmatmul.mubr.bf16.gmra.mrb[56].mxu0 %v17298_v26  ;;  %4521 = vmatmul.mubr.bf16.gmra.mrb[56].mxu1 %v17298_v26  ;;  %v664_v26 = vld [vmem:[%s24290_s1 + $0xb98] sm:$0xff] }
 0x14a   : > { %4144 = vmatprep.mubr.bf16.mxu0 %v17299_v27  ;;  %4530 = vmatprep.mubr.bf16.mxu1 %v17299_v27  ;;  %v672_v27 = vld [vmem:[%s24290_s1 + $0xbd8] sm:$0xff] }
 0x14b   : > { %v14459_v34 = vcombine.high %v664_v26, %v672_v27  ;;  %v14458_v42 = vcombine.low %v664_v26, %v672_v27  ;;  %v18083_v27 = vld [vmem:[%s18497_s23 + $0xc0] ss:$16 sps:$4 sm:$0xff]  }
 0x151   : > { %4145 = vmatmul.mubr.bf16.gmra.mrb[60].mxu0 %v17301_v28  ;;  %4531 = vmatmul.mubr.bf16.gmra.mrb[60].mxu1 %v17301_v28  ;;  %v14440_v28 = vcombine.low %v647_v12, %v655_v13  ;;  %v752_v12 = vld [vmem:[%s24290_s1 + $0xe58] sm:$0xff] }
 0x152   : > { %4573 = vmatprep.mubr.bf16.mxu0 %v18070_v29  ;;  %4959 = vmatprep.mubr.bf16.mxu1 %v18070_v29  ;;  %v14442_v29 = vcombine.low %v648_v15, %v656_v16 }
 0x159   : > { %4574 = vmatmul.mubr.bf16.vlgmr.msra.gmra.mrb[64].mxu0 %v18071_v40  ;;  %4960 = vmatmul.mubr.bf16.vlgmr.msra.gmra.mrb[64].mxu1 %v18071_v40  ;;  %v688_v40 = vld [vmem:[%s24290_s1 + $0xc58] sm:$0xff] }
 0x15a   : > { %4735 = vmatpush1.bf16.msra.mxu0 %v14344_v4  ;;  %5121 = vmatpush1.bf16.msra.mxu1 %v14346_v9  ;;  %v14377_v4 = vcombine.high %v583_v38, %v591_v39  ;;  %v607_v9 = vld [vmem:[%s24290_s1 + $0x9d0] sm:$0xff]  ;;  %v680_v39 = vld [vmem:[%s24290_s1 + $0xc18] sm:$0xff] }
 0x15b   : > { %4583 = vmatprep.mubr.bf16.mxu0 %v18072_v1  ;;  %4969 = vmatprep.mubr.bf16.mxu1 %v18072_v1  ;;  %v14393_v55 = vcombine.high %v599_v6, %v607_v9  ;;  %v14392_v63 = vcombine.low %v599_v6, %v607_v9  ;;  %v18078_v38 = vld [vmem:[%s18497_s23 + $0x84] ss:$16 sps:$4 sm:$0xff]   ;;  %v14474_v9 = vcombine.low %v680_v39, %v688_v40 }
 0x15c   : > { %4736 = vmatprep.subr.bf16.mxu0 %v14361_v37  ;;  %5122 = vmatprep.subr.bf16.mxu1 %v14363_v41  ;;  %v687_v37 = vld [vmem:[%s24290_s1 + $0xc50] sm:$0xff]  ;;  %v14456_v41 = vcombine.low %v663_v21, %v671_v25 }
 0x15d   : > { %v14473_v43 = vcombine.high %v679_v35, %v687_v37  ;;  %v695_v1 = vld [vmem:[%s24290_s1 + $0xc90] sm:$0xff]  ;;  %v14472_v6 = vcombine.low %v679_v35, %v687_v37  ;;  %v784_v35 = vld [vmem:[%s24290_s1 + $0xf58] sm:$0xff] }
 0x15e   : > { %4737 = vmatpush1.bf16.msra.mxu0 %v14360_v44  ;;  %5123 = vmatpush1.bf16.msra.mxu1 %v14362_v2  ;;  %v14475_v44 = vcombine.high %v680_v39, %v688_v40  ;;  %v703_v2 = vld [vmem:[%s24290_s1 + $0xcd0] sm:$0xff] }
 0x15f   : > { %4738 = vmatprep.subr.bf16.mxu0 %v14377_v4  ;;  %5124 = vmatprep.subr.bf16.mxu1 %v14379_v50  ;;  %v696_v4 = vld [vmem:[%s24290_s1 + $0xc98] sm:$0xff]  ;;  %v14489_v51 = vcombine.high %v695_v1, %v703_v2  ;;  %v14488_v59 = vcombine.low %v695_v1, %v703_v2 }
 0x160   : > { %v704_v50 = vld [vmem:[%s24290_s1 + $0xcd8] sm:$0xff] }
 0x161   : > { %4584 = vmatmul.mubr.bf16.gmra.mrb[68].mxu0 %v18073_v56  ;;  %4970 = vmatmul.mubr.bf16.gmra.mrb[68].mxu1 %v18073_v56  ;;  %v18080_v56 = vld [vmem:[%s18497_s23 + $0xa4] ss:$16 sps:$4 sm:$0xff]  }
 0x162   : > { %4593 = vmatprep.mubr.bf16.mxu0 %v18074_v60  ;;  %4979 = vmatprep.mubr.bf16.mxu1 %v18074_v60  ;;  %v14490_v60 = vcombine.low %v696_v4, %v704_v50 }
 0x163   : > { %4739 = vmatpush1.bf16.msra.mxu0 %v14376_v53  ;;  %5125 = vmatpush1.bf16.msra.mxu1 %v14378_v54  ;;  %v14491_v53 = vcombine.high %v696_v4, %v704_v50  ;;  %v711_v54 = vld [vmem:[%s24290_s1 + $0xd10] sm:$0xff] }
 0x164   : > { %4740 = vmatprep.subr.bf16.mxu0 %v14393_v55  ;;  %5126 = vmatprep.subr.bf16.mxu1 %v14395_v57  ;;  %v719_v55 = vld [vmem:[%s24290_s1 + $0xd50] sm:$0xff]  ;;  %v712_v57 = vld [vmem:[%s24290_s1 + $0xd18] sm:$0xff] }
 0x165   : > { %v14505_v61 = vcombine.high %v711_v54, %v719_v55  ;;  %v14507_v62 = vcombine.high %v712_v57, %v720_v58  ;;  %v14504_v23 = vcombine.low %v711_v54, %v719_v55  ;;  %v14506_v30 = vcombine.low %v712_v57, %v720_v58  ;;  %v18085_v50 = vld [vmem:[%s18497_s23 + $0xe0] ss:$16 sps:$4 sm:$0xff]  }
 0x166   : > { %v14095_v54 = vcombine.high %v19147_v47, %v19158_v49  ;;  %v18087_v55 = vld [vmem:[%s18497_s23 + $0x100] ss:$16 sps:$4 sm:$0xff]   ;;  %v809_v57 = vlaneseq }
 0x167   : > { %4741 = vmatpush1.bf16.msra.mxu0 %v14392_v63  ;;  %5127 = vmatpush1.bf16.msra.mxu1 %v14394_v0  ;;  %v727_v63 = vld [vmem:[%s24290_s1 + $0xd90] sm:$0xff] }
 0x168   : > { %4742 = vmatprep.subr.bf16.mxu0 %v14409_v3  ;;  %5128 = vmatprep.subr.bf16.mxu1 %v14411_v22  ;;  %v735_v0 = vld [vmem:[%s24290_s1 + $0xdd0] sm:$0xff]  ;;  %v728_v3 = vld [vmem:[%s24290_s1 + $0xd98] sm:$0xff] }
 0x169   : > { %4594 = vmatmul.mubr.bf16.gmra.mrb[72].mxu0 %v18075_v36  ;;  %4980 = vmatmul.mubr.bf16.gmra.mrb[72].mxu1 %v18075_v36  ;;  %v736_v22 = vld [vmem:[%s24290_s1 + $0xdd8] sm:$0xff]  ;;  %v14521_v7 = vcombine.high %v727_v63, %v735_v0  ;;  %v18082_v36 = vld [vmem:[%s18497_s23 + $0xc4] ss:$16 sps:$4 sm:$0xff]   ;;  %v14520_v13 = vcombine.low %v727_v63, %v735_v0  ;;  %v18089_v58 = vld [vmem:[%s18497_s23 + $0x120] ss:$16 sps:$4 sm:$0xff]  }
 0x16a   : > { %4603 = vmatprep.mubr.bf16.mxu0 %v18076_v14  ;;  %4989 = vmatprep.mubr.bf16.mxu1 %v18076_v14  ;;  %v14522_v14 = vcombine.low %v728_v3, %v736_v22 }
 0x16b   : > { %4743 = vmatpush1.bf16.msra.mxu0 %v14408_v10  ;;  %5129 = vmatpush1.bf16.msra.mxu1 %v14410_v24  ;;  %v14523_v10 = vcombine.high %v728_v3, %v736_v22  ;;  %v743_v24 = vld [vmem:[%s24290_s1 + $0xe10] sm:$0xff] }
 0x16c   : > { %4744 = vmatprep.subr.bf16.mxu0 %v14425_v31  ;;  %5130 = vmatprep.subr.bf16.mxu1 %v14427_v11  ;;  %v751_v31 = vld [vmem:[%s24290_s1 + $0xe50] sm:$0xff]  ;;  %v744_v11 = vld [vmem:[%s24290_s1 + $0xe18] sm:$0xff] }
 0x16d   : > { %v14537_v15 = vcombine.high %v743_v24, %v751_v31  ;;  %v14539_v16 = vcombine.high %v744_v11, %v752_v12  ;;  %v14536_v21 = vcombine.low %v743_v24, %v751_v31  ;;  %v14538_v25 = vcombine.low %v744_v11, %v752_v12  ;;  %v18091_v22 = vld [vmem:[%s18497_s23 + $0x140] ss:$16 sps:$4 sm:$0xff]  }
 0x16f   : > { %4745 = vmatpush1.bf16.msra.mxu0 %v14424_v17  ;;  %5131 = vmatpush1.bf16.msra.mxu1 %v14426_v18  ;;  %v759_v17 = vld [vmem:[%s24290_s1 + $0xe90] sm:$0xff] }
 0x170   : > { %4746 = vmatprep.subr.bf16.mxu0 %v14441_v19  ;;  %5132 = vmatprep.subr.bf16.mxu1 %v14443_v20  ;;  %v767_v18 = vld [vmem:[%s24290_s1 + $0xed0] sm:$0xff]  ;;  %v760_v19 = vld [vmem:[%s24290_s1 + $0xe98] sm:$0xff] }
 0x171   : > { %4604 = vmatmul.mubr.bf16.gmra.mrb[76].mxu0 %v18077_v33  ;;  %4990 = vmatmul.mubr.bf16.gmra.mrb[76].mxu1 %v18077_v33  ;;  %v768_v20 = vld [vmem:[%s24290_s1 + $0xed8] sm:$0xff]  ;;  %v14553_v26 = vcombine.high %v759_v17, %v767_v18  ;;  %v18084_v33 = vld [vmem:[%s18497_s23 + $0xe4] ss:$16 sps:$4 sm:$0xff]   ;;  %v14552_v37 = vcombine.low %v759_v17, %v767_v18 }
 0x172   : > { %4613 = vmatprep.mubr.bf16.mxu0 %v18078_v38  ;;  %4999 = vmatprep.mubr.bf16.mxu1 %v18078_v38  ;;  %v14554_v38 = vcombine.low %v760_v19, %v768_v20 }
 0x173   : > { %4747 = vmatpush1.bf16.msra.mxu0 %v14440_v28  ;;  %5133 = vmatpush1.bf16.msra.mxu1 %v14442_v29  ;;  %v14555_v28 = vcombine.high %v760_v19, %v768_v20  ;;  %v775_v29 = vld [vmem:[%s24290_s1 + $0xf10] sm:$0xff] }
 0x174   : > { %4748 = vmatprep.subr.bf16.mxu0 %v14457_v32  ;;  %5134 = vmatprep.subr.bf16.mxu1 %v14459_v34  ;;  %v783_v32 = vld [vmem:[%s24290_s1 + $0xf50] sm:$0xff]  ;;  %v776_v34 = vld [vmem:[%s24290_s1 + $0xf18] sm:$0xff] }
 0x175   : > { %v14569_v39 = vcombine.high %v775_v29, %v783_v32  ;;  %v14571_v40 = vcombine.high %v776_v34, %v784_v35  ;;  %v14568_v1 = vcombine.low %v775_v29, %v783_v32  ;;  %v14570_v2 = vcombine.low %v776_v34, %v784_v35  ;;  %v18094_v34 = vld [vmem:[%s18497_s23 + $0x184] ss:$16 sps:$4 sm:$0xff]  }
 0x177   : > { %4749 = vmatpush1.bf16.msra.mxu0 %v14456_v41  ;;  %5135 = vmatpush1.bf16.msra.mxu1 %v14458_v42  ;;  %v791_v41 = vld [vmem:[%s24290_s1 + $0xf90] sm:$0xff] }
 0x178   : > { %4750 = vmatprep.subr.bf16.mxu0 %v14473_v43  ;;  %5136 = vmatprep.subr.bf16.mxu1 %v14475_v44  ;;  %v799_v42 = vld [vmem:[%s24290_s1 + $0xfd0] sm:$0xff]  ;;  %v792_v43 = vld [vmem:[%s24290_s1 + $0xf98] sm:$0xff] }
 0x179   : > { %4614 = vmatmul.mubr.bf16.gmra.mrb[80].mxu0 %v18079_v52  ;;  %5000 = vmatmul.mubr.bf16.gmra.mrb[80].mxu1 %v18079_v52  ;;  %v800_v44 = vld [vmem:[%s24290_s1 + $0xfd8] sm:$0xff]  ;;  %v14585_v4 = vcombine.high %v791_v41, %v799_v42 }
 0x17a   : > { %4623 = vmatprep.mubr.bf16.mxu0 %v18080_v56  ;;  %5009 = vmatprep.mubr.bf16.mxu1 %v18080_v56  ;;  %v14586_v52 = vcombine.low %v792_v43, %v800_v44  ;;  %v18088_v56 = vld [vmem:[%s18497_s23 + $0x124] ss:$16 sps:$4 sm:$0xff]  }
 0x17b   : > { %4751 = vmatpush1.bf16.msra.mxu0 %v14472_v6  ;;  %5137 = vmatpush1.bf16.msra.mxu1 %v14474_v9  ;;  %v14587_v6 = vcombine.high %v792_v43, %v800_v44  ;;  %v18086_v9 = vld [vmem:[%s18497_s23 + $0x104] ss:$16 sps:$4 sm:$0xff]  }
 0x17c   : > { %4752 = vmatprep.subr.bf16.mxu0 %v14489_v51  ;;  %5138 = vmatprep.subr.bf16.mxu1 %v14491_v53  ;;  %v14584_v51 = vcombine.low %v791_v41, %v799_v42  ;;  %v14093_v53 = vcombine.high %v19137_v45, %v19142_v46  ;;  %v18104_v45 = vld [vmem:[%s18497_s23 + $0x2c] ss:$16 sps:$4 sm:$0xff]  }
 0x17f   : > { %4753 = vmatpush1.bf16.msra.mxu0 %v14488_v59  ;;  %5139 = vmatpush1.bf16.msra.mxu1 %v14490_v60  ;;  %v19339_v59 = vshrl.u32 %v809_v57, 7  ;;  %v18090_v60 = vld [vmem:[%s18497_s23 + $0x144] ss:$16 sps:$4 sm:$0xff]  }
 0x180   : > { %4754 = vmatprep.subr.bf16.mxu0 %v14505_v61  ;;  %5140 = vmatprep.subr.bf16.mxu1 %v14507_v62  ;;  %v805_v62 = vld [vmem:[%s24291_s2] sm:$0xff] }
 0x181   : > { %4624 = vmatmul.mubr.bf16.gmra.mrb[84].mxu0 %v18081_v8  ;;  %5010 = vmatmul.mubr.bf16.gmra.mrb[84].mxu1 %v18081_v8  ;;  %v19343_v61 = vsub.s32 0, %v19339_v59  ;;  %v19349_v63 = vsub.s32 2, %v19339_v59  ;;  %v19352_v0 = vsub.s32 1, %v19339_v59  ;;  %v19355_v3 = vsub.s32 3, %v19339_v59 }
 0x182   : > { %4633 = vmatprep.mubr.bf16.mxu0 %v18082_v36  ;;  %5019 = vmatprep.mubr.bf16.mxu1 %v18082_v36 }
 0x183   : > { %4755 = vmatpush1.bf16.msra.mxu0 %v14504_v23  ;;  %5141 = vmatpush1.bf16.msra.mxu1 %v14506_v30  ;;  %24496 = vst [vmem:[#allocation5_spill] sm:$0xff] %v19343_v61  ;;  %24497 = vst [vmem:[#allocation6_spill] sm:$0xff] %v19349_v63  ;;  %v19359_v23 = vrot.slane %v805_v62, %v19343_v61  ;;  %v19362_v30 = vrot.slane %v805_v62, %v19349_v63 }
 0x184   : > { %4756 = vmatprep.subr.bf16.mxu0 %v14521_v7  ;;  %5142 = vmatprep.subr.bf16.mxu1 %v14523_v10  ;;  %24498 = vst [vmem:[#allocation7_spill] sm:$0xff] %v19352_v0  ;;  %24499 = vst [vmem:[#allocation8_spill] sm:$0xff] %v19355_v3  ;;  %v18092_v7 = vld [vmem:[%s18497_s23 + $0x164] ss:$16 sps:$4 sm:$0xff]   ;;  %v19366_v8 = vrot.slane %v805_v62, %v19352_v0  ;;  %v19369_v10 = vrot.slane %v805_v62, %v19355_v3 }
 0x187   : > { %4757 = vmatpush1.bf16.msra.mxu0 %v14520_v13  ;;  %5143 = vmatpush1.bf16.msra.mxu1 %v14522_v14 }
 0x188   : > { %4758 = vmatprep.subr.bf16.mxu0 %v14537_v15  ;;  %5144 = vmatprep.subr.bf16.mxu1 %v14539_v16 }
 0x189   : > { %4634 = vmatmul.mubr.bf16.gmra.mrb[88].mxu0 %v18083_v27  ;;  %5020 = vmatmul.mubr.bf16.gmra.mrb[88].mxu1 %v18083_v27 }
 0x18a   : > { %4643 = vmatprep.mubr.bf16.mxu0 %v18084_v33  ;;  %5029 = vmatprep.mubr.bf16.mxu1 %v18084_v33 }
 0x18b   : > { %4759 = vmatpush1.bf16.msra.mxu0 %v14536_v21  ;;  %5145 = vmatpush1.bf16.msra.mxu1 %v14538_v25 }
 0x18c   : > { %4760 = vmatprep.subr.bf16.mxu0 %v14553_v26  ;;  %5146 = vmatprep.subr.bf16.mxu1 %v14555_v28  ;;  %v18093_v28 = vld [vmem:[%s18497_s23 + $0x160] ss:$16 sps:$4 sm:$0xff]  }
 0x18f   : > { %4761 = vmatpush1.bf16.msra.mxu0 %v14552_v37  ;;  %5147 = vmatpush1.bf16.msra.mxu1 %v14554_v38 }
 0x190   : > { %4762 = vmatprep.subr.bf16.mxu0 %v14569_v39  ;;  %5148 = vmatprep.subr.bf16.mxu1 %v14571_v40 }
 0x191   : > { %4644 = vmatmul.mubr.bf16.gmra.mrb[92].mxu0 %v18085_v50  ;;  %5030 = vmatmul.mubr.bf16.gmra.mrb[92].mxu1 %v18085_v50 }
 0x192   : > { %4653 = vmatprep.mubr.bf16.mxu0 %v18086_v9  ;;  %5039 = vmatprep.mubr.bf16.mxu1 %v18086_v9 }
 0x193   : > { %4763 = vmatpush1.bf16.msra.mxu0 %v14568_v1  ;;  %5149 = vmatpush1.bf16.msra.mxu1 %v14570_v2 }
 0x194   : > { %4764 = vmatprep.subr.bf16.mxu0 %v14585_v4  ;;  %5150 = vmatprep.subr.bf16.mxu1 %v14587_v6 }
 0x197   : > { %4765 = vmatpush1.bf16.msra.mxu0 %v14584_v51  ;;  %5151 = vmatpush1.bf16.msra.mxu1 %v14586_v52 }
 0x198   : > { %5313 = vmatprep.subr.bf16.mxu0 %v14093_v53  ;;  %5699 = vmatprep.subr.bf16.mxu1 %v14095_v54 }
 0x199   : > { %4654 = vmatmul.mubr.bf16.gmra.mrb[96].mxu0 %v18087_v55  ;;  %5040 = vmatmul.mubr.bf16.gmra.mrb[96].mxu1 %v18087_v55 }
 0x19a   : > { %4663 = vmatprep.mubr.bf16.mxu0 %v18088_v56  ;;  %5049 = vmatprep.mubr.bf16.mxu1 %v18088_v56 }
 0x1a1   : > { %4664 = vmatmul.mubr.bf16.gmra.mrb[100].mxu0 %v18089_v58  ;;  %5050 = vmatmul.mubr.bf16.gmra.mrb[100].mxu1 %v18089_v58 }
 0x1a2   : > { %4673 = vmatprep.mubr.bf16.mxu0 %v18090_v60  ;;  %5059 = vmatprep.mubr.bf16.mxu1 %v18090_v60  ;;  %v18095_v60 = vld [vmem:[%s18497_s23 + $0x180] ss:$16 sps:$4 sm:$0xff]  }
 0x1a9   : > { %4674 = vmatmul.mubr.bf16.gmra.mrb[104].mxu0 %v18091_v22  ;;  %5060 = vmatmul.mubr.bf16.gmra.mrb[104].mxu1 %v18091_v22 }
 0x1aa   : > { %4683 = vmatprep.mubr.bf16.mxu0 %v18092_v7  ;;  %5069 = vmatprep.mubr.bf16.mxu1 %v18092_v7 }
 0x1ac   : > { %v3996_v24 = vpop.f32.mrb[0].mxu0  ;;  %v4382_v36 = vpop.f32.mrb[0].mxu1 }
 0x1ad   : > { %v15117_v31 = vadd.f32 %v3996_v24, %v19359_v23  ;;  %v3998_v11 = vpop.f32.mrb[1].mxu0  ;;  %v15181_v12 = vadd.f32 %v4382_v36, %v19362_v30  ;;  %v4384_v13 = vpop.f32.mrb[1].mxu1  ;;  %v18096_v24 = vld [vmem:[%s18497_s23 + $0x1a4] ss:$16 sps:$4 sm:$0xff]  }
 0x1ae   : > { %v4000_v14 = vpop.f32.mrb[2].mxu0  ;;  %v15118_v15 = vadd.f32 %v3998_v11, %v19366_v8  ;;  %v4386_v17 = vpop.f32.mrb[2].mxu1  ;;  %v15182_v19 = vadd.f32 %v4384_v13, %v19369_v10 }
 0x1af   : > { %v15119_v16 = vadd.f32 %v4000_v14, %v19359_v23  ;;  %v4002_v18 = vpop.f32.mrb[3].mxu0  ;;  %v15183_v20 = vadd.f32 %v4386_v17, %v19362_v30  ;;  %v4388_v21 = vpop.f32.mrb[3].mxu1  ;;  %v6857_v26 = vmax.f32 %v15117_v31, 0.0  ;;  %v6859_v32 = vmax.f32 %v15181_v12, 0.0 }
 0x1b0   : > { %v15120_v25 = vadd.f32 %v4002_v18, %v19366_v8  ;;  %v15184_v29 = vadd.f32 %v4388_v21, %v19369_v10  ;;  %v6858_v35 = vmax.f32 %v15118_v15, 0.0  ;;  %v6860_v39 = vmax.f32 %v15182_v19, 0.0 }
 0x1b1   : > { %v6873_v27 = vmax.f32 %v15119_v16, 0.0  ;;  %4684 = vmatmul.mubr.bf16.gmra.mrb[108].mxu0 %v18093_v28  ;;  %v6875_v33 = vmax.f32 %v15183_v20, 0.0  ;;  %5070 = vmatmul.mubr.bf16.gmra.mrb[108].mxu1 %v18093_v28 }
 0x1b2   : > { %4693 = vmatprep.mubr.bf16.mxu0 %v18094_v34  ;;  %v6874_v37 = vmax.f32 %v15120_v25, 0.0  ;;  %5079 = vmatprep.mubr.bf16.mxu1 %v18094_v34  ;;  %v6876_v40 = vmax.f32 %v15184_v29, 0.0 }
 0x1b3   : > { %v19381_v38 = vpack.c.bf16 %v6873_v27, %v6857_v26  ;;  %v19383_v41 = vpack.c.bf16 %v6875_v33, %v6859_v32 }
 0x1b4   : > { %v4006_v42 = vpop.f32.mrb[4].mxu0  ;;  %v19385_v43 = vpack.c.bf16 %v6874_v37, %v6858_v35  ;;  %v4392_v44 = vpop.f32.mrb[4].mxu1  ;;  %v19388_v4 = vpack.c.bf16 %v6876_v40, %v6860_v39 }
 0x1b5   : > { %24500 = vst [vmem:[#allocation9_spill] sm:$0xff] %v19383_v41  ;;  %v4008_v1 = vpop.f32.mrb[5].mxu0  ;;  %v15121_v2 = vadd.f32 %v4006_v42, %v19359_v23  ;;  %v4394_v50 = vpop.f32.mrb[5].mxu1  ;;  %v15185_v51 = vadd.f32 %v4392_v44, %v19362_v30  ;;  %v18097_v42 = vld [vmem:[%s18497_s23 + $0x1a0] ss:$16 sps:$4 sm:$0xff]  }
 0x1b6   : > { %24501 = vst [vmem:[#allocation10_spill] sm:$0xff] %v19388_v4  ;;  %v4010_v6 = vpop.f32.mrb[6].mxu0  ;;  %v15122_v9 = vadd.f32 %v4008_v1, %v19366_v8  ;;  %v4396_v52 = vpop.f32.mrb[6].mxu1  ;;  %v15186_v55 = vadd.f32 %v4394_v50, %v19369_v10  ;;  %v18098_v50 = vld [vmem:[%s18497_s23 + $0x1c4] ss:$16 sps:$4 sm:$0xff]  }
 0x1b7   : > { %v4012_v53 = vpop.f32.mrb[7].mxu0  ;;  %v15123_v54 = vadd.f32 %v4010_v6, %v19359_v23  ;;  %v4398_v56 = vpop.f32.mrb[7].mxu1  ;;  %v15187_v58 = vadd.f32 %v4396_v52, %v19362_v30  ;;  %v6889_v62 = vmax.f32 %v15121_v2, 0.0  ;;  %v6891_v11 = vmax.f32 %v15185_v51, 0.0 }
 0x1b8   : > { %v15124_v57 = vadd.f32 %v4012_v53, %v19366_v8  ;;  %v15188_v7 = vadd.f32 %v4398_v56, %v19369_v10  ;;  %v6890_v31 = vmax.f32 %v15122_v9, 0.0  ;;  %v6892_v14 = vmax.f32 %v15186_v55, 0.0 }
 0x1b9   : > { %4694 = vmatmul.mubr.bf16.gmra.mrb[112].mxu0 %v18095_v60  ;;  %v6905_v22 = vmax.f32 %v15123_v54, 0.0  ;;  %5080 = vmatmul.mubr.bf16.gmra.mrb[112].mxu1 %v18095_v60  ;;  %v6907_v12 = vmax.f32 %v15187_v58, 0.0 }
 0x1ba   : > { %4703 = vmatprep.mubr.bf16.mxu0 %v18096_v24  ;;  %v6906_v36 = vmax.f32 %v15124_v57, 0.0  ;;  %5089 = vmatprep.mubr.bf16.mxu1 %v18096_v24  ;;  %v6908_v15 = vmax.f32 %v15188_v7, 0.0 }
 0x1bb   : > { %v19399_v13 = vpack.c.bf16 %v6905_v22, %v6889_v62  ;;  %v19403_v18 = vpack.c.bf16 %v6907_v12, %v6891_v11 }
 0x1bc   : > { %v4016_v16 = vpop.f32.mrb[8].mxu0  ;;  %v19401_v17 = vpack.c.bf16 %v6906_v36, %v6890_v31  ;;  %v4402_v19 = vpop.f32.mrb[8].mxu1  ;;  %v19406_v25 = vpack.c.bf16 %v6908_v15, %v6892_v14 }
 0x1bd   : > { %24502 = vst [vmem:[#allocation11_spill] sm:$0xff] %v19403_v18  ;;  %v4018_v20 = vpop.f32.mrb[9].mxu0  ;;  %v15125_v21 = vadd.f32 %v4016_v16, %v19359_v23  ;;  %v4404_v26 = vpop.f32.mrb[9].mxu1  ;;  %v15189_v29 = vadd.f32 %v4402_v19, %v19362_v30 }
 0x1be   : > { %24503 = vst [vmem:[#allocation12_spill] sm:$0xff] %v19406_v25  ;;  %v4020_v27 = vpop.f32.mrb[10].mxu0  ;;  %v15126_v28 = vadd.f32 %v4018_v20, %v19366_v8  ;;  %v4406_v32 = vpop.f32.mrb[10].mxu1  ;;  %v15190_v35 = vadd.f32 %v4404_v26, %v19369_v10  ;;  %v18099_v26 = vld [vmem:[%s18497_s23 + $0x1c0] ss:$16 sps:$4 sm:$0xff]  }
 0x1bf   : > { %v4022_v33 = vpop.f32.mrb[11].mxu0  ;;  %v15127_v34 = vadd.f32 %v4020_v27, %v19359_v23  ;;  %v4408_v37 = vpop.f32.mrb[11].mxu1  ;;  %v15191_v40 = vadd.f32 %v4406_v32, %v19362_v30  ;;  %v6921_v44 = vmax.f32 %v15125_v21, 0.0  ;;  %v6923_v51 = vmax.f32 %v15189_v29, 0.0  ;;  %v18100_v32 = vld [vmem:[%s18497_s23 + $0x1e4] ss:$16 sps:$4 sm:$0xff]  }
 0x1c0   : > { %v15128_v39 = vadd.f32 %v4022_v33, %v19366_v8  ;;  %v15192_v2 = vadd.f32 %v4408_v37, %v19369_v10  ;;  %v6922_v6 = vmax.f32 %v15126_v28, 0.0  ;;  %v6924_v54 = vmax.f32 %v15190_v35, 0.0 }
 0x1c1   : > { %4704 = vmatmul.mubr.bf16.gmra.mrb[116].mxu0 %v18097_v42  ;;  %v6937_v1 = vmax.f32 %v15127_v34, 0.0  ;;  %5090 = vmatmul.mubr.bf16.gmra.mrb[116].mxu1 %v18097_v42  ;;  %v6939_v52 = vmax.f32 %v15191_v40, 0.0 }
 0x1c2   : > { %4713 = vmatprep.mubr.bf16.mxu0 %v18098_v50  ;;  %v6938_v9 = vmax.f32 %v15128_v39, 0.0  ;;  %5099 = vmatprep.mubr.bf16.mxu1 %v18098_v50  ;;  %v6940_v55 = vmax.f32 %v15192_v2, 0.0 }
 0x1c3   : > { %v19417_v53 = vpack.c.bf16 %v6937_v1, %v6921_v44  ;;  %v19421_v58 = vpack.c.bf16 %v6939_v52, %v6923_v51 }
 0x1c4   : > { %v4026_v56 = vpop.f32.mrb[12].mxu0  ;;  %v19419_v57 = vpack.c.bf16 %v6938_v9, %v6922_v6  ;;  %v4412_v60 = vpop.f32.mrb[12].mxu1  ;;  %v19424_v7 = vpack.c.bf16 %v6940_v55, %v6924_v54 }
 0x1c5   : > { %24504 = vst [vmem:[#allocation13_spill] sm:$0xff] %v19421_v58  ;;  %v4028_v62 = vpop.f32.mrb[13].mxu0  ;;  %v15129_v22 = vadd.f32 %v4026_v56, %v19359_v23  ;;  %v4414_v24 = vpop.f32.mrb[13].mxu1  ;;  %v15193_v11 = vadd.f32 %v4412_v60, %v19362_v30 }
 0x1c6   : > { %24505 = vst [vmem:[#allocation14_spill] sm:$0xff] %v19424_v7  ;;  %v4030_v31 = vpop.f32.mrb[14].mxu0  ;;  %v15130_v36 = vadd.f32 %v4028_v62, %v19366_v8  ;;  %v4416_v12 = vpop.f32.mrb[14].mxu1  ;;  %v15194_v16 = vadd.f32 %v4414_v24, %v19369_v10 }
 0x1c7   : > { %v4032_v14 = vpop.f32.mrb[15].mxu0  ;;  %v15131_v15 = vadd.f32 %v4030_v31, %v19359_v23  ;;  %v4418_v19 = vpop.f32.mrb[15].mxu1  ;;  %v15195_v21 = vadd.f32 %v4416_v12, %v19362_v30  ;;  %v6953_v27 = vmax.f32 %v15129_v22, 0.0  ;;  %v6955_v35 = vmax.f32 %v15193_v11, 0.0  ;;  %v18101_v12 = vld [vmem:[%s18497_s23 + $0x1e0] ss:$16 sps:$4 sm:$0xff]  }
 0x1c8   : > { %v15132_v20 = vadd.f32 %v4032_v14, %v19366_v8  ;;  %v15196_v29 = vadd.f32 %v4418_v19, %v19369_v10  ;;  %v6954_v33 = vmax.f32 %v15130_v36, 0.0  ;;  %v6956_v40 = vmax.f32 %v15194_v16, 0.0  ;;  %v18102_v19 = vld [vmem:[%s18497_s23 + $0xc] ss:$16 sps:$4 sm:$0xff]  }
 0x1c9   : > { %4714 = vmatmul.mubr.bf16.gmra.mrb[120].mxu0 %v18099_v26  ;;  %v6969_v28 = vmax.f32 %v15131_v15, 0.0  ;;  %5100 = vmatmul.mubr.bf16.gmra.mrb[120].mxu1 %v18099_v26  ;;  %v6971_v37 = vmax.f32 %v15195_v21, 0.0 }
 0x1ca   : > { %4723 = vmatprep.mubr.bf16.mxu0 %v18100_v32  ;;  %v6970_v34 = vmax.f32 %v15132_v20, 0.0  ;;  %5109 = vmatprep.mubr.bf16.mxu1 %v18100_v32  ;;  %v6972_v42 = vmax.f32 %v15196_v29, 0.0  ;;  %v19461_v29 = vld [vmem:[%s24290_s1 + $0xe0] sm:$0xff] }
 0x1cb   : > { %v19435_v39 = vpack.c.bf16 %v6969_v28, %v6953_v27  ;;  %v19439_v2 = vpack.c.bf16 %v6971_v37, %v6955_v35  ;;  %v19456_v28 = vld [vmem:[%s24290_s1 + $0xa0] sm:$0xff]  ;;  %v19468_v37 = vld [vmem:[%s24290_s1 + $0xa8] sm:$0xff] }
 0x1cc   : > { %v4036_v44 = vpop.f32.mrb[16].mxu0  ;;  %v19437_v1 = vpack.c.bf16 %v6970_v34, %v6954_v33  ;;  %v4422_v50 = vpop.f32.mrb[16].mxu1  ;;  %v19442_v51 = vpack.c.bf16 %v6972_v42, %v6956_v40  ;;  %v19473_v40 = vld [vmem:[%s24290_s1 + $0xe8] sm:$0xff] }
 0x1cd   : > { %24506 = vst [vmem:[#allocation15_spill] sm:$0xff] %v19439_v2  ;;  %v4038_v6 = vpop.f32.mrb[17].mxu0  ;;  %v15133_v9 = vadd.f32 %v4036_v44, %v19359_v23  ;;  %v4424_v52 = vpop.f32.mrb[17].mxu1  ;;  %v15197_v56 = vadd.f32 %v4422_v50, %v19362_v30 }
 0x1ce   : > { %24507 = vst [vmem:[#allocation16_spill] sm:$0xff] %v19442_v51  ;;  %v4040_v54 = vpop.f32.mrb[18].mxu0  ;;  %v15134_v55 = vadd.f32 %v4038_v6, %v19366_v8  ;;  %v4426_v60 = vpop.f32.mrb[18].mxu1  ;;  %v15198_v24 = vadd.f32 %v4424_v52, %v19369_v10  ;;  %v19487_v52 = vld [vmem:[%s24290_s1 + $0x160] sm:$0xff] }
 0x1cf   : > { %v4042_v62 = vpop.f32.mrb[19].mxu0  ;;  %v15135_v22 = vadd.f32 %v4040_v54, %v19359_v23  ;;  %v4428_v31 = vpop.f32.mrb[19].mxu1  ;;  %v15199_v11 = vadd.f32 %v4426_v60, %v19362_v30  ;;  %v6985_v14 = vmax.f32 %v15133_v9, 0.0  ;;  %v6987_v26 = vmax.f32 %v15197_v56, 0.0  ;;  %v19482_v9 = vld [vmem:[%s24290_s1 + $0x120] sm:$0xff] }
 0x1d0   : > { %v15136_v36 = vadd.f32 %v4042_v62, %v19366_v8  ;;  %v15200_v16 = vadd.f32 %v4428_v31, %v19369_v10  ;;  %v6986_v20 = vmax.f32 %v15134_v55, 0.0  ;;  %v6988_v33 = vmax.f32 %v15198_v24, 0.0 }
 0x1d1   : > { %4724 = vmatmul.mubr.bf16.gmra.mrb[124].mxu0 %v18101_v12  ;;  %v7001_v15 = vmax.f32 %v15135_v22, 0.0  ;;  %5110 = vmatmul.mubr.bf16.gmra.mrb[124].mxu1 %v18101_v12  ;;  %v7003_v27 = vmax.f32 %v15199_v11, 0.0  ;;  %v14108_v62 = vcombine.low %v19456_v28, %v19461_v29  ;;  %v14109_v11 = vcombine.high %v19456_v28, %v19461_v29  ;;  %v18103_v28 = vld [vmem:[%s18497_s23 + $0x8] ss:$16 sps:$4 sm:$0xff]  }
 0x1d2   : > { %4766 = vmatprep.mubr.bf16.mxu0 %v18102_v19  ;;  %v7002_v21 = vmax.f32 %v15136_v36, 0.0  ;;  %5152 = vmatprep.mubr.bf16.mxu1 %v18102_v19  ;;  %v7004_v34 = vmax.f32 %v15200_v16, 0.0  ;;  %v14110_v12 = vcombine.low %v19468_v37, %v19473_v40  ;;  %v14111_v19 = vcombine.high %v19468_v37, %v19473_v40  ;;  %v19517_v29 = vld [vmem:[%s24290_s1 + $0x168] sm:$0xff] }
 0x1d3   : > { %v19463_v32 = vpack.c.bf16 %v7001_v15, %v6985_v14  ;;  %v19477_v44 = vpack.c.bf16 %v7003_v27, %v6987_v26 }
 0x1d4   : > { %v4046_v35 = vpop.f32.mrb[20].mxu0  ;;  %v19475_v42 = vpack.c.bf16 %v7002_v21, %v6986_v20  ;;  %v4432_v50 = vpop.f32.mrb[20].mxu1  ;;  %v19490_v55 = vpack.c.bf16 %v7004_v34, %v6988_v33  ;;  %v14125_v20 = vcombine.high %v19482_v9, %v19487_v52  ;;  %v19509_v21 = vld [vmem:[%s24290_s1 + $0x128] sm:$0xff]  ;;  %v19522_v33 = vld [vmem:[%s24290_s1 + $0x820] sm:$0xff] }
 0x1d5   : > { %24508 = vst [vmem:[#allocation17_spill] sm:$0xff] %v19477_v44  ;;  %v4048_v6 = vpop.f32.mrb[21].mxu0  ;;  %v15137_v54 = vadd.f32 %v4046_v35, %v19359_v23  ;;  %v4434_v56 = vpop.f32.mrb[21].mxu1  ;;  %v15201_v24 = vadd.f32 %v4432_v50, %v19362_v30  ;;  %v19527_v34 = vld [vmem:[%s24290_s1 + $0x860] sm:$0xff] }
 0x1d6   : > { %24509 = vst [vmem:[#allocation18_spill] sm:$0xff] %v19490_v55  ;;  %v4050_v60 = vpop.f32.mrb[22].mxu0  ;;  %v15138_v22 = vadd.f32 %v4048_v6, %v19366_v8  ;;  %v4436_v31 = vpop.f32.mrb[22].mxu1  ;;  %v15202_v15 = vadd.f32 %v4434_v56, %v19369_v10  ;;  %v19538_v56 = vld [vmem:[%s24290_s1 + $0x828] sm:$0xff] }
 0x1d7   : > { %v4052_v36 = vpop.f32.mrb[23].mxu0  ;;  %v15139_v14 = vadd.f32 %v4050_v60, %v19359_v23  ;;  %v4438_v16 = vpop.f32.mrb[23].mxu1  ;;  %v15203_v27 = vadd.f32 %v4436_v31, %v19362_v30  ;;  %v7017_v37 = vmax.f32 %v15137_v54, 0.0  ;;  %v19543_v54 = vld [vmem:[%s24290_s1 + $0x868] sm:$0xff] }
 0x1d8   : > { %v15140_v26 = vadd.f32 %v4052_v36, %v19366_v8  ;;  %v7018_v35 = vmax.f32 %v15138_v22, 0.0  ;;  %v15204_v50 = vadd.f32 %v4438_v16, %v19369_v10  ;;  %v7019_v22 = vmax.f32 %v15201_v24, 0.0 }
 0x1d9   : > { %4767 = vmatmul.mubr.bf16.vlgmr.msra.gmra.mrb[64].mxu0 %v18103_v28  ;;  %v7033_v40 = vmax.f32 %v15139_v14, 0.0  ;;  %5153 = vmatmul.mubr.bf16.vlgmr.msra.gmra.mrb[64].mxu1 %v18103_v28  ;;  %v7035_v31 = vmax.f32 %v15203_v27, 0.0  ;;  %v7020_v36 = vmax.f32 %v15202_v15, 0.0  ;;  %v14127_v24 = vcombine.high %v19509_v21, %v19517_v29  ;;  %v19567_v15 = vld [vmem:[%s24290_s1 + $0x1e0] sm:$0xff] }
 0x1da   : > { %5314 = vmatpush1.bf16.msra.mxu0 %v14092_v48  ;;  %v7034_v60 = vmax.f32 %v15140_v26, 0.0  ;;  %5700 = vmatpush1.bf16.msra.mxu1 %v14094_v5  ;;  %v7036_v14 = vmax.f32 %v15204_v50, 0.0  ;;  %v19562_v5 = vld [vmem:[%s24290_s1 + $0x1a0] sm:$0xff]  ;;  %v19582_v50 = vld [vmem:[%s24290_s1 + $0x1e8] sm:$0xff] }
 0x1db   : > { %4776 = vmatprep.mubr.bf16.mxu0 %v18104_v45  ;;  %v19551_v48 = vpack.c.bf16 %v7033_v40, %v7017_v37  ;;  %5162 = vmatprep.mubr.bf16.mxu1 %v18104_v45  ;;  %v19557_v27 = vpack.c.bf16 %v7035_v31, %v7019_v22  ;;  %v19577_v40 = vld [vmem:[%s24290_s1 + $0x1a8] sm:$0xff] }
 0x1dc   : > { %v4056_v16 = vpop.f32.mrb[24].mxu0  ;;  %5315 = vmatprep.subr.bf16.mxu0 %v14109_v11  ;;  %v19555_v26 = vpack.c.bf16 %v7034_v60, %v7018_v35  ;;  %v4442_v47 = vpop.f32.mrb[24].mxu1  ;;  %5701 = vmatprep.subr.bf16.mxu1 %v14111_v19  ;;  %v19570_v28 = vpack.c.bf16 %v7036_v14, %v7020_v36  ;;  %v14124_v19 = vcombine.low %v19482_v9, %v19487_v52 }
 0x1dd   : > { %24510 = vst [vmem:[#allocation19_spill] sm:$0xff] %v19557_v27  ;;  %v4058_v49 = vpop.f32.mrb[25].mxu0  ;;  %v15141_v11 = vadd.f32 %v4056_v16, %v19359_v23  ;;  %v4444_v35 = vpop.f32.mrb[25].mxu1  ;;  %v15205_v22 = vadd.f32 %v4442_v47, %v19362_v30  ;;  %v14126_v9 = vcombine.low %v19509_v21, %v19517_v29  ;;  %v14140_v14 = vcombine.low %v19562_v5, %v19567_v15  ;;  %v19602_v29 = vld [vmem:[%s24290_s1 + $0x220] sm:$0xff] }
 0x1de   : > { %24511 = vst [vmem:[#allocation20_spill] sm:$0xff] %v19570_v28  ;;  %v4060_v37 = vpop.f32.mrb[26].mxu0  ;;  %5316 = vmatpush1.bf16.msra.mxu0 %v14108_v62  ;;  %v15142_v60 = vadd.f32 %v4058_v49, %v19366_v8  ;;  %v4446_v31 = vpop.f32.mrb[26].mxu1  ;;  %5702 = vmatpush1.bf16.msra.mxu1 %v14110_v12  ;;  %v15206_v45 = vadd.f32 %v4444_v35, %v19369_v10  ;;  %v18106_v35 = vld [vmem:[%s18497_s23 + $0x4c] ss:$16 sps:$4 sm:$0xff]  }
 0x1df   : > { %v4062_v62 = vpop.f32.mrb[27].mxu0  ;;  %5317 = vmatprep.subr.bf16.mxu0 %v14125_v20  ;;  %v15143_v52 = vadd.f32 %v4060_v37, %v19359_v23  ;;  %v4448_v36 = vpop.f32.mrb[27].mxu1  ;;  %5703 = vmatprep.subr.bf16.mxu1 %v14127_v24  ;;  %v14141_v16 = vcombine.high %v19562_v5, %v19567_v15  ;;  %v15207_v12 = vadd.f32 %v4446_v31, %v19362_v30  ;;  %v18105_v20 = vld [vmem:[%s18497_s23 + $0x28] ss:$16 sps:$4 sm:$0xff]   ;;  %v19607_v24 = vld [vmem:[%s24290_s1 + $0x260] sm:$0xff]  ;;  %v7049_v49 = vmax.f32 %v15141_v11, 0.0 }
 0x1e0   : > { %v15144_v47 = vadd.f32 %v4062_v62, %v19366_v8  ;;  %v14143_v21 = vcombine.high %v19577_v40, %v19582_v50  ;;  %v15208_v15 = vadd.f32 %v4448_v36, %v19369_v10  ;;  %v19614_v37 = vld [vmem:[%s24290_s1 + $0x228] sm:$0xff]  ;;  %v7050_v62 = vmax.f32 %v15142_v60, 0.0  ;;  %v19630_v60 = vld [vmem:[%s24290_s1 + $0x2a0] sm:$0xff] }
 0x1e1   : > { %4777 = vmatmul.mubr.bf16.gmra.mrb[68].mxu0 %v18105_v20  ;;  %v7065_v5 = vmax.f32 %v15143_v52, 0.0  ;;  %5163 = vmatmul.mubr.bf16.gmra.mrb[68].mxu1 %v18105_v20  ;;  %v19619_v31 = vld [vmem:[%s24290_s1 + $0x268] sm:$0xff]  ;;  %v7051_v6 = vmax.f32 %v15205_v22, 0.0  ;;  %v7067_v11 = vmax.f32 %v15207_v12, 0.0  ;;  %v14142_v52 = vcombine.low %v19577_v40, %v19582_v50 }
 0x1e2   : > { %4786 = vmatprep.mubr.bf16.mxu0 %v18106_v35  ;;  %v7066_v46 = vmax.f32 %v15144_v47, 0.0  ;;  %5172 = vmatprep.mubr.bf16.mxu1 %v18106_v35  ;;  %v7052_v20 = vmax.f32 %v15206_v45, 0.0  ;;  %v7068_v27 = vmax.f32 %v15208_v15, 0.0  ;;  %v14157_v44 = vcombine.high %v19602_v29, %v19607_v24 }
 0x1e3   : > { %5318 = vmatpush1.bf16.msra.mxu0 %v14124_v19  ;;  %v19623_v36 = vpack.c.bf16 %v7065_v5, %v7049_v49  ;;  %5704 = vmatpush1.bf16.msra.mxu1 %v14126_v9  ;;  %v19635_v19 = vld [vmem:[%s24290_s1 + $0x2e0] sm:$0xff]  ;;  %v19639_v50 = vpack.c.bf16 %v7067_v11, %v7051_v6  ;;  %v14159_v45 = vcombine.high %v19614_v37, %v19619_v31  ;;  %v19651_v6 = vld [vmem:[%s24290_s1 + $0x2a8] sm:$0xff] }
 0x1e4   : > { %v4066_v28 = vpop.f32.mrb[28].mxu0  ;;  %5319 = vmatprep.subr.bf16.mxu0 %v14141_v16  ;;  %v19637_v40 = vpack.c.bf16 %v7066_v46, %v7050_v62  ;;  %v4452_v22 = vpop.f32.mrb[28].mxu1  ;;  %5705 = vmatprep.subr.bf16.mxu1 %v14143_v21  ;;  %v19644_v47 = vpack.c.bf16 %v7068_v27, %v7052_v20  ;;  %v14156_v5 = vcombine.low %v19602_v29, %v19607_v24  ;;  %v19656_v46 = vld [vmem:[%s24290_s1 + $0x2e8] sm:$0xff] }
 0x1e5   : > { %24512 = vst [vmem:[#allocation21_spill] sm:$0xff] %v19639_v50  ;;  %v4068_v9 = vpop.f32.mrb[29].mxu0  ;;  %v15145_v16 = vadd.f32 %v4066_v28, %v19359_v23  ;;  %v4454_v12 = vpop.f32.mrb[29].mxu1  ;;  %v15209_v27 = vadd.f32 %v4452_v22, %v19362_v30  ;;  %v14158_v29 = vcombine.low %v19614_v37, %v19619_v31  ;;  %v14172_v24 = vcombine.low %v19630_v60, %v19635_v19  ;;  %v19676_v31 = vld [vmem:[%s24290_s1 + $0x320] sm:$0xff] }
 0x1e6   : > { %24513 = vst [vmem:[#allocation22_spill] sm:$0xff] %v19644_v47  ;;  %v4070_v49 = vpop.f32.mrb[30].mxu0  ;;  %v15146_v28 = vadd.f32 %v4068_v9, %v19366_v8  ;;  %v4456_v21 = vpop.f32.mrb[30].mxu1  ;;  %v15210_v62 = vadd.f32 %v4454_v12, %v19369_v10  ;;  %v14173_v20 = vcombine.high %v19630_v60, %v19635_v19  ;;  %v18107_v9 = vld [vmem:[%s18497_s23 + $0x48] ss:$16 sps:$4 sm:$0xff]   ;;  %v14175_v37 = vcombine.high %v19651_v6, %v19656_v46 }
 0x1e7   : > { %v4072_v15 = vpop.f32.mrb[31].mxu0  ;;  %5320 = vmatpush1.bf16.msra.mxu0 %v14140_v14  ;;  %v15147_v35 = vadd.f32 %v4070_v49, %v19359_v23  ;;  %v4458_v11 = vpop.f32.mrb[31].mxu1  ;;  %5706 = vmatpush1.bf16.msra.mxu1 %v14142_v52  ;;  %v15211_v14 = vadd.f32 %v4456_v21, %v19362_v30  ;;  %v7081_v52 = vmax.f32 %v15145_v16, 0.0  ;;  %v18108_v12 = vld [vmem:[%s18497_s23 + $0x6c] ss:$16 sps:$4 sm:$0xff]   ;;  %v7083_v50 = vmax.f32 %v15209_v27, 0.0 }
 0x1e8   : > { %5321 = vmatprep.subr.bf16.mxu0 %v14157_v44  ;;  %v15148_v22 = vadd.f32 %v4072_v15, %v19366_v8  ;;  %5707 = vmatprep.subr.bf16.mxu1 %v14159_v45  ;;  %v19681_v44 = vld [vmem:[%s24290_s1 + $0x360] sm:$0xff]  ;;  %v15212_v19 = vadd.f32 %v4458_v11, %v19369_v10  ;;  %v19688_v45 = vld [vmem:[%s24290_s1 + $0x328] sm:$0xff]  ;;  %v7082_v21 = vmax.f32 %v15146_v28, 0.0 }
 0x1e9   : > { %4787 = vmatmul.mubr.bf16.gmra.mrb[72].mxu0 %v18107_v9  ;;  %v7097_v60 = vmax.f32 %v15147_v35, 0.0  ;;  %5173 = vmatmul.mubr.bf16.gmra.mrb[72].mxu1 %v18107_v9  ;;  %v19693_v49 = vld [vmem:[%s24290_s1 + $0x368] sm:$0xff]  ;;  %v7099_v16 = vmax.f32 %v15211_v14, 0.0  ;;  %v14174_v35 = vcombine.low %v19651_v6, %v19656_v46  ;;  %v7084_v9 = vmax.f32 %v15210_v62, 0.0  ;;  %v19704_v28 = vld [vmem:[%s24290_s1 + $0x3a0] sm:$0xff] }
 0x1ea   : > { %4796 = vmatprep.mubr.bf16.mxu0 %v18108_v12  ;;  %v7098_v15 = vmax.f32 %v15148_v22, 0.0  ;;  %5182 = vmatprep.mubr.bf16.mxu1 %v18108_v12  ;;  %v7100_v47 = vmax.f32 %v15212_v19, 0.0  ;;  %v14189_v2 = vcombine.high %v19676_v31, %v19681_v44  ;;  %v14191_v62 = vcombine.high %v19688_v45, %v19693_v49 }
 0x1eb   : > { %5322 = vmatpush1.bf16.msra.mxu0 %v14156_v5  ;;  %v19697_v11 = vpack.c.bf16 %v7097_v60, %v7081_v52  ;;  %5708 = vmatpush1.bf16.msra.mxu1 %v14158_v29  ;;  %v19709_v5 = vld [vmem:[%s24290_s1 + $0x3e0] sm:$0xff]  ;;  %v19713_v46 = vpack.c.bf16 %v7099_v16, %v7083_v50  ;;  %v14188_v60 = vcombine.low %v19676_v31, %v19681_v44  ;;  %v19725_v50 = vld [vmem:[%s24290_s1 + $0x3a8] sm:$0xff] }
 0x1ec   : > { %v4076_v55 = vpop.f32.mrb[32].mxu0  ;;  %5323 = vmatprep.subr.bf16.mxu0 %v14173_v20  ;;  %v19711_v6 = vpack.c.bf16 %v7098_v15, %v7082_v21  ;;  %v4462_v27 = vpop.f32.mrb[32].mxu1  ;;  %5709 = vmatprep.subr.bf16.mxu1 %v14175_v37  ;;  %v19718_v22 = vpack.c.bf16 %v7100_v47, %v7084_v9  ;;  %v19730_v37 = vld [vmem:[%s24290_s1 + $0x3e8] sm:$0xff]  ;;  %v14190_v31 = vcombine.low %v19688_v45, %v19693_v49  ;;  %v19750_v49 = vld [vmem:[%s24290_s1 + $0x420] sm:$0xff] }
 0x1ed   : > { %24514 = vst [vmem:[#allocation23_spill] sm:$0xff] %v19713_v46  ;;  %v4078_v29 = vpop.f32.mrb[33].mxu0  ;;  %v15149_v20 = vadd.f32 %v4076_v55, %v19359_v23  ;;  %v4464_v14 = vpop.f32.mrb[33].mxu1  ;;  %v15213_v47 = vadd.f32 %v4462_v27, %v19362_v30  ;;  %v14204_v44 = vcombine.low %v19704_v28, %v19709_v5  ;;  %v14205_v9 = vcombine.high %v19704_v28, %v19709_v5 }
 0x1ee   : > { %24515 = vst [vmem:[#allocation24_spill] sm:$0xff] %v19718_v22  ;;  %v4080_v52 = vpop.f32.mrb[34].mxu0  ;;  %v15150_v55 = vadd.f32 %v4078_v29, %v19366_v8  ;;  %v4466_v19 = vpop.f32.mrb[34].mxu1  ;;  %v15214_v15 = vadd.f32 %v4464_v14, %v19369_v10  ;;  %v18109_v29 = vld [vmem:[%s18497_s23 + $0x68] ss:$16 sps:$4 sm:$0xff]   ;;  %v14207_v45 = vcombine.high %v19725_v50, %v19730_v37 }
 0x1ef   : > { %v4082_v12 = vpop.f32.mrb[35].mxu0  ;;  %5324 = vmatpush1.bf16.msra.mxu0 %v14172_v24  ;;  %v15151_v21 = vadd.f32 %v4080_v52, %v19359_v23  ;;  %v4468_v16 = vpop.f32.mrb[35].mxu1  ;;  %5710 = vmatpush1.bf16.msra.mxu1 %v14174_v35  ;;  %v15215_v24 = vadd.f32 %v4466_v19, %v19362_v30  ;;  %v7113_v35 = vmax.f32 %v15149_v20, 0.0  ;;  %v18110_v14 = vld [vmem:[%s18497_s23 + $0x8c] ss:$16 sps:$4 sm:$0xff]   ;;  %v7115_v46 = vmax.f32 %v15213_v47, 0.0 }
 0x1f0   : > { %5325 = vmatprep.subr.bf16.mxu0 %v14189_v2  ;;  %v15152_v27 = vadd.f32 %v4082_v12, %v19366_v8  ;;  %5711 = vmatprep.subr.bf16.mxu1 %v14191_v62  ;;  %v19755_v2 = vld [vmem:[%s24290_s1 + $0x460] sm:$0xff]  ;;  %v15216_v5 = vadd.f32 %v4468_v16, %v19369_v10  ;;  %v19762_v62 = vld [vmem:[%s24290_s1 + $0x428] sm:$0xff]  ;;  %v7114_v19 = vmax.f32 %v15150_v55, 0.0 }
 0x1f1   : > { %4797 = vmatmul.mubr.bf16.gmra.mrb[76].mxu0 %v18109_v29  ;;  %v7129_v28 = vmax.f32 %v15151_v21, 0.0  ;;  %5183 = vmatmul.mubr.bf16.gmra.mrb[76].mxu1 %v18109_v29  ;;  %v19767_v52 = vld [vmem:[%s24290_s1 + $0x468] sm:$0xff]  ;;  %v7131_v20 = vmax.f32 %v15215_v24, 0.0  ;;  %v14206_v21 = vcombine.low %v19725_v50, %v19730_v37  ;;  %v7116_v29 = vmax.f32 %v15214_v15, 0.0  ;;  %v19778_v55 = vld [vmem:[%s24290_s1 + $0x4a0] sm:$0xff] }
 0x1f2   : > { %4806 = vmatprep.mubr.bf16.mxu0 %v18110_v14  ;;  %v7130_v12 = vmax.f32 %v15152_v27, 0.0  ;;  %5192 = vmatprep.mubr.bf16.mxu1 %v18110_v14  ;;  %v7132_v22 = vmax.f32 %v15216_v5, 0.0  ;;  %v14221_v58 = vcombine.high %v19750_v49, %v19755_v2  ;;  %v14223_v15 = vcombine.high %v19762_v62, %v19767_v52 }
 0x1f3   : > { %5326 = vmatpush1.bf16.msra.mxu0 %v14188_v60  ;;  %v19771_v16 = vpack.c.bf16 %v7129_v28, %v7113_v35  ;;  %5712 = vmatpush1.bf16.msra.mxu1 %v14190_v31  ;;  %v19783_v60 = vld [vmem:[%s24290_s1 + $0x4e0] sm:$0xff]  ;;  %v19787_v37 = vpack.c.bf16 %v7131_v20, %v7115_v46  ;;  %v14220_v28 = vcombine.low %v19750_v49, %v19755_v2  ;;  %v19799_v46 = vld [vmem:[%s24290_s1 + $0x4a8] sm:$0xff] }
 0x1f4   : > { %v4086_v51 = vpop.f32.mrb[36].mxu0  ;;  %5327 = vmatprep.subr.bf16.mxu0 %v14205_v9  ;;  %v19785_v50 = vpack.c.bf16 %v7130_v12, %v7114_v19  ;;  %v4472_v47 = vpop.f32.mrb[36].mxu1  ;;  %5713 = vmatprep.subr.bf16.mxu1 %v14207_v45  ;;  %v19792_v27 = vpack.c.bf16 %v7132_v22, %v7116_v29  ;;  %v19804_v45 = vld [vmem:[%s24290_s1 + $0x4e8] sm:$0xff]  ;;  %v14222_v49 = vcombine.low %v19762_v62, %v19767_v52  ;;  %v19824_v52 = vld [vmem:[%s24290_s1 + $0x520] sm:$0xff] }
 0x1f5   : > { %24516 = vst [vmem:[#allocation25_spill] sm:$0xff] %v19787_v37  ;;  %v4088_v31 = vpop.f32.mrb[37].mxu0  ;;  %v15153_v9 = vadd.f32 %v4086_v51, %v19359_v23  ;;  %v4474_v24 = vpop.f32.mrb[37].mxu1  ;;  %v15217_v22 = vadd.f32 %v4472_v47, %v19362_v30  ;;  %v14236_v2 = vcombine.low %v19778_v55, %v19783_v60  ;;  %v14237_v29 = vcombine.high %v19778_v55, %v19783_v60 }
 0x1f6   : > { %24517 = vst [vmem:[#allocation26_spill] sm:$0xff] %v19792_v27  ;;  %v4090_v35 = vpop.f32.mrb[38].mxu0  ;;  %v15154_v51 = vadd.f32 %v4088_v31, %v19366_v8  ;;  %v4476_v5 = vpop.f32.mrb[38].mxu1  ;;  %v15218_v12 = vadd.f32 %v4474_v24, %v19369_v10  ;;  %v18111_v31 = vld [vmem:[%s18497_s23 + $0x88] ss:$16 sps:$4 sm:$0xff]   ;;  %v14239_v62 = vcombine.high %v19799_v46, %v19804_v45 }
 0x1f7   : > { %v4092_v14 = vpop.f32.mrb[39].mxu0  ;;  %5328 = vmatpush1.bf16.msra.mxu0 %v14204_v44  ;;  %v15155_v19 = vadd.f32 %v4090_v35, %v19359_v23  ;;  %v4478_v20 = vpop.f32.mrb[39].mxu1  ;;  %5714 = vmatpush1.bf16.msra.mxu1 %v14206_v21  ;;  %v15219_v44 = vadd.f32 %v4476_v5, %v19362_v30  ;;  %v7145_v21 = vmax.f32 %v15153_v9, 0.0  ;;  %v18112_v24 = vld [vmem:[%s18497_s23 + $0xac] ss:$16 sps:$4 sm:$0xff]   ;;  %v7147_v37 = vmax.f32 %v15217_v22, 0.0 }
 0x1f8   : > { %5329 = vmatprep.subr.bf16.mxu0 %v14221_v58  ;;  %v15156_v47 = vadd.f32 %v4092_v14, %v19366_v8  ;;  %5715 = vmatprep.subr.bf16.mxu1 %v14223_v15  ;;  %v19829_v58 = vld [vmem:[%s24290_s1 + $0x560] sm:$0xff]  ;;  %v15220_v60 = vadd.f32 %v4478_v20, %v19369_v10  ;;  %v19836_v15 = vld [vmem:[%s24290_s1 + $0x528] sm:$0xff]  ;;  %v7146_v5 = vmax.f32 %v15154_v51, 0.0 }
 0x1f9   : > { %4807 = vmatmul.mubr.bf16.gmra.mrb[80].mxu0 %v18111_v31  ;;  %v7161_v55 = vmax.f32 %v15155_v19, 0.0  ;;  %5193 = vmatmul.mubr.bf16.gmra.mrb[80].mxu1 %v18111_v31  ;;  %v19841_v35 = vld [vmem:[%s24290_s1 + $0x568] sm:$0xff]  ;;  %v7163_v9 = vmax.f32 %v15219_v44, 0.0  ;;  %v14238_v19 = vcombine.low %v19799_v46, %v19804_v45  ;;  %v7148_v31 = vmax.f32 %v15218_v12, 0.0  ;;  %v19852_v51 = vld [vmem:[%s24290_s1 + $0x5a0] sm:$0xff] }
 0x1fa   : > { %4816 = vmatprep.mubr.bf16.mxu0 %v18112_v24  ;;  %v7162_v14 = vmax.f32 %v15156_v47, 0.0  ;;  %5202 = vmatprep.mubr.bf16.mxu1 %v18112_v24  ;;  %v7164_v27 = vmax.f32 %v15220_v60, 0.0  ;;  %v14253_v18 = vcombine.high %v19824_v52, %v19829_v58  ;;  %v14255_v12 = vcombine.high %v19836_v15, %v19841_v35 }
 0x1fb   : > { %5330 = vmatpush1.bf16.msra.mxu0 %v14220_v28  ;;  %v19845_v20 = vpack.c.bf16 %v7161_v55, %v7145_v21  ;;  %5716 = vmatpush1.bf16.msra.mxu1 %v14222_v49  ;;  %v19857_v28 = vld [vmem:[%s24290_s1 + $0x5e0] sm:$0xff]  ;;  %v19861_v45 = vpack.c.bf16 %v7163_v9, %v7147_v37  ;;  %v14252_v55 = vcombine.low %v19824_v52, %v19829_v58  ;;  %v19873_v37 = vld [vmem:[%s24290_s1 + $0x5a8] sm:$0xff] }
 0x1fc   : > { %v4096_v7 = vpop.f32.mrb[40].mxu0  ;;  %5331 = vmatprep.subr.bf16.mxu0 %v14237_v29  ;;  %v19859_v46 = vpack.c.bf16 %v7162_v14, %v7146_v5  ;;  %v4482_v22 = vpop.f32.mrb[40].mxu1  ;;  %5717 = vmatprep.subr.bf16.mxu1 %v14239_v62  ;;  %v19866_v47 = vpack.c.bf16 %v7164_v27, %v7148_v31  ;;  %v19878_v62 = vld [vmem:[%s24290_s1 + $0x5e8] sm:$0xff]  ;;  %v14254_v52 = vcombine.low %v19836_v15, %v19841_v35  ;;  %v19898_v35 = vld [vmem:[%s24290_s1 + $0x620] sm:$0xff] }
 0x1fd   : > { %24518 = vst [vmem:[#allocation27_spill] sm:$0xff] %v19861_v45  ;;  %v4098_v49 = vpop.f32.mrb[41].mxu0  ;;  %v15157_v29 = vadd.f32 %v4096_v7, %v19359_v23  ;;  %v4484_v44 = vpop.f32.mrb[41].mxu1  ;;  %v15221_v27 = vadd.f32 %v4482_v22, %v19362_v30  ;;  %v14268_v58 = vcombine.low %v19852_v51, %v19857_v28  ;;  %v14269_v31 = vcombine.high %v19852_v51, %v19857_v28 }
 0x1fe   : > { %24519 = vst [vmem:[#allocation28_spill] sm:$0xff] %v19866_v47  ;;  %v4100_v21 = vpop.f32.mrb[42].mxu0  ;;  %v15158_v7 = vadd.f32 %v4098_v49, %v19366_v8  ;;  %v4486_v60 = vpop.f32.mrb[42].mxu1  ;;  %v15222_v14 = vadd.f32 %v4484_v44, %v19369_v10  ;;  %v18113_v49 = vld [vmem:[%s18497_s23 + $0xa8] ss:$16 sps:$4 sm:$0xff]   ;;  %v14271_v15 = vcombine.high %v19873_v37, %v19878_v62 }
 0x1ff   : > { %v4102_v24 = vpop.f32.mrb[43].mxu0  ;;  %5332 = vmatpush1.bf16.msra.mxu0 %v14236_v2  ;;  %v15159_v5 = vadd.f32 %v4100_v21, %v19359_v23  ;;  %v4488_v9 = vpop.f32.mrb[43].mxu1  ;;  %5718 = vmatpush1.bf16.msra.mxu1 %v14238_v19  ;;  %v15223_v2 = vadd.f32 %v4486_v60, %v19362_v30  ;;  %v7177_v19 = vmax.f32 %v15157_v29, 0.0  ;;  %v18114_v44 = vld [vmem:[%s18497_s23 + $0xcc] ss:$16 sps:$4 sm:$0xff]   ;;  %v7179_v45 = vmax.f32 %v15221_v27, 0.0 }
 0x200   : > { %5333 = vmatprep.subr.bf16.mxu0 %v14253_v18  ;;  %v15160_v22 = vadd.f32 %v4102_v24, %v19366_v8  ;;  %5719 = vmatprep.subr.bf16.mxu1 %v14255_v12  ;;  %v19903_v18 = vld [vmem:[%s24290_s1 + $0x660] sm:$0xff]  ;;  %v15224_v28 = vadd.f32 %v4488_v9, %v19369_v10  ;;  %v19910_v12 = vld [vmem:[%s24290_s1 + $0x628] sm:$0xff]  ;;  %v7178_v60 = vmax.f32 %v15158_v7, 0.0 }
 0x201   : > { %4817 = vmatmul.mubr.bf16.gmra.mrb[84].mxu0 %v18113_v49  ;;  %v7193_v51 = vmax.f32 %v15159_v5, 0.0  ;;  %5203 = vmatmul.mubr.bf16.gmra.mrb[84].mxu1 %v18113_v49  ;;  %v19915_v21 = vld [vmem:[%s24290_s1 + $0x668] sm:$0xff]  ;;  %v7195_v29 = vmax.f32 %v15223_v2, 0.0  ;;  %v14270_v5 = vcombine.low %v19873_v37, %v19878_v62  ;;  %v7180_v49 = vmax.f32 %v15222_v14, 0.0  ;;  %v19926_v7 = vld [vmem:[%s24290_s1 + $0x6a0] sm:$0xff] }
 0x202   : > { %4826 = vmatprep.mubr.bf16.mxu0 %v18114_v44  ;;  %v7194_v24 = vmax.f32 %v15160_v22, 0.0  ;;  %5212 = vmatprep.mubr.bf16.mxu1 %v18114_v44  ;;  %v7196_v47 = vmax.f32 %v15224_v28, 0.0  ;;  %v14285_v41 = vcombine.high %v19898_v35, %v19903_v18  ;;  %v14287_v14 = vcombine.high %v19910_v12, %v19915_v21 }
 0x203   : > { %5334 = vmatpush1.bf16.msra.mxu0 %v14252_v55  ;;  %v19919_v9 = vpack.c.bf16 %v7193_v51, %v7177_v19  ;;  %5720 = vmatpush1.bf16.msra.mxu1 %v14254_v52  ;;  %v19931_v55 = vld [vmem:[%s24290_s1 + $0x6e0] sm:$0xff]  ;;  %v19935_v62 = vpack.c.bf16 %v7195_v29, %v7179_v45  ;;  %v14284_v51 = vcombine.low %v19898_v35, %v19903_v18  ;;  %v19947_v45 = vld [vmem:[%s24290_s1 + $0x6a8] sm:$0xff] }
 0x204   : > { %v4106_v25 = vpop.f32.mrb[44].mxu0  ;;  %5335 = vmatprep.subr.bf16.mxu0 %v14269_v31  ;;  %v19933_v37 = vpack.c.bf16 %v7194_v24, %v7178_v60  ;;  %v4492_v27 = vpop.f32.mrb[44].mxu1  ;;  %5721 = vmatprep.subr.bf16.mxu1 %v14271_v15  ;;  %v19940_v22 = vpack.c.bf16 %v7196_v47, %v7180_v49  ;;  %v19952_v15 = vld [vmem:[%s24290_s1 + $0x6e8] sm:$0xff]  ;;  %v14286_v35 = vcombine.low %v19910_v12, %v19915_v21  ;;  %v19972_v21 = vld [vmem:[%s24290_s1 + $0x720] sm:$0xff] }
 0x205   : > { %24520 = vst [vmem:[#allocation29_spill] sm:$0xff] %v19919_v9  ;;  %24521 = vst [vmem:[#allocation30_spill] sm:$0xff] %v19935_v62  ;;  %v4108_v52 = vpop.f32.mrb[45].mxu0  ;;  %v15161_v31 = vadd.f32 %v4106_v25, %v19359_v23  ;;  %v4494_v2 = vpop.f32.mrb[45].mxu1  ;;  %v15225_v47 = vadd.f32 %v4492_v27, %v19362_v30  ;;  %v14300_v18 = vcombine.low %v19926_v7, %v19931_v55 }
 0x206   : > { %24522 = vst [vmem:[#allocation31_spill] sm:$0xff] %v19940_v22  ;;  %v4110_v19 = vpop.f32.mrb[46].mxu0  ;;  %v15162_v25 = vadd.f32 %v4108_v52, %v19366_v8  ;;  %v4496_v28 = vpop.f32.mrb[46].mxu1  ;;  %v15226_v24 = vadd.f32 %v4494_v2, %v19369_v10  ;;  %v14301_v49 = vcombine.high %v19926_v7, %v19931_v55  ;;  %v18115_v52 = vld [vmem:[%s18497_s23 + $0xc8] ss:$16 sps:$4 sm:$0xff]   ;;  %v14303_v12 = vcombine.high %v19947_v45, %v19952_v15 }
 0x207   : > { %v4112_v44 = vpop.f32.mrb[47].mxu0  ;;  %5336 = vmatpush1.bf16.msra.mxu0 %v14268_v58  ;;  %v15163_v60 = vadd.f32 %v4110_v19, %v19359_v23  ;;  %v4498_v29 = vpop.f32.mrb[47].mxu1  ;;  %5722 = vmatpush1.bf16.msra.mxu1 %v14270_v5  ;;  %v15227_v58 = vadd.f32 %v4496_v28, %v19362_v30  ;;  %v7209_v5 = vmax.f32 %v15161_v31, 0.0  ;;  %v18116_v2 = vld [vmem:[%s18497_s23 + $0xec] ss:$16 sps:$4 sm:$0xff]   ;;  %v7211_v62 = vmax.f32 %v15225_v47, 0.0 }
 0x208   : > { %5337 = vmatprep.subr.bf16.mxu0 %v14285_v41  ;;  %v15164_v27 = vadd.f32 %v4112_v44, %v19366_v8  ;;  %5723 = vmatprep.subr.bf16.mxu1 %v14287_v14  ;;  %v19977_v41 = vld [vmem:[%s24290_s1 + $0x760] sm:$0xff]  ;;  %v15228_v55 = vadd.f32 %v4498_v29, %v19369_v10  ;;  %v19984_v14 = vld [vmem:[%s24290_s1 + $0x728] sm:$0xff]  ;;  %v7210_v28 = vmax.f32 %v15162_v25, 0.0 }
 0x209   : > { %4827 = vmatmul.mubr.bf16.gmra.mrb[88].mxu0 %v18115_v52  ;;  %v7225_v7 = vmax.f32 %v15163_v60, 0.0  ;;  %5213 = vmatmul.mubr.bf16.gmra.mrb[88].mxu1 %v18115_v52  ;;  %v19989_v19 = vld [vmem:[%s24290_s1 + $0x768] sm:$0xff]  ;;  %v7227_v31 = vmax.f32 %v15227_v58, 0.0  ;;  %v14302_v60 = vcombine.low %v19947_v45, %v19952_v15  ;;  %v7212_v52 = vmax.f32 %v15226_v24, 0.0  ;;  %v20000_v25 = vld [vmem:[%s24290_s1 + $0x7a0] sm:$0xff] }
 0x20a   : > { %4836 = vmatprep.mubr.bf16.mxu0 %v18116_v2  ;;  %v7226_v44 = vmax.f32 %v15164_v27, 0.0  ;;  %5222 = vmatprep.mubr.bf16.mxu1 %v18116_v2  ;;  %v7228_v22 = vmax.f32 %v15228_v55, 0.0  ;;  %v14317_v9 = vcombine.high %v19972_v21, %v19977_v41  ;;  %v14319_v24 = vcombine.high %v19984_v14, %v19989_v19 }
 0x20b   : > { %5338 = vmatpush1.bf16.msra.mxu0 %v14284_v51  ;;  %v19993_v29 = vpack.c.bf16 %v7225_v7, %v7209_v5  ;;  %5724 = vmatpush1.bf16.msra.mxu1 %v14286_v35  ;;  %v20005_v51 = vld [vmem:[%s24290_s1 + $0x7e0] sm:$0xff]  ;;  %v20009_v15 = vpack.c.bf16 %v7227_v31, %v7211_v62  ;;  %v14316_v7 = vcombine.low %v19972_v21, %v19977_v41  ;;  %v538_v62 = vld [vmem:[%s24290_s1 + $0x7a8] sm:$0xff] }
 0x20c   : > { %v4116_v4 = vpop.f32.mrb[48].mxu0  ;;  %5339 = vmatprep.subr.bf16.mxu0 %v14301_v49  ;;  %v20007_v45 = vpack.c.bf16 %v7226_v44, %v7210_v28  ;;  %v4502_v47 = vpop.f32.mrb[48].mxu1  ;;  %5725 = vmatprep.subr.bf16.mxu1 %v14303_v12  ;;  %v20014_v27 = vpack.c.bf16 %v7228_v22, %v7212_v52  ;;  %v546_v12 = vld [vmem:[%s24290_s1 + $0x7e8] sm:$0xff]  ;;  %v14318_v28 = vcombine.low %v19984_v14, %v19989_v19 }
 0x20d   : > { %24523 = vst [vmem:[#allocation32_spill] sm:$0xff] %v19993_v29  ;;  %24525 = vst [vmem:[#allocation34_spill] sm:$0xff] %v20009_v15  ;;  %v4118_v35 = vpop.f32.mrb[49].mxu0  ;;  %v15165_v49 = vadd.f32 %v4116_v4, %v19359_v23  ;;  %v4504_v58 = vpop.f32.mrb[49].mxu1  ;;  %v15229_v4 = vadd.f32 %v4502_v47, %v19362_v30  ;;  %v14332_v21 = vcombine.low %v20000_v25, %v20005_v51 }
 0x20e   : > { %24524 = vst [vmem:[#allocation33_spill] sm:$0xff] %v20007_v45  ;;  %24526 = vst [vmem:[#allocation35_spill] sm:$0xff] %v20014_v27  ;;  %v4120_v5 = vpop.f32.mrb[50].mxu0  ;;  %v15166_v55 = vadd.f32 %v4118_v35, %v19366_v8  ;;  %v4506_v22 = vpop.f32.mrb[50].mxu1  ;;  %v15230_v44 = vadd.f32 %v4504_v58, %v19369_v10  ;;  %v14333_v52 = vcombine.high %v20000_v25, %v20005_v51  ;;  %v18117_v35 = vld [vmem:[%s18497_s23 + $0xe8] ss:$16 sps:$4 sm:$0xff]  }
 0x20f   : > { %v4122_v2 = vpop.f32.mrb[51].mxu0  ;;  %5340 = vmatpush1.bf16.msra.mxu0 %v14300_v18  ;;  %v15167_v41 = vadd.f32 %v4120_v5, %v19359_v23  ;;  %v4508_v31 = vpop.f32.mrb[51].mxu1  ;;  %5726 = vmatpush1.bf16.msra.mxu1 %v14302_v60  ;;  %v15231_v18 = vadd.f32 %v4506_v22, %v19362_v30  ;;  %v14335_v14 = vcombine.high %v538_v62, %v546_v12  ;;  %v7241_v19 = vmax.f32 %v15165_v49, 0.0  ;;  %v18118_v58 = vld [vmem:[%s18497_s23 + $0x10c] ss:$16 sps:$4 sm:$0xff]  }
 0x210   : > { %5341 = vmatprep.subr.bf16.mxu0 %v14317_v9  ;;  %v15168_v47 = vadd.f32 %v4122_v2, %v19366_v8  ;;  %5727 = vmatprep.subr.bf16.mxu1 %v14319_v24  ;;  %v15232_v5 = vadd.f32 %v4508_v31, %v19369_v10  ;;  %v7242_v60 = vmax.f32 %v15166_v55, 0.0  ;;  %v7243_v27 = vmax.f32 %v15229_v4, 0.0 }
 0x211   : > { %4837 = vmatmul.mubr.bf16.gmra.mrb[92].mxu0 %v18117_v35  ;;  %v7257_v15 = vmax.f32 %v15167_v41, 0.0  ;;  %5223 = vmatmul.mubr.bf16.gmra.mrb[92].mxu1 %v18117_v35  ;;  %v7259_v29 = vmax.f32 %v15231_v18, 0.0  ;;  %v14334_v25 = vcombine.low %v538_v62, %v546_v12  ;;  %v7244_v22 = vmax.f32 %v15230_v44, 0.0 }
 0x212   : > { %4846 = vmatprep.mubr.bf16.mxu0 %v18118_v58  ;;  %v7258_v9 = vmax.f32 %v15168_v47, 0.0  ;;  %5232 = vmatprep.mubr.bf16.mxu1 %v18118_v58  ;;  %v7260_v2 = vmax.f32 %v15232_v5, 0.0  ;;  %v14349_v49 = vcombine.high %v19522_v33, %v19527_v34  ;;  %v18119_v5 = vld [vmem:[%s18497_s23 + $0x108] ss:$16 sps:$4 sm:$0xff]  }
 0x213   : > { %5342 = vmatpush1.bf16.msra.mxu0 %v14316_v7  ;;  %v20039_v51 = vpack.c.bf16 %v7257_v15, %v7241_v19  ;;  %5728 = vmatpush1.bf16.msra.mxu1 %v14318_v28  ;;  %v20045_v31 = vpack.c.bf16 %v7259_v29, %v7243_v27  ;;  %v14351_v7 = vcombine.high %v19538_v56, %v19543_v54 }
 0x214   : > { %v4126_v24 = vpop.f32.mrb[52].mxu0  ;;  %5343 = vmatprep.subr.bf16.mxu0 %v14333_v52  ;;  %v20043_v41 = vpack.c.bf16 %v7258_v9, %v7242_v60  ;;  %v4512_v55 = vpop.f32.mrb[52].mxu1  ;;  %5729 = vmatprep.subr.bf16.mxu1 %v14335_v14  ;;  %v20050_v62 = vpack.c.bf16 %v7260_v2, %v7244_v22 }
 0x215   : > { %24527 = vst [vmem:[#allocation36_spill] sm:$0xff] %v20039_v51  ;;  %24529 = vst [vmem:[#allocation38_spill] sm:$0xff] %v20045_v31  ;;  %v4128_v4 = vpop.f32.mrb[53].mxu0  ;;  %v15169_v15 = vadd.f32 %v4126_v24, %v19359_v23  ;;  %v4514_v12 = vpop.f32.mrb[53].mxu1  ;;  %v15233_v52 = vadd.f32 %v4512_v55, %v19362_v30 }
 0x216   : > { %24528 = vst [vmem:[#allocation37_spill] sm:$0xff] %v20043_v41  ;;  %24530 = vst [vmem:[#allocation39_spill] sm:$0xff] %v20050_v62  ;;  %v4130_v28 = vpop.f32.mrb[54].mxu0  ;;  %v15170_v44 = vadd.f32 %v4128_v4, %v19366_v8  ;;  %v4516_v47 = vpop.f32.mrb[54].mxu1  ;;  %v15234_v18 = vadd.f32 %v4514_v12, %v19369_v10 }
 0x217   : > { %v4132_v29 = vpop.f32.mrb[55].mxu0  ;;  %5344 = vmatpush1.bf16.msra.mxu0 %v14332_v21  ;;  %v15171_v27 = vadd.f32 %v4130_v28, %v19359_v23  ;;  %v4518_v35 = vpop.f32.mrb[55].mxu1  ;;  %5730 = vmatpush1.bf16.msra.mxu1 %v14334_v25  ;;  %v15235_v19 = vadd.f32 %v4516_v47, %v19362_v30  ;;  %v7273_v58 = vmax.f32 %v15169_v15, 0.0  ;;  %v18120_v21 = vld [vmem:[%s18497_s23 + $0x12c] ss:$16 sps:$4 sm:$0xff]   ;;  %v7275_v24 = vmax.f32 %v15233_v52, 0.0 }
 0x218   : > { %5506 = vmatprep.subr.bf16.mxu0 %v14349_v49  ;;  %v15172_v14 = vadd.f32 %v4132_v29, %v19366_v8  ;;  %5892 = vmatprep.subr.bf16.mxu1 %v14351_v7  ;;  %v15236_v9 = vadd.f32 %v4518_v35, %v19369_v10  ;;  %v7274_v22 = vmax.f32 %v15170_v44, 0.0  ;;  %v7276_v49 = vmax.f32 %v15234_v18, 0.0 }
 0x219   : > { %4847 = vmatmul.mubr.bf16.gmra.mrb[96].mxu0 %v18119_v5  ;;  %v7289_v60 = vmax.f32 %v15171_v27, 0.0  ;;  %5233 = vmatmul.mubr.bf16.gmra.mrb[96].mxu1 %v18119_v5  ;;  %v7291_v55 = vmax.f32 %v15235_v19, 0.0 }
 0x21a   : > { %4856 = vmatprep.mubr.bf16.mxu0 %v18120_v21  ;;  %v7290_v2 = vmax.f32 %v15172_v14, 0.0  ;;  %5242 = vmatprep.mubr.bf16.mxu1 %v18120_v21  ;;  %v7292_v4 = vmax.f32 %v15236_v9, 0.0 }
 0x21b   : > { %v20061_v25 = vpack.c.bf16 %v7289_v60, %v7273_v58  ;;  %v20065_v7 = vpack.c.bf16 %v7291_v55, %v7275_v24 }
 0x21c   : > { %v4136_v12 = vpop.f32.mrb[56].mxu0  ;;  %v20063_v28 = vpack.c.bf16 %v7290_v2, %v7274_v22  ;;  %v4522_v15 = vpop.f32.mrb[56].mxu1  ;;  %v20068_v27 = vpack.c.bf16 %v7292_v4, %v7276_v49  ;;  %v18121_v22 = vld [vmem:[%s18497_s23 + $0x128] ss:$16 sps:$4 sm:$0xff]   ;;  %v18122_v49 = vld [vmem:[%s18497_s23 + $0x14c] ss:$16 sps:$4 sm:$0xff]  }
 0x21d   : > { %24531 = vst [vmem:[#allocation40_spill] sm:$0xff] %v20061_v25  ;;  %24533 = vst [vmem:[#allocation42_spill] sm:$0xff] %v20065_v7  ;;  %v4138_v47 = vpop.f32.mrb[57].mxu0  ;;  %v15173_v29 = vadd.f32 %v4136_v12, %v19359_v23  ;;  %v4524_v44 = vpop.f32.mrb[57].mxu1  ;;  %v15237_v18 = vadd.f32 %v4522_v15, %v19362_v30  ;;  %v20541_v25 = vld [vmem:[%s24290_s1 + $0x838] sm:$0xff] }
 0x21e   : > { %24532 = vst [vmem:[#allocation41_spill] sm:$0xff] %v20063_v28  ;;  %24534 = vst [vmem:[#allocation43_spill] sm:$0xff] %v20068_v27  ;;  %v4140_v52 = vpop.f32.mrb[58].mxu0  ;;  %v15174_v35 = vadd.f32 %v4138_v47, %v19366_v8  ;;  %v4526_v14 = vpop.f32.mrb[58].mxu1  ;;  %v15238_v58 = vadd.f32 %v4524_v44, %v19369_v10  ;;  %v20546_v28 = vld [vmem:[%s24290_s1 + $0x878] sm:$0xff] }
 0x21f   : > { %v4142_v19 = vpop.f32.mrb[59].mxu0  ;;  %v15175_v5 = vadd.f32 %v4140_v52, %v19359_v23  ;;  %v4528_v60 = vpop.f32.mrb[59].mxu1  ;;  %v15239_v21 = vadd.f32 %v4526_v14, %v19362_v30  ;;  %v7305_v2 = vmax.f32 %v15173_v29, 0.0  ;;  %v7307_v15 = vmax.f32 %v15237_v18, 0.0 }
 0x220   : > { %v15176_v9 = vadd.f32 %v4142_v19, %v19366_v8  ;;  %v15240_v55 = vadd.f32 %v4528_v60, %v19369_v10  ;;  %v7306_v4 = vmax.f32 %v15174_v35, 0.0  ;;  %v7308_v52 = vmax.f32 %v15238_v58, 0.0 }
 0x221   : > { %4857 = vmatmul.mubr.bf16.gmra.mrb[100].mxu0 %v18121_v22  ;;  %v7321_v24 = vmax.f32 %v15175_v5, 0.0  ;;  %5243 = vmatmul.mubr.bf16.gmra.mrb[100].mxu1 %v18121_v22  ;;  %v7323_v47 = vmax.f32 %v15239_v21, 0.0 }
 0x222   : > { %4866 = vmatprep.mubr.bf16.mxu0 %v18122_v49  ;;  %v7322_v12 = vmax.f32 %v15176_v9, 0.0  ;;  %5252 = vmatprep.mubr.bf16.mxu1 %v18122_v49  ;;  %v7324_v19 = vmax.f32 %v15240_v55, 0.0 }
 0x223   : > { %v20079_v44 = vpack.c.bf16 %v7321_v24, %v7305_v2  ;;  %v20083_v29 = vpack.c.bf16 %v7323_v47, %v7307_v15 }
 0x224   : > { %v4146_v7 = vpop.f32.mrb[60].mxu0  ;;  %v20081_v14 = vpack.c.bf16 %v7322_v12, %v7306_v4  ;;  %v4532_v5 = vpop.f32.mrb[60].mxu1  ;;  %v20085_v22 = vpack.c.bf16 %v7324_v19, %v7308_v52  ;;  %v18123_v4 = vld [vmem:[%s18497_s23 + $0x148] ss:$16 sps:$4 sm:$0xff]   ;;  %v18124_v52 = vld [vmem:[%s18497_s23 + $0x16c] ss:$16 sps:$4 sm:$0xff]  }
 0x225   : > { %24535 = vst [vmem:[#allocation44_spill] sm:$0xff] %v20079_v44  ;;  %24537 = vst [vmem:[#allocation46_spill] sm:$0xff] %v20083_v29  ;;  %v4148_v60 = vpop.f32.mrb[61].mxu0  ;;  %v4534_v27 = vpop.f32.mrb[61].mxu1  ;;  %v15177_v18 = vadd.f32 %v4146_v7, %v19359_v23  ;;  %v15241_v49 = vadd.f32 %v4532_v5, %v19362_v30 }
 0x226   : > { %24536 = vst [vmem:[#allocation45_spill] sm:$0xff] %v20081_v14  ;;  %24538 = vst [vmem:[#allocation47_spill] sm:$0xff] %v20085_v22  ;;  %v4150_v35 = vpop.f32.mrb[62].mxu0  ;;  %v4536_v9 = vpop.f32.mrb[62].mxu1  ;;  %v15178_v24 = vadd.f32 %v4148_v60, %v19366_v8  ;;  %v15242_v15 = vadd.f32 %v4534_v27, %v19369_v10 }
 0x227   : > { %v4152_v21 = vpop.f32.mrb[63].mxu0  ;;  %v15179_v58 = vadd.f32 %v4150_v35, %v19359_v23  ;;  %v4538_v2 = vpop.f32.mrb[63].mxu1  ;;  %v15243_v7 = vadd.f32 %v4536_v9, %v19362_v30  ;;  %v7337_v23 = vmax.f32 %v15177_v18, 0.0  ;;  %v7339_v27 = vmax.f32 %v15241_v49, 0.0  ;;  %v18125_v18 = vld [vmem:[%s18497_s23 + $0x168] ss:$16 sps:$4 sm:$0xff]  }
 0x228   : > { %v15180_v55 = vadd.f32 %v4152_v21, %v19366_v8  ;;  %v15244_v47 = vadd.f32 %v4538_v2, %v19369_v10  ;;  %v7338_v19 = vmax.f32 %v15178_v24, 0.0  ;;  %v7340_v60 = vmax.f32 %v15242_v15, 0.0  ;;  %v18127_v2 = vld [vmem:[%s18497_s23 + $0x188] ss:$16 sps:$4 sm:$0xff]   ;;  %v18128_v24 = vld [vmem:[%s18497_s23 + $0x1ac] ss:$16 sps:$4 sm:$0xff]  }
 0x229   : > { %4867 = vmatmul.mubr.bf16.gmra.mrb[104].mxu0 %v18123_v4  ;;  %v7353_v12 = vmax.f32 %v15179_v58, 0.0  ;;  %5253 = vmatmul.mubr.bf16.gmra.mrb[104].mxu1 %v18123_v4  ;;  %v7355_v21 = vmax.f32 %v15243_v7, 0.0  ;;  %v18126_v58 = vld [vmem:[%s18497_s23 + $0x18c] ss:$16 sps:$4 sm:$0xff]   ;;  %v18131_v4 = vld [vmem:[%s18497_s23 + $0x1c8] ss:$16 sps:$4 sm:$0xff]  }
 0x22a   : > { %4876 = vmatprep.mubr.bf16.mxu0 %v18124_v52  ;;  %5262 = vmatprep.mubr.bf16.mxu1 %v18124_v52  ;;  %v7354_v8 = vmax.f32 %v15180_v55, 0.0  ;;  %v7356_v35 = vmax.f32 %v15244_v47, 0.0  ;;  %v18129_v55 = vld [vmem:[%s18497_s23 + $0x1a8] ss:$16 sps:$4 sm:$0xff]   ;;  %v18130_v49 = vld [vmem:[%s18497_s23 + $0x1cc] ss:$16 sps:$4 sm:$0xff]  }
 0x22b   : > { %v20097_v5 = vpack.c.bf16 %v7353_v12, %v7337_v23  ;;  %v20103_v9 = vpack.c.bf16 %v7355_v21, %v7339_v27  ;;  %v18132_v12 = vld [vmem:[%s18497_s23 + $0x1ec] ss:$16 sps:$4 sm:$0xff]   ;;  %v18133_v15 = vld [vmem:[%s18497_s23 + $0x1e8] ss:$16 sps:$4 sm:$0xff]   ;;  %v18134_v47 = vld [vmem:[%s18497_s23 + $0x4] ss:$16 sps:$4 sm:$0xff]  }
 0x22c   : > { %v20099_v10 = vpack.c.bf16 %v7354_v8, %v7338_v19  ;;  %v20101_v30 = vpack.c.bf16 %v7356_v35, %v7340_v60  ;;  %v569_v7 = vld [vmem:[%s24290_s1 + $0x8a0] sm:$0xff]  ;;  %v570_v23 = vld [vmem:[%s24290_s1 + $0x8a8] sm:$0xff] }
 0x22d   : > { %24539 = vst [vmem:[#allocation48_spill] sm:$0xff] %v20097_v5  ;;  %24542 = vst [vmem:[#allocation51_spill] sm:$0xff] %v20103_v9  ;;  %v577_v52 = vld [vmem:[%s24290_s1 + $0x8e0] sm:$0xff]  ;;  %v578_v19 = vld [vmem:[%s24290_s1 + $0x8e8] sm:$0xff] }
 0x22e   : > { %24540 = vst [vmem:[#allocation49_spill] sm:$0xff] %v20099_v10  ;;  %24541 = vst [vmem:[#allocation50_spill] sm:$0xff] %v20101_v30  ;;  %v14365_v8 = vcombine.high %v569_v7, %v577_v52  ;;  %v585_v60 = vld [vmem:[%s24290_s1 + $0x920] sm:$0xff]  ;;  %v14367_v21 = vcombine.high %v570_v23, %v578_v19 }
 0x22f   : > { %v593_v35 = vld [vmem:[%s24290_s1 + $0x960] sm:$0xff] }
 0x230   : > { %v18135_v27 = vld [vmem:[%s18497_s23] ss:$16 sps:$4 sm:$0xff]   ;;  %v18140_v9 = vld [vmem:[%s18497_s23 + $0x64] ss:$16 sps:$4 sm:$0xff]  }
 0x231   : > { %4877 = vmatmul.mubr.bf16.gmra.mrb[108].mxu0 %v18125_v18  ;;  %5263 = vmatmul.mubr.bf16.gmra.mrb[108].mxu1 %v18125_v18  ;;  %v586_v18 = vld [vmem:[%s24290_s1 + $0x928] sm:$0xff]  ;;  %v18158_v30 = vld [vmem:[%s18497_s23 + $0x160] ss:$16 sps:$4 sm:$0xff]  }
 0x232   : > { %4886 = vmatprep.mubr.bf16.mxu0 %v18126_v58  ;;  %5272 = vmatprep.mubr.bf16.mxu1 %v18126_v58  ;;  %v594_v58 = vld [vmem:[%s24290_s1 + $0x968] sm:$0xff] }
 0x239   : > { %4887 = vmatmul.mubr.bf16.gmra.mrb[112].mxu0 %v18127_v2  ;;  %5273 = vmatmul.mubr.bf16.gmra.mrb[112].mxu1 %v18127_v2  ;;  %v24543_v2 = vcombine.low %v19522_v33, %v19527_v34  ;;  %v609_v33 = vld [vmem:[%s24290_s1 + $0x9e0] sm:$0xff]  ;;  %v20156_v34 = vld [vmem:[%s24290_s1 + $0x30] sm:$0xff] }
 0x23a   : > { %4896 = vmatprep.mubr.bf16.mxu0 %v18128_v24  ;;  %5282 = vmatprep.mubr.bf16.mxu1 %v18128_v24  ;;  %v14364_v24 = vcombine.low %v569_v7, %v577_v52  ;;  %v602_v7 = vld [vmem:[%s24290_s1 + $0x9a8] sm:$0xff] }
 0x23b   : > { %v610_v52 = vld [vmem:[%s24290_s1 + $0x9e8] sm:$0xff] }
 0x241   : > { %4897 = vmatmul.mubr.bf16.gmra.mrb[116].mxu0 %v18129_v55  ;;  %5283 = vmatmul.mubr.bf16.gmra.mrb[116].mxu1 %v18129_v55  ;;  %v24544_v55 = vcombine.low %v19538_v56, %v19543_v54  ;;  %v20161_v56 = vld [vmem:[%s24290_s1 + $0x70] sm:$0xff]  ;;  %v20166_v54 = vld [vmem:[%s24290_s1 + $0x38] sm:$0xff] }
 0x242   : > { %4906 = vmatprep.mubr.bf16.mxu0 %v18130_v49  ;;  %5292 = vmatprep.mubr.bf16.mxu1 %v18130_v49  ;;  %v18136_v49 = vld [vmem:[%s18497_s23 + $0x24] ss:$16 sps:$4 sm:$0xff]  }
 0x249   : > { %4907 = vmatmul.mubr.bf16.gmra.mrb[120].mxu0 %v18131_v4  ;;  %5293 = vmatmul.mubr.bf16.gmra.mrb[120].mxu1 %v18131_v4  ;;  %v14366_v4 = vcombine.low %v570_v23, %v578_v19  ;;  %v20179_v19 = vld [vmem:[%s24290_s1 + $0x78] sm:$0xff]  ;;  %v625_v23 = vld [vmem:[%s24290_s1 + $0xa60] sm:$0xff] }
 0x24a   : > { %4916 = vmatprep.mubr.bf16.mxu0 %v18132_v12  ;;  %5302 = vmatprep.mubr.bf16.mxu1 %v18132_v12  ;;  %v14381_v12 = vcombine.high %v585_v60, %v593_v35 }
 0x251   : > { %4917 = vmatmul.mubr.bf16.gmra.mrb[124].mxu0 %v18133_v15  ;;  %5303 = vmatmul.mubr.bf16.gmra.mrb[124].mxu1 %v18133_v15  ;;  %v14383_v15 = vcombine.high %v586_v18, %v594_v58 }
 0x252   : > { %5345 = vmatprep.mubr.bf16.mxu0 %v18134_v47  ;;  %5731 = vmatprep.mubr.bf16.mxu1 %v18134_v47  ;;  %v601_v47 = vld [vmem:[%s24290_s1 + $0x9a0] sm:$0xff] }
 0x259   : > { %5346 = vmatmul.mubr.bf16.vlgmr.msra.gmra.mrb[128].mxu0 %v18135_v27  ;;  %5732 = vmatmul.mubr.bf16.vlgmr.msra.gmra.mrb[128].mxu1 %v18135_v27  ;;  %v641_v27 = vld [vmem:[%s24290_s1 + $0xae0] sm:$0xff] }
 0x25a   : > { %5507 = vmatpush1.bf16.msra.mxu0 %v24543_v2  ;;  %5893 = vmatpush1.bf16.msra.mxu1 %v24544_v55  ;;  %v14397_v2 = vcombine.high %v601_v47, %v609_v33  ;;  %v14399_v55 = vcombine.high %v602_v7, %v610_v52 }
 0x25b   : > { %5355 = vmatprep.mubr.bf16.mxu0 %v18136_v49  ;;  %5741 = vmatprep.mubr.bf16.mxu1 %v18136_v49  ;;  %v617_v49 = vld [vmem:[%s24290_s1 + $0xa20] sm:$0xff] }
 0x25c   : > { %5508 = vmatprep.subr.bf16.mxu0 %v14365_v8  ;;  %5894 = vmatprep.subr.bf16.mxu1 %v14367_v21  ;;  %v14380_v8 = vcombine.low %v585_v60, %v593_v35  ;;  %v14382_v21 = vcombine.low %v586_v18, %v594_v58  ;;  %v18138_v60 = vld [vmem:[%s18497_s23 + $0x44] ss:$16 sps:$4 sm:$0xff]   ;;  %v618_v35 = vld [vmem:[%s24290_s1 + $0xa28] sm:$0xff]  ;;  %v14396_v58 = vcombine.low %v601_v47, %v609_v33 }
 0x25d   : > { %v626_v18 = vld [vmem:[%s24290_s1 + $0xa68] sm:$0xff] }
 0x25e   : > { %5509 = vmatpush1.bf16.msra.mxu0 %v14364_v24  ;;  %5895 = vmatpush1.bf16.msra.mxu1 %v14366_v4  ;;  %v18137_v24 = vld [vmem:[%s18497_s23 + $0x20] ss:$16 sps:$4 sm:$0xff]   ;;  %v14398_v4 = vcombine.low %v602_v7, %v610_v52  ;;  %v634_v47 = vld [vmem:[%s24290_s1 + $0xaa8] sm:$0xff]  ;;  %v14412_v7 = vcombine.low %v617_v49, %v625_v23  ;;  %v14414_v52 = vcombine.low %v618_v35, %v626_v18 }
 0x25f   : > { %5510 = vmatprep.subr.bf16.mxu0 %v14381_v12  ;;  %5896 = vmatprep.subr.bf16.mxu1 %v14383_v15  ;;  %v14413_v12 = vcombine.high %v617_v49, %v625_v23  ;;  %v14415_v15 = vcombine.high %v618_v35, %v626_v18  ;;  %v642_v33 = vld [vmem:[%s24290_s1 + $0xae8] sm:$0xff] }
 0x260   : > { %v650_v23 = vld [vmem:[%s24290_s1 + $0xb28] sm:$0xff]  ;;  %v14430_v18 = vcombine.low %v634_v47, %v642_v33 }
 0x261   : > { %5356 = vmatmul.mubr.bf16.gmra.mrb[132].mxu0 %v18137_v24  ;;  %5742 = vmatmul.mubr.bf16.gmra.mrb[132].mxu1 %v18137_v24  ;;  %v633_v24 = vld [vmem:[%s24290_s1 + $0xaa0] sm:$0xff]  ;;  %v658_v49 = vld [vmem:[%s24290_s1 + $0xb68] sm:$0xff] }
 0x262   : > { %5365 = vmatprep.mubr.bf16.mxu0 %v18138_v60  ;;  %5751 = vmatprep.mubr.bf16.mxu1 %v18138_v60  ;;  %v657_v60 = vld [vmem:[%s24290_s1 + $0xb60] sm:$0xff]  ;;  %v14428_v35 = vcombine.low %v633_v24, %v641_v27 }
 0x263   : > { %5511 = vmatpush1.bf16.msra.mxu0 %v14380_v8  ;;  %5897 = vmatpush1.bf16.msra.mxu1 %v14382_v21  ;;  %v14429_v8 = vcombine.high %v633_v24, %v641_v27  ;;  %v18139_v21 = vld [vmem:[%s18497_s23 + $0x40] ss:$16 sps:$4 sm:$0xff]   ;;  %v674_v27 = vld [vmem:[%s24290_s1 + $0xbe8] sm:$0xff] }
 0x264   : > { %5512 = vmatprep.subr.bf16.mxu0 %v14397_v2  ;;  %5898 = vmatprep.subr.bf16.mxu1 %v14399_v55  ;;  %v14431_v2 = vcombine.high %v634_v47, %v642_v33  ;;  %v649_v55 = vld [vmem:[%s24290_s1 + $0xb20] sm:$0xff]  ;;  %v14446_v47 = vcombine.low %v650_v23, %v658_v49 }
 0x265   : > { %v14444_v24 = vcombine.low %v649_v55, %v657_v60 }
 0x267   : > { %5513 = vmatpush1.bf16.msra.mxu0 %v14396_v58  ;;  %5899 = vmatpush1.bf16.msra.mxu1 %v14398_v4  ;;  %v14445_v58 = vcombine.high %v649_v55, %v657_v60  ;;  %v14447_v4 = vcombine.high %v650_v23, %v658_v49  ;;  %v682_v55 = vld [vmem:[%s24290_s1 + $0xc28] sm:$0xff] }
 0x268   : > { %5514 = vmatprep.subr.bf16.mxu0 %v14413_v12  ;;  %5900 = vmatprep.subr.bf16.mxu1 %v14415_v15  ;;  %v665_v12 = vld [vmem:[%s24290_s1 + $0xba0] sm:$0xff]  ;;  %v690_v60 = vld [vmem:[%s24290_s1 + $0xc68] sm:$0xff] }
 0x269   : > { %5366 = vmatmul.mubr.bf16.gmra.mrb[136].mxu0 %v18139_v21  ;;  %5752 = vmatmul.mubr.bf16.gmra.mrb[136].mxu1 %v18139_v21  ;;  %v673_v15 = vld [vmem:[%s24290_s1 + $0xbe0] sm:$0xff] }
 0x26a   : > { %5375 = vmatprep.mubr.bf16.mxu0 %v18140_v9  ;;  %5761 = vmatprep.mubr.bf16.mxu1 %v18140_v9  ;;  %v666_v9 = vld [vmem:[%s24290_s1 + $0xba8] sm:$0xff]  ;;  %v14461_v33 = vcombine.high %v665_v12, %v673_v15  ;;  %v689_v21 = vld [vmem:[%s24290_s1 + $0xc60] sm:$0xff]  ;;  %v14460_v23 = vcombine.low %v665_v12, %v673_v15 }
 0x26b   : > { %5515 = vmatpush1.bf16.msra.mxu0 %v14412_v7  ;;  %5901 = vmatpush1.bf16.msra.mxu1 %v14414_v52  ;;  %v18141_v7 = vld [vmem:[%s18497_s23 + $0x60] ss:$16 sps:$4 sm:$0xff]   ;;  %v14463_v52 = vcombine.high %v666_v9, %v674_v27  ;;  %v14462_v49 = vcombine.low %v666_v9, %v674_v27  ;;  %v698_v12 = vld [vmem:[%s24290_s1 + $0xca8] sm:$0xff]  ;;  %v14478_v27 = vcombine.low %v682_v55, %v690_v60 }
 0x26c   : > { %5516 = vmatprep.subr.bf16.mxu0 %v14429_v8  ;;  %5902 = vmatprep.subr.bf16.mxu1 %v14431_v2  ;;  %v681_v8 = vld [vmem:[%s24290_s1 + $0xc20] sm:$0xff]  ;;  %v706_v15 = vld [vmem:[%s24290_s1 + $0xce8] sm:$0xff] }
 0x26d   : > { %v18142_v2 = vld [vmem:[%s18497_s23 + $0x84] ss:$16 sps:$4 sm:$0xff]   ;;  %v14476_v9 = vcombine.low %v681_v8, %v689_v21 }
 0x26f   : > { %5517 = vmatpush1.bf16.msra.mxu0 %v14428_v35  ;;  %5903 = vmatpush1.bf16.msra.mxu1 %v14430_v18  ;;  %v14477_v35 = vcombine.high %v681_v8, %v689_v21  ;;  %v14479_v18 = vcombine.high %v682_v55, %v690_v60  ;;  %v714_v8 = vld [vmem:[%s24290_s1 + $0xd28] sm:$0xff]  ;;  %v14494_v60 = vcombine.low %v698_v12, %v706_v15 }
 0x270   : > { %5518 = vmatprep.subr.bf16.mxu0 %v14445_v58  ;;  %5904 = vmatprep.subr.bf16.mxu1 %v14447_v4  ;;  %v697_v58 = vld [vmem:[%s24290_s1 + $0xca0] sm:$0xff]  ;;  %v722_v21 = vld [vmem:[%s24290_s1 + $0xd68] sm:$0xff] }
 0x271   : > { %5376 = vmatmul.mubr.bf16.gmra.mrb[140].mxu0 %v18141_v7  ;;  %5762 = vmatmul.mubr.bf16.gmra.mrb[140].mxu1 %v18141_v7  ;;  %v705_v4 = vld [vmem:[%s24290_s1 + $0xce0] sm:$0xff] }
 0x272   : > { %5385 = vmatprep.mubr.bf16.mxu0 %v18142_v2  ;;  %5771 = vmatprep.mubr.bf16.mxu1 %v18142_v2  ;;  %v713_v7 = vld [vmem:[%s24290_s1 + $0xd20] sm:$0xff]  ;;  %v14492_v55 = vcombine.low %v697_v58, %v705_v4 }
 0x273   : > { %5519 = vmatpush1.bf16.msra.mxu0 %v14444_v24  ;;  %5905 = vmatpush1.bf16.msra.mxu1 %v14446_v47  ;;  %v14493_v24 = vcombine.high %v697_v58, %v705_v4  ;;  %v18143_v47 = vld [vmem:[%s18497_s23 + $0x80] ss:$16 sps:$4 sm:$0xff]   ;;  %v18144_v2 = vld [vmem:[%s18497_s23 + $0xa4] ss:$16 sps:$4 sm:$0xff]   ;;  %v730_v58 = vld [vmem:[%s24290_s1 + $0xda8] sm:$0xff] }
 0x274   : > { %5520 = vmatprep.subr.bf16.mxu0 %v14461_v33  ;;  %5906 = vmatprep.subr.bf16.mxu1 %v14463_v52  ;;  %v14495_v33 = vcombine.high %v698_v12, %v706_v15  ;;  %v721_v52 = vld [vmem:[%s24290_s1 + $0xd60] sm:$0xff]  ;;  %v738_v4 = vld [vmem:[%s24290_s1 + $0xde8] sm:$0xff]  ;;  %v14510_v15 = vcombine.low %v714_v8, %v722_v21 }
 0x275   : > { %v14508_v12 = vcombine.low %v713_v7, %v721_v52 }
 0x277   : > { %5521 = vmatpush1.bf16.msra.mxu0 %v14460_v23  ;;  %5907 = vmatpush1.bf16.msra.mxu1 %v14462_v49  ;;  %v14509_v23 = vcombine.high %v713_v7, %v721_v52  ;;  %v14511_v49 = vcombine.high %v714_v8, %v722_v21  ;;  %v746_v7 = vld [vmem:[%s24290_s1 + $0xe28] sm:$0xff]  ;;  %v14526_v21 = vcombine.low %v730_v58, %v738_v4 }
 0x278   : > { %5522 = vmatprep.subr.bf16.mxu0 %v14477_v35  ;;  %5908 = vmatprep.subr.bf16.mxu1 %v14479_v18  ;;  %v729_v35 = vld [vmem:[%s24290_s1 + $0xda0] sm:$0xff]  ;;  %v754_v52 = vld [vmem:[%s24290_s1 + $0xe68] sm:$0xff] }
 0x279   : > { %5386 = vmatmul.mubr.bf16.gmra.mrb[144].mxu0 %v18143_v47  ;;  %5772 = vmatmul.mubr.bf16.gmra.mrb[144].mxu1 %v18143_v47  ;;  %v737_v18 = vld [vmem:[%s24290_s1 + $0xde0] sm:$0xff] }
 0x27a   : > { %5395 = vmatprep.mubr.bf16.mxu0 %v18144_v2  ;;  %5781 = vmatprep.mubr.bf16.mxu1 %v18144_v2  ;;  %v745_v47 = vld [vmem:[%s24290_s1 + $0xe20] sm:$0xff]  ;;  %v14524_v8 = vcombine.low %v729_v35, %v737_v18 }
 0x27b   : > { %5523 = vmatpush1.bf16.msra.mxu0 %v14476_v9  ;;  %5909 = vmatpush1.bf16.msra.mxu1 %v14478_v27  ;;  %v14525_v9 = vcombine.high %v729_v35, %v737_v18  ;;  %v18145_v27 = vld [vmem:[%s18497_s23 + $0xa0] ss:$16 sps:$4 sm:$0xff]   ;;  %v18146_v2 = vld [vmem:[%s18497_s23 + $0xc4] ss:$16 sps:$4 sm:$0xff]   ;;  %v762_v35 = vld [vmem:[%s24290_s1 + $0xea8] sm:$0xff] }
 0x27c   : > { %5524 = vmatprep.subr.bf16.mxu0 %v14493_v24  ;;  %5910 = vmatprep.subr.bf16.mxu1 %v14495_v33  ;;  %v14527_v24 = vcombine.high %v730_v58, %v738_v4  ;;  %v753_v33 = vld [vmem:[%s24290_s1 + $0xe60] sm:$0xff]  ;;  %v770_v18 = vld [vmem:[%s24290_s1 + $0xee8] sm:$0xff]  ;;  %v14542_v4 = vcombine.low %v746_v7, %v754_v52 }
 0x27d   : > { %v14540_v58 = vcombine.low %v745_v47, %v753_v33 }
 0x27f   : > { %5525 = vmatpush1.bf16.msra.mxu0 %v14492_v55  ;;  %5911 = vmatpush1.bf16.msra.mxu1 %v14494_v60  ;;  %v14541_v55 = vcombine.high %v745_v47, %v753_v33  ;;  %v14543_v60 = vcombine.high %v746_v7, %v754_v52  ;;  %v778_v47 = vld [vmem:[%s24290_s1 + $0xf28] sm:$0xff]  ;;  %v14558_v52 = vcombine.low %v762_v35, %v770_v18 }
 0x280   : > { %5526 = vmatprep.subr.bf16.mxu0 %v14509_v23  ;;  %5912 = vmatprep.subr.bf16.mxu1 %v14511_v49  ;;  %v761_v23 = vld [vmem:[%s24290_s1 + $0xea0] sm:$0xff]  ;;  %v786_v33 = vld [vmem:[%s24290_s1 + $0xf68] sm:$0xff] }
 0x281   : > { %5396 = vmatmul.mubr.bf16.gmra.mrb[148].mxu0 %v18145_v27  ;;  %5782 = vmatmul.mubr.bf16.gmra.mrb[148].mxu1 %v18145_v27  ;;  %v769_v49 = vld [vmem:[%s24290_s1 + $0xee0] sm:$0xff] }
 0x282   : > { %5405 = vmatprep.mubr.bf16.mxu0 %v18146_v2  ;;  %5791 = vmatprep.mubr.bf16.mxu1 %v18146_v2  ;;  %v777_v27 = vld [vmem:[%s24290_s1 + $0xf20] sm:$0xff]  ;;  %v14556_v7 = vcombine.low %v761_v23, %v769_v49 }
 0x283   : > { %5527 = vmatpush1.bf16.msra.mxu0 %v14508_v12  ;;  %5913 = vmatpush1.bf16.msra.mxu1 %v14510_v15  ;;  %v14557_v12 = vcombine.high %v761_v23, %v769_v49  ;;  %v18147_v15 = vld [vmem:[%s18497_s23 + $0xc0] ss:$16 sps:$4 sm:$0xff]   ;;  %v18148_v2 = vld [vmem:[%s18497_s23 + $0xe4] ss:$16 sps:$4 sm:$0xff]   ;;  %v794_v23 = vld [vmem:[%s24290_s1 + $0xfa8] sm:$0xff] }
 0x284   : > { %5528 = vmatprep.subr.bf16.mxu0 %v14525_v9  ;;  %5914 = vmatprep.subr.bf16.mxu1 %v14527_v24  ;;  %v14559_v9 = vcombine.high %v762_v35, %v770_v18  ;;  %v785_v24 = vld [vmem:[%s24290_s1 + $0xf60] sm:$0xff]  ;;  %v802_v49 = vld [vmem:[%s24290_s1 + $0xfe8] sm:$0xff]  ;;  %v14574_v18 = vcombine.low %v778_v47, %v786_v33 }
 0x285   : > { %v14572_v35 = vcombine.low %v777_v27, %v785_v24 }
 0x287   : > { %5529 = vmatpush1.bf16.msra.mxu0 %v14524_v8  ;;  %5915 = vmatpush1.bf16.msra.mxu1 %v14526_v21  ;;  %v14573_v8 = vcombine.high %v777_v27, %v785_v24  ;;  %v14575_v21 = vcombine.high %v778_v47, %v786_v33  ;;  %v14590_v27 = vcombine.low %v794_v23, %v802_v49  ;;  %v18151_v47 = vld [vmem:[%s18497_s23 + $0x100] ss:$16 sps:$4 sm:$0xff]   ;;  %v18152_v33 = vld [vmem:[%s18497_s23 + $0x124] ss:$16 sps:$4 sm:$0xff]  }
 0x288   : > { %5530 = vmatprep.subr.bf16.mxu0 %v14541_v55  ;;  %5916 = vmatprep.subr.bf16.mxu1 %v14543_v60  ;;  %v793_v55 = vld [vmem:[%s24290_s1 + $0xfa0] sm:$0xff]  ;;  %v14097_v24 = vcombine.high %v20156_v34, %v20161_v56 }
 0x289   : > { %5406 = vmatmul.mubr.bf16.gmra.mrb[152].mxu0 %v18147_v15  ;;  %5792 = vmatmul.mubr.bf16.gmra.mrb[152].mxu1 %v18147_v15  ;;  %v801_v60 = vld [vmem:[%s24290_s1 + $0xfe0] sm:$0xff] }
 0x28a   : > { %5415 = vmatprep.mubr.bf16.mxu0 %v18148_v2  ;;  %5801 = vmatprep.mubr.bf16.mxu1 %v18148_v2  ;;  %v18150_v15 = vld [vmem:[%s18497_s23 + $0x104] ss:$16 sps:$4 sm:$0xff]   ;;  %v14099_v2 = vcombine.high %v20166_v54, %v20179_v19 }
 0x28b   : > { %5531 = vmatpush1.bf16.msra.mxu0 %v14540_v58  ;;  %5917 = vmatpush1.bf16.msra.mxu1 %v14542_v4  ;;  %v14589_v58 = vcombine.high %v793_v55, %v801_v60  ;;  %v18149_v4 = vld [vmem:[%s18497_s23 + $0xe0] ss:$16 sps:$4 sm:$0xff]  }
 0x28c   : > { %5532 = vmatprep.subr.bf16.mxu0 %v14557_v12  ;;  %5918 = vmatprep.subr.bf16.mxu1 %v14559_v9  ;;  %v14591_v12 = vcombine.high %v794_v23, %v802_v49  ;;  %v14588_v9 = vcombine.low %v793_v55, %v801_v60  ;;  %v24325_v55 = vsub.s32 5, %v19339_v59  ;;  %v24324_v60 = vsub.s32 7, %v19339_v59  ;;  %v18155_v23 = vld [vmem:[%s18497_s23 + $0x140] ss:$16 sps:$4 sm:$0xff]  }
 0x28d   : > { %v18156_v49 = vld [vmem:[%s24291_s2] sm:$0xff] }
 0x28f   : > { %5533 = vmatpush1.bf16.msra.mxu0 %v14556_v7  ;;  %5919 = vmatpush1.bf16.msra.mxu1 %v14558_v52  ;;  %v18153_v7 = vld [vmem:[%s18497_s23 + $0x120] ss:$16 sps:$4 sm:$0xff]   ;;  %v18154_v52 = vld [vmem:[%s18497_s23 + $0x144] ss:$16 sps:$4 sm:$0xff]  }
 0x290   : > { %5534 = vmatprep.subr.bf16.mxu0 %v14573_v8  ;;  %5920 = vmatprep.subr.bf16.mxu1 %v14575_v21  ;;  %v24327_v8 = vsub.s32 4, %v19339_v59  ;;  %v24326_v21 = vsub.s32 6, %v19339_v59 }
 0x291   : > { %5416 = vmatmul.mubr.bf16.gmra.mrb[156].mxu0 %v18149_v4  ;;  %5802 = vmatmul.mubr.bf16.gmra.mrb[156].mxu1 %v18149_v4  ;;  %v18157_v4 = vld [vmem:[%s18497_s23 + $0x164] ss:$16 sps:$4 sm:$0xff]  }
 0x292   : > { %5425 = vmatprep.mubr.bf16.mxu0 %v18150_v15  ;;  %5811 = vmatprep.mubr.bf16.mxu1 %v18150_v15 }
 0x293   : > { %5535 = vmatpush1.bf16.msra.mxu0 %v14572_v35  ;;  %5921 = vmatpush1.bf16.msra.mxu1 %v14574_v18  ;;  %v20359_v35 = vrot.slane %v18156_v49, %v24327_v8  ;;  %v20363_v18 = vrot.slane %v18156_v49, %v24326_v21 }
 0x294   : > { %5536 = vmatprep.subr.bf16.mxu0 %v14589_v58  ;;  %5922 = vmatprep.subr.bf16.mxu1 %v14591_v12  ;;  %v20367_v58 = vrot.slane %v18156_v49, %v24325_v55  ;;  %v20372_v12 = vrot.slane %v18156_v49, %v24324_v60 }
 0x297   : > { %5537 = vmatpush1.bf16.msra.mxu0 %v14588_v9  ;;  %5923 = vmatpush1.bf16.msra.mxu1 %v14590_v27 }
 0x298   : > { %6085 = vmatprep.subr.bf16.mxu0 %v14097_v24  ;;  %6471 = vmatprep.subr.bf16.mxu1 %v14099_v2 }
 0x299   : > { %5426 = vmatmul.mubr.bf16.gmra.mrb[160].mxu0 %v18151_v47  ;;  %5812 = vmatmul.mubr.bf16.gmra.mrb[160].mxu1 %v18151_v47 }
 0x29a   : > { %5435 = vmatprep.mubr.bf16.mxu0 %v18152_v33  ;;  %5821 = vmatprep.mubr.bf16.mxu1 %v18152_v33 }
 0x2a1   : > { %5436 = vmatmul.mubr.bf16.gmra.mrb[164].mxu0 %v18153_v7  ;;  %5822 = vmatmul.mubr.bf16.gmra.mrb[164].mxu1 %v18153_v7 }
 0x2a2   : > { %5445 = vmatprep.mubr.bf16.mxu0 %v18154_v52  ;;  %5831 = vmatprep.mubr.bf16.mxu1 %v18154_v52 }
 0x2a9   : > { %5446 = vmatmul.mubr.bf16.gmra.mrb[168].mxu0 %v18155_v23  ;;  %5832 = vmatmul.mubr.bf16.gmra.mrb[168].mxu1 %v18155_v23 }
 0x2aa   : > { %5455 = vmatprep.mubr.bf16.mxu0 %v18157_v4  ;;  %5841 = vmatprep.mubr.bf16.mxu1 %v18157_v4 }
 0x2ac   : > { %v4768_v15 = vpop.f32.mrb[64].mxu0  ;;  %v5154_v27 = vpop.f32.mrb[64].mxu1 }
 0x2ad   : > { %v15245_v9 = vadd.f32 %v4768_v15, %v20359_v35  ;;  %v4770_v24 = vpop.f32.mrb[65].mxu0  ;;  %v15309_v2 = vadd.f32 %v5154_v27, %v20363_v18  ;;  %v5156_v33 = vpop.f32.mrb[65].mxu1 }
 0x2ae   : > { %v15246_v47 = vadd.f32 %v4770_v24, %v20367_v58  ;;  %v4772_v7 = vpop.f32.mrb[66].mxu0  ;;  %v15310_v52 = vadd.f32 %v5156_v33, %v20372_v12  ;;  %v5158_v49 = vpop.f32.mrb[66].mxu1 }
 0x2af   : > { %v15247_v23 = vadd.f32 %v4772_v7, %v20359_v35  ;;  %v4774_v60 = vpop.f32.mrb[67].mxu0  ;;  %v15311_v4 = vadd.f32 %v5158_v49, %v20363_v18  ;;  %v5160_v55 = vpop.f32.mrb[67].mxu1  ;;  %v6861_v21 = vmax.f32 %v15245_v9, 0.0  ;;  %v6863_v24 = vmax.f32 %v15309_v2, 0.0  ;;  %v18159_v7 = vld [vmem:[%s18497_s23 + $0x184] ss:$16 sps:$4 sm:$0xff]  }
 0x2b0   : > { %v15248_v15 = vadd.f32 %v4774_v60, %v20367_v58  ;;  %v15312_v27 = vadd.f32 %v5160_v55, %v20372_v12  ;;  %v6862_v29 = vmax.f32 %v15246_v47, 0.0  ;;  %v6864_v31 = vmax.f32 %v15310_v52, 0.0 }
 0x2b1   : > { %v6877_v8 = vmax.f32 %v15247_v23, 0.0  ;;  %5456 = vmatmul.mubr.bf16.gmra.mrb[172].mxu0 %v18158_v30  ;;  %v6879_v22 = vmax.f32 %v15311_v4, 0.0  ;;  %5842 = vmatmul.mubr.bf16.gmra.mrb[172].mxu1 %v18158_v30 }
 0x2b2   : > { %v6878_v33 = vmax.f32 %v15248_v15, 0.0  ;;  %5465 = vmatprep.mubr.bf16.mxu0 %v18159_v7  ;;  %v6880_v49 = vmax.f32 %v15312_v27, 0.0  ;;  %5851 = vmatprep.mubr.bf16.mxu1 %v18159_v7 }
 0x2b3   : > { %v20384_v62 = vpack.c.bf16 %v6877_v8, %v6861_v21  ;;  %v20386_v60 = vpack.c.bf16 %v6879_v22, %v6863_v24 }
 0x2b4   : > { %v20388_v9 = vpack.c.bf16 %v6878_v33, %v6862_v29  ;;  %v4778_v23 = vpop.f32.mrb[68].mxu0  ;;  %v20390_v55 = vpack.c.bf16 %v6880_v49, %v6864_v31  ;;  %v5164_v47 = vpop.f32.mrb[68].mxu1 }
 0x2b5   : > { %24545 = vst [vmem:[#allocation52_spill] sm:$0xff] %v20384_v62  ;;  %24546 = vst [vmem:[#allocation53_spill] sm:$0xff] %v20386_v60  ;;  %v15249_v2 = vadd.f32 %v4778_v23, %v20359_v35  ;;  %v4780_v4 = vpop.f32.mrb[69].mxu0  ;;  %v15313_v30 = vadd.f32 %v5164_v47, %v20363_v18  ;;  %v5166_v8 = vpop.f32.mrb[69].mxu1  ;;  %v18160_v47 = vld [vmem:[%s18497_s23 + $0x180] ss:$16 sps:$4 sm:$0xff]  }
 0x2b6   : > { %24547 = vst [vmem:[#allocation54_spill] sm:$0xff] %v20388_v9  ;;  %24548 = vst [vmem:[#allocation55_spill] sm:$0xff] %v20390_v55  ;;  %v15250_v52 = vadd.f32 %v4780_v4, %v20367_v58  ;;  %v4782_v21 = vpop.f32.mrb[70].mxu0  ;;  %v15314_v15 = vadd.f32 %v5166_v8, %v20372_v12  ;;  %v5168_v29 = vpop.f32.mrb[70].mxu1 }
 0x2b7   : > { %v15251_v22 = vadd.f32 %v4782_v21, %v20359_v35  ;;  %v4784_v27 = vpop.f32.mrb[71].mxu0  ;;  %v15315_v31 = vadd.f32 %v5168_v29, %v20363_v18  ;;  %v5170_v33 = vpop.f32.mrb[71].mxu1  ;;  %v6893_v7 = vmax.f32 %v15249_v2, 0.0  ;;  %v6895_v4 = vmax.f32 %v15313_v30, 0.0  ;;  %v18161_v21 = vld [vmem:[%s18497_s23 + $0x1a4] ss:$16 sps:$4 sm:$0xff]  }
 0x2b8   : > { %v15252_v24 = vadd.f32 %v4784_v27, %v20367_v58  ;;  %v15316_v23 = vadd.f32 %v5170_v33, %v20372_v12  ;;  %v6894_v60 = vmax.f32 %v15250_v52, 0.0  ;;  %v6896_v62 = vmax.f32 %v15314_v15, 0.0 }
 0x2b9   : > { %v6909_v49 = vmax.f32 %v15251_v22, 0.0  ;;  %5466 = vmatmul.mubr.bf16.gmra.mrb[176].mxu0 %v18160_v47  ;;  %v6911_v55 = vmax.f32 %v15315_v31, 0.0  ;;  %5852 = vmatmul.mubr.bf16.gmra.mrb[176].mxu1 %v18160_v47 }
 0x2ba   : > { %v6910_v8 = vmax.f32 %v15252_v24, 0.0  ;;  %5475 = vmatprep.mubr.bf16.mxu0 %v18161_v21  ;;  %v6912_v29 = vmax.f32 %v15316_v23, 0.0  ;;  %5861 = vmatprep.mubr.bf16.mxu1 %v18161_v21 }
 0x2bb   : > { %v20402_v9 = vpack.c.bf16 %v6909_v49, %v6893_v7  ;;  %v20404_v27 = vpack.c.bf16 %v6911_v55, %v6895_v4 }
 0x2bc   : > { %v20406_v2 = vpack.c.bf16 %v6910_v8, %v6894_v60  ;;  %v4788_v22 = vpop.f32.mrb[72].mxu0  ;;  %v20408_v33 = vpack.c.bf16 %v6912_v29, %v6896_v62  ;;  %v5174_v52 = vpop.f32.mrb[72].mxu1 }
 0x2bd   : > { %24549 = vst [vmem:[#allocation56_spill] sm:$0xff] %v20402_v9  ;;  %24550 = vst [vmem:[#allocation57_spill] sm:$0xff] %v20404_v27  ;;  %v15253_v30 = vadd.f32 %v4788_v22, %v20359_v35  ;;  %v4790_v31 = vpop.f32.mrb[73].mxu0  ;;  %v15317_v24 = vadd.f32 %v5174_v52, %v20363_v18  ;;  %v5176_v7 = vpop.f32.mrb[73].mxu1  ;;  %v18162_v52 = vld [vmem:[%s18497_s23 + $0x1a0] ss:$16 sps:$4 sm:$0xff]  }
 0x2be   : > { %24551 = vst [vmem:[#allocation58_spill] sm:$0xff] %v20406_v2  ;;  %24552 = vst [vmem:[#allocation59_spill] sm:$0xff] %v20408_v33  ;;  %v15254_v15 = vadd.f32 %v4790_v31, %v20367_v58  ;;  %v4792_v49 = vpop.f32.mrb[74].mxu0  ;;  %v15318_v23 = vadd.f32 %v5176_v7, %v20372_v12  ;;  %v5178_v60 = vpop.f32.mrb[74].mxu1 }
 0x2bf   : > { %v15255_v55 = vadd.f32 %v4792_v49, %v20359_v35  ;;  %v4794_v47 = vpop.f32.mrb[75].mxu0  ;;  %v15319_v62 = vadd.f32 %v5178_v60, %v20363_v18  ;;  %v5180_v8 = vpop.f32.mrb[75].mxu1  ;;  %v6925_v21 = vmax.f32 %v15253_v30, 0.0  ;;  %v6927_v31 = vmax.f32 %v15317_v24, 0.0  ;;  %v18163_v49 = vld [vmem:[%s18497_s23 + $0x1c4] ss:$16 sps:$4 sm:$0xff]  }
 0x2c0   : > { %v15256_v4 = vadd.f32 %v4794_v47, %v20367_v58  ;;  %v15320_v22 = vadd.f32 %v5180_v8, %v20372_v12  ;;  %v6926_v27 = vmax.f32 %v15254_v15, 0.0  ;;  %v6928_v9 = vmax.f32 %v15318_v23, 0.0 }
 0x2c1   : > { %v6941_v29 = vmax.f32 %v15255_v55, 0.0  ;;  %5476 = vmatmul.mubr.bf16.gmra.mrb[180].mxu0 %v18162_v52  ;;  %v6943_v33 = vmax.f32 %v15319_v62, 0.0  ;;  %5862 = vmatmul.mubr.bf16.gmra.mrb[180].mxu1 %v18162_v52 }
 0x2c2   : > { %v6942_v7 = vmax.f32 %v15256_v4, 0.0  ;;  %5485 = vmatprep.mubr.bf16.mxu0 %v18163_v49  ;;  %v6944_v60 = vmax.f32 %v15320_v22, 0.0  ;;  %5871 = vmatprep.mubr.bf16.mxu1 %v18163_v49 }
 0x2c3   : > { %v20420_v2 = vpack.c.bf16 %v6941_v29, %v6925_v21  ;;  %v20422_v47 = vpack.c.bf16 %v6943_v33, %v6927_v31 }
 0x2c4   : > { %v20424_v30 = vpack.c.bf16 %v6942_v7, %v6926_v27  ;;  %v4798_v55 = vpop.f32.mrb[76].mxu0  ;;  %v20426_v8 = vpack.c.bf16 %v6944_v60, %v6928_v9  ;;  %v5184_v15 = vpop.f32.mrb[76].mxu1 }
 0x2c5   : > { %24553 = vst [vmem:[#allocation60_spill] sm:$0xff] %v20420_v2  ;;  %24554 = vst [vmem:[#allocation61_spill] sm:$0xff] %v20422_v47  ;;  %v15257_v24 = vadd.f32 %v4798_v55, %v20359_v35  ;;  %v4800_v62 = vpop.f32.mrb[77].mxu0  ;;  %v15321_v4 = vadd.f32 %v5184_v15, %v20363_v18  ;;  %v5186_v21 = vpop.f32.mrb[77].mxu1  ;;  %v18164_v15 = vld [vmem:[%s18497_s23 + $0x1c0] ss:$16 sps:$4 sm:$0xff]  }
 0x2c6   : > { %24555 = vst [vmem:[#allocation62_spill] sm:$0xff] %v20424_v30  ;;  %24556 = vst [vmem:[#allocation63_spill] sm:$0xff] %v20426_v8  ;;  %v15258_v23 = vadd.f32 %v4800_v62, %v20367_v58  ;;  %v4802_v29 = vpop.f32.mrb[78].mxu0  ;;  %v15322_v22 = vadd.f32 %v5186_v21, %v20372_v12  ;;  %v5188_v27 = vpop.f32.mrb[78].mxu1 }
 0x2c7   : > { %v15259_v33 = vadd.f32 %v4802_v29, %v20359_v35  ;;  %v4804_v52 = vpop.f32.mrb[79].mxu0  ;;  %v15323_v9 = vadd.f32 %v5188_v27, %v20363_v18  ;;  %v5190_v7 = vpop.f32.mrb[79].mxu1  ;;  %v6957_v49 = vmax.f32 %v15257_v24, 0.0  ;;  %v6959_v62 = vmax.f32 %v15321_v4, 0.0  ;;  %v18165_v29 = vld [vmem:[%s18497_s23 + $0x1e4] ss:$16 sps:$4 sm:$0xff]  }
 0x2c8   : > { %v15260_v31 = vadd.f32 %v4804_v52, %v20367_v58  ;;  %v15324_v55 = vadd.f32 %v5190_v7, %v20372_v12  ;;  %v6958_v47 = vmax.f32 %v15258_v23, 0.0  ;;  %v6960_v2 = vmax.f32 %v15322_v22, 0.0 }
 0x2c9   : > { %v6973_v60 = vmax.f32 %v15259_v33, 0.0  ;;  %5486 = vmatmul.mubr.bf16.gmra.mrb[184].mxu0 %v18164_v15  ;;  %v6975_v8 = vmax.f32 %v15323_v9, 0.0  ;;  %5872 = vmatmul.mubr.bf16.gmra.mrb[184].mxu1 %v18164_v15 }
 0x2ca   : > { %v6974_v21 = vmax.f32 %v15260_v31, 0.0  ;;  %5495 = vmatprep.mubr.bf16.mxu0 %v18165_v29  ;;  %v6976_v27 = vmax.f32 %v15324_v55, 0.0  ;;  %5881 = vmatprep.mubr.bf16.mxu1 %v18165_v29 }
 0x2cb   : > { %v20438_v30 = vpack.c.bf16 %v6973_v60, %v6957_v49  ;;  %v20440_v52 = vpack.c.bf16 %v6975_v8, %v6959_v62 }
 0x2cc   : > { %v20442_v24 = vpack.c.bf16 %v6974_v21, %v6958_v47  ;;  %v4808_v33 = vpop.f32.mrb[80].mxu0  ;;  %v20444_v7 = vpack.c.bf16 %v6976_v27, %v6960_v2  ;;  %v5194_v23 = vpop.f32.mrb[80].mxu1 }
 0x2cd   : > { %24557 = vst [vmem:[#allocation64_spill] sm:$0xff] %v20438_v30  ;;  %24558 = vst [vmem:[#allocation65_spill] sm:$0xff] %v20440_v52  ;;  %v15261_v4 = vadd.f32 %v4808_v33, %v20359_v35  ;;  %v4810_v9 = vpop.f32.mrb[81].mxu0  ;;  %v15325_v31 = vadd.f32 %v5194_v23, %v20363_v18  ;;  %v5196_v49 = vpop.f32.mrb[81].mxu1  ;;  %v18166_v23 = vld [vmem:[%s18497_s23 + $0x1e0] ss:$16 sps:$4 sm:$0xff]  }
 0x2ce   : > { %24559 = vst [vmem:[#allocation66_spill] sm:$0xff] %v20442_v24  ;;  %24560 = vst [vmem:[#allocation67_spill] sm:$0xff] %v20444_v7  ;;  %v15262_v22 = vadd.f32 %v4810_v9, %v20367_v58  ;;  %v4812_v60 = vpop.f32.mrb[82].mxu0  ;;  %v15326_v55 = vadd.f32 %v5196_v49, %v20372_v12  ;;  %v5198_v47 = vpop.f32.mrb[82].mxu1 }
 0x2cf   : > { %v15263_v8 = vadd.f32 %v4812_v60, %v20359_v35  ;;  %v4814_v15 = vpop.f32.mrb[83].mxu0  ;;  %v15327_v2 = vadd.f32 %v5198_v47, %v20363_v18  ;;  %v5200_v21 = vpop.f32.mrb[83].mxu1  ;;  %v6989_v29 = vmax.f32 %v15261_v4, 0.0  ;;  %v6991_v9 = vmax.f32 %v15325_v31, 0.0  ;;  %v18167_v60 = vld [vmem:[%s18497_s23 + $0xc] ss:$16 sps:$4 sm:$0xff]  }
 0x2d0   : > { %v15264_v62 = vadd.f32 %v4814_v15, %v20367_v58  ;;  %v15328_v33 = vadd.f32 %v5200_v21, %v20372_v12  ;;  %v6990_v52 = vmax.f32 %v15262_v22, 0.0  ;;  %v6992_v30 = vmax.f32 %v15326_v55, 0.0  ;;  %v20461_v4 = vld [vmem:[%s24290_s1 + $0xb0] sm:$0xff]  ;;  %v20475_v55 = vld [vmem:[%s24290_s1 + $0xb8] sm:$0xff] }
 0x2d1   : > { %v7005_v27 = vmax.f32 %v15263_v8, 0.0  ;;  %5496 = vmatmul.mubr.bf16.gmra.mrb[188].mxu0 %v18166_v23  ;;  %v7007_v7 = vmax.f32 %v15327_v2, 0.0  ;;  %5882 = vmatmul.mubr.bf16.gmra.mrb[188].mxu1 %v18166_v23  ;;  %v20466_v31 = vld [vmem:[%s24290_s1 + $0xf0] sm:$0xff]  ;;  %v20480_v2 = vld [vmem:[%s24290_s1 + $0xf8] sm:$0xff] }
 0x2d2   : > { %v7006_v49 = vmax.f32 %v15264_v62, 0.0  ;;  %5538 = vmatprep.mubr.bf16.mxu0 %v18167_v60  ;;  %v7008_v47 = vmax.f32 %v15328_v33, 0.0  ;;  %5924 = vmatprep.mubr.bf16.mxu1 %v18167_v60  ;;  %v14115_v5 = vcombine.high %v20475_v55, %v20480_v2 }
 0x2d3   : > { %v20456_v24 = vpack.c.bf16 %v7005_v27, %v6989_v29  ;;  %v20468_v22 = vpack.c.bf16 %v7007_v7, %v6991_v9  ;;  %v20493_v27 = vld [vmem:[%s24290_s1 + $0x170] sm:$0xff] }
 0x2d4   : > { %v20470_v8 = vpack.c.bf16 %v7006_v49, %v6990_v52  ;;  %v4818_v15 = vpop.f32.mrb[84].mxu0  ;;  %v20482_v62 = vpack.c.bf16 %v7008_v47, %v6992_v30  ;;  %v5204_v29 = vpop.f32.mrb[84].mxu1  ;;  %v20488_v52 = vld [vmem:[%s24290_s1 + $0x130] sm:$0xff]  ;;  %v14112_v49 = vcombine.low %v20461_v4, %v20466_v31 }
 0x2d5   : > { %24561 = vst [vmem:[#allocation68_spill] sm:$0xff] %v20456_v24  ;;  %24562 = vst [vmem:[#allocation69_spill] sm:$0xff] %v20468_v22  ;;  %v15265_v21 = vadd.f32 %v4818_v15, %v20359_v35  ;;  %v4820_v7 = vpop.f32.mrb[85].mxu0  ;;  %v15329_v33 = vadd.f32 %v5204_v29, %v20363_v18  ;;  %v5206_v30 = vpop.f32.mrb[85].mxu1  ;;  %v14114_v29 = vcombine.low %v20475_v55, %v20480_v2  ;;  %v20526_v55 = vld [vmem:[%s24290_s1 + $0x830] sm:$0xff] }
 0x2d6   : > { %24563 = vst [vmem:[#allocation70_spill] sm:$0xff] %v20470_v8  ;;  %24564 = vst [vmem:[#allocation71_spill] sm:$0xff] %v20482_v62  ;;  %v15266_v23 = vadd.f32 %v4820_v7, %v20367_v58  ;;  %v4822_v9 = vpop.f32.mrb[86].mxu0  ;;  %v15330_v60 = vadd.f32 %v5206_v30, %v20372_v12  ;;  %v5208_v15 = vpop.f32.mrb[86].mxu1  ;;  %v14113_v62 = vcombine.high %v20461_v4, %v20466_v31  ;;  %v20531_v2 = vld [vmem:[%s24290_s1 + $0x870] sm:$0xff] }
 0x2d7   : > { %v15267_v47 = vadd.f32 %v4822_v9, %v20359_v35  ;;  %v4824_v22 = vpop.f32.mrb[87].mxu0  ;;  %v15331_v7 = vadd.f32 %v5208_v15, %v20363_v18  ;;  %v5210_v8 = vpop.f32.mrb[87].mxu1  ;;  %v14129_v30 = vcombine.high %v20488_v52, %v20493_v27  ;;  %v20514_v9 = vld [vmem:[%s24290_s1 + $0x138] sm:$0xff]  ;;  %v7021_v4 = vmax.f32 %v15265_v21, 0.0 }
 0x2d8   : > { %v15268_v24 = vadd.f32 %v4824_v22, %v20367_v58  ;;  %v7023_v31 = vmax.f32 %v15329_v33, 0.0  ;;  %v15332_v44 = vadd.f32 %v5210_v8, %v20372_v12  ;;  %v18168_v15 = vld [vmem:[%s18497_s23 + $0x8] ss:$16 sps:$4 sm:$0xff]   ;;  %v7022_v21 = vmax.f32 %v15266_v23, 0.0 }
 0x2d9   : > { %v7037_v10 = vmax.f32 %v15267_v47, 0.0  ;;  %5539 = vmatmul.mubr.bf16.vlgmr.msra.gmra.mrb[128].mxu0 %v18168_v15  ;;  %v20521_v22 = vld [vmem:[%s24290_s1 + $0x178] sm:$0xff]  ;;  %v7039_v8 = vmax.f32 %v15331_v7, 0.0  ;;  %5925 = vmatmul.mubr.bf16.vlgmr.msra.gmra.mrb[128].mxu1 %v18168_v15  ;;  %v24565_v47 = vcombine.low %v20156_v34, %v20161_v56  ;;  %v7024_v23 = vmax.f32 %v15330_v60, 0.0 }
 0x2da   : > { %v7038_v33 = vmax.f32 %v15268_v24, 0.0  ;;  %v7040_v7 = vmax.f32 %v15332_v44, 0.0  ;;  %v24567_v34 = vcombine.low %v20166_v54, %v20179_v19  ;;  %v18169_v56 = vld [vmem:[%s18497_s23 + $0x2c] ss:$16 sps:$4 sm:$0xff]  }
 0x2db   : > { %6086 = vmatpush1.bf16.msra.mxu0 %v24565_v47  ;;  %v20548_v24 = vpack.c.bf16 %v7037_v10, %v7021_v4  ;;  %5548 = vmatprep.mubr.bf16.mxu0 %v18169_v56  ;;  %v20556_v47 = vpack.c.bf16 %v7039_v8, %v7023_v31  ;;  %v14131_v10 = vcombine.high %v20514_v9, %v20521_v22  ;;  %v20568_v4 = vld [vmem:[%s24290_s1 + $0x1b0] sm:$0xff] }
 0x2dc   : > { %6472 = vmatpush1.bf16.msra.mxu1 %v24567_v34  ;;  %v20558_v14 = vpack.c.bf16 %v7038_v33, %v7022_v21  ;;  %v4828_v51 = vpop.f32.mrb[88].mxu0  ;;  %5934 = vmatprep.mubr.bf16.mxu1 %v18169_v56  ;;  %v20562_v44 = vpack.c.bf16 %v7040_v7, %v7024_v23  ;;  %v5214_v19 = vpop.f32.mrb[88].mxu1  ;;  %v20573_v31 = vld [vmem:[%s24290_s1 + $0x1f0] sm:$0xff]  ;;  %v20587_v23 = vld [vmem:[%s24290_s1 + $0x1f8] sm:$0xff] }
 0x2dd   : > { %24566 = vst [vmem:[#allocation72_spill] sm:$0xff] %v20548_v24  ;;  %24568 = vst [vmem:[#allocation73_spill] sm:$0xff] %v20556_v47  ;;  %6087 = vmatprep.subr.bf16.mxu0 %v14113_v62  ;;  %v15269_v54 = vadd.f32 %v4828_v51, %v20359_v35  ;;  %v4830_v60 = vpop.f32.mrb[89].mxu0  ;;  %6473 = vmatprep.subr.bf16.mxu1 %v14115_v5  ;;  %v15333_v62 = vadd.f32 %v5214_v19, %v20363_v18  ;;  %v5216_v8 = vpop.f32.mrb[89].mxu1  ;;  %v20582_v5 = vld [vmem:[%s24290_s1 + $0x1b8] sm:$0xff] }
 0x2de   : > { %24569 = vst [vmem:[#allocation74_spill] sm:$0xff] %v20558_v14  ;;  %24570 = vst [vmem:[#allocation75_spill] sm:$0xff] %v20562_v44  ;;  %v15270_v21 = vadd.f32 %v4830_v60, %v20367_v58  ;;  %v4832_v33 = vpop.f32.mrb[90].mxu0  ;;  %v14128_v51 = vcombine.low %v20488_v52, %v20493_v27  ;;  %v15334_v7 = vadd.f32 %v5216_v8, %v20372_v12  ;;  %v5218_v56 = vpop.f32.mrb[90].mxu1 }
 0x2df   : > { %6088 = vmatpush1.bf16.msra.mxu0 %v14112_v49  ;;  %v15271_v34 = vadd.f32 %v4832_v33, %v20359_v35  ;;  %v4834_v49 = vpop.f32.mrb[91].mxu0  ;;  %v14130_v52 = vcombine.low %v20514_v9, %v20521_v22  ;;  %v15335_v27 = vadd.f32 %v5218_v56, %v20363_v18  ;;  %v5220_v60 = vpop.f32.mrb[91].mxu1  ;;  %v14144_v8 = vcombine.low %v20568_v4, %v20573_v31  ;;  %v20606_v22 = vld [vmem:[%s24290_s1 + $0x230] sm:$0xff]  ;;  %v18171_v56 = vld [vmem:[%s18497_s23 + $0x4c] ss:$16 sps:$4 sm:$0xff]  }
 0x2e0   : > { %6474 = vmatpush1.bf16.msra.mxu1 %v14114_v29  ;;  %6089 = vmatprep.subr.bf16.mxu0 %v14129_v30  ;;  %v15272_v19 = vadd.f32 %v4834_v49, %v20367_v58  ;;  %v14145_v33 = vcombine.high %v20568_v4, %v20573_v31  ;;  %v7053_v15 = vmax.f32 %v15269_v54, 0.0  ;;  %v15336_v29 = vadd.f32 %v5220_v60, %v20372_v12  ;;  %v18170_v30 = vld [vmem:[%s18497_s23 + $0x28] ss:$16 sps:$4 sm:$0xff]  }
 0x2e1   : > { %6475 = vmatprep.subr.bf16.mxu1 %v14131_v10  ;;  %v7069_v47 = vmax.f32 %v15271_v34, 0.0  ;;  %5549 = vmatmul.mubr.bf16.gmra.mrb[132].mxu0 %v18170_v30  ;;  %v14147_v9 = vcombine.high %v20582_v5, %v20587_v23  ;;  %v20611_v10 = vld [vmem:[%s24290_s1 + $0x270] sm:$0xff]  ;;  %v7055_v4 = vmax.f32 %v15333_v62, 0.0  ;;  %v7054_v54 = vmax.f32 %v15270_v21, 0.0  ;;  %v20617_v49 = vld [vmem:[%s24290_s1 + $0x238] sm:$0xff] }
 0x2e2   : > { %v7071_v31 = vmax.f32 %v15335_v27, 0.0  ;;  %v7070_v34 = vmax.f32 %v15272_v19, 0.0  ;;  %5935 = vmatmul.mubr.bf16.gmra.mrb[132].mxu1 %v18170_v30  ;;  %5558 = vmatprep.mubr.bf16.mxu0 %v18171_v56  ;;  %v20622_v60 = vld [vmem:[%s24290_s1 + $0x278] sm:$0xff]  ;;  %v7056_v44 = vmax.f32 %v15334_v7, 0.0  ;;  %v7072_v62 = vmax.f32 %v15336_v29, 0.0 }
 0x2e3   : > { %v20624_v24 = vpack.c.bf16 %v7069_v47, %v7053_v15  ;;  %5944 = vmatprep.mubr.bf16.mxu1 %v18171_v56  ;;  %6090 = vmatpush1.bf16.msra.mxu0 %v14128_v51  ;;  %v14146_v21 = vcombine.low %v20582_v5, %v20587_v23  ;;  %v14161_v14 = vcombine.high %v20606_v22, %v20611_v10  ;;  %v20637_v15 = vld [vmem:[%s24290_s1 + $0x2b0] sm:$0xff] }
 0x2e4   : > { %v20628_v27 = vpack.c.bf16 %v7071_v31, %v7055_v4  ;;  %v20630_v19 = vpack.c.bf16 %v7070_v34, %v7054_v54  ;;  %v4838_v30 = vpop.f32.mrb[92].mxu0  ;;  %6476 = vmatpush1.bf16.msra.mxu1 %v14130_v52  ;;  %6091 = vmatprep.subr.bf16.mxu0 %v14145_v33  ;;  %v20642_v47 = vld [vmem:[%s24290_s1 + $0x2f0] sm:$0xff]  ;;  %v20644_v51 = vpack.c.bf16 %v7072_v62, %v7056_v44  ;;  %v5224_v23 = vpop.f32.mrb[92].mxu1  ;;  %v20656_v44 = vld [vmem:[%s24290_s1 + $0x2b8] sm:$0xff] }
 0x2e5   : > { %24571 = vst [vmem:[#allocation76_spill] sm:$0xff] %v20624_v24  ;;  %v15273_v5 = vadd.f32 %v4838_v30, %v20359_v35  ;;  %v4840_v7 = vpop.f32.mrb[93].mxu0  ;;  %6477 = vmatprep.subr.bf16.mxu1 %v14147_v9  ;;  %v14163_v52 = vcombine.high %v20617_v49, %v20622_v60  ;;  %v15337_v33 = vadd.f32 %v5224_v23, %v20363_v18  ;;  %v5226_v4 = vpop.f32.mrb[93].mxu1  ;;  %v20661_v9 = vld [vmem:[%s24290_s1 + $0x2f8] sm:$0xff] }
 0x2e6   : > { %24572 = vst [vmem:[#allocation77_spill] sm:$0xff] %v20628_v27  ;;  %24573 = vst [vmem:[#allocation78_spill] sm:$0xff] %v20630_v19  ;;  %v15274_v29 = vadd.f32 %v4840_v7, %v20367_v58  ;;  %v4842_v54 = vpop.f32.mrb[94].mxu0  ;;  %v14160_v31 = vcombine.low %v20606_v22, %v20611_v10  ;;  %v15338_v34 = vadd.f32 %v5226_v4, %v20372_v12  ;;  %v5228_v62 = vpop.f32.mrb[94].mxu1  ;;  %v18172_v24 = vld [vmem:[%s18497_s23 + $0x48] ss:$16 sps:$4 sm:$0xff]  }
 0x2e7   : > { %24574 = vst [vmem:[#allocation79_spill] sm:$0xff] %v20644_v51  ;;  %v15275_v56 = vadd.f32 %v4842_v54, %v20359_v35  ;;  %v4844_v30 = vpop.f32.mrb[95].mxu0  ;;  %6092 = vmatpush1.bf16.msra.mxu0 %v14144_v8  ;;  %v14162_v22 = vcombine.low %v20617_v49, %v20622_v60  ;;  %v14176_v10 = vcombine.low %v20637_v15, %v20642_v47  ;;  %v5230_v27 = vpop.f32.mrb[95].mxu1  ;;  %v7085_v54 = vmax.f32 %v15273_v5, 0.0  ;;  %v20680_v60 = vld [vmem:[%s24290_s1 + $0x330] sm:$0xff] }
 0x2e8   : > { %v15339_v23 = vadd.f32 %v5228_v62, %v20363_v18  ;;  %v15276_v7 = vadd.f32 %v4844_v30, %v20367_v58  ;;  %6478 = vmatpush1.bf16.msra.mxu1 %v14146_v21  ;;  %6093 = vmatprep.subr.bf16.mxu0 %v14161_v14  ;;  %v14177_v4 = vcombine.high %v20637_v15, %v20642_v47  ;;  %v20685_v14 = vld [vmem:[%s24290_s1 + $0x370] sm:$0xff]  ;;  %v7087_v21 = vmax.f32 %v15337_v33, 0.0  ;;  %v18173_v5 = vld [vmem:[%s18497_s23 + $0x6c] ss:$16 sps:$4 sm:$0xff]  }
 0x2e9   : > { %v7101_v51 = vmax.f32 %v15275_v56, 0.0  ;;  %v15340_v8 = vadd.f32 %v5230_v27, %v20372_v12  ;;  %5559 = vmatmul.mubr.bf16.gmra.mrb[136].mxu0 %v18172_v24  ;;  %6479 = vmatprep.subr.bf16.mxu1 %v14163_v52  ;;  %v14179_v49 = vcombine.high %v20656_v44, %v20661_v9  ;;  %v7086_v15 = vmax.f32 %v15274_v29, 0.0  ;;  %v20691_v52 = vld [vmem:[%s24290_s1 + $0x338] sm:$0xff] }
 0x2ea   : > { %v7103_v47 = vmax.f32 %v15339_v23, 0.0  ;;  %v7102_v27 = vmax.f32 %v15276_v7, 0.0  ;;  %5945 = vmatmul.mubr.bf16.gmra.mrb[136].mxu1 %v18172_v24  ;;  %5568 = vmatprep.mubr.bf16.mxu0 %v18173_v5  ;;  %v20696_v56 = vld [vmem:[%s24290_s1 + $0x378] sm:$0xff]  ;;  %v7088_v62 = vmax.f32 %v15338_v34, 0.0  ;;  %v14178_v24 = vcombine.low %v20656_v44, %v20661_v9 }
 0x2eb   : > { %v20698_v30 = vpack.c.bf16 %v7101_v51, %v7085_v54  ;;  %v7104_v33 = vmax.f32 %v15340_v8, 0.0  ;;  %5954 = vmatprep.mubr.bf16.mxu1 %v18173_v5  ;;  %6094 = vmatpush1.bf16.msra.mxu0 %v14160_v31  ;;  %v14193_v19 = vcombine.high %v20680_v60, %v20685_v14  ;;  %v20711_v51 = vld [vmem:[%s24290_s1 + $0x3b0] sm:$0xff] }
 0x2ec   : > { %v20702_v29 = vpack.c.bf16 %v7103_v47, %v7087_v21  ;;  %v20704_v23 = vpack.c.bf16 %v7102_v27, %v7086_v15  ;;  %v4848_v7 = vpop.f32.mrb[96].mxu0  ;;  %6480 = vmatpush1.bf16.msra.mxu1 %v14162_v22  ;;  %6095 = vmatprep.subr.bf16.mxu0 %v14177_v4  ;;  %v20716_v31 = vld [vmem:[%s24290_s1 + $0x3f0] sm:$0xff]  ;;  %v5234_v34 = vpop.f32.mrb[96].mxu1  ;;  %v14195_v4 = vcombine.high %v20691_v52, %v20696_v56  ;;  %v20730_v27 = vld [vmem:[%s24290_s1 + $0x3b8] sm:$0xff] }
 0x2ed   : > { %24575 = vst [vmem:[#allocation80_spill] sm:$0xff] %v20698_v30  ;;  %v20718_v44 = vpack.c.bf16 %v7104_v33, %v7088_v62  ;;  %v15277_v9 = vadd.f32 %v4848_v7, %v20359_v35  ;;  %v4850_v22 = vpop.f32.mrb[97].mxu0  ;;  %6481 = vmatprep.subr.bf16.mxu1 %v14179_v49  ;;  %v15341_v54 = vadd.f32 %v5234_v34, %v20363_v18  ;;  %v5236_v21 = vpop.f32.mrb[97].mxu1  ;;  %v20735_v49 = vld [vmem:[%s24290_s1 + $0x3f8] sm:$0xff] }
 0x2ee   : > { %24576 = vst [vmem:[#allocation81_spill] sm:$0xff] %v20702_v29  ;;  %24577 = vst [vmem:[#allocation82_spill] sm:$0xff] %v20704_v23  ;;  %v15278_v8 = vadd.f32 %v4850_v22, %v20367_v58  ;;  %v4852_v15 = vpop.f32.mrb[98].mxu0  ;;  %v14192_v47 = vcombine.low %v20680_v60, %v20685_v14  ;;  %v15342_v5 = vadd.f32 %v5236_v21, %v20372_v12  ;;  %v5238_v33 = vpop.f32.mrb[98].mxu1  ;;  %v18174_v30 = vld [vmem:[%s18497_s23 + $0x68] ss:$16 sps:$4 sm:$0xff]  }
 0x2ef   : > { %24578 = vst [vmem:[#allocation83_spill] sm:$0xff] %v20718_v44  ;;  %v15279_v62 = vadd.f32 %v4852_v15, %v20359_v35  ;;  %v4854_v7 = vpop.f32.mrb[99].mxu0  ;;  %6096 = vmatpush1.bf16.msra.mxu0 %v14176_v10  ;;  %v14194_v60 = vcombine.low %v20691_v52, %v20696_v56  ;;  %v14208_v14 = vcombine.low %v20711_v51, %v20716_v31  ;;  %v5240_v29 = vpop.f32.mrb[99].mxu1  ;;  %v7117_v15 = vmax.f32 %v15277_v9, 0.0  ;;  %v20754_v56 = vld [vmem:[%s24290_s1 + $0x430] sm:$0xff] }
 0x2f0   : > { %v15343_v34 = vadd.f32 %v5238_v33, %v20363_v18  ;;  %v15280_v22 = vadd.f32 %v4854_v7, %v20367_v58  ;;  %6482 = vmatpush1.bf16.msra.mxu1 %v14178_v24  ;;  %6097 = vmatprep.subr.bf16.mxu0 %v14193_v19  ;;  %v14209_v21 = vcombine.high %v20711_v51, %v20716_v31  ;;  %v20759_v19 = vld [vmem:[%s24290_s1 + $0x470] sm:$0xff]  ;;  %v7119_v24 = vmax.f32 %v15341_v54, 0.0  ;;  %v18175_v9 = vld [vmem:[%s18497_s23 + $0x8c] ss:$16 sps:$4 sm:$0xff]  }
 0x2f1   : > { %v7133_v44 = vmax.f32 %v15279_v62, 0.0  ;;  %v15344_v10 = vadd.f32 %v5240_v29, %v20372_v12  ;;  %5569 = vmatmul.mubr.bf16.gmra.mrb[140].mxu0 %v18174_v30  ;;  %6483 = vmatprep.subr.bf16.mxu1 %v14195_v4  ;;  %v14211_v52 = vcombine.high %v20730_v27, %v20735_v49  ;;  %v7118_v51 = vmax.f32 %v15278_v8, 0.0  ;;  %v20765_v4 = vld [vmem:[%s24290_s1 + $0x438] sm:$0xff] }
 0x2f2   : > { %v7135_v31 = vmax.f32 %v15343_v34, 0.0  ;;  %v7134_v29 = vmax.f32 %v15280_v22, 0.0  ;;  %5955 = vmatmul.mubr.bf16.gmra.mrb[140].mxu1 %v18174_v30  ;;  %5578 = vmatprep.mubr.bf16.mxu0 %v18175_v9  ;;  %v20770_v62 = vld [vmem:[%s24290_s1 + $0x478] sm:$0xff]  ;;  %v7120_v33 = vmax.f32 %v15342_v5, 0.0  ;;  %v14210_v30 = vcombine.low %v20730_v27, %v20735_v49 }
 0x2f3   : > { %v20772_v7 = vpack.c.bf16 %v7133_v44, %v7117_v15  ;;  %v7136_v54 = vmax.f32 %v15344_v10, 0.0  ;;  %5964 = vmatprep.mubr.bf16.mxu1 %v18175_v9  ;;  %6098 = vmatpush1.bf16.msra.mxu0 %v14192_v47  ;;  %v14225_v23 = vcombine.high %v20754_v56, %v20759_v19  ;;  %v20785_v44 = vld [vmem:[%s24290_s1 + $0x4b0] sm:$0xff] }
 0x2f4   : > { %v20776_v8 = vpack.c.bf16 %v7135_v31, %v7119_v24  ;;  %v20778_v34 = vpack.c.bf16 %v7134_v29, %v7118_v51  ;;  %v4858_v22 = vpop.f32.mrb[100].mxu0  ;;  %6484 = vmatpush1.bf16.msra.mxu1 %v14194_v60  ;;  %6099 = vmatprep.subr.bf16.mxu0 %v14209_v21  ;;  %v20790_v47 = vld [vmem:[%s24290_s1 + $0x4f0] sm:$0xff]  ;;  %v5244_v5 = vpop.f32.mrb[100].mxu1  ;;  %v14227_v21 = vcombine.high %v20765_v4, %v20770_v62  ;;  %v20804_v29 = vld [vmem:[%s24290_s1 + $0x4b8] sm:$0xff] }
 0x2f5   : > { %24579 = vst [vmem:[#allocation84_spill] sm:$0xff] %v20772_v7  ;;  %v20792_v27 = vpack.c.bf16 %v7136_v54, %v7120_v33  ;;  %v15281_v49 = vadd.f32 %v4858_v22, %v20359_v35  ;;  %v4860_v60 = vpop.f32.mrb[101].mxu0  ;;  %6485 = vmatprep.subr.bf16.mxu1 %v14211_v52  ;;  %v15345_v15 = vadd.f32 %v5244_v5, %v20363_v18  ;;  %v5246_v24 = vpop.f32.mrb[101].mxu1  ;;  %v20809_v52 = vld [vmem:[%s24290_s1 + $0x4f8] sm:$0xff] }
 0x2f6   : > { %24580 = vst [vmem:[#allocation85_spill] sm:$0xff] %v20776_v8  ;;  %24581 = vst [vmem:[#allocation86_spill] sm:$0xff] %v20778_v34  ;;  %v15282_v10 = vadd.f32 %v4860_v60, %v20367_v58  ;;  %v4862_v51 = vpop.f32.mrb[102].mxu0  ;;  %v14224_v31 = vcombine.low %v20754_v56, %v20759_v19  ;;  %v15346_v9 = vadd.f32 %v5246_v24, %v20372_v12  ;;  %v5248_v54 = vpop.f32.mrb[102].mxu1  ;;  %v18176_v7 = vld [vmem:[%s18497_s23 + $0x88] ss:$16 sps:$4 sm:$0xff]  }
 0x2f7   : > { %24582 = vst [vmem:[#allocation87_spill] sm:$0xff] %v20792_v27  ;;  %v15283_v33 = vadd.f32 %v4862_v51, %v20359_v35  ;;  %v4864_v22 = vpop.f32.mrb[103].mxu0  ;;  %6100 = vmatpush1.bf16.msra.mxu0 %v14208_v14  ;;  %v14226_v56 = vcombine.low %v20765_v4, %v20770_v62  ;;  %v14240_v19 = vcombine.low %v20785_v44, %v20790_v47  ;;  %v5250_v8 = vpop.f32.mrb[103].mxu1  ;;  %v7149_v51 = vmax.f32 %v15281_v49, 0.0  ;;  %v20828_v62 = vld [vmem:[%s24290_s1 + $0x530] sm:$0xff] }
 0x2f8   : > { %v15347_v5 = vadd.f32 %v5248_v54, %v20363_v18  ;;  %v15284_v60 = vadd.f32 %v4864_v22, %v20367_v58  ;;  %6486 = vmatpush1.bf16.msra.mxu1 %v14210_v30  ;;  %6101 = vmatprep.subr.bf16.mxu0 %v14225_v23  ;;  %v14241_v24 = vcombine.high %v20785_v44, %v20790_v47  ;;  %v20833_v23 = vld [vmem:[%s24290_s1 + $0x570] sm:$0xff]  ;;  %v7151_v30 = vmax.f32 %v15345_v15, 0.0  ;;  %v18177_v49 = vld [vmem:[%s18497_s23 + $0xac] ss:$16 sps:$4 sm:$0xff]  }
 0x2f9   : > { %v7165_v27 = vmax.f32 %v15283_v33, 0.0  ;;  %v15348_v14 = vadd.f32 %v5250_v8, %v20372_v12  ;;  %5579 = vmatmul.mubr.bf16.gmra.mrb[144].mxu0 %v18176_v7  ;;  %6487 = vmatprep.subr.bf16.mxu1 %v14227_v21  ;;  %v14243_v4 = vcombine.high %v20804_v29, %v20809_v52  ;;  %v7150_v44 = vmax.f32 %v15282_v10, 0.0  ;;  %v20839_v21 = vld [vmem:[%s24290_s1 + $0x538] sm:$0xff] }
 0x2fa   : > { %v7167_v47 = vmax.f32 %v15347_v5, 0.0  ;;  %v7166_v8 = vmax.f32 %v15284_v60, 0.0  ;;  %5965 = vmatmul.mubr.bf16.gmra.mrb[144].mxu1 %v18176_v7  ;;  %5588 = vmatprep.mubr.bf16.mxu0 %v18177_v49  ;;  %v20844_v33 = vld [vmem:[%s24290_s1 + $0x578] sm:$0xff]  ;;  %v7152_v54 = vmax.f32 %v15346_v9, 0.0  ;;  %v14242_v7 = vcombine.low %v20804_v29, %v20809_v52 }
 0x2fb   : > { %v20846_v22 = vpack.c.bf16 %v7165_v27, %v7149_v51  ;;  %v7168_v15 = vmax.f32 %v15348_v14, 0.0  ;;  %5974 = vmatprep.mubr.bf16.mxu1 %v18177_v49  ;;  %6102 = vmatpush1.bf16.msra.mxu0 %v14224_v31  ;;  %v14257_v34 = vcombine.high %v20828_v62, %v20833_v23  ;;  %v20859_v27 = vld [vmem:[%s24290_s1 + $0x5b0] sm:$0xff] }
 0x2fc   : > { %v20850_v10 = vpack.c.bf16 %v7167_v47, %v7151_v30  ;;  %v20852_v5 = vpack.c.bf16 %v7166_v8, %v7150_v44  ;;  %v4868_v60 = vpop.f32.mrb[104].mxu0  ;;  %6488 = vmatpush1.bf16.msra.mxu1 %v14226_v56  ;;  %6103 = vmatprep.subr.bf16.mxu0 %v14241_v24  ;;  %v20864_v31 = vld [vmem:[%s24290_s1 + $0x5f0] sm:$0xff]  ;;  %v5254_v9 = vpop.f32.mrb[104].mxu1  ;;  %v14259_v24 = vcombine.high %v20839_v21, %v20844_v33  ;;  %v20878_v8 = vld [vmem:[%s24290_s1 + $0x5b8] sm:$0xff] }
 0x2fd   : > { %24583 = vst [vmem:[#allocation88_spill] sm:$0xff] %v20846_v22  ;;  %v20866_v29 = vpack.c.bf16 %v7168_v15, %v7152_v54  ;;  %v15285_v52 = vadd.f32 %v4868_v60, %v20359_v35  ;;  %v4870_v56 = vpop.f32.mrb[105].mxu0  ;;  %6489 = vmatprep.subr.bf16.mxu1 %v14243_v4  ;;  %v15349_v51 = vadd.f32 %v5254_v9, %v20363_v18  ;;  %v5256_v30 = vpop.f32.mrb[105].mxu1  ;;  %v20883_v4 = vld [vmem:[%s24290_s1 + $0x5f8] sm:$0xff] }
 0x2fe   : > { %24584 = vst [vmem:[#allocation89_spill] sm:$0xff] %v20850_v10  ;;  %24585 = vst [vmem:[#allocation90_spill] sm:$0xff] %v20852_v5  ;;  %v15286_v14 = vadd.f32 %v4870_v56, %v20367_v58  ;;  %v4872_v44 = vpop.f32.mrb[106].mxu0  ;;  %v14256_v47 = vcombine.low %v20828_v62, %v20833_v23  ;;  %v15350_v49 = vadd.f32 %v5256_v30, %v20372_v12  ;;  %v5258_v15 = vpop.f32.mrb[106].mxu1  ;;  %v18178_v22 = vld [vmem:[%s18497_s23 + $0xa8] ss:$16 sps:$4 sm:$0xff]  }
 0x2ff   : > { %24586 = vst [vmem:[#allocation91_spill] sm:$0xff] %v20866_v29  ;;  %v15287_v54 = vadd.f32 %v4872_v44, %v20359_v35  ;;  %v4874_v60 = vpop.f32.mrb[107].mxu0  ;;  %6104 = vmatpush1.bf16.msra.mxu0 %v14240_v19  ;;  %v14258_v62 = vcombine.low %v20839_v21, %v20844_v33  ;;  %v14272_v23 = vcombine.low %v20859_v27, %v20864_v31  ;;  %v5260_v10 = vpop.f32.mrb[107].mxu1  ;;  %v7181_v44 = vmax.f32 %v15285_v52, 0.0  ;;  %v20902_v33 = vld [vmem:[%s24290_s1 + $0x630] sm:$0xff] }
 0x300   : > { %v15351_v9 = vadd.f32 %v5258_v15, %v20363_v18  ;;  %v15288_v56 = vadd.f32 %v4874_v60, %v20367_v58  ;;  %6490 = vmatpush1.bf16.msra.mxu1 %v14242_v7  ;;  %6105 = vmatprep.subr.bf16.mxu0 %v14257_v34  ;;  %v14273_v30 = vcombine.high %v20859_v27, %v20864_v31  ;;  %v20907_v34 = vld [vmem:[%s24290_s1 + $0x670] sm:$0xff]  ;;  %v7183_v7 = vmax.f32 %v15349_v51, 0.0  ;;  %v18179_v52 = vld [vmem:[%s18497_s23 + $0xcc] ss:$16 sps:$4 sm:$0xff]  }
 0x301   : > { %v7197_v29 = vmax.f32 %v15287_v54, 0.0  ;;  %v15352_v19 = vadd.f32 %v5260_v10, %v20372_v12  ;;  %5589 = vmatmul.mubr.bf16.gmra.mrb[148].mxu0 %v18178_v22  ;;  %6491 = vmatprep.subr.bf16.mxu1 %v14259_v24  ;;  %v14275_v21 = vcombine.high %v20878_v8, %v20883_v4  ;;  %v7182_v27 = vmax.f32 %v15286_v14, 0.0  ;;  %v20913_v24 = vld [vmem:[%s24290_s1 + $0x638] sm:$0xff] }
 0x302   : > { %v7199_v31 = vmax.f32 %v15351_v9, 0.0  ;;  %v7198_v10 = vmax.f32 %v15288_v56, 0.0  ;;  %5975 = vmatmul.mubr.bf16.gmra.mrb[148].mxu1 %v18178_v22  ;;  %5598 = vmatprep.mubr.bf16.mxu0 %v18179_v52  ;;  %v20918_v54 = vld [vmem:[%s24290_s1 + $0x678] sm:$0xff]  ;;  %v7184_v15 = vmax.f32 %v15350_v49, 0.0  ;;  %v14274_v22 = vcombine.low %v20878_v8, %v20883_v4 }
 0x303   : > { %v20920_v60 = vpack.c.bf16 %v7197_v29, %v7181_v44  ;;  %v7200_v51 = vmax.f32 %v15352_v19, 0.0  ;;  %5984 = vmatprep.mubr.bf16.mxu1 %v18179_v52  ;;  %6106 = vmatpush1.bf16.msra.mxu0 %v14256_v47  ;;  %v14289_v5 = vcombine.high %v20902_v33, %v20907_v34  ;;  %v20933_v29 = vld [vmem:[%s24290_s1 + $0x6b0] sm:$0xff] }
 0x304   : > { %v20924_v14 = vpack.c.bf16 %v7199_v31, %v7183_v7  ;;  %v20926_v9 = vpack.c.bf16 %v7198_v10, %v7182_v27  ;;  %v4878_v56 = vpop.f32.mrb[108].mxu0  ;;  %6492 = vmatpush1.bf16.msra.mxu1 %v14258_v62  ;;  %6107 = vmatprep.subr.bf16.mxu0 %v14273_v30  ;;  %v20938_v47 = vld [vmem:[%s24290_s1 + $0x6f0] sm:$0xff]  ;;  %v5264_v49 = vpop.f32.mrb[108].mxu1  ;;  %v14291_v30 = vcombine.high %v20913_v24, %v20918_v54  ;;  %v20952_v10 = vld [vmem:[%s24290_s1 + $0x6b8] sm:$0xff] }
 0x305   : > { %24587 = vst [vmem:[#allocation92_spill] sm:$0xff] %v20920_v60  ;;  %v20940_v8 = vpack.c.bf16 %v7200_v51, %v7184_v15  ;;  %v15289_v4 = vadd.f32 %v4878_v56, %v20359_v35  ;;  %v4880_v62 = vpop.f32.mrb[109].mxu0  ;;  %6493 = vmatprep.subr.bf16.mxu1 %v14275_v21  ;;  %v15353_v44 = vadd.f32 %v5264_v49, %v20363_v18  ;;  %v5266_v7 = vpop.f32.mrb[109].mxu1  ;;  %v20957_v21 = vld [vmem:[%s24290_s1 + $0x6f8] sm:$0xff] }
 0x306   : > { %24588 = vst [vmem:[#allocation93_spill] sm:$0xff] %v20924_v14  ;;  %24589 = vst [vmem:[#allocation94_spill] sm:$0xff] %v20926_v9  ;;  %v15290_v19 = vadd.f32 %v4880_v62, %v20367_v58  ;;  %v4882_v27 = vpop.f32.mrb[110].mxu0  ;;  %v14288_v31 = vcombine.low %v20902_v33, %v20907_v34  ;;  %v15354_v52 = vadd.f32 %v5266_v7, %v20372_v12  ;;  %v5268_v51 = vpop.f32.mrb[110].mxu1  ;;  %v18180_v60 = vld [vmem:[%s18497_s23 + $0xc8] ss:$16 sps:$4 sm:$0xff]  }
 0x307   : > { %24590 = vst [vmem:[#allocation95_spill] sm:$0xff] %v20940_v8  ;;  %v15291_v15 = vadd.f32 %v4882_v27, %v20359_v35  ;;  %v4884_v56 = vpop.f32.mrb[111].mxu0  ;;  %6108 = vmatpush1.bf16.msra.mxu0 %v14272_v23  ;;  %v14290_v33 = vcombine.low %v20913_v24, %v20918_v54  ;;  %v14304_v34 = vcombine.low %v20933_v29, %v20938_v47  ;;  %v5270_v14 = vpop.f32.mrb[111].mxu1  ;;  %v7213_v27 = vmax.f32 %v15289_v4, 0.0  ;;  %v20976_v54 = vld [vmem:[%s24290_s1 + $0x730] sm:$0xff] }
 0x308   : > { %v15355_v49 = vadd.f32 %v5268_v51, %v20363_v18  ;;  %v15292_v62 = vadd.f32 %v4884_v56, %v20367_v58  ;;  %6494 = vmatpush1.bf16.msra.mxu1 %v14274_v22  ;;  %6109 = vmatprep.subr.bf16.mxu0 %v14289_v5  ;;  %v14305_v7 = vcombine.high %v20933_v29, %v20938_v47  ;;  %v20981_v5 = vld [vmem:[%s24290_s1 + $0x770] sm:$0xff]  ;;  %v7215_v22 = vmax.f32 %v15353_v44, 0.0  ;;  %v18181_v4 = vld [vmem:[%s18497_s23 + $0xec] ss:$16 sps:$4 sm:$0xff]  }
 0x309   : > { %v7229_v8 = vmax.f32 %v15291_v15, 0.0  ;;  %v15356_v23 = vadd.f32 %v5270_v14, %v20372_v12  ;;  %5599 = vmatmul.mubr.bf16.gmra.mrb[152].mxu0 %v18180_v60  ;;  %6495 = vmatprep.subr.bf16.mxu1 %v14291_v30  ;;  %v14307_v24 = vcombine.high %v20952_v10, %v20957_v21  ;;  %v7214_v29 = vmax.f32 %v15290_v19, 0.0  ;;  %v20987_v30 = vld [vmem:[%s24290_s1 + $0x738] sm:$0xff] }
 0x30a   : > { %v7231_v47 = vmax.f32 %v15355_v49, 0.0  ;;  %v7230_v14 = vmax.f32 %v15292_v62, 0.0  ;;  %5985 = vmatmul.mubr.bf16.gmra.mrb[152].mxu1 %v18180_v60  ;;  %5608 = vmatprep.mubr.bf16.mxu0 %v18181_v4  ;;  %v20992_v15 = vld [vmem:[%s24290_s1 + $0x778] sm:$0xff]  ;;  %v7216_v51 = vmax.f32 %v15354_v52, 0.0  ;;  %v14306_v60 = vcombine.low %v20952_v10, %v20957_v21 }
 0x30b   : > { %v20994_v56 = vpack.c.bf16 %v7229_v8, %v7213_v27  ;;  %v7232_v44 = vmax.f32 %v15356_v23, 0.0  ;;  %5994 = vmatprep.mubr.bf16.mxu1 %v18181_v4  ;;  %6110 = vmatpush1.bf16.msra.mxu0 %v14288_v31  ;;  %v14321_v9 = vcombine.high %v20976_v54, %v20981_v5  ;;  %v21007_v8 = vld [vmem:[%s24290_s1 + $0x7b0] sm:$0xff] }
 0x30c   : > { %v20998_v19 = vpack.c.bf16 %v7231_v47, %v7215_v22  ;;  %v21000_v49 = vpack.c.bf16 %v7230_v14, %v7214_v29  ;;  %v4888_v62 = vpop.f32.mrb[112].mxu0  ;;  %6496 = vmatpush1.bf16.msra.mxu1 %v14290_v33  ;;  %6111 = vmatprep.subr.bf16.mxu0 %v14305_v7  ;;  %v21012_v31 = vld [vmem:[%s24290_s1 + $0x7f0] sm:$0xff]  ;;  %v5274_v52 = vpop.f32.mrb[112].mxu1  ;;  %v14323_v7 = vcombine.high %v20987_v30, %v20992_v15  ;;  %v540_v14 = vld [vmem:[%s24290_s1 + $0x7b8] sm:$0xff] }
 0x30d   : > { %24591 = vst [vmem:[#allocation96_spill] sm:$0xff] %v20994_v56  ;;  %v21014_v10 = vpack.c.bf16 %v7232_v44, %v7216_v51  ;;  %v15293_v21 = vadd.f32 %v4888_v62, %v20359_v35  ;;  %v4890_v33 = vpop.f32.mrb[113].mxu0  ;;  %6497 = vmatprep.subr.bf16.mxu1 %v14307_v24  ;;  %v15357_v27 = vadd.f32 %v5274_v52, %v20363_v18  ;;  %v5276_v22 = vpop.f32.mrb[113].mxu1  ;;  %v548_v24 = vld [vmem:[%s24290_s1 + $0x7f8] sm:$0xff] }
 0x30e   : > { %24592 = vst [vmem:[#allocation97_spill] sm:$0xff] %v20998_v19  ;;  %24593 = vst [vmem:[#allocation98_spill] sm:$0xff] %v21000_v49  ;;  %v15294_v23 = vadd.f32 %v4890_v33, %v20367_v58  ;;  %v4892_v29 = vpop.f32.mrb[114].mxu0  ;;  %v14320_v47 = vcombine.low %v20976_v54, %v20981_v5  ;;  %v15358_v4 = vadd.f32 %v5276_v22, %v20372_v12  ;;  %v5278_v44 = vpop.f32.mrb[114].mxu1  ;;  %v18182_v56 = vld [vmem:[%s18497_s23 + $0xe8] ss:$16 sps:$4 sm:$0xff]  }
 0x30f   : > { %24594 = vst [vmem:[#allocation99_spill] sm:$0xff] %v21014_v10  ;;  %v15295_v51 = vadd.f32 %v4892_v29, %v20359_v35  ;;  %v4894_v62 = vpop.f32.mrb[115].mxu0  ;;  %6112 = vmatpush1.bf16.msra.mxu0 %v14304_v34  ;;  %v14322_v52 = vcombine.low %v20987_v30, %v20992_v15  ;;  %v14336_v54 = vcombine.low %v21007_v8, %v21012_v31  ;;  %v5280_v19 = vpop.f32.mrb[115].mxu1  ;;  %v7245_v29 = vmax.f32 %v15293_v21, 0.0 }
 0x310   : > { %v15359_v5 = vadd.f32 %v5278_v44, %v20363_v18  ;;  %v15296_v33 = vadd.f32 %v4894_v62, %v20367_v58  ;;  %6498 = vmatpush1.bf16.msra.mxu1 %v14306_v60  ;;  %6113 = vmatprep.subr.bf16.mxu0 %v14321_v9  ;;  %v14337_v22 = vcombine.high %v21007_v8, %v21012_v31  ;;  %v7247_v15 = vmax.f32 %v15357_v27, 0.0  ;;  %v18183_v62 = vld [vmem:[%s18497_s23 + $0x10c] ss:$16 sps:$4 sm:$0xff]  }
 0x311   : > { %v7261_v10 = vmax.f32 %v15295_v51, 0.0  ;;  %v15360_v34 = vadd.f32 %v5280_v19, %v20372_v12  ;;  %5609 = vmatmul.mubr.bf16.gmra.mrb[156].mxu0 %v18182_v56  ;;  %6499 = vmatprep.subr.bf16.mxu1 %v14323_v7  ;;  %v14339_v30 = vcombine.high %v540_v14, %v548_v24  ;;  %v7246_v49 = vmax.f32 %v15294_v23, 0.0 }
 0x312   : > { %v7263_v44 = vmax.f32 %v15359_v5, 0.0  ;;  %v7262_v41 = vmax.f32 %v15296_v33, 0.0  ;;  %5995 = vmatmul.mubr.bf16.gmra.mrb[156].mxu1 %v18182_v56  ;;  %5618 = vmatprep.mubr.bf16.mxu0 %v18183_v62  ;;  %v7248_v60 = vmax.f32 %v15358_v4, 0.0  ;;  %v14338_v8 = vcombine.low %v540_v14, %v548_v24 }
 0x313   : > { %v21042_v9 = vpack.c.bf16 %v7261_v10, %v7245_v29  ;;  %v7264_v45 = vmax.f32 %v15360_v34, 0.0  ;;  %6004 = vmatprep.mubr.bf16.mxu1 %v18183_v62  ;;  %6114 = vmatpush1.bf16.msra.mxu0 %v14320_v47  ;;  %v14353_v7 = vcombine.high %v20526_v55, %v20531_v2  ;;  %v14355_v47 = vcombine.high %v20541_v25, %v20546_v28 }
 0x314   : > { %v21044_v31 = vpack.c.bf16 %v7263_v44, %v7247_v15  ;;  %v21046_v19 = vpack.c.bf16 %v7262_v41, %v7246_v49  ;;  %v4898_v21 = vpop.f32.mrb[116].mxu0  ;;  %6500 = vmatpush1.bf16.msra.mxu1 %v14322_v52  ;;  %6115 = vmatprep.subr.bf16.mxu0 %v14337_v22  ;;  %v5284_v10 = vpop.f32.mrb[116].mxu1  ;;  %v18184_v15 = vld [vmem:[%s18497_s23 + $0x108] ss:$16 sps:$4 sm:$0xff]  }
 0x315   : > { %v21050_v56 = vpack.c.bf16 %v7264_v45, %v7248_v60  ;;  %v15297_v27 = vadd.f32 %v4898_v21, %v20359_v35  ;;  %v4900_v23 = vpop.f32.mrb[117].mxu0  ;;  %6501 = vmatprep.subr.bf16.mxu1 %v14339_v30  ;;  %v15361_v14 = vadd.f32 %v5284_v10, %v20363_v18  ;;  %v5286_v49 = vpop.f32.mrb[117].mxu1 }
 0x316   : > { %v15298_v41 = vadd.f32 %v4900_v23, %v20367_v58  ;;  %v4902_v24 = vpop.f32.mrb[118].mxu0  ;;  %v15362_v4 = vadd.f32 %v5286_v49, %v20372_v12  ;;  %v5288_v51 = vpop.f32.mrb[118].mxu1 }
 0x317   : > { %v15299_v45 = vadd.f32 %v4902_v24, %v20359_v35  ;;  %v4904_v52 = vpop.f32.mrb[119].mxu0  ;;  %6116 = vmatpush1.bf16.msra.mxu0 %v14336_v54  ;;  %v15363_v5 = vadd.f32 %v5288_v51, %v20363_v18  ;;  %v5290_v22 = vpop.f32.mrb[119].mxu1  ;;  %v7277_v29 = vmax.f32 %v15297_v27, 0.0  ;;  %v7279_v44 = vmax.f32 %v15361_v14, 0.0  ;;  %v18185_v54 = vld [vmem:[%s18497_s23 + $0x12c] ss:$16 sps:$4 sm:$0xff]  }
 0x318   : > { %v15300_v33 = vadd.f32 %v4904_v52, %v20367_v58  ;;  %6502 = vmatpush1.bf16.msra.mxu1 %v14338_v8  ;;  %6278 = vmatprep.subr.bf16.mxu0 %v14353_v7  ;;  %v15364_v30 = vadd.f32 %v5290_v22, %v20372_v12  ;;  %v7278_v62 = vmax.f32 %v15298_v41, 0.0  ;;  %v7280_v10 = vmax.f32 %v15362_v4, 0.0 }
 0x319   : > { %v7293_v34 = vmax.f32 %v15299_v45, 0.0  ;;  %5619 = vmatmul.mubr.bf16.gmra.mrb[160].mxu0 %v18184_v15  ;;  %6664 = vmatprep.subr.bf16.mxu1 %v14355_v47  ;;  %v7295_v60 = vmax.f32 %v15363_v5, 0.0 }
 0x31a   : > { %v7294_v21 = vmax.f32 %v15300_v33, 0.0  ;;  %6005 = vmatmul.mubr.bf16.gmra.mrb[160].mxu1 %v18184_v15  ;;  %5628 = vmatprep.mubr.bf16.mxu0 %v18185_v54  ;;  %v7296_v49 = vmax.f32 %v15364_v30, 0.0 }
 0x31b   : > { %v21064_v23 = vpack.c.bf16 %v7293_v34, %v7277_v29  ;;  %6014 = vmatprep.mubr.bf16.mxu1 %v18185_v54  ;;  %v21066_v8 = vpack.c.bf16 %v7295_v60, %v7279_v44 }
 0x31c   : > { %v21068_v7 = vpack.c.bf16 %v7294_v21, %v7278_v62  ;;  %v4908_v27 = vpop.f32.mrb[120].mxu0  ;;  %v21070_v24 = vpack.c.bf16 %v7296_v49, %v7280_v10  ;;  %v5294_v14 = vpop.f32.mrb[120].mxu1  ;;  %v18186_v21 = vld [vmem:[%s18497_s23 + $0x128] ss:$16 sps:$4 sm:$0xff]  }
 0x31d   : > { %v15301_v47 = vadd.f32 %v4908_v27, %v20359_v35  ;;  %v4910_v41 = vpop.f32.mrb[121].mxu0  ;;  %v15365_v45 = vadd.f32 %v5294_v14, %v20363_v18  ;;  %v5296_v51 = vpop.f32.mrb[121].mxu1  ;;  %v18187_v14 = vld [vmem:[%s18497_s23 + $0x14c] ss:$16 sps:$4 sm:$0xff]  }
 0x31e   : > { %v15302_v4 = vadd.f32 %v4910_v41, %v20367_v58  ;;  %v4912_v52 = vpop.f32.mrb[122].mxu0  ;;  %v15366_v5 = vadd.f32 %v5296_v51, %v20372_v12  ;;  %v5298_v22 = vpop.f32.mrb[122].mxu1 }
 0x31f   : > { %v15303_v33 = vadd.f32 %v4912_v52, %v20359_v35  ;;  %v4914_v29 = vpop.f32.mrb[123].mxu0  ;;  %v15367_v34 = vadd.f32 %v5298_v22, %v20363_v18  ;;  %v5300_v15 = vpop.f32.mrb[123].mxu1  ;;  %v7309_v44 = vmax.f32 %v15301_v47, 0.0  ;;  %v7311_v54 = vmax.f32 %v15365_v45, 0.0 }
 0x320   : > { %v15304_v30 = vadd.f32 %v4914_v29, %v20367_v58  ;;  %v15368_v60 = vadd.f32 %v5300_v15, %v20372_v12  ;;  %v7310_v10 = vmax.f32 %v15302_v4, 0.0  ;;  %v7312_v41 = vmax.f32 %v15366_v5, 0.0 }
 0x321   : > { %v7325_v62 = vmax.f32 %v15303_v33, 0.0  ;;  %5629 = vmatmul.mubr.bf16.gmra.mrb[164].mxu0 %v18186_v21  ;;  %v7327_v49 = vmax.f32 %v15367_v34, 0.0 }
 0x322   : > { %v7326_v27 = vmax.f32 %v15304_v30, 0.0  ;;  %6015 = vmatmul.mubr.bf16.gmra.mrb[164].mxu1 %v18186_v21  ;;  %5638 = vmatprep.mubr.bf16.mxu0 %v18187_v14  ;;  %v7328_v52 = vmax.f32 %v15368_v60, 0.0 }
 0x323   : > { %v21082_v51 = vpack.c.bf16 %v7325_v62, %v7309_v44  ;;  %6024 = vmatprep.mubr.bf16.mxu1 %v18187_v14  ;;  %v21084_v22 = vpack.c.bf16 %v7327_v49, %v7311_v54 }
 0x324   : > { %v21086_v47 = vpack.c.bf16 %v7326_v27, %v7310_v10  ;;  %v4918_v33 = vpop.f32.mrb[124].mxu0  ;;  %v21088_v29 = vpack.c.bf16 %v7328_v52, %v7312_v41  ;;  %v5304_v4 = vpop.f32.mrb[124].mxu1 }
 0x325   : > { %v15305_v45 = vadd.f32 %v4918_v33, %v20359_v35  ;;  %v4920_v34 = vpop.f32.mrb[125].mxu0  ;;  %v15369_v30 = vadd.f32 %v5304_v4, %v20363_v18  ;;  %v5306_v15 = vpop.f32.mrb[125].mxu1  ;;  %v18188_v33 = vld [vmem:[%s18497_s23 + $0x148] ss:$16 sps:$4 sm:$0xff]  }
 0x326   : > { %v15306_v5 = vadd.f32 %v4920_v34, %v20367_v58  ;;  %v4922_v44 = vpop.f32.mrb[126].mxu0  ;;  %v15370_v62 = vadd.f32 %v5306_v15, %v20372_v12  ;;  %v5308_v21 = vpop.f32.mrb[126].mxu1 }
 0x327   : > { %v15307_v60 = vadd.f32 %v4922_v44, %v20359_v35  ;;  %v4924_v54 = vpop.f32.mrb[127].mxu0  ;;  %v15371_v10 = vadd.f32 %v5308_v21, %v20363_v18  ;;  %v5310_v27 = vpop.f32.mrb[127].mxu1  ;;  %v7341_v14 = vmax.f32 %v15305_v45, 0.0  ;;  %v7343_v4 = vmax.f32 %v15369_v30, 0.0  ;;  %v18189_v44 = vld [vmem:[%s18497_s23 + $0x16c] ss:$16 sps:$4 sm:$0xff]  }
 0x328   : > { %v15308_v49 = vadd.f32 %v4924_v54, %v20367_v58  ;;  %v15372_v52 = vadd.f32 %v5310_v27, %v20372_v12  ;;  %v7342_v34 = vmax.f32 %v15306_v5, 0.0  ;;  %v7344_v18 = vmax.f32 %v15370_v62, 0.0  ;;  %v18190_v5 = vld [vmem:[%s18497_s23 + $0x168] ss:$16 sps:$4 sm:$0xff]   ;;  %v18191_v21 = vld [vmem:[%s18497_s23 + $0x18c] ss:$16 sps:$4 sm:$0xff]  }
 0x329   : > { %v7357_v41 = vmax.f32 %v15307_v60, 0.0  ;;  %5639 = vmatmul.mubr.bf16.gmra.mrb[168].mxu0 %v18188_v33  ;;  %v7359_v15 = vmax.f32 %v15371_v10, 0.0  ;;  %v18192_v62 = vld [vmem:[%s18497_s23 + $0x188] ss:$16 sps:$4 sm:$0xff]   ;;  %v18193_v54 = vld [vmem:[%s18497_s23 + $0x1ac] ss:$16 sps:$4 sm:$0xff]  }
 0x32a   : > { %v7358_v35 = vmax.f32 %v15308_v49, 0.0  ;;  %6025 = vmatmul.mubr.bf16.gmra.mrb[168].mxu1 %v18188_v33  ;;  %5648 = vmatprep.mubr.bf16.mxu0 %v18189_v44  ;;  %v7360_v45 = vmax.f32 %v15372_v52, 0.0  ;;  %v18194_v10 = vld [vmem:[%s18497_s23 + $0x1a8] ss:$16 sps:$4 sm:$0xff]   ;;  %v18195_v49 = vld [vmem:[%s18497_s23 + $0x1cc] ss:$16 sps:$4 sm:$0xff]  }
 0x32b   : > { %v21100_v58 = vpack.c.bf16 %v7357_v41, %v7341_v14  ;;  %6034 = vmatprep.mubr.bf16.mxu1 %v18189_v44  ;;  %v21102_v12 = vpack.c.bf16 %v7359_v15, %v7343_v4  ;;  %v18196_v27 = vld [vmem:[%s18497_s23 + $0x1c8] ss:$16 sps:$4 sm:$0xff]   ;;  %v18197_v14 = vld [vmem:[%s18497_s23 + $0x1ec] ss:$16 sps:$4 sm:$0xff]   ;;  %v18199_v52 = vld [vmem:[%s18497_s23 + $0x4] ss:$16 sps:$4 sm:$0xff]  }
 0x32c   : > { %v21104_v60 = vpack.c.bf16 %v7358_v35, %v7342_v34  ;;  %v21106_v30 = vpack.c.bf16 %v7360_v45, %v7344_v18  ;;  %v18198_v41 = vld [vmem:[%s18497_s23 + $0x1e8] ss:$16 sps:$4 sm:$0xff]   ;;  %v571_v33 = vld [vmem:[%s24290_s1 + $0x8b0] sm:$0xff] }
 0x32d   : > { %24595 = vst [vmem:[#allocation100_spill] sm:$0xff] %v21102_v12  ;;  %v579_v4 = vld [vmem:[%s24290_s1 + $0x8f0] sm:$0xff]  ;;  %v572_v34 = vld [vmem:[%s24290_s1 + $0x8b8] sm:$0xff] }
 0x32e   : > { %24596 = vst [vmem:[#allocation101_spill] sm:$0xff] %v21106_v30  ;;  %v580_v15 = vld [vmem:[%s24290_s1 + $0x8f8] sm:$0xff]  ;;  %v14369_v35 = vcombine.high %v571_v33, %v579_v4  ;;  %v587_v44 = vld [vmem:[%s24290_s1 + $0x930] sm:$0xff] }
 0x32f   : > { %v595_v18 = vld [vmem:[%s24290_s1 + $0x970] sm:$0xff] }
 0x330   : > { %v18200_v45 = vld [vmem:[%s18497_s23] ss:$16 sps:$4 sm:$0xff]  }
 0x331   : > { %5649 = vmatmul.mubr.bf16.gmra.mrb[172].mxu0 %v18190_v5 }
 0x332   : > { %6035 = vmatmul.mubr.bf16.gmra.mrb[172].mxu1 %v18190_v5  ;;  %5658 = vmatprep.mubr.bf16.mxu0 %v18191_v21  ;;  %v14371_v5 = vcombine.high %v572_v34, %v580_v15 }
 0x333   : > { %6044 = vmatprep.mubr.bf16.mxu1 %v18191_v21  ;;  %v588_v21 = vld [vmem:[%s24290_s1 + $0x938] sm:$0xff] }
 0x339   : > { %5659 = vmatmul.mubr.bf16.gmra.mrb[176].mxu0 %v18192_v62 }
 0x33a   : > { %6045 = vmatmul.mubr.bf16.gmra.mrb[176].mxu1 %v18192_v62  ;;  %5668 = vmatprep.mubr.bf16.mxu0 %v18193_v54  ;;  %v596_v62 = vld [vmem:[%s24290_s1 + $0x978] sm:$0xff] }
 0x33b   : > { %6054 = vmatprep.mubr.bf16.mxu1 %v18193_v54  ;;  %v24597_v54 = vcombine.low %v20526_v55, %v20531_v2  ;;  %v611_v55 = vld [vmem:[%s24290_s1 + $0x9f0] sm:$0xff]  ;;  %v14384_v2 = vcombine.low %v587_v44, %v595_v18 }
 0x341   : > { %5669 = vmatmul.mubr.bf16.gmra.mrb[180].mxu0 %v18194_v10 }
 0x342   : > { %6055 = vmatmul.mubr.bf16.gmra.mrb[180].mxu1 %v18194_v10  ;;  %5678 = vmatprep.mubr.bf16.mxu0 %v18195_v49  ;;  %v14368_v10 = vcombine.low %v571_v33, %v579_v4  ;;  %v14386_v33 = vcombine.low %v588_v21, %v596_v62 }
 0x343   : > { %6064 = vmatprep.mubr.bf16.mxu1 %v18195_v49  ;;  %v24598_v49 = vcombine.low %v20541_v25, %v20546_v28  ;;  %v604_v25 = vld [vmem:[%s24290_s1 + $0x9b8] sm:$0xff] }
 0x344   : > { %v612_v28 = vld [vmem:[%s24290_s1 + $0x9f8] sm:$0xff] }
 0x349   : > { %5679 = vmatmul.mubr.bf16.gmra.mrb[184].mxu0 %v18196_v27 }
 0x34a   : > { %6065 = vmatmul.mubr.bf16.gmra.mrb[184].mxu1 %v18196_v27  ;;  %5688 = vmatprep.mubr.bf16.mxu0 %v18197_v14  ;;  %v18201_v27 = vld [vmem:[%s18497_s23 + $0x24] ss:$16 sps:$4 sm:$0xff]  }
 0x34b   : > { %6074 = vmatprep.mubr.bf16.mxu1 %v18197_v14  ;;  %v14370_v14 = vcombine.low %v572_v34, %v580_v15  ;;  %v18202_v34 = vld [vmem:[%s18497_s23 + $0x20] ss:$16 sps:$4 sm:$0xff]   ;;  %v14403_v15 = vcombine.high %v604_v25, %v612_v28 }
 0x351   : > { %5689 = vmatmul.mubr.bf16.gmra.mrb[188].mxu0 %v18198_v41 }
 0x352   : > { %6075 = vmatmul.mubr.bf16.gmra.mrb[188].mxu1 %v18198_v41  ;;  %6117 = vmatprep.mubr.bf16.mxu0 %v18199_v52  ;;  %v14385_v41 = vcombine.high %v587_v44, %v595_v18  ;;  %v620_v44 = vld [vmem:[%s24290_s1 + $0xa38] sm:$0xff] }
 0x353   : > { %6503 = vmatprep.mubr.bf16.mxu1 %v18199_v52  ;;  %v14387_v52 = vcombine.high %v588_v21, %v596_v62  ;;  %v628_v18 = vld [vmem:[%s24290_s1 + $0xa78] sm:$0xff]  ;;  %v14402_v62 = vcombine.low %v604_v25, %v612_v28  ;;  %v18204_v28 = vld [vmem:[%s18497_s23 + $0x40] ss:$16 sps:$4 sm:$0xff]  }
 0x359   : > { %6118 = vmatmul.mubr.bf16.vlgmr.msra.gmra.mrb[192].mxu0 %v18200_v45 }
 0x35a   : > { %6504 = vmatmul.mubr.bf16.vlgmr.msra.gmra.mrb[192].mxu1 %v18200_v45  ;;  %6279 = vmatpush1.bf16.msra.mxu0 %v24597_v54  ;;  %v603_v45 = vld [vmem:[%s24290_s1 + $0x9b0] sm:$0xff] }
 0x35b   : > { %6665 = vmatpush1.bf16.msra.mxu1 %v24598_v49  ;;  %6127 = vmatprep.mubr.bf16.mxu0 %v18201_v27  ;;  %v14401_v4 = vcombine.high %v603_v45, %v611_v55  ;;  %v18203_v54 = vld [vmem:[%s18497_s23 + $0x44] ss:$16 sps:$4 sm:$0xff]   ;;  %v14400_v21 = vcombine.low %v603_v45, %v611_v55  ;;  %v14419_v49 = vcombine.high %v620_v44, %v628_v18 }
 0x35c   : > { %6513 = vmatprep.mubr.bf16.mxu1 %v18201_v27  ;;  %6280 = vmatprep.subr.bf16.mxu0 %v14369_v35  ;;  %v619_v35 = vld [vmem:[%s24290_s1 + $0xa30] sm:$0xff]  ;;  %v14418_v55 = vcombine.low %v620_v44, %v628_v18 }
 0x35d   : > { %6666 = vmatprep.subr.bf16.mxu1 %v14371_v5  ;;  %v627_v5 = vld [vmem:[%s24290_s1 + $0xa70] sm:$0xff] }
 0x35e   : > { %6281 = vmatpush1.bf16.msra.mxu0 %v14368_v10  ;;  %v14417_v10 = vcombine.high %v619_v35, %v627_v5  ;;  %v635_v27 = vld [vmem:[%s24290_s1 + $0xab0] sm:$0xff]  ;;  %v14416_v45 = vcombine.low %v619_v35, %v627_v5  ;;  %v660_v35 = vld [vmem:[%s24290_s1 + $0xb78] sm:$0xff] }
 0x35f   : > { %6667 = vmatpush1.bf16.msra.mxu1 %v14370_v14  ;;  %6282 = vmatprep.subr.bf16.mxu0 %v14385_v41  ;;  %v643_v14 = vld [vmem:[%s24290_s1 + $0xaf0] sm:$0xff]  ;;  %v636_v41 = vld [vmem:[%s24290_s1 + $0xab8] sm:$0xff] }
 0x360   : > { %6668 = vmatprep.subr.bf16.mxu1 %v14387_v52  ;;  %v644_v52 = vld [vmem:[%s24290_s1 + $0xaf8] sm:$0xff]  ;;  %v14433_v25 = vcombine.high %v635_v27, %v643_v14  ;;  %v14432_v5 = vcombine.low %v635_v27, %v643_v14 }
 0x361   : > { %6128 = vmatmul.mubr.bf16.gmra.mrb[196].mxu0 %v18202_v34 }
 0x362   : > { %6514 = vmatmul.mubr.bf16.gmra.mrb[196].mxu1 %v18202_v34  ;;  %6137 = vmatprep.mubr.bf16.mxu0 %v18203_v54  ;;  %v18205_v34 = vld [vmem:[%s18497_s23 + $0x64] ss:$16 sps:$4 sm:$0xff]  }
 0x363   : > { %6523 = vmatprep.mubr.bf16.mxu1 %v18203_v54  ;;  %6283 = vmatpush1.bf16.msra.mxu0 %v14384_v2  ;;  %v14435_v2 = vcombine.high %v636_v41, %v644_v52  ;;  %v14434_v54 = vcombine.low %v636_v41, %v644_v52  ;;  %v18206_v52 = vld [vmem:[%s18497_s23 + $0x60] ss:$16 sps:$4 sm:$0xff]  }
 0x364   : > { %6669 = vmatpush1.bf16.msra.mxu1 %v14386_v33  ;;  %6284 = vmatprep.subr.bf16.mxu0 %v14401_v4  ;;  %v651_v33 = vld [vmem:[%s24290_s1 + $0xb30] sm:$0xff] }
 0x365   : > { %6670 = vmatprep.subr.bf16.mxu1 %v14403_v15  ;;  %v659_v4 = vld [vmem:[%s24290_s1 + $0xb70] sm:$0xff]  ;;  %v652_v15 = vld [vmem:[%s24290_s1 + $0xb38] sm:$0xff] }
 0x366   : > { %v14449_v44 = vcombine.high %v651_v33, %v659_v4  ;;  %v14451_v18 = vcombine.high %v652_v15, %v660_v35  ;;  %v14448_v27 = vcombine.low %v651_v33, %v659_v4  ;;  %v14450_v14 = vcombine.low %v652_v15, %v660_v35  ;;  %v692_v33 = vld [vmem:[%s24290_s1 + $0xc78] sm:$0xff] }
 0x367   : > { %6285 = vmatpush1.bf16.msra.mxu0 %v14400_v21  ;;  %v667_v21 = vld [vmem:[%s24290_s1 + $0xbb0] sm:$0xff] }
 0x368   : > { %6671 = vmatpush1.bf16.msra.mxu1 %v14402_v62  ;;  %6286 = vmatprep.subr.bf16.mxu0 %v14417_v10  ;;  %v675_v62 = vld [vmem:[%s24290_s1 + $0xbf0] sm:$0xff]  ;;  %v668_v10 = vld [vmem:[%s24290_s1 + $0xbb8] sm:$0xff] }
 0x369   : > { %6138 = vmatmul.mubr.bf16.gmra.mrb[200].mxu0 %v18204_v28  ;;  %6672 = vmatprep.subr.bf16.mxu1 %v14419_v49  ;;  %v676_v49 = vld [vmem:[%s24290_s1 + $0xbf8] sm:$0xff]  ;;  %v14465_v41 = vcombine.high %v667_v21, %v675_v62  ;;  %v14464_v4 = vcombine.low %v667_v21, %v675_v62 }
 0x36a   : > { %6524 = vmatmul.mubr.bf16.gmra.mrb[200].mxu1 %v18204_v28  ;;  %6147 = vmatprep.mubr.bf16.mxu0 %v18205_v34  ;;  %v18207_v28 = vld [vmem:[%s18497_s23 + $0x84] ss:$16 sps:$4 sm:$0xff]  }
 0x36b   : > { %6533 = vmatprep.mubr.bf16.mxu1 %v18205_v34  ;;  %6287 = vmatpush1.bf16.msra.mxu0 %v14416_v45  ;;  %v14467_v45 = vcombine.high %v668_v10, %v676_v49  ;;  %v14466_v34 = vcombine.low %v668_v10, %v676_v49  ;;  %v18208_v49 = vld [vmem:[%s18497_s23 + $0x80] ss:$16 sps:$4 sm:$0xff]  }
 0x36c   : > { %6673 = vmatpush1.bf16.msra.mxu1 %v14418_v55  ;;  %6288 = vmatprep.subr.bf16.mxu0 %v14433_v25  ;;  %v683_v55 = vld [vmem:[%s24290_s1 + $0xc30] sm:$0xff] }
 0x36d   : > { %6674 = vmatprep.subr.bf16.mxu1 %v14435_v2  ;;  %v691_v25 = vld [vmem:[%s24290_s1 + $0xc70] sm:$0xff]  ;;  %v684_v2 = vld [vmem:[%s24290_s1 + $0xc38] sm:$0xff] }
 0x36e   : > { %v14481_v15 = vcombine.high %v683_v55, %v691_v25  ;;  %v14483_v35 = vcombine.high %v684_v2, %v692_v33  ;;  %v14480_v21 = vcombine.low %v683_v55, %v691_v25  ;;  %v14482_v62 = vcombine.low %v684_v2, %v692_v33  ;;  %v724_v55 = vld [vmem:[%s24290_s1 + $0xd78] sm:$0xff] }
 0x36f   : > { %6289 = vmatpush1.bf16.msra.mxu0 %v14432_v5  ;;  %v699_v5 = vld [vmem:[%s24290_s1 + $0xcb0] sm:$0xff] }
 0x370   : > { %6675 = vmatpush1.bf16.msra.mxu1 %v14434_v54  ;;  %6290 = vmatprep.subr.bf16.mxu0 %v14449_v44  ;;  %v707_v54 = vld [vmem:[%s24290_s1 + $0xcf0] sm:$0xff]  ;;  %v700_v44 = vld [vmem:[%s24290_s1 + $0xcb8] sm:$0xff] }
 0x371   : > { %6148 = vmatmul.mubr.bf16.gmra.mrb[204].mxu0 %v18206_v52  ;;  %6676 = vmatprep.subr.bf16.mxu1 %v14451_v18  ;;  %v708_v18 = vld [vmem:[%s24290_s1 + $0xcf8] sm:$0xff]  ;;  %v14497_v10 = vcombine.high %v699_v5, %v707_v54  ;;  %v14496_v25 = vcombine.low %v699_v5, %v707_v54 }
 0x372   : > { %6534 = vmatmul.mubr.bf16.gmra.mrb[204].mxu1 %v18206_v52  ;;  %6157 = vmatprep.mubr.bf16.mxu0 %v18207_v28  ;;  %v18209_v52 = vld [vmem:[%s18497_s23 + $0xa4] ss:$16 sps:$4 sm:$0xff]  }
 0x373   : > { %6543 = vmatprep.mubr.bf16.mxu1 %v18207_v28  ;;  %6291 = vmatpush1.bf16.msra.mxu0 %v14448_v27  ;;  %v14499_v27 = vcombine.high %v700_v44, %v708_v18  ;;  %v14498_v28 = vcombine.low %v700_v44, %v708_v18  ;;  %v18210_v18 = vld [vmem:[%s18497_s23 + $0xa0] ss:$16 sps:$4 sm:$0xff]  }
 0x374   : > { %6677 = vmatpush1.bf16.msra.mxu1 %v14450_v14  ;;  %6292 = vmatprep.subr.bf16.mxu0 %v14465_v41  ;;  %v715_v14 = vld [vmem:[%s24290_s1 + $0xd30] sm:$0xff] }
 0x375   : > { %6678 = vmatprep.subr.bf16.mxu1 %v14467_v45  ;;  %v723_v41 = vld [vmem:[%s24290_s1 + $0xd70] sm:$0xff]  ;;  %v716_v45 = vld [vmem:[%s24290_s1 + $0xd38] sm:$0xff] }
 0x376   : > { %v14513_v2 = vcombine.high %v715_v14, %v723_v41  ;;  %v14515_v33 = vcombine.high %v716_v45, %v724_v55  ;;  %v14512_v5 = vcombine.low %v715_v14, %v723_v41  ;;  %v14514_v54 = vcombine.low %v716_v45, %v724_v55  ;;  %v756_v14 = vld [vmem:[%s24290_s1 + $0xe78] sm:$0xff] }
 0x377   : > { %6293 = vmatpush1.bf16.msra.mxu0 %v14464_v4  ;;  %v731_v4 = vld [vmem:[%s24290_s1 + $0xdb0] sm:$0xff] }
 0x378   : > { %6679 = vmatpush1.bf16.msra.mxu1 %v14466_v34  ;;  %6294 = vmatprep.subr.bf16.mxu0 %v14481_v15  ;;  %v739_v34 = vld [vmem:[%s24290_s1 + $0xdf0] sm:$0xff]  ;;  %v732_v15 = vld [vmem:[%s24290_s1 + $0xdb8] sm:$0xff] }
 0x379   : > { %6158 = vmatmul.mubr.bf16.gmra.mrb[208].mxu0 %v18208_v49  ;;  %6680 = vmatprep.subr.bf16.mxu1 %v14483_v35  ;;  %v740_v35 = vld [vmem:[%s24290_s1 + $0xdf8] sm:$0xff]  ;;  %v14529_v44 = vcombine.high %v731_v4, %v739_v34  ;;  %v14528_v41 = vcombine.low %v731_v4, %v739_v34 }
 0x37a   : > { %6544 = vmatmul.mubr.bf16.gmra.mrb[208].mxu1 %v18208_v49  ;;  %6167 = vmatprep.mubr.bf16.mxu0 %v18209_v52  ;;  %v18211_v49 = vld [vmem:[%s18497_s23 + $0xc4] ss:$16 sps:$4 sm:$0xff]  }
 0x37b   : > { %6553 = vmatprep.mubr.bf16.mxu1 %v18209_v52  ;;  %6295 = vmatpush1.bf16.msra.mxu0 %v14480_v21  ;;  %v14531_v21 = vcombine.high %v732_v15, %v740_v35  ;;  %v14530_v52 = vcombine.low %v732_v15, %v740_v35  ;;  %v18212_v35 = vld [vmem:[%s18497_s23 + $0xc0] ss:$16 sps:$4 sm:$0xff]  }
 0x37c   : > { %6681 = vmatpush1.bf16.msra.mxu1 %v14482_v62  ;;  %6296 = vmatprep.subr.bf16.mxu0 %v14497_v10  ;;  %v747_v62 = vld [vmem:[%s24290_s1 + $0xe30] sm:$0xff] }
 0x37d   : > { %6682 = vmatprep.subr.bf16.mxu1 %v14499_v27  ;;  %v755_v10 = vld [vmem:[%s24290_s1 + $0xe70] sm:$0xff]  ;;  %v748_v27 = vld [vmem:[%s24290_s1 + $0xe38] sm:$0xff] }
 0x37e   : > { %v14545_v45 = vcombine.high %v747_v62, %v755_v10  ;;  %v14547_v55 = vcombine.high %v748_v27, %v756_v14  ;;  %v14544_v4 = vcombine.low %v747_v62, %v755_v10  ;;  %v14546_v34 = vcombine.low %v748_v27, %v756_v14  ;;  %v788_v62 = vld [vmem:[%s24290_s1 + $0xf78] sm:$0xff] }
 0x37f   : > { %6297 = vmatpush1.bf16.msra.mxu0 %v14496_v25  ;;  %v763_v25 = vld [vmem:[%s24290_s1 + $0xeb0] sm:$0xff] }
 0x380   : > { %6683 = vmatpush1.bf16.msra.mxu1 %v14498_v28  ;;  %6298 = vmatprep.subr.bf16.mxu0 %v14513_v2  ;;  %v771_v28 = vld [vmem:[%s24290_s1 + $0xef0] sm:$0xff]  ;;  %v764_v2 = vld [vmem:[%s24290_s1 + $0xeb8] sm:$0xff] }
 0x381   : > { %6168 = vmatmul.mubr.bf16.gmra.mrb[212].mxu0 %v18210_v18  ;;  %6684 = vmatprep.subr.bf16.mxu1 %v14515_v33  ;;  %v772_v33 = vld [vmem:[%s24290_s1 + $0xef8] sm:$0xff]  ;;  %v14561_v15 = vcombine.high %v763_v25, %v771_v28  ;;  %v14560_v10 = vcombine.low %v763_v25, %v771_v28 }
 0x382   : > { %6554 = vmatmul.mubr.bf16.gmra.mrb[212].mxu1 %v18210_v18  ;;  %6177 = vmatprep.mubr.bf16.mxu0 %v18211_v49  ;;  %v18213_v18 = vld [vmem:[%s18497_s23 + $0xe4] ss:$16 sps:$4 sm:$0xff]  }
 0x383   : > { %6563 = vmatprep.mubr.bf16.mxu1 %v18211_v49  ;;  %6299 = vmatpush1.bf16.msra.mxu0 %v14512_v5  ;;  %v14563_v5 = vcombine.high %v764_v2, %v772_v33  ;;  %v14562_v49 = vcombine.low %v764_v2, %v772_v33  ;;  %v18214_v33 = vld [vmem:[%s18497_s23 + $0xe0] ss:$16 sps:$4 sm:$0xff]  }
 0x384   : > { %6685 = vmatpush1.bf16.msra.mxu1 %v14514_v54  ;;  %6300 = vmatprep.subr.bf16.mxu0 %v14529_v44  ;;  %v779_v54 = vld [vmem:[%s24290_s1 + $0xf30] sm:$0xff] }
 0x385   : > { %6686 = vmatprep.subr.bf16.mxu1 %v14531_v21  ;;  %v787_v44 = vld [vmem:[%s24290_s1 + $0xf70] sm:$0xff]  ;;  %v780_v21 = vld [vmem:[%s24290_s1 + $0xf38] sm:$0xff] }
 0x386   : > { %v14577_v27 = vcombine.high %v779_v54, %v787_v44  ;;  %v14579_v14 = vcombine.high %v780_v21, %v788_v62  ;;  %v14576_v25 = vcombine.low %v779_v54, %v787_v44  ;;  %v14578_v28 = vcombine.low %v780_v21, %v788_v62  ;;  %v17307_v54 = vld [vmem:[%s24292_s3 + $0xc] ss:$16 sps:$4 sm:$0xff]   ;;  %v18216_v44 = vld [vmem:[%s18497_s23 + $0x100] ss:$16 sps:$4 sm:$0xff]   ;;  %v18219_v62 = vld [vmem:[%s18497_s23 + $0x144] ss:$16 sps:$4 sm:$0xff]  }
 0x387   : > { %6301 = vmatpush1.bf16.msra.mxu0 %v14528_v41  ;;  %v795_v41 = vld [vmem:[%s24290_s1 + $0xfb0] sm:$0xff] }
 0x388   : > { %6687 = vmatpush1.bf16.msra.mxu1 %v14530_v52  ;;  %6302 = vmatprep.subr.bf16.mxu0 %v14545_v45  ;;  %v803_v52 = vld [vmem:[%s24290_s1 + $0xff0] sm:$0xff]  ;;  %v796_v45 = vld [vmem:[%s24290_s1 + $0xfb8] sm:$0xff] }
 0x389   : > { %6178 = vmatmul.mubr.bf16.gmra.mrb[216].mxu0 %v18212_v35  ;;  %6688 = vmatprep.subr.bf16.mxu1 %v14547_v55  ;;  %v804_v55 = vld [vmem:[%s24290_s1 + $0xff8] sm:$0xff]  ;;  %v14593_v2 = vcombine.high %v795_v41, %v803_v52  ;;  %v18218_v21 = vld [vmem:[%s18497_s23 + $0x120] ss:$16 sps:$4 sm:$0xff]  }
 0x38a   : > { %6564 = vmatmul.mubr.bf16.gmra.mrb[216].mxu1 %v18212_v35  ;;  %6187 = vmatprep.mubr.bf16.mxu0 %v18213_v18  ;;  %v14594_v35 = vcombine.low %v796_v45, %v804_v55 }
 0x38b   : > { %6573 = vmatprep.mubr.bf16.mxu1 %v18213_v18  ;;  %6303 = vmatpush1.bf16.msra.mxu0 %v14544_v4  ;;  %v14595_v4 = vcombine.high %v796_v45, %v804_v55  ;;  %v18217_v18 = vld [vmem:[%s18497_s23 + $0x124] ss:$16 sps:$4 sm:$0xff]  }
 0x38c   : > { %6689 = vmatpush1.bf16.msra.mxu1 %v14546_v34  ;;  %6304 = vmatprep.subr.bf16.mxu0 %v14561_v15  ;;  %v18215_v34 = vld [vmem:[%s18497_s23 + $0x104] ss:$16 sps:$4 sm:$0xff]   ;;  %v14592_v15 = vcombine.low %v795_v41, %v803_v52 }
 0x38d   : > { %6690 = vmatprep.subr.bf16.mxu1 %v14563_v5  ;;  %v17304_v5 = vld [vmem:[%s24292_s3 + $0x4] ss:$16 sps:$4 sm:$0xff]  }
 0x38e   : > { %v18221_v52 = vld [vmem:[%s18497_s23 + $0x164] ss:$16 sps:$4 sm:$0xff]  }
 0x38f   : > { %6305 = vmatpush1.bf16.msra.mxu0 %v14560_v10  ;;  %v806_v10 = vld [vmem:[%s24291_s2 + $0x8] sm:$0xff] }
 0x390   : > { %6691 = vmatpush1.bf16.msra.mxu1 %v14562_v49  ;;  %6306 = vmatprep.subr.bf16.mxu0 %v14577_v27  ;;  %v18220_v49 = vld [vmem:[%s18497_s23 + $0x140] ss:$16 sps:$4 sm:$0xff]   ;;  %v21335_v27 = vrot.slane %v806_v10, %v19343_v61  ;;  %v21341_v41 = vrot.slane %v806_v10, %v19352_v0  ;;  %v21345_v45 = vrot.slane %v806_v10, %v19355_v3 }
 0x391   : > { %6188 = vmatmul.mubr.bf16.gmra.mrb[220].mxu0 %v18214_v33  ;;  %6692 = vmatprep.subr.bf16.mxu1 %v14579_v14  ;;  %v21338_v14 = vrot.slane %v806_v10, %v19349_v63 }
 0x392   : > { %6574 = vmatmul.mubr.bf16.gmra.mrb[220].mxu1 %v18214_v33  ;;  %6197 = vmatprep.mubr.bf16.mxu0 %v18215_v34 }
 0x393   : > { %6583 = vmatprep.mubr.bf16.mxu1 %v18215_v34  ;;  %6307 = vmatpush1.bf16.msra.mxu0 %v14576_v25 }
 0x394   : > { %6693 = vmatpush1.bf16.msra.mxu1 %v14578_v28  ;;  %6308 = vmatprep.subr.bf16.mxu0 %v14593_v2 }
 0x395   : > { %6694 = vmatprep.subr.bf16.mxu1 %v14595_v4 }
 0x397   : > { %6309 = vmatpush1.bf16.msra.mxu0 %v14592_v15 }
 0x398   : > { %6695 = vmatpush1.bf16.msra.mxu1 %v14594_v35  ;;  %10719 = vmatprep.subr.bf16.mxu0 %v17304_v5 }
 0x399   : > { %6198 = vmatmul.mubr.bf16.gmra.mrb[224].mxu0 %v18216_v44  ;;  %12263 = vmatprep.subr.bf16.mxu1 %v17307_v54 }
 0x39a   : > { %6584 = vmatmul.mubr.bf16.gmra.mrb[224].mxu1 %v18216_v44  ;;  %6207 = vmatprep.mubr.bf16.mxu0 %v18217_v18 }
 0x39b   : > { %6593 = vmatprep.mubr.bf16.mxu1 %v18217_v18 }
 0x3a1   : > { %6208 = vmatmul.mubr.bf16.gmra.mrb[228].mxu0 %v18218_v21 }
 0x3a2   : > { %6594 = vmatmul.mubr.bf16.gmra.mrb[228].mxu1 %v18218_v21  ;;  %6217 = vmatprep.mubr.bf16.mxu0 %v18219_v62 }
 0x3a3   : > { %6603 = vmatprep.mubr.bf16.mxu1 %v18219_v62 }
 0x3a9   : > { %6218 = vmatmul.mubr.bf16.gmra.mrb[232].mxu0 %v18220_v49 }
 0x3aa   : > { %6604 = vmatmul.mubr.bf16.gmra.mrb[232].mxu1 %v18220_v49  ;;  %6227 = vmatprep.mubr.bf16.mxu0 %v18221_v52 }
 0x3ab   : > { %6613 = vmatprep.mubr.bf16.mxu1 %v18221_v52 }
 0x3ac   : > { %v5540_v55 = vpop.f32.mrb[128].mxu0  ;;  %v5926_v28 = vpop.f32.mrb[128].mxu1 }
 0x3ad   : > { %v15373_v25 = vadd.f32 %v5540_v55, %v21335_v27  ;;  %v5542_v2 = vpop.f32.mrb[129].mxu0  ;;  %v15437_v33 = vadd.f32 %v5926_v28, %v21338_v14  ;;  %v5928_v34 = vpop.f32.mrb[129].mxu1  ;;  %v18222_v55 = vld [vmem:[%s18497_s23 + $0x160] ss:$16 sps:$4 sm:$0xff]  }
 0x3ae   : > { %v15374_v4 = vadd.f32 %v5542_v2, %v21341_v41  ;;  %v5544_v15 = vpop.f32.mrb[130].mxu0  ;;  %v15438_v35 = vadd.f32 %v5928_v34, %v21345_v45  ;;  %v5930_v54 = vpop.f32.mrb[130].mxu1 }
 0x3af   : > { %v15375_v5 = vadd.f32 %v5544_v15, %v21335_v27  ;;  %v5546_v44 = vpop.f32.mrb[131].mxu0  ;;  %v15439_v18 = vadd.f32 %v5930_v54, %v21338_v14  ;;  %v5932_v62 = vpop.f32.mrb[131].mxu1  ;;  %v6865_v10 = vmax.f32 %v15373_v25, 0.0  ;;  %v6867_v28 = vmax.f32 %v15437_v33, 0.0  ;;  %v18223_v15 = vld [vmem:[%s18497_s23 + $0x184] ss:$16 sps:$4 sm:$0xff]  }
 0x3b0   : > { %v15376_v21 = vadd.f32 %v5546_v44, %v21341_v41  ;;  %v15440_v52 = vadd.f32 %v5932_v62, %v21345_v45  ;;  %v6866_v2 = vmax.f32 %v15374_v4, 0.0  ;;  %v6868_v0 = vmax.f32 %v15438_v35, 0.0 }
 0x3b1   : > { %v6881_v49 = vmax.f32 %v15375_v5, 0.0  ;;  %6228 = vmatmul.mubr.bf16.gmra.mrb[236].mxu0 %v18222_v55  ;;  %v6883_v3 = vmax.f32 %v15439_v18, 0.0 }
 0x3b2   : > { %v6882_v34 = vmax.f32 %v15376_v21, 0.0  ;;  %6614 = vmatmul.mubr.bf16.gmra.mrb[236].mxu1 %v18222_v55  ;;  %6237 = vmatprep.mubr.bf16.mxu0 %v18223_v15  ;;  %v6884_v54 = vmax.f32 %v15440_v52, 0.0 }
 0x3b3   : > { %v21357_v63 = vpack.c.bf16 %v6881_v49, %v6865_v10  ;;  %6623 = vmatprep.mubr.bf16.mxu1 %v18223_v15  ;;  %v21359_v44 = vpack.c.bf16 %v6883_v3, %v6867_v28 }
 0x3b4   : > { %v21361_v25 = vpack.c.bf16 %v6882_v34, %v6866_v2  ;;  %v5550_v5 = vpop.f32.mrb[132].mxu0  ;;  %v21363_v62 = vpack.c.bf16 %v6884_v54, %v6868_v0 }
 0x3b5   : > { %24599 = vst [vmem:[#allocation102_spill] sm:$0xff] %v21357_v63  ;;  %24600 = vst [vmem:[#allocation103_spill] sm:$0xff] %v21359_v44  ;;  %v15377_v33 = vadd.f32 %v5550_v5, %v21335_v27  ;;  %v5936_v4 = vpop.f32.mrb[132].mxu1  ;;  %v5552_v18 = vpop.f32.mrb[133].mxu0 }
 0x3b6   : > { %24601 = vst [vmem:[#allocation104_spill] sm:$0xff] %v21361_v25  ;;  %24602 = vst [vmem:[#allocation105_spill] sm:$0xff] %v21363_v62  ;;  %v15441_v21 = vadd.f32 %v5936_v4, %v21338_v14  ;;  %v15378_v35 = vadd.f32 %v5552_v18, %v21341_v41  ;;  %v5938_v10 = vpop.f32.mrb[133].mxu1  ;;  %v5554_v49 = vpop.f32.mrb[134].mxu0  ;;  %v18224_v4 = vld [vmem:[%s18497_s23 + $0x180] ss:$16 sps:$4 sm:$0xff]  }
 0x3b7   : > { %v15442_v52 = vadd.f32 %v5938_v10, %v21345_v45  ;;  %v15379_v3 = vadd.f32 %v5554_v49, %v21335_v27  ;;  %v5940_v55 = vpop.f32.mrb[134].mxu1  ;;  %v5556_v28 = vpop.f32.mrb[135].mxu0  ;;  %v6897_v15 = vmax.f32 %v15377_v33, 0.0  ;;  %v18225_v49 = vld [vmem:[%s18497_s23 + $0x1a4] ss:$16 sps:$4 sm:$0xff]  }
 0x3b8   : > { %v15443_v0 = vadd.f32 %v5940_v55, %v21338_v14  ;;  %v15380_v2 = vadd.f32 %v5556_v28, %v21341_v41  ;;  %v5942_v34 = vpop.f32.mrb[135].mxu1  ;;  %v6899_v18 = vmax.f32 %v15441_v21, 0.0  ;;  %v6898_v61 = vmax.f32 %v15378_v35, 0.0  ;;  %v18233_v25 = vld [vmem:[%s18497_s23 + $0x2c] ss:$16 sps:$4 sm:$0xff]  }
 0x3b9   : > { %v6913_v54 = vmax.f32 %v15379_v3, 0.0  ;;  %v15444_v5 = vadd.f32 %v5942_v34, %v21345_v45  ;;  %6238 = vmatmul.mubr.bf16.gmra.mrb[240].mxu0 %v18224_v4  ;;  %v6900_v62 = vmax.f32 %v15442_v52, 0.0 }
 0x3ba   : > { %v6915_v44 = vmax.f32 %v15443_v0, 0.0  ;;  %v6914_v10 = vmax.f32 %v15380_v2, 0.0  ;;  %6624 = vmatmul.mubr.bf16.gmra.mrb[240].mxu1 %v18224_v4  ;;  %6247 = vmatprep.mubr.bf16.mxu0 %v18225_v49 }
 0x3bb   : > { %v21375_v63 = vpack.c.bf16 %v6913_v54, %v6897_v15  ;;  %v6916_v55 = vmax.f32 %v15444_v5, 0.0  ;;  %6633 = vmatprep.mubr.bf16.mxu1 %v18225_v49 }
 0x3bc   : > { %v21377_v28 = vpack.c.bf16 %v6915_v44, %v6899_v18  ;;  %v21379_v33 = vpack.c.bf16 %v6914_v10, %v6898_v61  ;;  %v5560_v3 = vpop.f32.mrb[136].mxu0 }
 0x3bd   : > { %24603 = vst [vmem:[#allocation106_spill] sm:$0xff] %v21375_v63  ;;  %v21381_v34 = vpack.c.bf16 %v6916_v55, %v6900_v62  ;;  %v15381_v21 = vadd.f32 %v5560_v3, %v21335_v27  ;;  %v5946_v35 = vpop.f32.mrb[136].mxu1  ;;  %v5562_v0 = vpop.f32.mrb[137].mxu0 }
 0x3be   : > { %24604 = vst [vmem:[#allocation107_spill] sm:$0xff] %v21377_v28  ;;  %24605 = vst [vmem:[#allocation108_spill] sm:$0xff] %v21379_v33  ;;  %v15445_v2 = vadd.f32 %v5946_v35, %v21338_v14  ;;  %v15382_v52 = vadd.f32 %v5562_v0, %v21341_v41  ;;  %v5948_v15 = vpop.f32.mrb[137].mxu1  ;;  %v5564_v54 = vpop.f32.mrb[138].mxu0  ;;  %v18226_v35 = vld [vmem:[%s18497_s23 + $0x1a0] ss:$16 sps:$4 sm:$0xff]  }
 0x3bf   : > { %24606 = vst [vmem:[#allocation109_spill] sm:$0xff] %v21381_v34  ;;  %v15446_v5 = vadd.f32 %v5948_v15, %v21345_v45  ;;  %v15383_v44 = vadd.f32 %v5564_v54, %v21335_v27  ;;  %v5950_v61 = vpop.f32.mrb[138].mxu1  ;;  %v5566_v4 = vpop.f32.mrb[139].mxu0  ;;  %v6929_v49 = vmax.f32 %v15381_v21, 0.0  ;;  %v18227_v54 = vld [vmem:[%s18497_s23 + $0x1c4] ss:$16 sps:$4 sm:$0xff]  }
 0x3c0   : > { %v15447_v62 = vadd.f32 %v5950_v61, %v21338_v14  ;;  %v15384_v18 = vadd.f32 %v5566_v4, %v21341_v41  ;;  %v5952_v10 = vpop.f32.mrb[139].mxu1  ;;  %v6931_v0 = vmax.f32 %v15445_v2, 0.0  ;;  %v6930_v28 = vmax.f32 %v15382_v52, 0.0 }
 0x3c1   : > { %v6945_v55 = vmax.f32 %v15383_v44, 0.0  ;;  %v15448_v3 = vadd.f32 %v5952_v10, %v21345_v45  ;;  %6248 = vmatmul.mubr.bf16.gmra.mrb[244].mxu0 %v18226_v35  ;;  %v6932_v63 = vmax.f32 %v15446_v5, 0.0 }
 0x3c2   : > { %v6947_v34 = vmax.f32 %v15447_v62, 0.0  ;;  %v6946_v15 = vmax.f32 %v15384_v18, 0.0  ;;  %6634 = vmatmul.mubr.bf16.gmra.mrb[244].mxu1 %v18226_v35  ;;  %6257 = vmatprep.mubr.bf16.mxu0 %v18227_v54 }
 0x3c3   : > { %v21393_v33 = vpack.c.bf16 %v6945_v55, %v6929_v49  ;;  %v6948_v61 = vmax.f32 %v15448_v3, 0.0  ;;  %6643 = vmatprep.mubr.bf16.mxu1 %v18227_v54 }
 0x3c4   : > { %v21395_v4 = vpack.c.bf16 %v6947_v34, %v6931_v0  ;;  %v21397_v21 = vpack.c.bf16 %v6946_v15, %v6930_v28  ;;  %v5570_v44 = vpop.f32.mrb[140].mxu0 }
 0x3c5   : > { %24607 = vst [vmem:[#allocation110_spill] sm:$0xff] %v21393_v33  ;;  %v21399_v10 = vpack.c.bf16 %v6948_v61, %v6932_v63  ;;  %v15385_v2 = vadd.f32 %v5570_v44, %v21335_v27  ;;  %v5956_v52 = vpop.f32.mrb[140].mxu1  ;;  %v5572_v62 = vpop.f32.mrb[141].mxu0 }
 0x3c6   : > { %24608 = vst [vmem:[#allocation111_spill] sm:$0xff] %v21395_v4  ;;  %24609 = vst [vmem:[#allocation112_spill] sm:$0xff] %v21397_v21  ;;  %v15449_v18 = vadd.f32 %v5956_v52, %v21338_v14  ;;  %v15386_v5 = vadd.f32 %v5572_v62, %v21341_v41  ;;  %v5958_v49 = vpop.f32.mrb[141].mxu1  ;;  %v5574_v55 = vpop.f32.mrb[142].mxu0  ;;  %v18228_v52 = vld [vmem:[%s18497_s23 + $0x1c0] ss:$16 sps:$4 sm:$0xff]  }
 0x3c7   : > { %24610 = vst [vmem:[#allocation113_spill] sm:$0xff] %v21399_v10  ;;  %v15450_v3 = vadd.f32 %v5958_v49, %v21345_v45  ;;  %v15387_v34 = vadd.f32 %v5574_v55, %v21335_v27  ;;  %v5960_v28 = vpop.f32.mrb[142].mxu1  ;;  %v5576_v35 = vpop.f32.mrb[143].mxu0  ;;  %v6961_v54 = vmax.f32 %v15385_v2, 0.0  ;;  %v18229_v55 = vld [vmem:[%s18497_s23 + $0x1e4] ss:$16 sps:$4 sm:$0xff]  }
 0x3c8   : > { %v15451_v63 = vadd.f32 %v5960_v28, %v21338_v14  ;;  %v15388_v0 = vadd.f32 %v5576_v35, %v21341_v41  ;;  %v5962_v15 = vpop.f32.mrb[143].mxu1  ;;  %v6963_v62 = vmax.f32 %v15449_v18, 0.0  ;;  %v6962_v4 = vmax.f32 %v15386_v5, 0.0 }
 0x3c9   : > { %v6977_v61 = vmax.f32 %v15387_v34, 0.0  ;;  %v15452_v44 = vadd.f32 %v5962_v15, %v21345_v45  ;;  %6258 = vmatmul.mubr.bf16.gmra.mrb[248].mxu0 %v18228_v52  ;;  %v6964_v33 = vmax.f32 %v15450_v3, 0.0 }
 0x3ca   : > { %v6979_v10 = vmax.f32 %v15451_v63, 0.0  ;;  %v6978_v49 = vmax.f32 %v15388_v0, 0.0  ;;  %6644 = vmatmul.mubr.bf16.gmra.mrb[248].mxu1 %v18228_v52  ;;  %6267 = vmatprep.mubr.bf16.mxu0 %v18229_v55 }
 0x3cb   : > { %v21411_v21 = vpack.c.bf16 %v6977_v61, %v6961_v54  ;;  %v6980_v28 = vmax.f32 %v15452_v44, 0.0  ;;  %6653 = vmatprep.mubr.bf16.mxu1 %v18229_v55 }
 0x3cc   : > { %v21413_v35 = vpack.c.bf16 %v6979_v10, %v6963_v62  ;;  %v21415_v2 = vpack.c.bf16 %v6978_v49, %v6962_v4  ;;  %v5580_v34 = vpop.f32.mrb[144].mxu0 }
 0x3cd   : > { %24611 = vst [vmem:[#allocation114_spill] sm:$0xff] %v21411_v21  ;;  %v21417_v15 = vpack.c.bf16 %v6980_v28, %v6964_v33  ;;  %v15389_v18 = vadd.f32 %v5580_v34, %v21335_v27  ;;  %v5966_v5 = vpop.f32.mrb[144].mxu1  ;;  %v5582_v63 = vpop.f32.mrb[145].mxu0 }
 0x3ce   : > { %24612 = vst [vmem:[#allocation115_spill] sm:$0xff] %v21413_v35  ;;  %24613 = vst [vmem:[#allocation116_spill] sm:$0xff] %v21415_v2  ;;  %v15453_v0 = vadd.f32 %v5966_v5, %v21338_v14  ;;  %v15390_v3 = vadd.f32 %v5582_v63, %v21341_v41  ;;  %v5968_v54 = vpop.f32.mrb[145].mxu1  ;;  %v5584_v61 = vpop.f32.mrb[146].mxu0  ;;  %v18230_v5 = vld [vmem:[%s18497_s23 + $0x1e0] ss:$16 sps:$4 sm:$0xff]  }
 0x3cf   : > { %24614 = vst [vmem:[#allocation117_spill] sm:$0xff] %v21417_v15  ;;  %v15454_v44 = vadd.f32 %v5968_v54, %v21345_v45  ;;  %v15391_v10 = vadd.f32 %v5584_v61, %v21335_v27  ;;  %v5970_v4 = vpop.f32.mrb[146].mxu1  ;;  %v5586_v52 = vpop.f32.mrb[147].mxu0  ;;  %v6993_v55 = vmax.f32 %v15389_v18, 0.0  ;;  %v18231_v61 = vld [vmem:[%s18497_s23 + $0xc] ss:$16 sps:$4 sm:$0xff]  }
 0x3d0   : > { %v15455_v33 = vadd.f32 %v5970_v4, %v21338_v14  ;;  %v15392_v62 = vadd.f32 %v5586_v52, %v21341_v41  ;;  %v5972_v49 = vpop.f32.mrb[147].mxu1  ;;  %v6995_v63 = vmax.f32 %v15453_v0, 0.0  ;;  %v6994_v35 = vmax.f32 %v15390_v3, 0.0 }
 0x3d1   : > { %v7009_v28 = vmax.f32 %v15391_v10, 0.0  ;;  %v15456_v34 = vadd.f32 %v5972_v49, %v21345_v45  ;;  %6268 = vmatmul.mubr.bf16.gmra.mrb[252].mxu0 %v18230_v5  ;;  %v6996_v21 = vmax.f32 %v15454_v44, 0.0 }
 0x3d2   : > { %v7011_v15 = vmax.f32 %v15455_v33, 0.0  ;;  %v7010_v54 = vmax.f32 %v15392_v62, 0.0  ;;  %6654 = vmatmul.mubr.bf16.gmra.mrb[252].mxu1 %v18230_v5  ;;  %6310 = vmatprep.mubr.bf16.mxu0 %v18231_v61 }
 0x3d3   : > { %v21429_v2 = vpack.c.bf16 %v7009_v28, %v6993_v55  ;;  %v7012_v4 = vmax.f32 %v15456_v34, 0.0  ;;  %6696 = vmatprep.mubr.bf16.mxu1 %v18231_v61 }
 0x3d4   : > { %v21431_v52 = vpack.c.bf16 %v7011_v15, %v6995_v63  ;;  %v21433_v18 = vpack.c.bf16 %v7010_v54, %v6994_v35  ;;  %v5590_v10 = vpop.f32.mrb[148].mxu0  ;;  %v17302_v15 = vld [vmem:[%s24292_s3] ss:$16 sps:$4 sm:$0xff]   ;;  %v17305_v63 = vld [vmem:[%s24292_s3 + $0x8] ss:$16 sps:$4 sm:$0xff]  }
 0x3d5   : > { %24615 = vst [vmem:[#allocation118_spill] sm:$0xff] %v21429_v2  ;;  %v21435_v49 = vpack.c.bf16 %v7012_v4, %v6996_v21  ;;  %v15393_v0 = vadd.f32 %v5590_v10, %v21335_v27  ;;  %v5976_v3 = vpop.f32.mrb[148].mxu1  ;;  %v5592_v33 = vpop.f32.mrb[149].mxu0  ;;  %v17310_v10 = vld [vmem:[%s24292_s3 + $0x24] ss:$16 sps:$4 sm:$0xff]  }
 0x3d6   : > { %24616 = vst [vmem:[#allocation119_spill] sm:$0xff] %v21431_v52  ;;  %24617 = vst [vmem:[#allocation120_spill] sm:$0xff] %v21433_v18  ;;  %v15457_v62 = vadd.f32 %v5976_v3, %v21338_v14  ;;  %v15394_v5 = vadd.f32 %v5592_v33, %v21341_v41  ;;  %v5978_v44 = vpop.f32.mrb[149].mxu1  ;;  %v5594_v55 = vpop.f32.mrb[150].mxu0  ;;  %v17313_v52 = vld [vmem:[%s24292_s3 + $0x2c] ss:$16 sps:$4 sm:$0xff]  }
 0x3d7   : > { %24618 = vst [vmem:[#allocation121_spill] sm:$0xff] %v21435_v49  ;;  %v15458_v35 = vadd.f32 %v5978_v44, %v21345_v45  ;;  %v15395_v21 = vadd.f32 %v5594_v55, %v21335_v27  ;;  %v5980_v28 = vpop.f32.mrb[150].mxu1  ;;  %v5596_v34 = vpop.f32.mrb[151].mxu0  ;;  %v7025_v3 = vmax.f32 %v15393_v0, 0.0  ;;  %v18232_v55 = vld [vmem:[%s18497_s23 + $0x8] ss:$16 sps:$4 sm:$0xff]  }
 0x3d8   : > { %v15459_v54 = vadd.f32 %v5980_v28, %v21338_v14  ;;  %v15396_v61 = vadd.f32 %v5596_v34, %v21341_v41  ;;  %v5982_v4 = vpop.f32.mrb[151].mxu1  ;;  %v7027_v49 = vmax.f32 %v15457_v62, 0.0  ;;  %v7026_v28 = vmax.f32 %v15394_v5, 0.0  ;;  %v17308_v0 = vld [vmem:[%s24292_s3 + $0x20] ss:$16 sps:$4 sm:$0xff]  }
 0x3d9   : > { %v7041_v33 = vmax.f32 %v15395_v21, 0.0  ;;  %v15460_v44 = vadd.f32 %v5982_v4, %v21345_v45  ;;  %6311 = vmatmul.mubr.bf16.vlgmr.msra.gmra.mrb[192].mxu0 %v18232_v55  ;;  %v7028_v21 = vmax.f32 %v15458_v35, 0.0  ;;  %v17311_v62 = vld [vmem:[%s24292_s3 + $0x28] ss:$16 sps:$4 sm:$0xff]   ;;  %v17316_v5 = vld [vmem:[%s24292_s3 + $0x44] ss:$16 sps:$4 sm:$0xff]  }
 0x3da   : > { %v7043_v2 = vmax.f32 %v15459_v54, 0.0  ;;  %v7042_v34 = vmax.f32 %v15396_v61, 0.0  ;;  %6697 = vmatmul.mubr.bf16.vlgmr.msra.gmra.mrb[192].mxu1 %v18232_v55  ;;  %10720 = vmatpush1.bf16.msra.mxu0 %v17302_v15  ;;  %v17319_v35 = vld [vmem:[%s24292_s3 + $0x4c] ss:$16 sps:$4 sm:$0xff]  }
 0x3db   : > { %v21461_v18 = vpack.c.bf16 %v7041_v33, %v7025_v3  ;;  %v7044_v4 = vmax.f32 %v15460_v44, 0.0  ;;  %12264 = vmatpush1.bf16.msra.mxu1 %v17305_v63  ;;  %6320 = vmatprep.mubr.bf16.mxu0 %v18233_v25 }
 0x3dc   : > { %v21470_v15 = vpack.c.bf16 %v7043_v2, %v7027_v49  ;;  %v21472_v54 = vpack.c.bf16 %v7042_v34, %v7026_v28  ;;  %v5600_v61 = vpop.f32.mrb[152].mxu0  ;;  %6706 = vmatprep.mubr.bf16.mxu1 %v18233_v25  ;;  %10721 = vmatprep.subr.bf16.mxu0 %v17310_v10 }
 0x3dd   : > { %24619 = vst [vmem:[#allocation122_spill] sm:$0xff] %v21461_v18  ;;  %v21477_v63 = vpack.c.bf16 %v7044_v4, %v7028_v21  ;;  %v15397_v3 = vadd.f32 %v5600_v61, %v21335_v27  ;;  %v5986_v33 = vpop.f32.mrb[152].mxu1  ;;  %v5602_v44 = vpop.f32.mrb[153].mxu0  ;;  %12265 = vmatprep.subr.bf16.mxu1 %v17313_v52  ;;  %v17314_v4 = vld [vmem:[%s24292_s3 + $0x40] ss:$16 sps:$4 sm:$0xff]  }
 0x3de   : > { %24620 = vst [vmem:[#allocation123_spill] sm:$0xff] %v21470_v15  ;;  %24621 = vst [vmem:[#allocation124_spill] sm:$0xff] %v21472_v54  ;;  %v15461_v55 = vadd.f32 %v5986_v33, %v21338_v14  ;;  %v15398_v2 = vadd.f32 %v5602_v44, %v21341_v41  ;;  %v5988_v49 = vpop.f32.mrb[153].mxu1  ;;  %v5604_v28 = vpop.f32.mrb[154].mxu0  ;;  %10722 = vmatpush1.bf16.msra.mxu0 %v17308_v0  ;;  %v17317_v0 = vld [vmem:[%s24292_s3 + $0x48] ss:$16 sps:$4 sm:$0xff]  }
 0x3df   : > { %24622 = vst [vmem:[#allocation125_spill] sm:$0xff] %v21477_v63  ;;  %v15462_v25 = vadd.f32 %v5988_v49, %v21345_v45  ;;  %v15399_v10 = vadd.f32 %v5604_v28, %v21335_v27  ;;  %v5990_v34 = vpop.f32.mrb[154].mxu1  ;;  %v5606_v21 = vpop.f32.mrb[155].mxu0  ;;  %12266 = vmatpush1.bf16.msra.mxu1 %v17311_v62  ;;  %10723 = vmatprep.subr.bf16.mxu0 %v17316_v5  ;;  %v17322_v62 = vld [vmem:[%s24292_s3 + $0x64] ss:$16 sps:$4 sm:$0xff]   ;;  %v7057_v44 = vmax.f32 %v15397_v3, 0.0 }
 0x3e0   : > { %v15463_v52 = vadd.f32 %v5990_v34, %v21338_v14  ;;  %v15400_v61 = vadd.f32 %v5606_v21, %v21341_v41  ;;  %v5992_v33 = vpop.f32.mrb[155].mxu1  ;;  %12267 = vmatprep.subr.bf16.mxu1 %v17319_v35  ;;  %v18234_v5 = vld [vmem:[%s18497_s23 + $0x28] ss:$16 sps:$4 sm:$0xff]   ;;  %v17325_v34 = vld [vmem:[%s24292_s3 + $0x6c] ss:$16 sps:$4 sm:$0xff]   ;;  %v7059_v21 = vmax.f32 %v15461_v55, 0.0 }
 0x3e1   : > { %v7073_v49 = vmax.f32 %v15399_v10, 0.0  ;;  %v15464_v28 = vadd.f32 %v5992_v33, %v21345_v45  ;;  %6321 = vmatmul.mubr.bf16.gmra.mrb[196].mxu0 %v18234_v5  ;;  %v7058_v15 = vmax.f32 %v15398_v2, 0.0  ;;  %v18235_v35 = vld [vmem:[%s18497_s23 + $0x4c] ss:$16 sps:$4 sm:$0xff]   ;;  %v7060_v54 = vmax.f32 %v15462_v25, 0.0 }
 0x3e2   : > { %v7075_v63 = vmax.f32 %v15463_v52, 0.0  ;;  %v7074_v18 = vmax.f32 %v15400_v61, 0.0  ;;  %6707 = vmatmul.mubr.bf16.gmra.mrb[196].mxu1 %v18234_v5  ;;  %6330 = vmatprep.mubr.bf16.mxu0 %v18235_v35  ;;  %v17320_v10 = vld [vmem:[%s24292_s3 + $0x60] ss:$16 sps:$4 sm:$0xff]   ;;  %v17323_v2 = vld [vmem:[%s24292_s3 + $0x68] ss:$16 sps:$4 sm:$0xff]  }
 0x3e3   : > { %v21501_v12 = vpack.c.bf16 %v7073_v49, %v7057_v44  ;;  %v7076_v3 = vmax.f32 %v15464_v28, 0.0  ;;  %6716 = vmatprep.mubr.bf16.mxu1 %v18235_v35  ;;  %10724 = vmatpush1.bf16.msra.mxu0 %v17314_v4  ;;  %v17328_v25 = vld [vmem:[%s24292_s3 + $0x84] ss:$16 sps:$4 sm:$0xff]  }
 0x3e4   : > { %v21506_v33 = vpack.c.bf16 %v7075_v63, %v7059_v21  ;;  %v21508_v30 = vpack.c.bf16 %v7074_v18, %v7058_v15  ;;  %v5610_v55 = vpop.f32.mrb[156].mxu0  ;;  %12268 = vmatpush1.bf16.msra.mxu1 %v17317_v0  ;;  %10725 = vmatprep.subr.bf16.mxu0 %v17322_v62  ;;  %v17331_v18 = vld [vmem:[%s24292_s3 + $0x8c] ss:$16 sps:$4 sm:$0xff]  }
 0x3e5   : > { %24623 = vst [vmem:[#allocation126_spill] sm:$0xff] %v21501_v12  ;;  %v21516_v4 = vpack.c.bf16 %v7076_v3, %v7060_v54  ;;  %v15401_v52 = vadd.f32 %v5610_v55, %v21335_v27  ;;  %v5996_v61 = vpop.f32.mrb[156].mxu1  ;;  %v5612_v63 = vpop.f32.mrb[157].mxu0  ;;  %12269 = vmatprep.subr.bf16.mxu1 %v17325_v34  ;;  %v17326_v34 = vld [vmem:[%s24292_s3 + $0x80] ss:$16 sps:$4 sm:$0xff]  }
 0x3e6   : > { %24624 = vst [vmem:[#allocation127_spill] sm:$0xff] %v21506_v33  ;;  %24625 = vst [vmem:[#allocation128_spill] sm:$0xff] %v21508_v30  ;;  %v15465_v15 = vadd.f32 %v5996_v61, %v21338_v14  ;;  %v15402_v0 = vadd.f32 %v5612_v63, %v21341_v41  ;;  %v5998_v62 = vpop.f32.mrb[157].mxu1  ;;  %v5614_v44 = vpop.f32.mrb[158].mxu0  ;;  %v17329_v55 = vld [vmem:[%s24292_s3 + $0x88] ss:$16 sps:$4 sm:$0xff]  }
 0x3e7   : > { %24626 = vst [vmem:[#allocation129_spill] sm:$0xff] %v21516_v4  ;;  %v15466_v49 = vadd.f32 %v5998_v62, %v21345_v45  ;;  %v15403_v54 = vadd.f32 %v5614_v44, %v21335_v27  ;;  %v6000_v28 = vpop.f32.mrb[158].mxu1  ;;  %v5616_v5 = vpop.f32.mrb[159].mxu0  ;;  %10726 = vmatpush1.bf16.msra.mxu0 %v17320_v10  ;;  %v17334_v10 = vld [vmem:[%s24292_s3 + $0xa4] ss:$16 sps:$4 sm:$0xff]   ;;  %v7089_v61 = vmax.f32 %v15401_v52, 0.0 }
 0x3e8   : > { %v15467_v21 = vadd.f32 %v6000_v28, %v21338_v14  ;;  %v15404_v35 = vadd.f32 %v5616_v5, %v21341_v41  ;;  %v6002_v3 = vpop.f32.mrb[159].mxu1  ;;  %12270 = vmatpush1.bf16.msra.mxu1 %v17323_v2  ;;  %10727 = vmatprep.subr.bf16.mxu0 %v17328_v25  ;;  %v18236_v44 = vld [vmem:[%s18497_s23 + $0x48] ss:$16 sps:$4 sm:$0xff]   ;;  %v17337_v2 = vld [vmem:[%s24292_s3 + $0xac] ss:$16 sps:$4 sm:$0xff]   ;;  %v7091_v25 = vmax.f32 %v15465_v15, 0.0 }
 0x3e9   : > { %v7105_v63 = vmax.f32 %v15403_v54, 0.0  ;;  %v15468_v62 = vadd.f32 %v6002_v3, %v21345_v45  ;;  %6331 = vmatmul.mubr.bf16.gmra.mrb[200].mxu0 %v18236_v44  ;;  %12271 = vmatprep.subr.bf16.mxu1 %v17331_v18  ;;  %v7090_v28 = vmax.f32 %v15402_v0, 0.0  ;;  %v18237_v4 = vld [vmem:[%s18497_s23 + $0x6c] ss:$16 sps:$4 sm:$0xff]   ;;  %v7092_v12 = vmax.f32 %v15466_v49, 0.0 }
 0x3ea   : > { %v7107_v5 = vmax.f32 %v15467_v21, 0.0  ;;  %v7106_v33 = vmax.f32 %v15404_v35, 0.0  ;;  %6717 = vmatmul.mubr.bf16.gmra.mrb[200].mxu1 %v18236_v44  ;;  %6340 = vmatprep.mubr.bf16.mxu0 %v18237_v4  ;;  %v17332_v18 = vld [vmem:[%s24292_s3 + $0xa0] ss:$16 sps:$4 sm:$0xff]   ;;  %v17335_v0 = vld [vmem:[%s24292_s3 + $0xa8] ss:$16 sps:$4 sm:$0xff]  }
 0x3eb   : > { %v21543_v30 = vpack.c.bf16 %v7105_v63, %v7089_v61  ;;  %v7108_v52 = vmax.f32 %v15468_v62, 0.0  ;;  %6726 = vmatprep.mubr.bf16.mxu1 %v18237_v4  ;;  %10728 = vmatpush1.bf16.msra.mxu0 %v17326_v34  ;;  %v17340_v4 = vld [vmem:[%s24292_s3 + $0xc4] ss:$16 sps:$4 sm:$0xff]  }
 0x3ec   : > { %v21548_v54 = vpack.c.bf16 %v7107_v5, %v7091_v25  ;;  %v21550_v3 = vpack.c.bf16 %v7106_v33, %v7090_v28  ;;  %v5620_v15 = vpop.f32.mrb[160].mxu0  ;;  %12272 = vmatpush1.bf16.msra.mxu1 %v17329_v55  ;;  %10729 = vmatprep.subr.bf16.mxu0 %v17334_v10  ;;  %v17343_v33 = vld [vmem:[%s24292_s3 + $0xcc] ss:$16 sps:$4 sm:$0xff]  }
 0x3ed   : > { %24627 = vst [vmem:[#allocation130_spill] sm:$0xff] %v21543_v30  ;;  %v21558_v49 = vpack.c.bf16 %v7108_v52, %v7092_v12  ;;  %v15405_v34 = vadd.f32 %v5620_v15, %v21335_v27  ;;  %v6006_v21 = vpop.f32.mrb[160].mxu1  ;;  %v5622_v35 = vpop.f32.mrb[161].mxu0  ;;  %12273 = vmatprep.subr.bf16.mxu1 %v17337_v2  ;;  %v17338_v2 = vld [vmem:[%s24292_s3 + $0xc0] ss:$16 sps:$4 sm:$0xff]  }
 0x3ee   : > { %24628 = vst [vmem:[#allocation131_spill] sm:$0xff] %v21548_v54  ;;  %24629 = vst [vmem:[#allocation132_spill] sm:$0xff] %v21550_v3  ;;  %v15469_v55 = vadd.f32 %v6006_v21, %v21338_v14  ;;  %v15406_v10 = vadd.f32 %v5622_v35, %v21341_v41  ;;  %v6008_v61 = vpop.f32.mrb[161].mxu1  ;;  %v5624_v63 = vpop.f32.mrb[162].mxu0  ;;  %v17341_v15 = vld [vmem:[%s24292_s3 + $0xc8] ss:$16 sps:$4 sm:$0xff]  }
 0x3ef   : > { %24630 = vst [vmem:[#allocation133_spill] sm:$0xff] %v21558_v49  ;;  %v15470_v62 = vadd.f32 %v6008_v61, %v21345_v45  ;;  %v15407_v12 = vadd.f32 %v5624_v63, %v21335_v27  ;;  %v6010_v44 = vpop.f32.mrb[162].mxu1  ;;  %v5626_v25 = vpop.f32.mrb[163].mxu0  ;;  %10730 = vmatpush1.bf16.msra.mxu0 %v17332_v18  ;;  %v17346_v18 = vld [vmem:[%s24292_s3 + $0xe4] ss:$16 sps:$4 sm:$0xff]   ;;  %v7121_v21 = vmax.f32 %v15405_v34, 0.0 }
 0x3f0   : > { %v15471_v28 = vadd.f32 %v6010_v44, %v21338_v14  ;;  %v15408_v5 = vadd.f32 %v5626_v25, %v21341_v41  ;;  %v6012_v52 = vpop.f32.mrb[163].mxu1  ;;  %12274 = vmatpush1.bf16.msra.mxu1 %v17335_v0  ;;  %10731 = vmatprep.subr.bf16.mxu0 %v17340_v4  ;;  %v18238_v63 = vld [vmem:[%s18497_s23 + $0x68] ss:$16 sps:$4 sm:$0xff]   ;;  %v17349_v0 = vld [vmem:[%s24292_s3 + $0xec] ss:$16 sps:$4 sm:$0xff]   ;;  %v7123_v4 = vmax.f32 %v15469_v55, 0.0 }
 0x3f1   : > { %v7137_v35 = vmax.f32 %v15407_v12, 0.0  ;;  %v15472_v61 = vadd.f32 %v6012_v52, %v21345_v45  ;;  %6341 = vmatmul.mubr.bf16.gmra.mrb[204].mxu0 %v18238_v63  ;;  %12275 = vmatprep.subr.bf16.mxu1 %v17343_v33  ;;  %v7122_v44 = vmax.f32 %v15406_v10, 0.0  ;;  %v18239_v49 = vld [vmem:[%s18497_s23 + $0x8c] ss:$16 sps:$4 sm:$0xff]   ;;  %v7124_v30 = vmax.f32 %v15470_v62, 0.0 }
 0x3f2   : > { %v7139_v25 = vmax.f32 %v15471_v28, 0.0  ;;  %v7138_v54 = vmax.f32 %v15408_v5, 0.0  ;;  %6727 = vmatmul.mubr.bf16.gmra.mrb[204].mxu1 %v18238_v63  ;;  %6350 = vmatprep.mubr.bf16.mxu0 %v18239_v49  ;;  %v17344_v33 = vld [vmem:[%s24292_s3 + $0xe0] ss:$16 sps:$4 sm:$0xff]   ;;  %v17347_v10 = vld [vmem:[%s24292_s3 + $0xe8] ss:$16 sps:$4 sm:$0xff]  }
 0x3f3   : > { %v21585_v3 = vpack.c.bf16 %v7137_v35, %v7121_v21  ;;  %v7140_v34 = vmax.f32 %v15472_v61, 0.0  ;;  %6736 = vmatprep.mubr.bf16.mxu1 %v18239_v49  ;;  %10732 = vmatpush1.bf16.msra.mxu0 %v17338_v2  ;;  %v17352_v49 = vld [vmem:[%s24292_s3 + $0x104] ss:$16 sps:$4 sm:$0xff]  }
 0x3f4   : > { %v21590_v12 = vpack.c.bf16 %v7139_v25, %v7123_v4  ;;  %v21592_v52 = vpack.c.bf16 %v7138_v54, %v7122_v44  ;;  %v5630_v55 = vpop.f32.mrb[164].mxu0  ;;  %12276 = vmatpush1.bf16.msra.mxu1 %v17341_v15  ;;  %10733 = vmatprep.subr.bf16.mxu0 %v17346_v18  ;;  %v17355_v54 = vld [vmem:[%s24292_s3 + $0x10c] ss:$16 sps:$4 sm:$0xff]  }
 0x3f5   : > { %24631 = vst [vmem:[#allocation134_spill] sm:$0xff] %v21585_v3  ;;  %v21600_v62 = vpack.c.bf16 %v7140_v34, %v7124_v30  ;;  %v15409_v2 = vadd.f32 %v5630_v55, %v21335_v27  ;;  %v6016_v28 = vpop.f32.mrb[164].mxu1  ;;  %v5632_v5 = vpop.f32.mrb[165].mxu0  ;;  %12277 = vmatprep.subr.bf16.mxu1 %v17349_v0  ;;  %v17350_v0 = vld [vmem:[%s24292_s3 + $0x100] ss:$16 sps:$4 sm:$0xff]  }
 0x3f6   : > { %24632 = vst [vmem:[#allocation135_spill] sm:$0xff] %v21590_v12  ;;  %24633 = vst [vmem:[#allocation136_spill] sm:$0xff] %v21592_v52  ;;  %v15473_v15 = vadd.f32 %v6016_v28, %v21338_v14  ;;  %v15410_v18 = vadd.f32 %v5632_v5, %v21341_v41  ;;  %v6018_v21 = vpop.f32.mrb[165].mxu1  ;;  %v5634_v35 = vpop.f32.mrb[166].mxu0  ;;  %v17353_v55 = vld [vmem:[%s24292_s3 + $0x108] ss:$16 sps:$4 sm:$0xff]  }
 0x3f7   : > { %24634 = vst [vmem:[#allocation137_spill] sm:$0xff] %v21600_v62  ;;  %v15474_v61 = vadd.f32 %v6018_v21, %v21345_v45  ;;  %v15411_v30 = vadd.f32 %v5634_v35, %v21335_v27  ;;  %v6020_v63 = vpop.f32.mrb[166].mxu1  ;;  %v5636_v4 = vpop.f32.mrb[167].mxu0  ;;  %10734 = vmatpush1.bf16.msra.mxu0 %v17344_v33  ;;  %v17358_v33 = vld [vmem:[%s24292_s3 + $0x124] ss:$16 sps:$4 sm:$0xff]   ;;  %v7153_v28 = vmax.f32 %v15409_v2, 0.0 }
 0x3f8   : > { %v15475_v44 = vadd.f32 %v6020_v63, %v21338_v14  ;;  %v15412_v25 = vadd.f32 %v5636_v4, %v21341_v41  ;;  %v6022_v34 = vpop.f32.mrb[167].mxu1  ;;  %12278 = vmatpush1.bf16.msra.mxu1 %v17347_v10  ;;  %10735 = vmatprep.subr.bf16.mxu0 %v17352_v49  ;;  %v18240_v35 = vld [vmem:[%s18497_s23 + $0x88] ss:$16 sps:$4 sm:$0xff]   ;;  %v17361_v10 = vld [vmem:[%s24292_s3 + $0x12c] ss:$16 sps:$4 sm:$0xff]   ;;  %v7155_v49 = vmax.f32 %v15473_v15, 0.0 }
 0x3f9   : > { %v7169_v5 = vmax.f32 %v15411_v30, 0.0  ;;  %v15476_v21 = vadd.f32 %v6022_v34, %v21345_v45  ;;  %6351 = vmatmul.mubr.bf16.gmra.mrb[208].mxu0 %v18240_v35  ;;  %12279 = vmatprep.subr.bf16.mxu1 %v17355_v54  ;;  %v7154_v63 = vmax.f32 %v15410_v18, 0.0  ;;  %v18241_v62 = vld [vmem:[%s18497_s23 + $0xac] ss:$16 sps:$4 sm:$0xff]   ;;  %v7156_v3 = vmax.f32 %v15474_v61, 0.0 }
 0x3fa   : > { %v7171_v4 = vmax.f32 %v15475_v44, 0.0  ;;  %v7170_v12 = vmax.f32 %v15412_v25, 0.0  ;;  %6737 = vmatmul.mubr.bf16.gmra.mrb[208].mxu1 %v18240_v35  ;;  %6360 = vmatprep.mubr.bf16.mxu0 %v18241_v62  ;;  %v17356_v54 = vld [vmem:[%s24292_s3 + $0x120] ss:$16 sps:$4 sm:$0xff]   ;;  %v17359_v18 = vld [vmem:[%s24292_s3 + $0x128] ss:$16 sps:$4 sm:$0xff]  }
 0x3fb   : > { %v21627_v52 = vpack.c.bf16 %v7169_v5, %v7153_v28  ;;  %v7172_v2 = vmax.f32 %v15476_v21, 0.0  ;;  %6746 = vmatprep.mubr.bf16.mxu1 %v18241_v62  ;;  %10736 = vmatpush1.bf16.msra.mxu0 %v17350_v0  ;;  %v17364_v62 = vld [vmem:[%s24292_s3 + $0x144] ss:$16 sps:$4 sm:$0xff]  }
 0x3fc   : > { %v21632_v30 = vpack.c.bf16 %v7171_v4, %v7155_v49  ;;  %v21634_v34 = vpack.c.bf16 %v7170_v12, %v7154_v63  ;;  %v5640_v15 = vpop.f32.mrb[168].mxu0  ;;  %12280 = vmatpush1.bf16.msra.mxu1 %v17353_v55  ;;  %10737 = vmatprep.subr.bf16.mxu0 %v17358_v33  ;;  %v17367_v12 = vld [vmem:[%s24292_s3 + $0x14c] ss:$16 sps:$4 sm:$0xff]  }
 0x3fd   : > { %24635 = vst [vmem:[#allocation138_spill] sm:$0xff] %v21627_v52  ;;  %v21642_v61 = vpack.c.bf16 %v7172_v2, %v7156_v3  ;;  %v15413_v0 = vadd.f32 %v5640_v15, %v21335_v27  ;;  %v6026_v44 = vpop.f32.mrb[168].mxu1  ;;  %v5642_v25 = vpop.f32.mrb[169].mxu0  ;;  %12281 = vmatprep.subr.bf16.mxu1 %v17361_v10  ;;  %v17362_v10 = vld [vmem:[%s24292_s3 + $0x140] ss:$16 sps:$4 sm:$0xff]  }
 0x3fe   : > { %24636 = vst [vmem:[#allocation139_spill] sm:$0xff] %v21632_v30  ;;  %24637 = vst [vmem:[#allocation140_spill] sm:$0xff] %v21634_v34  ;;  %v15477_v55 = vadd.f32 %v6026_v44, %v21338_v14  ;;  %v15414_v33 = vadd.f32 %v5642_v25, %v21341_v41  ;;  %v6028_v28 = vpop.f32.mrb[169].mxu1  ;;  %v5644_v5 = vpop.f32.mrb[170].mxu0  ;;  %v17365_v15 = vld [vmem:[%s24292_s3 + $0x148] ss:$16 sps:$4 sm:$0xff]  }
 0x3ff   : > { %24638 = vst [vmem:[#allocation141_spill] sm:$0xff] %v21642_v61  ;;  %v15478_v21 = vadd.f32 %v6028_v28, %v21345_v45  ;;  %v15415_v3 = vadd.f32 %v5644_v5, %v21335_v27  ;;  %v6030_v35 = vpop.f32.mrb[170].mxu1  ;;  %v5646_v49 = vpop.f32.mrb[171].mxu0  ;;  %10738 = vmatpush1.bf16.msra.mxu0 %v17356_v54  ;;  %v17370_v54 = vld [vmem:[%s24292_s3 + $0x164] ss:$16 sps:$4 sm:$0xff]   ;;  %v7185_v44 = vmax.f32 %v15413_v0, 0.0 }
 0x400   : > { %v15479_v63 = vadd.f32 %v6030_v35, %v21338_v14  ;;  %v15416_v4 = vadd.f32 %v5646_v49, %v21341_v41  ;;  %v6032_v2 = vpop.f32.mrb[171].mxu1  ;;  %12282 = vmatpush1.bf16.msra.mxu1 %v17359_v18  ;;  %10739 = vmatprep.subr.bf16.mxu0 %v17364_v62  ;;  %v18242_v5 = vld [vmem:[%s18497_s23 + $0xa8] ss:$16 sps:$4 sm:$0xff]   ;;  %v17373_v18 = vld [vmem:[%s24292_s3 + $0x16c] ss:$16 sps:$4 sm:$0xff]   ;;  %v7187_v62 = vmax.f32 %v15477_v55, 0.0 }
 0x401   : > { %v7201_v25 = vmax.f32 %v15415_v3, 0.0  ;;  %v15480_v28 = vadd.f32 %v6032_v2, %v21345_v45  ;;  %6361 = vmatmul.mubr.bf16.gmra.mrb[212].mxu0 %v18242_v5  ;;  %12283 = vmatprep.subr.bf16.mxu1 %v17367_v12  ;;  %v7186_v35 = vmax.f32 %v15414_v33, 0.0  ;;  %v18243_v61 = vld [vmem:[%s18497_s23 + $0xcc] ss:$16 sps:$4 sm:$0xff]   ;;  %v7188_v52 = vmax.f32 %v15478_v21, 0.0 }
 0x402   : > { %v7203_v49 = vmax.f32 %v15479_v63, 0.0  ;;  %v7202_v30 = vmax.f32 %v15416_v4, 0.0  ;;  %6747 = vmatmul.mubr.bf16.gmra.mrb[212].mxu1 %v18242_v5  ;;  %6370 = vmatprep.mubr.bf16.mxu0 %v18243_v61  ;;  %v17368_v12 = vld [vmem:[%s24292_s3 + $0x160] ss:$16 sps:$4 sm:$0xff]   ;;  %v17371_v33 = vld [vmem:[%s24292_s3 + $0x168] ss:$16 sps:$4 sm:$0xff]  }
 0x403   : > { %v21669_v34 = vpack.c.bf16 %v7201_v25, %v7185_v44  ;;  %v7204_v0 = vmax.f32 %v15480_v28, 0.0  ;;  %6756 = vmatprep.mubr.bf16.mxu1 %v18243_v61  ;;  %10740 = vmatpush1.bf16.msra.mxu0 %v17362_v10  ;;  %v17376_v61 = vld [vmem:[%s24292_s3 + $0x184] ss:$16 sps:$4 sm:$0xff]  }
 0x404   : > { %v21674_v3 = vpack.c.bf16 %v7203_v49, %v7187_v62  ;;  %v21676_v2 = vpack.c.bf16 %v7202_v30, %v7186_v35  ;;  %v5650_v55 = vpop.f32.mrb[172].mxu0  ;;  %12284 = vmatpush1.bf16.msra.mxu1 %v17365_v15  ;;  %10741 = vmatprep.subr.bf16.mxu0 %v17370_v54  ;;  %v17379_v30 = vld [vmem:[%s24292_s3 + $0x18c] ss:$16 sps:$4 sm:$0xff]  }
 0x405   : > { %24639 = vst [vmem:[#allocation142_spill] sm:$0xff] %v21669_v34  ;;  %v21684_v21 = vpack.c.bf16 %v7204_v0, %v7188_v52  ;;  %v15417_v10 = vadd.f32 %v5650_v55, %v21335_v27  ;;  %v6036_v63 = vpop.f32.mrb[172].mxu1  ;;  %v5652_v4 = vpop.f32.mrb[173].mxu0  ;;  %12285 = vmatprep.subr.bf16.mxu1 %v17373_v18  ;;  %v17374_v18 = vld [vmem:[%s24292_s3 + $0x180] ss:$16 sps:$4 sm:$0xff]  }
 0x406   : > { %24640 = vst [vmem:[#allocation143_spill] sm:$0xff] %v21674_v3  ;;  %24641 = vst [vmem:[#allocation144_spill] sm:$0xff] %v21676_v2  ;;  %v15481_v15 = vadd.f32 %v6036_v63, %v21338_v14  ;;  %v15418_v54 = vadd.f32 %v5652_v4, %v21341_v41  ;;  %v6038_v44 = vpop.f32.mrb[173].mxu1  ;;  %v5654_v25 = vpop.f32.mrb[174].mxu0  ;;  %v17377_v55 = vld [vmem:[%s24292_s3 + $0x188] ss:$16 sps:$4 sm:$0xff]  }
 0x407   : > { %24642 = vst [vmem:[#allocation145_spill] sm:$0xff] %v21684_v21  ;;  %v15482_v28 = vadd.f32 %v6038_v44, %v21345_v45  ;;  %v15419_v52 = vadd.f32 %v5654_v25, %v21335_v27  ;;  %v6040_v5 = vpop.f32.mrb[174].mxu1  ;;  %v5656_v62 = vpop.f32.mrb[175].mxu0  ;;  %10742 = vmatpush1.bf16.msra.mxu0 %v17368_v12  ;;  %v17382_v12 = vld [vmem:[%s24292_s3 + $0x1a4] ss:$16 sps:$4 sm:$0xff]   ;;  %v7217_v63 = vmax.f32 %v15417_v10, 0.0 }
 0x408   : > { %v15483_v35 = vadd.f32 %v6040_v5, %v21338_v14  ;;  %v15420_v49 = vadd.f32 %v5656_v62, %v21341_v41  ;;  %v6042_v0 = vpop.f32.mrb[175].mxu1  ;;  %12286 = vmatpush1.bf16.msra.mxu1 %v17371_v33  ;;  %10743 = vmatprep.subr.bf16.mxu0 %v17376_v61  ;;  %v18244_v25 = vld [vmem:[%s18497_s23 + $0xc8] ss:$16 sps:$4 sm:$0xff]   ;;  %v17385_v33 = vld [vmem:[%s24292_s3 + $0x1ac] ss:$16 sps:$4 sm:$0xff]   ;;  %v7219_v61 = vmax.f32 %v15481_v15, 0.0 }
 0x409   : > { %v7233_v4 = vmax.f32 %v15419_v52, 0.0  ;;  %v15484_v44 = vadd.f32 %v6042_v0, %v21345_v45  ;;  %6371 = vmatmul.mubr.bf16.gmra.mrb[216].mxu0 %v18244_v25  ;;  %12287 = vmatprep.subr.bf16.mxu1 %v17379_v30  ;;  %v7218_v5 = vmax.f32 %v15418_v54, 0.0  ;;  %v18245_v21 = vld [vmem:[%s18497_s23 + $0xec] ss:$16 sps:$4 sm:$0xff]   ;;  %v7220_v34 = vmax.f32 %v15482_v28, 0.0 }
 0x40a   : > { %v7235_v62 = vmax.f32 %v15483_v35, 0.0  ;;  %v7234_v3 = vmax.f32 %v15420_v49, 0.0  ;;  %6757 = vmatmul.mubr.bf16.gmra.mrb[216].mxu1 %v18244_v25  ;;  %6380 = vmatprep.mubr.bf16.mxu0 %v18245_v21  ;;  %v17380_v30 = vld [vmem:[%s24292_s3 + $0x1a0] ss:$16 sps:$4 sm:$0xff]   ;;  %v17383_v54 = vld [vmem:[%s24292_s3 + $0x1a8] ss:$16 sps:$4 sm:$0xff]  }
 0x40b   : > { %v21711_v2 = vpack.c.bf16 %v7233_v4, %v7217_v63  ;;  %v7236_v10 = vmax.f32 %v15484_v44, 0.0  ;;  %6766 = vmatprep.mubr.bf16.mxu1 %v18245_v21  ;;  %10744 = vmatpush1.bf16.msra.mxu0 %v17374_v18  ;;  %v17388_v21 = vld [vmem:[%s24292_s3 + $0x1c4] ss:$16 sps:$4 sm:$0xff]  }
 0x40c   : > { %v21716_v52 = vpack.c.bf16 %v7235_v62, %v7219_v61  ;;  %v21718_v0 = vpack.c.bf16 %v7234_v3, %v7218_v5  ;;  %v5660_v15 = vpop.f32.mrb[176].mxu0  ;;  %12288 = vmatpush1.bf16.msra.mxu1 %v17377_v55  ;;  %10745 = vmatprep.subr.bf16.mxu0 %v17382_v12  ;;  %v17391_v3 = vld [vmem:[%s24292_s3 + $0x1cc] ss:$16 sps:$4 sm:$0xff]  }
 0x40d   : > { %24643 = vst [vmem:[#allocation146_spill] sm:$0xff] %v21711_v2  ;;  %v21726_v28 = vpack.c.bf16 %v7236_v10, %v7220_v34  ;;  %v15421_v18 = vadd.f32 %v5660_v15, %v21335_v27  ;;  %v6046_v35 = vpop.f32.mrb[176].mxu1  ;;  %v5662_v49 = vpop.f32.mrb[177].mxu0  ;;  %12289 = vmatprep.subr.bf16.mxu1 %v17385_v33  ;;  %v17386_v33 = vld [vmem:[%s24292_s3 + $0x1c0] ss:$16 sps:$4 sm:$0xff]  }
 0x40e   : > { %24644 = vst [vmem:[#allocation147_spill] sm:$0xff] %v21716_v52  ;;  %24645 = vst [vmem:[#allocation148_spill] sm:$0xff] %v21718_v0  ;;  %v15485_v55 = vadd.f32 %v6046_v35, %v21338_v14  ;;  %v15422_v12 = vadd.f32 %v5662_v49, %v21341_v41  ;;  %v6048_v63 = vpop.f32.mrb[177].mxu1  ;;  %v5664_v4 = vpop.f32.mrb[178].mxu0  ;;  %v17389_v15 = vld [vmem:[%s24292_s3 + $0x1c8] ss:$16 sps:$4 sm:$0xff]  }
 0x40f   : > { %24646 = vst [vmem:[#allocation149_spill] sm:$0xff] %v21726_v28  ;;  %v15486_v44 = vadd.f32 %v6048_v63, %v21345_v45  ;;  %v15423_v34 = vadd.f32 %v5664_v4, %v21335_v27  ;;  %v6050_v25 = vpop.f32.mrb[178].mxu1  ;;  %v5666_v61 = vpop.f32.mrb[179].mxu0  ;;  %10746 = vmatpush1.bf16.msra.mxu0 %v17380_v30  ;;  %v17394_v30 = vld [vmem:[%s24292_s3 + $0x1e4] ss:$16 sps:$4 sm:$0xff]   ;;  %v7249_v35 = vmax.f32 %v15421_v18, 0.0 }
 0x410   : > { %v15487_v5 = vadd.f32 %v6050_v25, %v21338_v14  ;;  %v15424_v62 = vadd.f32 %v5666_v61, %v21341_v41  ;;  %v6052_v10 = vpop.f32.mrb[179].mxu1  ;;  %12290 = vmatpush1.bf16.msra.mxu1 %v17383_v54  ;;  %10747 = vmatprep.subr.bf16.mxu0 %v17388_v21  ;;  %v18246_v4 = vld [vmem:[%s18497_s23 + $0xe8] ss:$16 sps:$4 sm:$0xff]   ;;  %v17397_v54 = vld [vmem:[%s24292_s3 + $0x1ec] ss:$16 sps:$4 sm:$0xff]   ;;  %v7251_v21 = vmax.f32 %v15485_v55, 0.0 }
 0x411   : > { %v7265_v49 = vmax.f32 %v15423_v34, 0.0  ;;  %v15488_v63 = vadd.f32 %v6052_v10, %v21345_v45  ;;  %6381 = vmatmul.mubr.bf16.gmra.mrb[220].mxu0 %v18246_v4  ;;  %12291 = vmatprep.subr.bf16.mxu1 %v17391_v3  ;;  %v7250_v25 = vmax.f32 %v15422_v12, 0.0  ;;  %v18247_v28 = vld [vmem:[%s18497_s23 + $0x10c] ss:$16 sps:$4 sm:$0xff]   ;;  %v7252_v2 = vmax.f32 %v15486_v44, 0.0 }
 0x412   : > { %v7267_v61 = vmax.f32 %v15487_v5, 0.0  ;;  %v7266_v52 = vmax.f32 %v15424_v62, 0.0  ;;  %6767 = vmatmul.mubr.bf16.gmra.mrb[220].mxu1 %v18246_v4  ;;  %6390 = vmatprep.mubr.bf16.mxu0 %v18247_v28  ;;  %v17392_v3 = vld [vmem:[%s24292_s3 + $0x1e0] ss:$16 sps:$4 sm:$0xff]   ;;  %v17395_v12 = vld [vmem:[%s24292_s3 + $0x1e8] ss:$16 sps:$4 sm:$0xff]  }
 0x413   : > { %v21753_v0 = vpack.c.bf16 %v7265_v49, %v7249_v35  ;;  %v7268_v18 = vmax.f32 %v15488_v63, 0.0  ;;  %6776 = vmatprep.mubr.bf16.mxu1 %v18247_v28  ;;  %10748 = vmatpush1.bf16.msra.mxu0 %v17386_v33  ;;  %v17400_v28 = vld [vmem:[%s24292_s3 + $0x204] ss:$16 sps:$4 sm:$0xff]  }
 0x414   : > { %v21758_v34 = vpack.c.bf16 %v7267_v61, %v7251_v21  ;;  %v21760_v10 = vpack.c.bf16 %v7266_v52, %v7250_v25  ;;  %v5670_v55 = vpop.f32.mrb[180].mxu0  ;;  %12292 = vmatpush1.bf16.msra.mxu1 %v17389_v15  ;;  %10749 = vmatprep.subr.bf16.mxu0 %v17394_v30  ;;  %v17403_v52 = vld [vmem:[%s24292_s3 + $0x20c] ss:$16 sps:$4 sm:$0xff]  }
 0x415   : > { %24647 = vst [vmem:[#allocation150_spill] sm:$0xff] %v21753_v0  ;;  %v21768_v44 = vpack.c.bf16 %v7268_v18, %v7252_v2  ;;  %v15425_v33 = vadd.f32 %v5670_v55, %v21335_v27  ;;  %v6056_v5 = vpop.f32.mrb[180].mxu1  ;;  %v5672_v62 = vpop.f32.mrb[181].mxu0  ;;  %12293 = vmatprep.subr.bf16.mxu1 %v17397_v54 }
 0x416   : > { %24648 = vst [vmem:[#allocation151_spill] sm:$0xff] %v21758_v34  ;;  %v15489_v15 = vadd.f32 %v6056_v5, %v21338_v14  ;;  %v15426_v30 = vadd.f32 %v5672_v62, %v21341_v41  ;;  %v6058_v35 = vpop.f32.mrb[181].mxu1  ;;  %v5674_v49 = vpop.f32.mrb[182].mxu0  ;;  %v18248_v62 = vld [vmem:[%s18497_s23 + $0x108] ss:$16 sps:$4 sm:$0xff]  }
 0x417   : > { %24649 = vst [vmem:[#allocation152_spill] sm:$0xff] %v21768_v44  ;;  %v15490_v63 = vadd.f32 %v6058_v35, %v21345_v45  ;;  %v15427_v2 = vadd.f32 %v5674_v49, %v21335_v27  ;;  %v6060_v4 = vpop.f32.mrb[182].mxu1  ;;  %v5676_v21 = vpop.f32.mrb[183].mxu0  ;;  %10750 = vmatpush1.bf16.msra.mxu0 %v17392_v3  ;;  %v7281_v18 = vmax.f32 %v15425_v33, 0.0  ;;  %v18249_v3 = vld [vmem:[%s18497_s23 + $0x12c] ss:$16 sps:$4 sm:$0xff]  }
 0x418   : > { %v15491_v54 = vadd.f32 %v6060_v4, %v21338_v14  ;;  %v15428_v25 = vadd.f32 %v5676_v21, %v21341_v41  ;;  %v6062_v61 = vpop.f32.mrb[183].mxu1  ;;  %12294 = vmatpush1.bf16.msra.mxu1 %v17395_v12  ;;  %10912 = vmatprep.subr.bf16.mxu0 %v17400_v28  ;;  %v7283_v35 = vmax.f32 %v15489_v15, 0.0  ;;  %v7282_v49 = vmax.f32 %v15426_v30, 0.0 }
 0x419   : > { %v7297_v55 = vmax.f32 %v15427_v2, 0.0  ;;  %v15492_v5 = vadd.f32 %v6062_v61, %v21345_v45  ;;  %6391 = vmatmul.mubr.bf16.gmra.mrb[224].mxu0 %v18248_v62  ;;  %12456 = vmatprep.subr.bf16.mxu1 %v17403_v52  ;;  %v7284_v4 = vmax.f32 %v15490_v63, 0.0 }
 0x41a   : > { %v7299_v34 = vmax.f32 %v15491_v54, 0.0  ;;  %v7298_v44 = vmax.f32 %v15428_v25, 0.0  ;;  %6777 = vmatmul.mubr.bf16.gmra.mrb[224].mxu1 %v18248_v62  ;;  %6400 = vmatprep.mubr.bf16.mxu0 %v18249_v3 }
 0x41b   : > { %v21783_v0 = vpack.c.bf16 %v7297_v55, %v7281_v18  ;;  %v7300_v21 = vmax.f32 %v15492_v5, 0.0  ;;  %6786 = vmatprep.mubr.bf16.mxu1 %v18249_v3 }
 0x41c   : > { %v21785_v12 = vpack.c.bf16 %v7299_v34, %v7283_v35  ;;  %v21787_v28 = vpack.c.bf16 %v7298_v44, %v7282_v49  ;;  %v5680_v33 = vpop.f32.mrb[184].mxu0 }
 0x41d   : > { %v21789_v2 = vpack.c.bf16 %v7300_v21, %v7284_v4  ;;  %v15429_v52 = vadd.f32 %v5680_v33, %v21335_v27  ;;  %v6066_v15 = vpop.f32.mrb[184].mxu1  ;;  %v5682_v30 = vpop.f32.mrb[185].mxu0  ;;  %v18250_v21 = vld [vmem:[%s18497_s23 + $0x128] ss:$16 sps:$4 sm:$0xff]  }
 0x41e   : > { %24650 = vst [vmem:[#allocation153_spill] sm:$0xff] %v21785_v12  ;;  %v15493_v54 = vadd.f32 %v6066_v15, %v21338_v14  ;;  %v15430_v63 = vadd.f32 %v5682_v30, %v21341_v41  ;;  %v6068_v25 = vpop.f32.mrb[185].mxu1  ;;  %v5684_v61 = vpop.f32.mrb[186].mxu0 }
 0x41f   : > { %24651 = vst [vmem:[#allocation154_spill] sm:$0xff] %v21789_v2  ;;  %v15494_v18 = vadd.f32 %v6068_v25, %v21345_v45  ;;  %v15431_v34 = vadd.f32 %v5684_v61, %v21335_v27  ;;  %v6070_v44 = vpop.f32.mrb[186].mxu1  ;;  %v5686_v55 = vpop.f32.mrb[187].mxu0  ;;  %v7313_v49 = vmax.f32 %v15429_v52, 0.0  ;;  %v18251_v61 = vld [vmem:[%s18497_s23 + $0x14c] ss:$16 sps:$4 sm:$0xff]  }
 0x420   : > { %v15495_v5 = vadd.f32 %v6070_v44, %v21338_v14  ;;  %v15432_v62 = vadd.f32 %v5686_v55, %v21341_v41  ;;  %v6072_v35 = vpop.f32.mrb[187].mxu1  ;;  %v7315_v33 = vmax.f32 %v15493_v54, 0.0  ;;  %v7314_v15 = vmax.f32 %v15430_v63, 0.0 }
 0x421   : > { %v7329_v3 = vmax.f32 %v15431_v34, 0.0  ;;  %v15496_v4 = vadd.f32 %v6072_v35, %v21345_v45  ;;  %6401 = vmatmul.mubr.bf16.gmra.mrb[228].mxu0 %v18250_v21  ;;  %v7316_v12 = vmax.f32 %v15494_v18, 0.0 }
 0x422   : > { %v7331_v30 = vmax.f32 %v15495_v5, 0.0  ;;  %v7330_v25 = vmax.f32 %v15432_v62, 0.0  ;;  %6787 = vmatmul.mubr.bf16.gmra.mrb[228].mxu1 %v18250_v21  ;;  %6410 = vmatprep.mubr.bf16.mxu0 %v18251_v61 }
 0x423   : > { %v21801_v2 = vpack.c.bf16 %v7329_v3, %v7313_v49  ;;  %v7332_v44 = vmax.f32 %v15496_v4, 0.0  ;;  %6796 = vmatprep.mubr.bf16.mxu1 %v18251_v61 }
 0x424   : > { %v21803_v55 = vpack.c.bf16 %v7331_v30, %v7315_v33  ;;  %v21805_v52 = vpack.c.bf16 %v7330_v25, %v7314_v15  ;;  %v5690_v34 = vpop.f32.mrb[188].mxu0 }
 0x425   : > { %v21807_v35 = vpack.c.bf16 %v7332_v44, %v7316_v12  ;;  %v15433_v54 = vadd.f32 %v5690_v34, %v21335_v27  ;;  %v6076_v63 = vpop.f32.mrb[188].mxu1  ;;  %v5692_v5 = vpop.f32.mrb[189].mxu0 }
 0x426   : > { %24652 = vst [vmem:[#allocation155_spill] sm:$0xff] %v21803_v55  ;;  %v15497_v62 = vadd.f32 %v6076_v63, %v21338_v14  ;;  %v15434_v18 = vadd.f32 %v5692_v5, %v21341_v41  ;;  %v6078_v49 = vpop.f32.mrb[189].mxu1  ;;  %v5694_v3 = vpop.f32.mrb[190].mxu0  ;;  %v18252_v63 = vld [vmem:[%s18497_s23 + $0x148] ss:$16 sps:$4 sm:$0xff]  }
 0x427   : > { %v15498_v4 = vadd.f32 %v6078_v49, %v21345_v45  ;;  %v15435_v21 = vadd.f32 %v5694_v3, %v21335_v27  ;;  %v6080_v33 = vpop.f32.mrb[190].mxu1  ;;  %v5696_v15 = vpop.f32.mrb[191].mxu0  ;;  %v7345_v61 = vmax.f32 %v15433_v54, 0.0  ;;  %v18253_v3 = vld [vmem:[%s18497_s23 + $0x16c] ss:$16 sps:$4 sm:$0xff]  }
 0x428   : > { %v15499_v12 = vadd.f32 %v6080_v33, %v21338_v14  ;;  %v15436_v30 = vadd.f32 %v5696_v15, %v21341_v41  ;;  %v6082_v25 = vpop.f32.mrb[191].mxu1  ;;  %v7347_v5 = vmax.f32 %v15497_v62, 0.0  ;;  %v7346_v55 = vmax.f32 %v15434_v18, 0.0  ;;  %v18254_v18 = vld [vmem:[%s18497_s23 + $0x168] ss:$16 sps:$4 sm:$0xff]  }
 0x429   : > { %v7361_v44 = vmax.f32 %v15435_v21, 0.0  ;;  %v15500_v34 = vadd.f32 %v6082_v25, %v21345_v45  ;;  %6411 = vmatmul.mubr.bf16.gmra.mrb[232].mxu0 %v18252_v63  ;;  %v7348_v14 = vmax.f32 %v15498_v4, 0.0  ;;  %v18255_v33 = vld [vmem:[%s18497_s23 + $0x18c] ss:$16 sps:$4 sm:$0xff]   ;;  %v18256_v4 = vld [vmem:[%s18497_s23 + $0x188] ss:$16 sps:$4 sm:$0xff]  }
 0x42a   : > { %v7363_v49 = vmax.f32 %v15499_v12, 0.0  ;;  %v7362_v27 = vmax.f32 %v15436_v30, 0.0  ;;  %6797 = vmatmul.mubr.bf16.gmra.mrb[232].mxu1 %v18252_v63  ;;  %6420 = vmatprep.mubr.bf16.mxu0 %v18253_v3  ;;  %v18257_v15 = vld [vmem:[%s18497_s23 + $0x1ac] ss:$16 sps:$4 sm:$0xff]   ;;  %v18260_v30 = vld [vmem:[%s18497_s23 + $0x1c8] ss:$16 sps:$4 sm:$0xff]  }
 0x42b   : > { %v21819_v41 = vpack.c.bf16 %v7361_v44, %v7345_v61  ;;  %v7364_v54 = vmax.f32 %v15500_v34, 0.0  ;;  %6806 = vmatprep.mubr.bf16.mxu1 %v18253_v3  ;;  %v18259_v12 = vld [vmem:[%s18497_s23 + $0x1cc] ss:$16 sps:$4 sm:$0xff]   ;;  %v18262_v61 = vld [vmem:[%s18497_s23 + $0x1e8] ss:$16 sps:$4 sm:$0xff]  }
 0x42c   : > { %v21821_v45 = vpack.c.bf16 %v7363_v49, %v7347_v5  ;;  %v21823_v21 = vpack.c.bf16 %v7362_v27, %v7346_v55  ;;  %v18258_v55 = vld [vmem:[%s18497_s23 + $0x1a8] ss:$16 sps:$4 sm:$0xff]   ;;  %v18261_v25 = vld [vmem:[%s18497_s23 + $0x1ec] ss:$16 sps:$4 sm:$0xff]   ;;  %v17398_v44 = vld [vmem:[%s24292_s3 + $0x200] ss:$16 sps:$4 sm:$0xff]   ;;  %s24236_s23 = scalar_lea.hbm %s24294_s5, %s15116_s17 }
 0x42d   : > { %v21825_v62 = vpack.c.bf16 %v7364_v54, %v7348_v14  ;;  %v17401_v34 = vld [vmem:[%s24292_s3 + $0x208] ss:$16 sps:$4 sm:$0xff]   ;;  %v17406_v63 = vld [vmem:[%s24292_s3 + $0x224] ss:$16 sps:$4 sm:$0xff]   ;;  %v17409_v5 = vld [vmem:[%s24292_s3 + $0x22c] ss:$16 sps:$4 sm:$0xff]  }
 0x42e   : > { %v17407_v49 = vld [vmem:[%s24292_s3 + $0x228] ss:$16 sps:$4 sm:$0xff]   ;;  %v17412_v27 = vld [vmem:[%s24292_s3 + $0x244] ss:$16 sps:$4 sm:$0xff]   ;;  %v17421_v54 = vld [vmem:[%s24292_s3 + $0x26c] ss:$16 sps:$4 sm:$0xff]  }
 0x42f   : > { %v17413_v3 = vld [vmem:[%s24292_s3 + $0x248] ss:$16 sps:$4 sm:$0xff]   ;;  %v17418_v14 = vld [vmem:[%s24292_s3 + $0x264] ss:$16 sps:$4 sm:$0xff]  }
 0x431   : > { %6421 = vmatmul.mubr.bf16.gmra.mrb[236].mxu0 %v18254_v18 }
 0x432   : > { %6807 = vmatmul.mubr.bf16.gmra.mrb[236].mxu1 %v18254_v18  ;;  %6430 = vmatprep.mubr.bf16.mxu0 %v18255_v33  ;;  %v17416_v18 = vld [vmem:[%s24292_s3 + $0x260] ss:$16 sps:$4 sm:$0xff]  }
 0x433   : > { %6816 = vmatprep.mubr.bf16.mxu1 %v18255_v33  ;;  %v17419_v33 = vld [vmem:[%s24292_s3 + $0x268] ss:$16 sps:$4 sm:$0xff]  }
 0x439   : > { %6431 = vmatmul.mubr.bf16.gmra.mrb[240].mxu0 %v18256_v4 }
 0x43a   : > { %6817 = vmatmul.mubr.bf16.gmra.mrb[240].mxu1 %v18256_v4  ;;  %6440 = vmatprep.mubr.bf16.mxu0 %v18257_v15  ;;  %v17424_v4 = vld [vmem:[%s24292_s3 + $0x284] ss:$16 sps:$4 sm:$0xff]  }
 0x43b   : > { %6826 = vmatprep.mubr.bf16.mxu1 %v18257_v15  ;;  %v17425_v15 = vld [vmem:[%s24292_s3 + $0x288] ss:$16 sps:$4 sm:$0xff]  }
 0x441   : > { %6441 = vmatmul.mubr.bf16.gmra.mrb[244].mxu0 %v18258_v55 }
 0x442   : > { %6827 = vmatmul.mubr.bf16.gmra.mrb[244].mxu1 %v18258_v55  ;;  %6450 = vmatprep.mubr.bf16.mxu0 %v18259_v12  ;;  %v17430_v55 = vld [vmem:[%s24292_s3 + $0x2a4] ss:$16 sps:$4 sm:$0xff]  }
 0x443   : > { %6836 = vmatprep.mubr.bf16.mxu1 %v18259_v12  ;;  %v17433_v12 = vld [vmem:[%s24292_s3 + $0x2ac] ss:$16 sps:$4 sm:$0xff]  }
 0x449   : > { %6451 = vmatmul.mubr.bf16.gmra.mrb[248].mxu0 %v18260_v30 }
 0x44a   : > { %6837 = vmatmul.mubr.bf16.gmra.mrb[248].mxu1 %v18260_v30  ;;  %6460 = vmatprep.mubr.bf16.mxu0 %v18261_v25  ;;  %v17428_v30 = vld [vmem:[%s24292_s3 + $0x2a0] ss:$16 sps:$4 sm:$0xff]  }
 0x44b   : > { %6846 = vmatprep.mubr.bf16.mxu1 %v18261_v25  ;;  %v17431_v25 = vld [vmem:[%s24292_s3 + $0x2a8] ss:$16 sps:$4 sm:$0xff]  }
 0x451   : > { %6461 = vmatmul.mubr.bf16.gmra.mrb[252].mxu0 %v18262_v61 }
 0x452   : > { %6847 = vmatmul.mubr.bf16.gmra.mrb[252].mxu1 %v18262_v61  ;;  %10751 = vmatprep.mubr.bf16.mxu0 %v19385_v43  ;;  %v17436_v61 = vld [vmem:[%s24292_s3 + $0x2c4] ss:$16 sps:$4 sm:$0xff]  }
 0x453   : > { %12295 = vmatprep.mubr.bf16.mxu1 %v19385_v43  ;;  %v17404_v43 = vld [vmem:[%s24292_s3 + $0x220] ss:$16 sps:$4 sm:$0xff]  }
 0x459   : > { %10752 = vmatmul.mubr.bf16.vlgmr.msra.gmra.mrb[0].mxu0 %v19381_v38 }
 0x45a   : > { %12296 = vmatmul.mubr.bf16.vlgmr.msra.gmra.mrb[0].mxu1 %v19381_v38  ;;  %10761 = vmatprep.mubr.bf16.mxu0 %v19401_v17  ;;  %v17415_v38 = vld [vmem:[%s24292_s3 + $0x24c] ss:$16 sps:$4 sm:$0xff]  }
 0x45b   : > { %10913 = vmatpush1.bf16.msra.mxu0 %v17398_v44  ;;  %12305 = vmatprep.mubr.bf16.mxu1 %v19401_v17  ;;  %v17410_v17 = vld [vmem:[%s24292_s3 + $0x240] ss:$16 sps:$4 sm:$0xff]   ;;  %v17437_v44 = vld [vmem:[%s24292_s3 + $0x2c8] ss:$16 sps:$4 sm:$0xff]  }
 0x45c   : > { %12457 = vmatpush1.bf16.msra.mxu1 %v17401_v34  ;;  %10914 = vmatprep.subr.bf16.mxu0 %v17406_v63  ;;  %v17442_v34 = vld [vmem:[%s24292_s3 + $0x2e4] ss:$16 sps:$4 sm:$0xff]   ;;  %v17445_v63 = vld [vmem:[%s24292_s3 + $0x2ec] ss:$16 sps:$4 sm:$0xff]  }
 0x45d   : > { %12458 = vmatprep.subr.bf16.mxu1 %v17409_v5  ;;  %v17440_v5 = vld [vmem:[%s24292_s3 + $0x2e0] ss:$16 sps:$4 sm:$0xff]  }
 0x45f   : > { %10915 = vmatpush1.bf16.msra.mxu0 %v17404_v43  ;;  %v17443_v43 = vld [vmem:[%s24292_s3 + $0x2e8] ss:$16 sps:$4 sm:$0xff]  }
 0x460   : > { %12459 = vmatpush1.bf16.msra.mxu1 %v17407_v49  ;;  %10916 = vmatprep.subr.bf16.mxu0 %v17412_v27  ;;  %v17448_v49 = vld [vmem:[%s24292_s3 + $0x304] ss:$16 sps:$4 sm:$0xff]   ;;  %v17449_v27 = vld [vmem:[%s24292_s3 + $0x308] ss:$16 sps:$4 sm:$0xff]  }
 0x461   : > { %10762 = vmatmul.mubr.bf16.gmra.mrb[4].mxu0 %v19399_v13  ;;  %12460 = vmatprep.subr.bf16.mxu1 %v17415_v38  ;;  %v17454_v38 = vld [vmem:[%s24292_s3 + $0x324] ss:$16 sps:$4 sm:$0xff]  }
 0x462   : > { %12306 = vmatmul.mubr.bf16.gmra.mrb[4].mxu1 %v19399_v13  ;;  %10771 = vmatprep.mubr.bf16.mxu0 %v19419_v57  ;;  %v17427_v13 = vld [vmem:[%s24292_s3 + $0x28c] ss:$16 sps:$4 sm:$0xff]  }
 0x463   : > { %12315 = vmatprep.mubr.bf16.mxu1 %v19419_v57  ;;  %10917 = vmatpush1.bf16.msra.mxu0 %v17410_v17  ;;  %v17422_v57 = vld [vmem:[%s24292_s3 + $0x280] ss:$16 sps:$4 sm:$0xff]   ;;  %v17457_v17 = vld [vmem:[%s24292_s3 + $0x32c] ss:$16 sps:$4 sm:$0xff]  }
 0x464   : > { %12461 = vmatpush1.bf16.msra.mxu1 %v17413_v3  ;;  %10918 = vmatprep.subr.bf16.mxu0 %v17418_v14  ;;  %v17452_v3 = vld [vmem:[%s24292_s3 + $0x320] ss:$16 sps:$4 sm:$0xff]   ;;  %v17455_v14 = vld [vmem:[%s24292_s3 + $0x328] ss:$16 sps:$4 sm:$0xff]  }
 0x465   : > { %12462 = vmatprep.subr.bf16.mxu1 %v17421_v54  ;;  %v17460_v54 = vld [vmem:[%s24292_s3 + $0x344] ss:$16 sps:$4 sm:$0xff]  }
 0x467   : > { %10919 = vmatpush1.bf16.msra.mxu0 %v17416_v18  ;;  %v17461_v18 = vld [vmem:[%s24292_s3 + $0x348] ss:$16 sps:$4 sm:$0xff]  }
 0x468   : > { %12463 = vmatpush1.bf16.msra.mxu1 %v17419_v33  ;;  %10920 = vmatprep.subr.bf16.mxu0 %v17424_v4  ;;  %v17466_v33 = vld [vmem:[%s24292_s3 + $0x364] ss:$16 sps:$4 sm:$0xff]   ;;  %v17469_v4 = vld [vmem:[%s24292_s3 + $0x36c] ss:$16 sps:$4 sm:$0xff]  }
 0x469   : > { %10772 = vmatmul.mubr.bf16.gmra.mrb[8].mxu0 %v19417_v53  ;;  %12464 = vmatprep.subr.bf16.mxu1 %v17427_v13  ;;  %v17464_v13 = vld [vmem:[%s24292_s3 + $0x360] ss:$16 sps:$4 sm:$0xff]  }
 0x46a   : > { %12316 = vmatmul.mubr.bf16.gmra.mrb[8].mxu1 %v19417_v53  ;;  %10781 = vmatprep.mubr.bf16.mxu0 %v19437_v1  ;;  %v17439_v53 = vld [vmem:[%s24292_s3 + $0x2cc] ss:$16 sps:$4 sm:$0xff]  }
 0x46b   : > { %12325 = vmatprep.mubr.bf16.mxu1 %v19437_v1  ;;  %10921 = vmatpush1.bf16.msra.mxu0 %v17422_v57  ;;  %v17434_v1 = vld [vmem:[%s24292_s3 + $0x2c0] ss:$16 sps:$4 sm:$0xff]   ;;  %v17467_v57 = vld [vmem:[%s24292_s3 + $0x368] ss:$16 sps:$4 sm:$0xff]  }
 0x46c   : > { %12465 = vmatpush1.bf16.msra.mxu1 %v17425_v15  ;;  %10922 = vmatprep.subr.bf16.mxu0 %v17430_v55  ;;  %v17472_v15 = vld [vmem:[%s24292_s3 + $0x384] ss:$16 sps:$4 sm:$0xff]   ;;  %v17473_v55 = vld [vmem:[%s24292_s3 + $0x388] ss:$16 sps:$4 sm:$0xff]  }
 0x46d   : > { %12466 = vmatprep.subr.bf16.mxu1 %v17433_v12  ;;  %v17478_v12 = vld [vmem:[%s24292_s3 + $0x3a4] ss:$16 sps:$4 sm:$0xff]  }
 0x46f   : > { %10923 = vmatpush1.bf16.msra.mxu0 %v17428_v30  ;;  %v17481_v30 = vld [vmem:[%s24292_s3 + $0x3ac] ss:$16 sps:$4 sm:$0xff]  }
 0x470   : > { %12467 = vmatpush1.bf16.msra.mxu1 %v17431_v25  ;;  %10924 = vmatprep.subr.bf16.mxu0 %v17436_v61  ;;  %v17476_v25 = vld [vmem:[%s24292_s3 + $0x3a0] ss:$16 sps:$4 sm:$0xff]   ;;  %v17479_v61 = vld [vmem:[%s24292_s3 + $0x3a8] ss:$16 sps:$4 sm:$0xff]  }
 0x471   : > { %10782 = vmatmul.mubr.bf16.gmra.mrb[12].mxu0 %v19435_v39  ;;  %12468 = vmatprep.subr.bf16.mxu1 %v17439_v53  ;;  %v17484_v53 = vld [vmem:[%s24292_s3 + $0x3c4] ss:$16 sps:$4 sm:$0xff]  }
 0x472   : > { %12326 = vmatmul.mubr.bf16.gmra.mrb[12].mxu1 %v19435_v39  ;;  %10791 = vmatprep.mubr.bf16.mxu0 %v19475_v42  ;;  %v17451_v39 = vld [vmem:[%s24292_s3 + $0x30c] ss:$16 sps:$4 sm:$0xff]  }
 0x473   : > { %12335 = vmatprep.mubr.bf16.mxu1 %v19475_v42  ;;  %10925 = vmatpush1.bf16.msra.mxu0 %v17434_v1  ;;  %v17446_v42 = vld [vmem:[%s24292_s3 + $0x300] ss:$16 sps:$4 sm:$0xff]   ;;  %v17485_v1 = vld [vmem:[%s24292_s3 + $0x3c8] ss:$16 sps:$4 sm:$0xff]  }
 0x474   : > { %12469 = vmatpush1.bf16.msra.mxu1 %v17437_v44  ;;  %10926 = vmatprep.subr.bf16.mxu0 %v17442_v34  ;;  %v17490_v44 = vld [vmem:[%s24292_s3 + $0x3e4] ss:$16 sps:$4 sm:$0xff]   ;;  %v17493_v34 = vld [vmem:[%s24292_s3 + $0x3ec] ss:$16 sps:$4 sm:$0xff]  }
 0x475   : > { %12470 = vmatprep.subr.bf16.mxu1 %v17445_v63  ;;  %v17488_v63 = vld [vmem:[%s24292_s3 + $0x3e0] ss:$16 sps:$4 sm:$0xff]  }
 0x477   : > { %10927 = vmatpush1.bf16.msra.mxu0 %v17440_v5  ;;  %v17491_v5 = vld [vmem:[%s24292_s3 + $0x3e8] ss:$16 sps:$4 sm:$0xff]  }
 0x478   : > { %12471 = vmatpush1.bf16.msra.mxu1 %v17443_v43  ;;  %10928 = vmatprep.subr.bf16.mxu0 %v17448_v49  ;;  %v17496_v43 = vld [vmem:[%s24292_s3 + $0x404] ss:$16 sps:$4 sm:$0xff]   ;;  %v18263_v49 = vld [vmem:[%s24291_s2 + $0x8] sm:$0xff] }
 0x479   : > { %10792 = vmatmul.mubr.bf16.gmra.mrb[16].mxu0 %v19463_v32  ;;  %12472 = vmatprep.subr.bf16.mxu1 %v17451_v39 }
 0x47a   : > { %12336 = vmatmul.mubr.bf16.gmra.mrb[16].mxu1 %v19463_v32  ;;  %10801 = vmatprep.mubr.bf16.mxu0 %v19555_v26  ;;  %v17463_v32 = vld [vmem:[%s24292_s3 + $0x34c] ss:$16 sps:$4 sm:$0xff]  }
 0x47b   : > { %12345 = vmatprep.mubr.bf16.mxu1 %v19555_v26  ;;  %10929 = vmatpush1.bf16.msra.mxu0 %v17446_v42  ;;  %v17458_v26 = vld [vmem:[%s24292_s3 + $0x340] ss:$16 sps:$4 sm:$0xff]  }
 0x47c   : > { %12473 = vmatpush1.bf16.msra.mxu1 %v17449_v27  ;;  %10930 = vmatprep.subr.bf16.mxu0 %v17454_v38  ;;  %v24658_v38 = vsub.s32 7, %v19339_v59 }
 0x47d   : > { %12474 = vmatprep.subr.bf16.mxu1 %v17457_v17 }
 0x47e   : > { %v22091_v17 = vrot.slane %v18263_v49, %v24658_v38 }
 0x47f   : > { %10931 = vmatpush1.bf16.msra.mxu0 %v17452_v3 }
 0x480   : > { %12475 = vmatpush1.bf16.msra.mxu1 %v17455_v14  ;;  %10932 = vmatprep.subr.bf16.mxu0 %v17460_v54 }
 0x481   : > { %10802 = vmatmul.mubr.bf16.gmra.mrb[20].mxu0 %v19551_v48  ;;  %12476 = vmatprep.subr.bf16.mxu1 %v17463_v32 }
 0x482   : > { %12346 = vmatmul.mubr.bf16.gmra.mrb[20].mxu1 %v19551_v48  ;;  %10811 = vmatprep.mubr.bf16.mxu0 %v19637_v40  ;;  %v17475_v48 = vld [vmem:[%s24292_s3 + $0x38c] ss:$16 sps:$4 sm:$0xff]  }
 0x483   : > { %12355 = vmatprep.mubr.bf16.mxu1 %v19637_v40  ;;  %10933 = vmatpush1.bf16.msra.mxu0 %v17458_v26  ;;  %v17470_v40 = vld [vmem:[%s24292_s3 + $0x380] ss:$16 sps:$4 sm:$0xff]  }
 0x484   : > { %12477 = vmatpush1.bf16.msra.mxu1 %v17461_v18  ;;  %10934 = vmatprep.subr.bf16.mxu0 %v17466_v33 }
 0x485   : > { %12478 = vmatprep.subr.bf16.mxu1 %v17469_v4 }
 0x487   : > { %10935 = vmatpush1.bf16.msra.mxu0 %v17464_v13 }
 0x488   : > { %12479 = vmatpush1.bf16.msra.mxu1 %v17467_v57  ;;  %10936 = vmatprep.subr.bf16.mxu0 %v17472_v15 }
 0x489   : > { %10812 = vmatmul.mubr.bf16.gmra.mrb[24].mxu0 %v19623_v36  ;;  %12480 = vmatprep.subr.bf16.mxu1 %v17475_v48 }
 0x48a   : > { %12356 = vmatmul.mubr.bf16.gmra.mrb[24].mxu1 %v19623_v36  ;;  %10821 = vmatprep.mubr.bf16.mxu0 %v19711_v6  ;;  %v17487_v36 = vld [vmem:[%s24292_s3 + $0x3cc] ss:$16 sps:$4 sm:$0xff]  }
 0x48b   : > { %12365 = vmatprep.mubr.bf16.mxu1 %v19711_v6  ;;  %10937 = vmatpush1.bf16.msra.mxu0 %v17470_v40  ;;  %v17482_v6 = vld [vmem:[%s24292_s3 + $0x3c0] ss:$16 sps:$4 sm:$0xff]  }
 0x48c   : > { %12481 = vmatpush1.bf16.msra.mxu1 %v17473_v55  ;;  %10938 = vmatprep.subr.bf16.mxu0 %v17478_v12 }
 0x48d   : > { %12482 = vmatprep.subr.bf16.mxu1 %v17481_v30 }
 0x48f   : > { %10939 = vmatpush1.bf16.msra.mxu0 %v17476_v25 }
 0x490   : > { %12483 = vmatpush1.bf16.msra.mxu1 %v17479_v61  ;;  %10940 = vmatprep.subr.bf16.mxu0 %v17484_v53  ;;  %v24659_v61 = vld [vmem:[#allocation32_spill] sm:$0xff] }
 0x491   : > { %10822 = vmatmul.mubr.bf16.gmra.mrb[28].mxu0 %v19697_v11  ;;  %12484 = vmatprep.subr.bf16.mxu1 %v17487_v36 }
 0x492   : > { %12366 = vmatmul.mubr.bf16.gmra.mrb[28].mxu1 %v19697_v11  ;;  %10831 = vmatprep.mubr.bf16.mxu0 %v19785_v50  ;;  %v17499_v11 = vld [vmem:[%s24292_s3 + $0x40c] ss:$16 sps:$4 sm:$0xff]  }
 0x493   : > { %12375 = vmatprep.mubr.bf16.mxu1 %v19785_v50  ;;  %10941 = vmatpush1.bf16.msra.mxu0 %v17482_v6  ;;  %v24653_v50 = vld [vmem:[#allocation29_spill] sm:$0xff] }
 0x494   : > { %12485 = vmatpush1.bf16.msra.mxu1 %v17485_v1  ;;  %10942 = vmatprep.subr.bf16.mxu0 %v17490_v44  ;;  %v24660_v44 = vld [vmem:[#allocation37_spill] sm:$0xff] }
 0x495   : > { %12486 = vmatprep.subr.bf16.mxu1 %v17493_v34 }
 0x497   : > { %10943 = vmatpush1.bf16.msra.mxu0 %v17488_v63 }
 0x498   : > { %12487 = vmatpush1.bf16.msra.mxu1 %v17491_v5  ;;  %11105 = vmatprep.subr.bf16.mxu0 %v17496_v43 }
 0x499   : > { %10832 = vmatmul.mubr.bf16.gmra.mrb[32].mxu0 %v19771_v16  ;;  %12649 = vmatprep.subr.bf16.mxu1 %v17499_v11 }
 0x49a   : > { %12376 = vmatmul.mubr.bf16.gmra.mrb[32].mxu1 %v19771_v16  ;;  %10841 = vmatprep.mubr.bf16.mxu0 %v19859_v46  ;;  %v24654_v16 = vsub.s32 4, %v19339_v59 }
 0x49b   : > { %12385 = vmatprep.mubr.bf16.mxu1 %v19859_v46  ;;  %v24655_v46 = vld [vmem:[#allocation33_spill] sm:$0xff] }
 0x49c   : > { %v22076_v39 = vrot.slane %v18263_v49, %v24654_v16 }
 0x4a1   : > { %10842 = vmatmul.mubr.bf16.gmra.mrb[36].mxu0 %v19845_v20 }
 0x4a2   : > { %12386 = vmatmul.mubr.bf16.gmra.mrb[36].mxu1 %v19845_v20  ;;  %10851 = vmatprep.mubr.bf16.mxu0 %v19933_v37  ;;  %v24656_v20 = vsub.s32 6, %v19339_v59 }
 0x4a3   : > { %12395 = vmatprep.mubr.bf16.mxu1 %v19933_v37  ;;  %v24657_v37 = vsub.s32 5, %v19339_v59 }
 0x4a4   : > { %v22082_v42 = vrot.slane %v18263_v49, %v24656_v20 }
 0x4a5   : > { %v22086_v27 = vrot.slane %v18263_v49, %v24657_v37 }
 0x4a9   : > { %10852 = vmatmul.mubr.bf16.gmra.mrb[40].mxu0 %v24653_v50 }
 0x4aa   : > { %12396 = vmatmul.mubr.bf16.gmra.mrb[40].mxu1 %v24653_v50  ;;  %10861 = vmatprep.mubr.bf16.mxu0 %v24655_v46 }
 0x4ab   : > { %12405 = vmatprep.mubr.bf16.mxu1 %v24655_v46 }
 0x4ac   : > { %v6312_v3 = vpop.f32.mrb[192].mxu0 }
 0x4ad   : > { %v15501_v14 = vadd.f32 %v6312_v3, %v22076_v39  ;;  %v6698_v54 = vpop.f32.mrb[192].mxu1  ;;  %v6314_v32 = vpop.f32.mrb[193].mxu0 }
 0x4ae   : > { %v15565_v26 = vadd.f32 %v6698_v54, %v22082_v42  ;;  %v15502_v18 = vadd.f32 %v6314_v32, %v22086_v27  ;;  %v6700_v33 = vpop.f32.mrb[193].mxu1  ;;  %v6316_v4 = vpop.f32.mrb[194].mxu0 }
 0x4af   : > { %v15566_v13 = vadd.f32 %v6700_v33, %v22091_v17  ;;  %v15503_v57 = vadd.f32 %v6316_v4, %v22076_v39  ;;  %v6702_v15 = vpop.f32.mrb[194].mxu1  ;;  %v6318_v48 = vpop.f32.mrb[195].mxu0  ;;  %v6869_v12 = vmax.f32 %v15501_v14, 0.0 }
 0x4b0   : > { %v15567_v59 = vadd.f32 %v6702_v15, %v22082_v42  ;;  %v15504_v40 = vadd.f32 %v6318_v48, %v22086_v27  ;;  %v6704_v55 = vpop.f32.mrb[195].mxu1  ;;  %v6871_v53 = vmax.f32 %v15565_v26, 0.0  ;;  %v6870_v36 = vmax.f32 %v15502_v18, 0.0 }
 0x4b1   : > { %v6885_v30 = vmax.f32 %v15503_v57, 0.0  ;;  %v15568_v25 = vadd.f32 %v6704_v55, %v22091_v17  ;;  %10862 = vmatmul.mubr.bf16.gmra.mrb[44].mxu0 %v24659_v61  ;;  %v6872_v34 = vmax.f32 %v15566_v13, 0.0 }
 0x4b2   : > { %v6887_v6 = vmax.f32 %v15567_v59, 0.0  ;;  %v6886_v1 = vmax.f32 %v15504_v40, 0.0  ;;  %12406 = vmatmul.mubr.bf16.gmra.mrb[44].mxu1 %v24659_v61  ;;  %10871 = vmatprep.mubr.bf16.mxu0 %v24660_v44  ;;  %v24663_v59 = vld [vmem:[#allocation36_spill] sm:$0xff] }
 0x4b3   : > { %v22104_v63 = vpack.c.bf16 %v6885_v30, %v6869_v12  ;;  %v6888_v5 = vmax.f32 %v15568_v25, 0.0  ;;  %12415 = vmatprep.mubr.bf16.mxu1 %v24660_v44  ;;  %v24664_v25 = vld [vmem:[#allocation41_spill] sm:$0xff] }
 0x4b4   : > { %v22107_v43 = vpack.c.bf16 %v6887_v6, %v6871_v53  ;;  %v22109_v11 = vpack.c.bf16 %v6886_v1, %v6870_v36  ;;  %v6322_v50 = vpop.f32.mrb[196].mxu0 }
 0x4b5   : > { %v22111_v49 = vpack.c.bf16 %v6888_v5, %v6872_v34  ;;  %v15505_v16 = vadd.f32 %v6322_v50, %v22076_v39  ;;  %v6708_v46 = vpop.f32.mrb[196].mxu1  ;;  %v6324_v20 = vpop.f32.mrb[197].mxu0 }
 0x4b6   : > { %24661 = vst [vmem:[#allocation29_spill] sm:$0xff] %v22107_v43  ;;  %v15569_v37 = vadd.f32 %v6708_v46, %v22082_v42  ;;  %v15506_v38 = vadd.f32 %v6324_v20, %v22086_v27  ;;  %v6710_v3 = vpop.f32.mrb[197].mxu1  ;;  %v6326_v14 = vpop.f32.mrb[198].mxu0 }
 0x4b7   : > { %24662 = vst [vmem:[#allocation33_spill] sm:$0xff] %v22111_v49  ;;  %v15570_v54 = vadd.f32 %v6710_v3, %v22091_v17  ;;  %v15507_v32 = vadd.f32 %v6326_v14, %v22076_v39  ;;  %v6712_v26 = vpop.f32.mrb[198].mxu1  ;;  %v6328_v18 = vpop.f32.mrb[199].mxu0  ;;  %v6901_v57 = vmax.f32 %v15505_v16, 0.0  ;;  %v24689_v49 = vld [vmem:[#allocation16_spill] sm:$0xff] }
 0x4b8   : > { %v15571_v33 = vadd.f32 %v6712_v26, %v22082_v42  ;;  %v15508_v4 = vadd.f32 %v6328_v18, %v22086_v27  ;;  %v6714_v13 = vpop.f32.mrb[199].mxu1  ;;  %v6903_v40 = vmax.f32 %v15569_v37, 0.0  ;;  %v6902_v55 = vmax.f32 %v15506_v38, 0.0 }
 0x4b9   : > { %v6917_v15 = vmax.f32 %v15507_v32, 0.0  ;;  %v15572_v48 = vadd.f32 %v6714_v13, %v22091_v17  ;;  %10872 = vmatmul.mubr.bf16.gmra.mrb[48].mxu0 %v24663_v59  ;;  %v6904_v61 = vmax.f32 %v15570_v54, 0.0 }
 0x4ba   : > { %v6919_v12 = vmax.f32 %v15571_v33, 0.0  ;;  %v6918_v30 = vmax.f32 %v15508_v4, 0.0  ;;  %12416 = vmatmul.mubr.bf16.gmra.mrb[48].mxu1 %v24663_v59  ;;  %10881 = vmatprep.mubr.bf16.mxu0 %v24664_v25 }
 0x4bb   : > { %v22124_v53 = vpack.c.bf16 %v6917_v15, %v6901_v57  ;;  %v6920_v36 = vmax.f32 %v15572_v48, 0.0  ;;  %12425 = vmatprep.mubr.bf16.mxu1 %v24664_v25  ;;  %v24667_v15 = vld [vmem:[#allocation40_spill] sm:$0xff] }
 0x4bc   : > { %v22127_v6 = vpack.c.bf16 %v6919_v12, %v6903_v40  ;;  %v22129_v1 = vpack.c.bf16 %v6918_v30, %v6902_v55  ;;  %v6332_v44 = vpop.f32.mrb[200].mxu0  ;;  %v24668_v12 = vld [vmem:[#allocation45_spill] sm:$0xff] }
 0x4bd   : > { %v22131_v34 = vpack.c.bf16 %v6920_v36, %v6904_v61  ;;  %v15509_v5 = vadd.f32 %v6332_v44, %v22076_v39  ;;  %v6718_v50 = vpop.f32.mrb[200].mxu1  ;;  %v6334_v16 = vpop.f32.mrb[201].mxu0 }
 0x4be   : > { %24665 = vst [vmem:[#allocation32_spill] sm:$0xff] %v22127_v6  ;;  %v15573_v46 = vadd.f32 %v6718_v50, %v22082_v42  ;;  %v15510_v20 = vadd.f32 %v6334_v16, %v22086_v27  ;;  %v6720_v37 = vpop.f32.mrb[201].mxu1  ;;  %v6336_v38 = vpop.f32.mrb[202].mxu0 }
 0x4bf   : > { %24666 = vst [vmem:[#allocation37_spill] sm:$0xff] %v22131_v34  ;;  %v15574_v3 = vadd.f32 %v6720_v37, %v22091_v17  ;;  %v15511_v14 = vadd.f32 %v6336_v38, %v22076_v39  ;;  %v6722_v54 = vpop.f32.mrb[202].mxu1  ;;  %v6338_v32 = vpop.f32.mrb[203].mxu0  ;;  %v6933_v4 = vmax.f32 %v15509_v5, 0.0  ;;  %v24684_v34 = vld [vmem:[#allocation14_spill] sm:$0xff] }
 0x4c0   : > { %v15575_v26 = vadd.f32 %v6722_v54, %v22082_v42  ;;  %v15512_v18 = vadd.f32 %v6338_v32, %v22086_v27  ;;  %v6724_v33 = vpop.f32.mrb[203].mxu1  ;;  %v6935_v48 = vmax.f32 %v15573_v46, 0.0  ;;  %v6934_v59 = vmax.f32 %v15510_v20, 0.0 }
 0x4c1   : > { %v6949_v13 = vmax.f32 %v15511_v14, 0.0  ;;  %v15576_v57 = vadd.f32 %v6724_v33, %v22091_v17  ;;  %10882 = vmatmul.mubr.bf16.gmra.mrb[52].mxu0 %v24667_v15  ;;  %v6936_v30 = vmax.f32 %v15574_v3, 0.0 }
 0x4c2   : > { %v6951_v40 = vmax.f32 %v15575_v26, 0.0  ;;  %v6950_v55 = vmax.f32 %v15512_v18, 0.0  ;;  %12426 = vmatmul.mubr.bf16.gmra.mrb[52].mxu1 %v24667_v15  ;;  %10891 = vmatprep.mubr.bf16.mxu0 %v24668_v12 }
 0x4c3   : > { %v22144_v25 = vpack.c.bf16 %v6949_v13, %v6933_v4  ;;  %v6952_v61 = vmax.f32 %v15576_v57, 0.0  ;;  %12435 = vmatprep.mubr.bf16.mxu1 %v24668_v12 }
 0x4c4   : > { %v22147_v36 = vpack.c.bf16 %v6951_v40, %v6935_v48  ;;  %v22149_v44 = vpack.c.bf16 %v6950_v55, %v6934_v59  ;;  %v6342_v5 = vpop.f32.mrb[204].mxu0  ;;  %v24671_v59 = vld [vmem:[#allocation44_spill] sm:$0xff] }
 0x4c5   : > { %v22151_v50 = vpack.c.bf16 %v6952_v61, %v6936_v30  ;;  %v15513_v16 = vadd.f32 %v6342_v5, %v22076_v39  ;;  %v6728_v46 = vpop.f32.mrb[204].mxu1  ;;  %v6344_v20 = vpop.f32.mrb[205].mxu0  ;;  %v24672_v61 = vld [vmem:[#allocation49_spill] sm:$0xff] }
 0x4c6   : > { %24669 = vst [vmem:[#allocation36_spill] sm:$0xff] %v22147_v36  ;;  %v15577_v37 = vadd.f32 %v6728_v46, %v22082_v42  ;;  %v15514_v38 = vadd.f32 %v6344_v20, %v22086_v27  ;;  %v6730_v3 = vpop.f32.mrb[205].mxu1  ;;  %v6346_v14 = vpop.f32.mrb[206].mxu0  ;;  %v24680_v36 = vld [vmem:[#allocation12_spill] sm:$0xff] }
 0x4c7   : > { %24670 = vst [vmem:[#allocation41_spill] sm:$0xff] %v22151_v50  ;;  %v15578_v54 = vadd.f32 %v6730_v3, %v22091_v17  ;;  %v15515_v32 = vadd.f32 %v6346_v14, %v22076_v39  ;;  %v6732_v26 = vpop.f32.mrb[206].mxu1  ;;  %v6348_v18 = vpop.f32.mrb[207].mxu0  ;;  %v6965_v57 = vmax.f32 %v15513_v16, 0.0 }
 0x4c8   : > { %v15579_v33 = vadd.f32 %v6732_v26, %v22082_v42  ;;  %v15516_v4 = vadd.f32 %v6348_v18, %v22086_v27  ;;  %v6734_v13 = vpop.f32.mrb[207].mxu1  ;;  %v6967_v40 = vmax.f32 %v15577_v37, 0.0  ;;  %v6966_v55 = vmax.f32 %v15514_v38, 0.0 }
 0x4c9   : > { %v6981_v15 = vmax.f32 %v15515_v32, 0.0  ;;  %v15580_v48 = vadd.f32 %v6734_v13, %v22091_v17  ;;  %10892 = vmatmul.mubr.bf16.gmra.mrb[56].mxu0 %v24671_v59  ;;  %v6968_v5 = vmax.f32 %v15578_v54, 0.0 }
 0x4ca   : > { %v6983_v12 = vmax.f32 %v15579_v33, 0.0  ;;  %v6982_v30 = vmax.f32 %v15516_v4, 0.0  ;;  %12436 = vmatmul.mubr.bf16.gmra.mrb[56].mxu1 %v24671_v59  ;;  %10901 = vmatprep.mubr.bf16.mxu0 %v24672_v61 }
 0x4cb   : > { %v22164_v46 = vpack.c.bf16 %v6981_v15, %v6965_v57  ;;  %v6984_v20 = vmax.f32 %v15580_v48, 0.0  ;;  %12445 = vmatprep.mubr.bf16.mxu1 %v24672_v61 }
 0x4cc   : > { %v22167_v16 = vpack.c.bf16 %v6983_v12, %v6967_v40  ;;  %v22169_v3 = vpack.c.bf16 %v6982_v30, %v6966_v55  ;;  %v6352_v14 = vpop.f32.mrb[208].mxu0 }
 0x4cd   : > { %v22171_v32 = vpack.c.bf16 %v6984_v20, %v6968_v5  ;;  %v15517_v37 = vadd.f32 %v6352_v14, %v22076_v39  ;;  %v6738_v38 = vpop.f32.mrb[208].mxu1  ;;  %v6354_v26 = vpop.f32.mrb[209].mxu0  ;;  %v24675_v5 = vld [vmem:[#allocation48_spill] sm:$0xff] }
 0x4ce   : > { %24673 = vst [vmem:[#allocation40_spill] sm:$0xff] %v22167_v16  ;;  %v15581_v18 = vadd.f32 %v6738_v38, %v22082_v42  ;;  %v15518_v54 = vadd.f32 %v6354_v26, %v22086_v27  ;;  %v6740_v33 = vpop.f32.mrb[209].mxu1  ;;  %v6356_v4 = vpop.f32.mrb[210].mxu0 }
 0x4cf   : > { %24674 = vst [vmem:[#allocation45_spill] sm:$0xff] %v22171_v32  ;;  %v15582_v13 = vadd.f32 %v6740_v33, %v22091_v17  ;;  %v15519_v57 = vadd.f32 %v6356_v4, %v22076_v39  ;;  %v6742_v15 = vpop.f32.mrb[210].mxu1  ;;  %v6358_v48 = vpop.f32.mrb[211].mxu0  ;;  %v6997_v12 = vmax.f32 %v15517_v37, 0.0  ;;  %v24676_v33 = vld [vmem:[#allocation10_spill] sm:$0xff] }
 0x4d0   : > { %v15583_v59 = vadd.f32 %v6742_v15, %v22082_v42  ;;  %v15520_v40 = vadd.f32 %v6358_v48, %v22086_v27  ;;  %v6744_v55 = vpop.f32.mrb[211].mxu1  ;;  %v6999_v20 = vmax.f32 %v15581_v18, 0.0  ;;  %v6998_v14 = vmax.f32 %v15518_v54, 0.0 }
 0x4d1   : > { %v7013_v30 = vmax.f32 %v15519_v57, 0.0  ;;  %v15584_v61 = vadd.f32 %v6744_v55, %v22091_v17  ;;  %10902 = vmatmul.mubr.bf16.gmra.mrb[60].mxu0 %v24675_v5  ;;  %v7000_v4 = vmax.f32 %v15582_v13, 0.0 }
 0x4d2   : > { %v7015_v38 = vmax.f32 %v15583_v59, 0.0  ;;  %v7014_v26 = vmax.f32 %v15520_v40, 0.0  ;;  %12446 = vmatmul.mubr.bf16.gmra.mrb[60].mxu1 %v24675_v5  ;;  %10944 = vmatprep.mubr.bf16.mxu0 %v24676_v33 }
 0x4d3   : > { %v22184_v16 = vpack.c.bf16 %v7013_v30, %v6997_v12  ;;  %v7016_v15 = vmax.f32 %v15584_v61, 0.0  ;;  %12488 = vmatprep.mubr.bf16.mxu1 %v24676_v33 }
 0x4d4   : > { %v22187_v37 = vpack.c.bf16 %v7015_v38, %v6999_v20  ;;  %v22189_v57 = vpack.c.bf16 %v7014_v26, %v6998_v14  ;;  %v6362_v48 = vpop.f32.mrb[212].mxu0  ;;  %v17494_v38 = vld [vmem:[%s24292_s3 + $0x400] ss:$16 sps:$4 sm:$0xff]  }
 0x4d5   : > { %v22191_v55 = vpack.c.bf16 %v7016_v15, %v7000_v4  ;;  %v15521_v18 = vadd.f32 %v6362_v48, %v22076_v39  ;;  %v6748_v54 = vpop.f32.mrb[212].mxu1  ;;  %v6364_v59 = vpop.f32.mrb[213].mxu0  ;;  %v17497_v15 = vld [vmem:[%s24292_s3 + $0x408] ss:$16 sps:$4 sm:$0xff]   ;;  %v17502_v48 = vld [vmem:[%s24292_s3 + $0x424] ss:$16 sps:$4 sm:$0xff]  }
 0x4d6   : > { %24677 = vst [vmem:[#allocation44_spill] sm:$0xff] %v22187_v37  ;;  %v15585_v40 = vadd.f32 %v6748_v54, %v22082_v42  ;;  %v15522_v13 = vadd.f32 %v6364_v59, %v22086_v27  ;;  %v6750_v12 = vpop.f32.mrb[213].mxu1  ;;  %v6366_v30 = vpop.f32.mrb[214].mxu0 }
 0x4d7   : > { %24678 = vst [vmem:[#allocation49_spill] sm:$0xff] %v22191_v55  ;;  %v15586_v61 = vadd.f32 %v6750_v12, %v22091_v17  ;;  %v15523_v5 = vadd.f32 %v6366_v30, %v22076_v39  ;;  %v6752_v20 = vpop.f32.mrb[214].mxu1  ;;  %v6368_v14 = vpop.f32.mrb[215].mxu0  ;;  %v7029_v54 = vmax.f32 %v15521_v18, 0.0  ;;  %v24679_v30 = vld [vmem:[#allocation9_spill] sm:$0xff] }
 0x4d8   : > { %v15587_v26 = vadd.f32 %v6752_v20, %v22082_v42  ;;  %v15524_v33 = vadd.f32 %v6368_v14, %v22086_v27  ;;  %v6754_v4 = vpop.f32.mrb[215].mxu1  ;;  %v17505_v20 = vld [vmem:[%s24292_s3 + $0x42c] ss:$16 sps:$4 sm:$0xff]   ;;  %v7031_v14 = vmax.f32 %v15585_v40, 0.0  ;;  %v7030_v37 = vmax.f32 %v15522_v13, 0.0 }
 0x4d9   : > { %v7045_v59 = vmax.f32 %v15523_v5, 0.0  ;;  %v15588_v12 = vadd.f32 %v6754_v4, %v22091_v17  ;;  %10945 = vmatmul.mubr.bf16.vlgmr.msra.gmra.mrb[0].mxu0 %v24679_v30  ;;  %v7032_v50 = vmax.f32 %v15586_v61, 0.0  ;;  %v17500_v5 = vld [vmem:[%s24292_s3 + $0x420] ss:$16 sps:$4 sm:$0xff]   ;;  %v17503_v61 = vld [vmem:[%s24292_s3 + $0x428] ss:$16 sps:$4 sm:$0xff]  }
 0x4da   : > { %v7047_v55 = vmax.f32 %v15587_v26, 0.0  ;;  %v7046_v32 = vmax.f32 %v15524_v33, 0.0  ;;  %12489 = vmatmul.mubr.bf16.vlgmr.msra.gmra.mrb[0].mxu1 %v24679_v30  ;;  %10954 = vmatprep.mubr.bf16.mxu0 %v24680_v36 }
 0x4db   : > { %v22216_v6 = vpack.c.bf16 %v7045_v59, %v7029_v54  ;;  %v7048_v18 = vmax.f32 %v15588_v12, 0.0  ;;  %11106 = vmatpush1.bf16.msra.mxu0 %v17494_v38  ;;  %12498 = vmatprep.mubr.bf16.mxu1 %v24680_v36  ;;  %v17508_v38 = vld [vmem:[%s24292_s3 + $0x444] ss:$16 sps:$4 sm:$0xff]  }
 0x4dc   : > { %v22222_v4 = vpack.c.bf16 %v7047_v55, %v7031_v14  ;;  %v22224_v40 = vpack.c.bf16 %v7046_v32, %v7030_v37  ;;  %12650 = vmatpush1.bf16.msra.mxu1 %v17497_v15  ;;  %v6372_v13 = vpop.f32.mrb[216].mxu0  ;;  %11107 = vmatprep.subr.bf16.mxu0 %v17502_v48  ;;  %v17511_v32 = vld [vmem:[%s24292_s3 + $0x44c] ss:$16 sps:$4 sm:$0xff]  }
 0x4dd   : > { %v22232_v36 = vpack.c.bf16 %v7048_v18, %v7032_v50  ;;  %v15525_v26 = vadd.f32 %v6372_v13, %v22076_v39  ;;  %v6758_v33 = vpop.f32.mrb[216].mxu1  ;;  %v6374_v55 = vpop.f32.mrb[217].mxu0  ;;  %12651 = vmatprep.subr.bf16.mxu1 %v17505_v20  ;;  %v17506_v20 = vld [vmem:[%s24292_s3 + $0x440] ss:$16 sps:$4 sm:$0xff]  }
 0x4de   : > { %24681 = vst [vmem:[#allocation48_spill] sm:$0xff] %v22222_v4  ;;  %v15589_v37 = vadd.f32 %v6758_v33, %v22082_v42  ;;  %v15526_v15 = vadd.f32 %v6374_v55, %v22086_v27  ;;  %v6760_v48 = vpop.f32.mrb[217].mxu1  ;;  %v6376_v54 = vpop.f32.mrb[218].mxu0  ;;  %v17509_v33 = vld [vmem:[%s24292_s3 + $0x448] ss:$16 sps:$4 sm:$0xff]   ;;  %v24683_v4 = vld [vmem:[#allocation11_spill] sm:$0xff] }
 0x4df   : > { %24682 = vst [vmem:[#allocation10_spill] sm:$0xff] %v22232_v36  ;;  %v15590_v59 = vadd.f32 %v6760_v48, %v22091_v17  ;;  %v15527_v50 = vadd.f32 %v6376_v54, %v22076_v39  ;;  %v6762_v12 = vpop.f32.mrb[218].mxu1  ;;  %v6378_v30 = vpop.f32.mrb[219].mxu0  ;;  %11108 = vmatpush1.bf16.msra.mxu0 %v17500_v5  ;;  %v17514_v55 = vld [vmem:[%s24292_s3 + $0x464] ss:$16 sps:$4 sm:$0xff]   ;;  %v7061_v5 = vmax.f32 %v15525_v26, 0.0 }
 0x4e0   : > { %v15591_v14 = vadd.f32 %v6762_v12, %v22082_v42  ;;  %v15528_v18 = vadd.f32 %v6378_v30, %v22086_v27  ;;  %v6764_v13 = vpop.f32.mrb[219].mxu1  ;;  %12652 = vmatpush1.bf16.msra.mxu1 %v17503_v61  ;;  %11109 = vmatprep.subr.bf16.mxu0 %v17508_v38  ;;  %v17517_v61 = vld [vmem:[%s24292_s3 + $0x46c] ss:$16 sps:$4 sm:$0xff]   ;;  %v7063_v38 = vmax.f32 %v15589_v37, 0.0  ;;  %v7062_v12 = vmax.f32 %v15526_v15, 0.0 }
 0x4e1   : > { %v7077_v48 = vmax.f32 %v15527_v50, 0.0  ;;  %v15592_v54 = vadd.f32 %v6764_v13, %v22091_v17  ;;  %10955 = vmatmul.mubr.bf16.gmra.mrb[4].mxu0 %v24683_v4  ;;  %12653 = vmatprep.subr.bf16.mxu1 %v17511_v32  ;;  %v7064_v43 = vmax.f32 %v15590_v59, 0.0  ;;  %v17512_v32 = vld [vmem:[%s24292_s3 + $0x460] ss:$16 sps:$4 sm:$0xff]  }
 0x4e2   : > { %v7079_v30 = vmax.f32 %v15591_v14, 0.0  ;;  %v7078_v36 = vmax.f32 %v15528_v18, 0.0  ;;  %12499 = vmatmul.mubr.bf16.gmra.mrb[4].mxu1 %v24683_v4  ;;  %10964 = vmatprep.mubr.bf16.mxu0 %v24684_v34  ;;  %v17515_v4 = vld [vmem:[%s24292_s3 + $0x468] ss:$16 sps:$4 sm:$0xff]  }
 0x4e3   : > { %v22260_v26 = vpack.c.bf16 %v7077_v48, %v7061_v5  ;;  %v7080_v50 = vmax.f32 %v15592_v54, 0.0  ;;  %12508 = vmatprep.mubr.bf16.mxu1 %v24684_v34  ;;  %11110 = vmatpush1.bf16.msra.mxu0 %v17506_v20  ;;  %v17520_v34 = vld [vmem:[%s24292_s3 + $0x484] ss:$16 sps:$4 sm:$0xff]  }
 0x4e4   : > { %v22266_v13 = vpack.c.bf16 %v7079_v30, %v7063_v38  ;;  %v22268_v37 = vpack.c.bf16 %v7078_v36, %v7062_v12  ;;  %v6382_v15 = vpop.f32.mrb[220].mxu0  ;;  %12654 = vmatpush1.bf16.msra.mxu1 %v17509_v33  ;;  %11111 = vmatprep.subr.bf16.mxu0 %v17514_v55  ;;  %v17523_v36 = vld [vmem:[%s24292_s3 + $0x48c] ss:$16 sps:$4 sm:$0xff]  }
 0x4e5   : > { %24685 = vst [vmem:[#allocation9_spill] sm:$0xff] %v22260_v26  ;;  %v22276_v59 = vpack.c.bf16 %v7080_v50, %v7064_v43  ;;  %v15529_v20 = vadd.f32 %v6382_v15, %v22076_v39  ;;  %v6768_v14 = vpop.f32.mrb[220].mxu1  ;;  %v6384_v18 = vpop.f32.mrb[221].mxu0  ;;  %12655 = vmatprep.subr.bf16.mxu1 %v17517_v61  ;;  %v17518_v61 = vld [vmem:[%s24292_s3 + $0x480] ss:$16 sps:$4 sm:$0xff]  }
 0x4e6   : > { %24686 = vst [vmem:[#allocation12_spill] sm:$0xff] %v22266_v13  ;;  %v15593_v33 = vadd.f32 %v6768_v14, %v22082_v42  ;;  %v15530_v55 = vadd.f32 %v6384_v18, %v22086_v27  ;;  %v6770_v5 = vpop.f32.mrb[221].mxu1  ;;  %v6386_v48 = vpop.f32.mrb[222].mxu0  ;;  %v17521_v14 = vld [vmem:[%s24292_s3 + $0x488] ss:$16 sps:$4 sm:$0xff]   ;;  %v24688_v13 = vld [vmem:[#allocation13_spill] sm:$0xff] }
 0x4e7   : > { %24687 = vst [vmem:[#allocation11_spill] sm:$0xff] %v22276_v59  ;;  %v15594_v54 = vadd.f32 %v6770_v5, %v22091_v17  ;;  %v15531_v43 = vadd.f32 %v6386_v48, %v22076_v39  ;;  %v6772_v38 = vpop.f32.mrb[222].mxu1  ;;  %v6388_v12 = vpop.f32.mrb[223].mxu0  ;;  %11112 = vmatpush1.bf16.msra.mxu0 %v17512_v32  ;;  %v17526_v18 = vld [vmem:[%s24292_s3 + $0x4a4] ss:$16 sps:$4 sm:$0xff]   ;;  %v7093_v32 = vmax.f32 %v15529_v20, 0.0 }
 0x4e8   : > { %v15595_v30 = vadd.f32 %v6772_v38, %v22082_v42  ;;  %v15532_v50 = vadd.f32 %v6388_v12, %v22086_v27  ;;  %v6774_v15 = vpop.f32.mrb[223].mxu1  ;;  %12656 = vmatpush1.bf16.msra.mxu1 %v17515_v4  ;;  %11113 = vmatprep.subr.bf16.mxu0 %v17520_v34  ;;  %v17529_v4 = vld [vmem:[%s24292_s3 + $0x4ac] ss:$16 sps:$4 sm:$0xff]   ;;  %v7095_v34 = vmax.f32 %v15593_v33, 0.0  ;;  %v7094_v38 = vmax.f32 %v15530_v55, 0.0 }
 0x4e9   : > { %v7109_v5 = vmax.f32 %v15531_v43, 0.0  ;;  %v15596_v48 = vadd.f32 %v6774_v15, %v22091_v17  ;;  %10965 = vmatmul.mubr.bf16.gmra.mrb[8].mxu0 %v24688_v13  ;;  %12657 = vmatprep.subr.bf16.mxu1 %v17523_v36  ;;  %v7096_v26 = vmax.f32 %v15594_v54, 0.0  ;;  %v17524_v36 = vld [vmem:[%s24292_s3 + $0x4a0] ss:$16 sps:$4 sm:$0xff]  }
 0x4ea   : > { %v7111_v12 = vmax.f32 %v15595_v30, 0.0  ;;  %v7110_v59 = vmax.f32 %v15532_v50, 0.0  ;;  %12509 = vmatmul.mubr.bf16.gmra.mrb[8].mxu1 %v24688_v13  ;;  %10974 = vmatprep.mubr.bf16.mxu0 %v24689_v49  ;;  %v17527_v13 = vld [vmem:[%s24292_s3 + $0x4a8] ss:$16 sps:$4 sm:$0xff]  }
 0x4eb   : > { %v22304_v20 = vpack.c.bf16 %v7109_v5, %v7093_v32  ;;  %v7112_v43 = vmax.f32 %v15596_v48, 0.0  ;;  %12518 = vmatprep.mubr.bf16.mxu1 %v24689_v49  ;;  %11114 = vmatpush1.bf16.msra.mxu0 %v17518_v61  ;;  %v17532_v49 = vld [vmem:[%s24292_s3 + $0x4c4] ss:$16 sps:$4 sm:$0xff]  }
 0x4ec   : > { %v22310_v15 = vpack.c.bf16 %v7111_v12, %v7095_v34  ;;  %v22312_v33 = vpack.c.bf16 %v7110_v59, %v7094_v38  ;;  %v6392_v55 = vpop.f32.mrb[224].mxu0  ;;  %12658 = vmatpush1.bf16.msra.mxu1 %v17521_v14  ;;  %11115 = vmatprep.subr.bf16.mxu0 %v17526_v18  ;;  %v17535_v59 = vld [vmem:[%s24292_s3 + $0x4cc] ss:$16 sps:$4 sm:$0xff]  }
 0x4ed   : > { %24690 = vst [vmem:[#allocation14_spill] sm:$0xff] %v22304_v20  ;;  %v22320_v54 = vpack.c.bf16 %v7112_v43, %v7096_v26  ;;  %v15533_v61 = vadd.f32 %v6392_v55, %v22076_v39  ;;  %v6778_v30 = vpop.f32.mrb[224].mxu1  ;;  %v6394_v50 = vpop.f32.mrb[225].mxu0  ;;  %12659 = vmatprep.subr.bf16.mxu1 %v17529_v4  ;;  %v17530_v4 = vld [vmem:[%s24292_s3 + $0x4c0] ss:$16 sps:$4 sm:$0xff]   ;;  %v24695_v20 = vld [vmem:[#allocation18_spill] sm:$0xff] }
 0x4ee   : > { %24691 = vst [vmem:[#allocation13_spill] sm:$0xff] %v22310_v15  ;;  %24692 = vst [vmem:[#allocation16_spill] sm:$0xff] %v22312_v33  ;;  %v15597_v14 = vadd.f32 %v6778_v30, %v22082_v42  ;;  %v15534_v18 = vadd.f32 %v6394_v50, %v22086_v27  ;;  %v6780_v32 = vpop.f32.mrb[225].mxu1  ;;  %v6396_v5 = vpop.f32.mrb[226].mxu0  ;;  %v17533_v30 = vld [vmem:[%s24292_s3 + $0x4c8] ss:$16 sps:$4 sm:$0xff]  }
 0x4ef   : > { %24693 = vst [vmem:[#allocation156_spill] sm:$0xff] %v22320_v54  ;;  %v15598_v48 = vadd.f32 %v6780_v32, %v22091_v17  ;;  %v15535_v26 = vadd.f32 %v6396_v5, %v22076_v39  ;;  %v6782_v34 = vpop.f32.mrb[226].mxu1  ;;  %v6398_v38 = vpop.f32.mrb[227].mxu0  ;;  %11116 = vmatpush1.bf16.msra.mxu0 %v17524_v36  ;;  %v17538_v50 = vld [vmem:[%s24292_s3 + $0x4e4] ss:$16 sps:$4 sm:$0xff]   ;;  %v7125_v36 = vmax.f32 %v15533_v61, 0.0 }
 0x4f0   : > { %v15599_v12 = vadd.f32 %v6782_v34, %v22082_v42  ;;  %v15536_v43 = vadd.f32 %v6398_v38, %v22086_v27  ;;  %v6784_v55 = vpop.f32.mrb[227].mxu1  ;;  %12660 = vmatpush1.bf16.msra.mxu1 %v17527_v13  ;;  %11117 = vmatprep.subr.bf16.mxu0 %v17532_v49  ;;  %v24694_v15 = vld [vmem:[#allocation15_spill] sm:$0xff]  ;;  %v17541_v13 = vld [vmem:[%s24292_s3 + $0x4ec] ss:$16 sps:$4 sm:$0xff]   ;;  %v7127_v49 = vmax.f32 %v15597_v14, 0.0  ;;  %v7126_v34 = vmax.f32 %v15534_v18, 0.0 }
 0x4f1   : > { %v7141_v32 = vmax.f32 %v15535_v26, 0.0  ;;  %v15600_v5 = vadd.f32 %v6784_v55, %v22091_v17  ;;  %10975 = vmatmul.mubr.bf16.gmra.mrb[12].mxu0 %v24694_v15  ;;  %12661 = vmatprep.subr.bf16.mxu1 %v17535_v59  ;;  %v7128_v33 = vmax.f32 %v15598_v48, 0.0  ;;  %v17536_v59 = vld [vmem:[%s24292_s3 + $0x4e0] ss:$16 sps:$4 sm:$0xff]  }
 0x4f2   : > { %v7143_v38 = vmax.f32 %v15599_v12, 0.0  ;;  %v7142_v54 = vmax.f32 %v15536_v43, 0.0  ;;  %12519 = vmatmul.mubr.bf16.gmra.mrb[12].mxu1 %v24694_v15  ;;  %10984 = vmatprep.mubr.bf16.mxu0 %v24695_v20  ;;  %v17539_v15 = vld [vmem:[%s24292_s3 + $0x4e8] ss:$16 sps:$4 sm:$0xff]  }
 0x4f3   : > { %v22348_v61 = vpack.c.bf16 %v7141_v32, %v7125_v36  ;;  %v7144_v26 = vmax.f32 %v15600_v5, 0.0  ;;  %12528 = vmatprep.mubr.bf16.mxu1 %v24695_v20  ;;  %11118 = vmatpush1.bf16.msra.mxu0 %v17530_v4  ;;  %v17544_v20 = vld [vmem:[%s24292_s3 + $0x504] ss:$16 sps:$4 sm:$0xff]  }
 0x4f4   : > { %v22354_v55 = vpack.c.bf16 %v7143_v38, %v7127_v49  ;;  %v22356_v14 = vpack.c.bf16 %v7142_v54, %v7126_v34  ;;  %v6402_v18 = vpop.f32.mrb[228].mxu0  ;;  %12662 = vmatpush1.bf16.msra.mxu1 %v17533_v30  ;;  %11119 = vmatprep.subr.bf16.mxu0 %v17538_v50  ;;  %v17547_v54 = vld [vmem:[%s24292_s3 + $0x50c] ss:$16 sps:$4 sm:$0xff]  }
 0x4f5   : > { %24696 = vst [vmem:[#allocation15_spill] sm:$0xff] %v22348_v61  ;;  %v22364_v48 = vpack.c.bf16 %v7144_v26, %v7128_v33  ;;  %v15537_v4 = vadd.f32 %v6402_v18, %v22076_v39  ;;  %v6788_v12 = vpop.f32.mrb[228].mxu1  ;;  %v6404_v43 = vpop.f32.mrb[229].mxu0  ;;  %12663 = vmatprep.subr.bf16.mxu1 %v17541_v13  ;;  %v17542_v13 = vld [vmem:[%s24292_s3 + $0x500] ss:$16 sps:$4 sm:$0xff]   ;;  %v24701_v61 = vld [vmem:[#allocation20_spill] sm:$0xff] }
 0x4f6   : > { %24697 = vst [vmem:[#allocation18_spill] sm:$0xff] %v22354_v55  ;;  %24698 = vst [vmem:[#allocation157_spill] sm:$0xff] %v22356_v14  ;;  %v15601_v30 = vadd.f32 %v6788_v12, %v22082_v42  ;;  %v15538_v50 = vadd.f32 %v6404_v43, %v22086_v27  ;;  %v6790_v36 = vpop.f32.mrb[229].mxu1  ;;  %v6406_v32 = vpop.f32.mrb[230].mxu0  ;;  %v17545_v12 = vld [vmem:[%s24292_s3 + $0x508] ss:$16 sps:$4 sm:$0xff]  }
 0x4f7   : > { %24699 = vst [vmem:[#allocation158_spill] sm:$0xff] %v22364_v48  ;;  %v15602_v5 = vadd.f32 %v6790_v36, %v22091_v17  ;;  %v15539_v33 = vadd.f32 %v6406_v32, %v22076_v39  ;;  %v6792_v49 = vpop.f32.mrb[230].mxu1  ;;  %v6408_v34 = vpop.f32.mrb[231].mxu0  ;;  %11120 = vmatpush1.bf16.msra.mxu0 %v17536_v59  ;;  %v17550_v43 = vld [vmem:[%s24292_s3 + $0x524] ss:$16 sps:$4 sm:$0xff]   ;;  %v7157_v59 = vmax.f32 %v15537_v4, 0.0 }
 0x4f8   : > { %v15603_v38 = vadd.f32 %v6792_v49, %v22082_v42  ;;  %v15540_v26 = vadd.f32 %v6408_v34, %v22086_v27  ;;  %v6794_v18 = vpop.f32.mrb[231].mxu1  ;;  %12664 = vmatpush1.bf16.msra.mxu1 %v17539_v15  ;;  %11121 = vmatprep.subr.bf16.mxu0 %v17544_v20  ;;  %v24700_v55 = vld [vmem:[#allocation17_spill] sm:$0xff]  ;;  %v17553_v15 = vld [vmem:[%s24292_s3 + $0x52c] ss:$16 sps:$4 sm:$0xff]   ;;  %v7159_v20 = vmax.f32 %v15601_v30, 0.0  ;;  %v7158_v49 = vmax.f32 %v15538_v50, 0.0 }
 0x4f9   : > { %v7173_v36 = vmax.f32 %v15539_v33, 0.0  ;;  %v15604_v32 = vadd.f32 %v6794_v18, %v22091_v17  ;;  %10985 = vmatmul.mubr.bf16.gmra.mrb[16].mxu0 %v24700_v55  ;;  %12665 = vmatprep.subr.bf16.mxu1 %v17547_v54  ;;  %v7160_v14 = vmax.f32 %v15602_v5, 0.0  ;;  %v17548_v54 = vld [vmem:[%s24292_s3 + $0x520] ss:$16 sps:$4 sm:$0xff]  }
 0x4fa   : > { %v7175_v34 = vmax.f32 %v15603_v38, 0.0  ;;  %v7174_v48 = vmax.f32 %v15540_v26, 0.0  ;;  %12529 = vmatmul.mubr.bf16.gmra.mrb[16].mxu1 %v24700_v55  ;;  %10994 = vmatprep.mubr.bf16.mxu0 %v24701_v61  ;;  %v17551_v55 = vld [vmem:[%s24292_s3 + $0x528] ss:$16 sps:$4 sm:$0xff]  }
 0x4fb   : > { %v22392_v4 = vpack.c.bf16 %v7173_v36, %v7157_v59  ;;  %v7176_v33 = vmax.f32 %v15604_v32, 0.0  ;;  %12538 = vmatprep.mubr.bf16.mxu1 %v24701_v61  ;;  %11122 = vmatpush1.bf16.msra.mxu0 %v17542_v13  ;;  %v17556_v61 = vld [vmem:[%s24292_s3 + $0x544] ss:$16 sps:$4 sm:$0xff]  }
 0x4fc   : > { %v22398_v18 = vpack.c.bf16 %v7175_v34, %v7159_v20  ;;  %v22400_v30 = vpack.c.bf16 %v7174_v48, %v7158_v49  ;;  %v6412_v50 = vpop.f32.mrb[232].mxu0  ;;  %12666 = vmatpush1.bf16.msra.mxu1 %v17545_v12  ;;  %11123 = vmatprep.subr.bf16.mxu0 %v17550_v43  ;;  %v17559_v48 = vld [vmem:[%s24292_s3 + $0x54c] ss:$16 sps:$4 sm:$0xff]  }
 0x4fd   : > { %24702 = vst [vmem:[#allocation17_spill] sm:$0xff] %v22392_v4  ;;  %v22408_v5 = vpack.c.bf16 %v7176_v33, %v7160_v14  ;;  %v15541_v13 = vadd.f32 %v6412_v50, %v22076_v39  ;;  %v6798_v38 = vpop.f32.mrb[232].mxu1  ;;  %v6414_v26 = vpop.f32.mrb[233].mxu0  ;;  %12667 = vmatprep.subr.bf16.mxu1 %v17553_v15  ;;  %v17554_v15 = vld [vmem:[%s24292_s3 + $0x540] ss:$16 sps:$4 sm:$0xff]   ;;  %v24707_v4 = vld [vmem:[#allocation22_spill] sm:$0xff] }
 0x4fe   : > { %24703 = vst [vmem:[#allocation20_spill] sm:$0xff] %v22398_v18  ;;  %24704 = vst [vmem:[#allocation159_spill] sm:$0xff] %v22400_v30  ;;  %v15605_v12 = vadd.f32 %v6798_v38, %v22082_v42  ;;  %v15542_v43 = vadd.f32 %v6414_v26, %v22086_v27  ;;  %v6800_v59 = vpop.f32.mrb[233].mxu1  ;;  %v6416_v36 = vpop.f32.mrb[234].mxu0  ;;  %v17557_v38 = vld [vmem:[%s24292_s3 + $0x548] ss:$16 sps:$4 sm:$0xff]  }
 0x4ff   : > { %24705 = vst [vmem:[#allocation160_spill] sm:$0xff] %v22408_v5  ;;  %v15606_v32 = vadd.f32 %v6800_v59, %v22091_v17  ;;  %v15543_v14 = vadd.f32 %v6416_v36, %v22076_v39  ;;  %v6802_v20 = vpop.f32.mrb[234].mxu1  ;;  %v6418_v49 = vpop.f32.mrb[235].mxu0  ;;  %11124 = vmatpush1.bf16.msra.mxu0 %v17548_v54  ;;  %v17562_v26 = vld [vmem:[%s24292_s3 + $0x564] ss:$16 sps:$4 sm:$0xff]   ;;  %v7189_v54 = vmax.f32 %v15541_v13, 0.0 }
 0x500   : > { %v15607_v34 = vadd.f32 %v6802_v20, %v22082_v42  ;;  %v15544_v33 = vadd.f32 %v6418_v49, %v22086_v27  ;;  %v6804_v50 = vpop.f32.mrb[235].mxu1  ;;  %12668 = vmatpush1.bf16.msra.mxu1 %v17551_v55  ;;  %11125 = vmatprep.subr.bf16.mxu0 %v17556_v61  ;;  %v24706_v18 = vld [vmem:[#allocation19_spill] sm:$0xff]  ;;  %v17565_v55 = vld [vmem:[%s24292_s3 + $0x56c] ss:$16 sps:$4 sm:$0xff]   ;;  %v7191_v61 = vmax.f32 %v15605_v12, 0.0  ;;  %v7190_v20 = vmax.f32 %v15542_v43, 0.0 }
 0x501   : > { %v7205_v59 = vmax.f32 %v15543_v14, 0.0  ;;  %v15608_v36 = vadd.f32 %v6804_v50, %v22091_v17  ;;  %10995 = vmatmul.mubr.bf16.gmra.mrb[20].mxu0 %v24706_v18  ;;  %12669 = vmatprep.subr.bf16.mxu1 %v17559_v48  ;;  %v7192_v30 = vmax.f32 %v15606_v32, 0.0  ;;  %v17560_v48 = vld [vmem:[%s24292_s3 + $0x560] ss:$16 sps:$4 sm:$0xff]  }
 0x502   : > { %v7207_v49 = vmax.f32 %v15607_v34, 0.0  ;;  %v7206_v5 = vmax.f32 %v15544_v33, 0.0  ;;  %12539 = vmatmul.mubr.bf16.gmra.mrb[20].mxu1 %v24706_v18  ;;  %11004 = vmatprep.mubr.bf16.mxu0 %v24707_v4  ;;  %v17563_v18 = vld [vmem:[%s24292_s3 + $0x568] ss:$16 sps:$4 sm:$0xff]  }
 0x503   : > { %v22436_v13 = vpack.c.bf16 %v7205_v59, %v7189_v54  ;;  %v7208_v14 = vmax.f32 %v15608_v36, 0.0  ;;  %12548 = vmatprep.mubr.bf16.mxu1 %v24707_v4  ;;  %11126 = vmatpush1.bf16.msra.mxu0 %v17554_v15  ;;  %v17568_v4 = vld [vmem:[%s24292_s3 + $0x584] ss:$16 sps:$4 sm:$0xff]  }
 0x504   : > { %v22442_v50 = vpack.c.bf16 %v7207_v49, %v7191_v61  ;;  %v22444_v12 = vpack.c.bf16 %v7206_v5, %v7190_v20  ;;  %v6422_v43 = vpop.f32.mrb[236].mxu0  ;;  %12670 = vmatpush1.bf16.msra.mxu1 %v17557_v38  ;;  %11127 = vmatprep.subr.bf16.mxu0 %v17562_v26  ;;  %v17571_v5 = vld [vmem:[%s24292_s3 + $0x58c] ss:$16 sps:$4 sm:$0xff]  }
 0x505   : > { %24708 = vst [vmem:[#allocation19_spill] sm:$0xff] %v22436_v13  ;;  %v22452_v32 = vpack.c.bf16 %v7208_v14, %v7192_v30  ;;  %v15545_v15 = vadd.f32 %v6422_v43, %v22076_v39  ;;  %v6808_v34 = vpop.f32.mrb[236].mxu1  ;;  %v6424_v33 = vpop.f32.mrb[237].mxu0  ;;  %12671 = vmatprep.subr.bf16.mxu1 %v17565_v55  ;;  %v17566_v55 = vld [vmem:[%s24292_s3 + $0x580] ss:$16 sps:$4 sm:$0xff]   ;;  %v24713_v13 = vld [vmem:[#allocation24_spill] sm:$0xff] }
 0x506   : > { %24709 = vst [vmem:[#allocation22_spill] sm:$0xff] %v22442_v50  ;;  %24710 = vst [vmem:[#allocation161_spill] sm:$0xff] %v22444_v12  ;;  %v15609_v38 = vadd.f32 %v6808_v34, %v22082_v42  ;;  %v15546_v26 = vadd.f32 %v6424_v33, %v22086_v27  ;;  %v6810_v54 = vpop.f32.mrb[237].mxu1  ;;  %v6426_v59 = vpop.f32.mrb[238].mxu0  ;;  %v17569_v34 = vld [vmem:[%s24292_s3 + $0x588] ss:$16 sps:$4 sm:$0xff]  }
 0x507   : > { %24711 = vst [vmem:[#allocation162_spill] sm:$0xff] %v22452_v32  ;;  %v15610_v36 = vadd.f32 %v6810_v54, %v22091_v17  ;;  %v15547_v30 = vadd.f32 %v6426_v59, %v22076_v39  ;;  %v6812_v61 = vpop.f32.mrb[238].mxu1  ;;  %v6428_v20 = vpop.f32.mrb[239].mxu0  ;;  %11128 = vmatpush1.bf16.msra.mxu0 %v17560_v48  ;;  %v17574_v33 = vld [vmem:[%s24292_s3 + $0x5a4] ss:$16 sps:$4 sm:$0xff]   ;;  %v7221_v48 = vmax.f32 %v15545_v15, 0.0 }
 0x508   : > { %v15611_v49 = vadd.f32 %v6812_v61, %v22082_v42  ;;  %v15548_v14 = vadd.f32 %v6428_v20, %v22086_v27  ;;  %v6814_v43 = vpop.f32.mrb[239].mxu1  ;;  %12672 = vmatpush1.bf16.msra.mxu1 %v17563_v18  ;;  %11129 = vmatprep.subr.bf16.mxu0 %v17568_v4  ;;  %v24712_v50 = vld [vmem:[#allocation21_spill] sm:$0xff]  ;;  %v17577_v18 = vld [vmem:[%s24292_s3 + $0x5ac] ss:$16 sps:$4 sm:$0xff]   ;;  %v7223_v4 = vmax.f32 %v15609_v38, 0.0  ;;  %v7222_v61 = vmax.f32 %v15546_v26, 0.0 }
 0x509   : > { %v7237_v54 = vmax.f32 %v15547_v30, 0.0  ;;  %v15612_v59 = vadd.f32 %v6814_v43, %v22091_v17  ;;  %11005 = vmatmul.mubr.bf16.gmra.mrb[24].mxu0 %v24712_v50  ;;  %12673 = vmatprep.subr.bf16.mxu1 %v17571_v5  ;;  %v7224_v12 = vmax.f32 %v15610_v36, 0.0  ;;  %v17572_v5 = vld [vmem:[%s24292_s3 + $0x5a0] ss:$16 sps:$4 sm:$0xff]  }
 0x50a   : > { %v7239_v20 = vmax.f32 %v15611_v49, 0.0  ;;  %v7238_v32 = vmax.f32 %v15548_v14, 0.0  ;;  %12549 = vmatmul.mubr.bf16.gmra.mrb[24].mxu1 %v24712_v50  ;;  %11014 = vmatprep.mubr.bf16.mxu0 %v24713_v13  ;;  %v17575_v50 = vld [vmem:[%s24292_s3 + $0x5a8] ss:$16 sps:$4 sm:$0xff]  }
 0x50b   : > { %v22480_v15 = vpack.c.bf16 %v7237_v54, %v7221_v48  ;;  %v7240_v30 = vmax.f32 %v15612_v59, 0.0  ;;  %12558 = vmatprep.mubr.bf16.mxu1 %v24713_v13  ;;  %11130 = vmatpush1.bf16.msra.mxu0 %v17566_v55  ;;  %v17580_v13 = vld [vmem:[%s24292_s3 + $0x5c4] ss:$16 sps:$4 sm:$0xff]  }
 0x50c   : > { %v22486_v43 = vpack.c.bf16 %v7239_v20, %v7223_v4  ;;  %v22488_v38 = vpack.c.bf16 %v7238_v32, %v7222_v61  ;;  %v6432_v26 = vpop.f32.mrb[240].mxu0  ;;  %12674 = vmatpush1.bf16.msra.mxu1 %v17569_v34  ;;  %11131 = vmatprep.subr.bf16.mxu0 %v17574_v33  ;;  %v17583_v32 = vld [vmem:[%s24292_s3 + $0x5cc] ss:$16 sps:$4 sm:$0xff]  }
 0x50d   : > { %24714 = vst [vmem:[#allocation21_spill] sm:$0xff] %v22480_v15  ;;  %v22496_v36 = vpack.c.bf16 %v7240_v30, %v7224_v12  ;;  %v15549_v55 = vadd.f32 %v6432_v26, %v22076_v39  ;;  %v6818_v49 = vpop.f32.mrb[240].mxu1  ;;  %v6434_v14 = vpop.f32.mrb[241].mxu0  ;;  %12675 = vmatprep.subr.bf16.mxu1 %v17577_v18  ;;  %v17578_v18 = vld [vmem:[%s24292_s3 + $0x5c0] ss:$16 sps:$4 sm:$0xff]   ;;  %v24719_v15 = vld [vmem:[#allocation26_spill] sm:$0xff] }
 0x50e   : > { %24715 = vst [vmem:[#allocation24_spill] sm:$0xff] %v22486_v43  ;;  %24716 = vst [vmem:[#allocation163_spill] sm:$0xff] %v22488_v38  ;;  %v15613_v34 = vadd.f32 %v6818_v49, %v22082_v42  ;;  %v15550_v33 = vadd.f32 %v6434_v14, %v22086_v27  ;;  %v6820_v48 = vpop.f32.mrb[241].mxu1  ;;  %v6436_v54 = vpop.f32.mrb[242].mxu0  ;;  %v17581_v49 = vld [vmem:[%s24292_s3 + $0x5c8] ss:$16 sps:$4 sm:$0xff]  }
 0x50f   : > { %24717 = vst [vmem:[#allocation164_spill] sm:$0xff] %v22496_v36  ;;  %v15614_v59 = vadd.f32 %v6820_v48, %v22091_v17  ;;  %v15551_v12 = vadd.f32 %v6436_v54, %v22076_v39  ;;  %v6822_v4 = vpop.f32.mrb[242].mxu1  ;;  %v6438_v61 = vpop.f32.mrb[243].mxu0  ;;  %11132 = vmatpush1.bf16.msra.mxu0 %v17572_v5  ;;  %v17586_v14 = vld [vmem:[%s24292_s3 + $0x5e4] ss:$16 sps:$4 sm:$0xff]   ;;  %v7253_v5 = vmax.f32 %v15549_v55, 0.0 }
 0x510   : > { %v15615_v20 = vadd.f32 %v6822_v4, %v22082_v42  ;;  %v15552_v30 = vadd.f32 %v6438_v61, %v22086_v27  ;;  %v6824_v26 = vpop.f32.mrb[243].mxu1  ;;  %12676 = vmatpush1.bf16.msra.mxu1 %v17575_v50  ;;  %11133 = vmatprep.subr.bf16.mxu0 %v17580_v13  ;;  %v24718_v43 = vld [vmem:[#allocation23_spill] sm:$0xff]  ;;  %v17589_v50 = vld [vmem:[%s24292_s3 + $0x5ec] ss:$16 sps:$4 sm:$0xff]   ;;  %v7255_v13 = vmax.f32 %v15613_v34, 0.0  ;;  %v7254_v4 = vmax.f32 %v15550_v33, 0.0 }
 0x511   : > { %v7269_v48 = vmax.f32 %v15551_v12, 0.0  ;;  %v15616_v54 = vadd.f32 %v6824_v26, %v22091_v17  ;;  %11015 = vmatmul.mubr.bf16.gmra.mrb[28].mxu0 %v24718_v43  ;;  %12677 = vmatprep.subr.bf16.mxu1 %v17583_v32  ;;  %v7256_v38 = vmax.f32 %v15614_v59, 0.0  ;;  %v17584_v32 = vld [vmem:[%s24292_s3 + $0x5e0] ss:$16 sps:$4 sm:$0xff]  }
 0x512   : > { %v7271_v61 = vmax.f32 %v15615_v20, 0.0  ;;  %v7270_v36 = vmax.f32 %v15552_v30, 0.0  ;;  %12559 = vmatmul.mubr.bf16.gmra.mrb[28].mxu1 %v24718_v43  ;;  %11024 = vmatprep.mubr.bf16.mxu0 %v24719_v15  ;;  %v17587_v43 = vld [vmem:[%s24292_s3 + $0x5e8] ss:$16 sps:$4 sm:$0xff]  }
 0x513   : > { %v22524_v55 = vpack.c.bf16 %v7269_v48, %v7253_v5  ;;  %v7272_v12 = vmax.f32 %v15616_v54, 0.0  ;;  %12568 = vmatprep.mubr.bf16.mxu1 %v24719_v15  ;;  %11134 = vmatpush1.bf16.msra.mxu0 %v17578_v18  ;;  %v17592_v15 = vld [vmem:[%s24292_s3 + $0x604] ss:$16 sps:$4 sm:$0xff]  }
 0x514   : > { %v22530_v26 = vpack.c.bf16 %v7271_v61, %v7255_v13  ;;  %v22532_v34 = vpack.c.bf16 %v7270_v36, %v7254_v4  ;;  %v6442_v33 = vpop.f32.mrb[244].mxu0  ;;  %12678 = vmatpush1.bf16.msra.mxu1 %v17581_v49  ;;  %11135 = vmatprep.subr.bf16.mxu0 %v17586_v14  ;;  %v17595_v36 = vld [vmem:[%s24292_s3 + $0x60c] ss:$16 sps:$4 sm:$0xff]  }
 0x515   : > { %24720 = vst [vmem:[#allocation23_spill] sm:$0xff] %v22524_v55  ;;  %v22540_v59 = vpack.c.bf16 %v7272_v12, %v7256_v38  ;;  %v15553_v18 = vadd.f32 %v6442_v33, %v22076_v39  ;;  %v6828_v20 = vpop.f32.mrb[244].mxu1  ;;  %v6444_v30 = vpop.f32.mrb[245].mxu0  ;;  %12679 = vmatprep.subr.bf16.mxu1 %v17589_v50 }
 0x516   : > { %24721 = vst [vmem:[#allocation26_spill] sm:$0xff] %v22530_v26  ;;  %v15617_v49 = vadd.f32 %v6828_v20, %v22082_v42  ;;  %v15554_v14 = vadd.f32 %v6444_v30, %v22086_v27  ;;  %v6830_v5 = vpop.f32.mrb[245].mxu1  ;;  %v6446_v48 = vpop.f32.mrb[246].mxu0  ;;  %v24723_v26 = vld [vmem:[#allocation25_spill] sm:$0xff] }
 0x517   : > { %24722 = vst [vmem:[#allocation165_spill] sm:$0xff] %v22540_v59  ;;  %v15618_v54 = vadd.f32 %v6830_v5, %v22091_v17  ;;  %v15555_v38 = vadd.f32 %v6446_v48, %v22076_v39  ;;  %v6832_v13 = vpop.f32.mrb[246].mxu1  ;;  %v6448_v4 = vpop.f32.mrb[247].mxu0  ;;  %11136 = vmatpush1.bf16.msra.mxu0 %v17584_v32  ;;  %v7285_v33 = vmax.f32 %v15553_v18, 0.0  ;;  %v24724_v32 = vld [vmem:[#allocation28_spill] sm:$0xff] }
 0x518   : > { %v15619_v61 = vadd.f32 %v6832_v13, %v22082_v42  ;;  %v15556_v50 = vadd.f32 %v6448_v4, %v22086_v27  ;;  %v6834_v12 = vpop.f32.mrb[247].mxu1  ;;  %12680 = vmatpush1.bf16.msra.mxu1 %v17587_v43  ;;  %11298 = vmatprep.subr.bf16.mxu0 %v17592_v15  ;;  %v7287_v5 = vmax.f32 %v15617_v49, 0.0  ;;  %v7286_v59 = vmax.f32 %v15554_v14, 0.0 }
 0x519   : > { %v7301_v20 = vmax.f32 %v15555_v38, 0.0  ;;  %v15620_v30 = vadd.f32 %v6834_v12, %v22091_v17  ;;  %11025 = vmatmul.mubr.bf16.gmra.mrb[32].mxu0 %v24723_v26  ;;  %12842 = vmatprep.subr.bf16.mxu1 %v17595_v36  ;;  %v7288_v13 = vmax.f32 %v15618_v54, 0.0 }
 0x51a   : > { %v7303_v48 = vmax.f32 %v15619_v61, 0.0  ;;  %v7302_v55 = vmax.f32 %v15556_v50, 0.0  ;;  %12569 = vmatmul.mubr.bf16.gmra.mrb[32].mxu1 %v24723_v26  ;;  %11034 = vmatprep.mubr.bf16.mxu0 %v24724_v32 }
 0x51b   : > { %v22556_v4 = vpack.c.bf16 %v7301_v20, %v7285_v33  ;;  %v7304_v43 = vmax.f32 %v15620_v30, 0.0  ;;  %12578 = vmatprep.mubr.bf16.mxu1 %v24724_v32 }
 0x51c   : > { %v22559_v15 = vpack.c.bf16 %v7303_v48, %v7287_v5  ;;  %v22561_v18 = vpack.c.bf16 %v7302_v55, %v7286_v59  ;;  %v6452_v38 = vpop.f32.mrb[248].mxu0 }
 0x51d   : > { %24725 = vst [vmem:[#allocation25_spill] sm:$0xff] %v22556_v4  ;;  %v22563_v36 = vpack.c.bf16 %v7304_v43, %v7288_v13  ;;  %v15557_v49 = vadd.f32 %v6452_v38, %v22076_v39  ;;  %v6838_v14 = vpop.f32.mrb[248].mxu1  ;;  %v6454_v61 = vpop.f32.mrb[249].mxu0  ;;  %v24728_v38 = vld [vmem:[#allocation27_spill] sm:$0xff] }
 0x51e   : > { %24726 = vst [vmem:[#allocation28_spill] sm:$0xff] %v22559_v15  ;;  %v15621_v26 = vadd.f32 %v6838_v14, %v22082_v42  ;;  %v15558_v54 = vadd.f32 %v6454_v61, %v22086_v27  ;;  %v6840_v50 = vpop.f32.mrb[249].mxu1  ;;  %v6456_v12 = vpop.f32.mrb[250].mxu0 }
 0x51f   : > { %24727 = vst [vmem:[#allocation166_spill] sm:$0xff] %v22563_v36  ;;  %v15622_v33 = vadd.f32 %v6840_v50, %v22091_v17  ;;  %v15559_v20 = vadd.f32 %v6456_v12, %v22076_v39  ;;  %v6842_v30 = vpop.f32.mrb[250].mxu1  ;;  %v6458_v55 = vpop.f32.mrb[251].mxu0  ;;  %v7317_v32 = vmax.f32 %v15557_v49, 0.0  ;;  %v24729_v50 = vld [vmem:[#allocation31_spill] sm:$0xff] }
 0x520   : > { %v15623_v59 = vadd.f32 %v6842_v30, %v22082_v42  ;;  %v15560_v5 = vadd.f32 %v6458_v55, %v22086_v27  ;;  %v6844_v48 = vpop.f32.mrb[251].mxu1  ;;  %v7319_v14 = vmax.f32 %v15621_v26, 0.0  ;;  %v7318_v61 = vmax.f32 %v15558_v54, 0.0 }
 0x521   : > { %v7333_v13 = vmax.f32 %v15559_v20, 0.0  ;;  %v15624_v43 = vadd.f32 %v6844_v48, %v22091_v17  ;;  %11035 = vmatmul.mubr.bf16.gmra.mrb[36].mxu0 %v24728_v38  ;;  %v7320_v12 = vmax.f32 %v15622_v33, 0.0 }
 0x522   : > { %v7335_v15 = vmax.f32 %v15623_v59, 0.0  ;;  %v7334_v36 = vmax.f32 %v15560_v5, 0.0  ;;  %12579 = vmatmul.mubr.bf16.gmra.mrb[36].mxu1 %v24728_v38  ;;  %11044 = vmatprep.mubr.bf16.mxu0 %v24729_v50 }
 0x523   : > { %v22576_v4 = vpack.c.bf16 %v7333_v13, %v7317_v32  ;;  %v7336_v30 = vmax.f32 %v15624_v43, 0.0  ;;  %12588 = vmatprep.mubr.bf16.mxu1 %v24729_v50 }
 0x524   : > { %v22579_v49 = vpack.c.bf16 %v7335_v15, %v7319_v14  ;;  %v22581_v20 = vpack.c.bf16 %v7334_v36, %v7318_v61  ;;  %v6462_v55 = vpop.f32.mrb[252].mxu0 }
 0x525   : > { %24730 = vst [vmem:[#allocation27_spill] sm:$0xff] %v22576_v4  ;;  %v22583_v48 = vpack.c.bf16 %v7336_v30, %v7320_v12  ;;  %v15561_v26 = vadd.f32 %v6462_v55, %v22076_v39  ;;  %v6848_v54 = vpop.f32.mrb[252].mxu1  ;;  %v6464_v59 = vpop.f32.mrb[253].mxu0 }
 0x526   : > { %24731 = vst [vmem:[#allocation31_spill] sm:$0xff] %v22579_v49  ;;  %v15625_v5 = vadd.f32 %v6848_v54, %v22082_v42  ;;  %v15562_v33 = vadd.f32 %v6464_v59, %v22086_v27  ;;  %v6850_v32 = vpop.f32.mrb[253].mxu1  ;;  %v6466_v13 = vpop.f32.mrb[254].mxu0  ;;  %v24733_v54 = vld [vmem:[#allocation30_spill] sm:$0xff] }
 0x527   : > { %24732 = vst [vmem:[#allocation167_spill] sm:$0xff] %v22583_v48  ;;  %v15626_v43 = vadd.f32 %v6850_v32, %v22091_v17  ;;  %v15563_v15 = vadd.f32 %v6466_v13, %v22076_v39  ;;  %v6852_v38 = vpop.f32.mrb[254].mxu1  ;;  %v6468_v36 = vpop.f32.mrb[255].mxu0  ;;  %v7349_v12 = vmax.f32 %v15561_v26, 0.0  ;;  %v24734_v39 = vld [vmem:[#allocation35_spill] sm:$0xff] }
 0x528   : > { %v15627_v14 = vadd.f32 %v6852_v38, %v22082_v42  ;;  %v15564_v61 = vadd.f32 %v6468_v36, %v22086_v27  ;;  %v6854_v50 = vpop.f32.mrb[255].mxu1  ;;  %v7351_v59 = vmax.f32 %v15625_v5, 0.0  ;;  %v7350_v49 = vmax.f32 %v15562_v33, 0.0  ;;  %v24735_v5 = vld [vmem:[#allocation34_spill] sm:$0xff]  ;;  %v24736_v33 = vld [vmem:[#allocation39_spill] sm:$0xff] }
 0x529   : > { %v7365_v30 = vmax.f32 %v15563_v15, 0.0  ;;  %v15628_v55 = vadd.f32 %v6854_v50, %v22091_v17  ;;  %11045 = vmatmul.mubr.bf16.gmra.mrb[40].mxu0 %v24733_v54  ;;  %v7352_v32 = vmax.f32 %v15626_v43, 0.0  ;;  %v24737_v43 = vld [vmem:[#allocation38_spill] sm:$0xff]  ;;  %v24738_v15 = vld [vmem:[#allocation43_spill] sm:$0xff] }
 0x52a   : > { %v7367_v48 = vmax.f32 %v15627_v14, 0.0  ;;  %v7366_v4 = vmax.f32 %v15564_v61, 0.0  ;;  %12589 = vmatmul.mubr.bf16.gmra.mrb[40].mxu1 %v24733_v54  ;;  %11054 = vmatprep.mubr.bf16.mxu0 %v24734_v39  ;;  %v24742_v38 = vld [vmem:[#allocation50_spill] sm:$0xff]  ;;  %v24743_v36 = vld [vmem:[#allocation51_spill] sm:$0xff] }
 0x52b   : > { %v22596_v13 = vpack.c.bf16 %v7365_v30, %v7349_v12  ;;  %v7368_v42 = vmax.f32 %v15628_v55, 0.0  ;;  %12598 = vmatprep.mubr.bf16.mxu1 %v24734_v39  ;;  %v24744_v14 = vld [vmem:[#allocation54_spill] sm:$0xff]  ;;  %v17590_v61 = vld [vmem:[%s24292_s3 + $0x600] ss:$16 sps:$4 sm:$0xff]   ;;  %v17598_v12 = vld [vmem:[%s24292_s3 + $0x624] ss:$16 sps:$4 sm:$0xff]  }
 0x52c   : > { %v22599_v27 = vpack.c.bf16 %v7367_v48, %v7351_v59  ;;  %v22601_v26 = vpack.c.bf16 %v7366_v4, %v7350_v49  ;;  %v24739_v4 = vld [vmem:[#allocation42_spill] sm:$0xff]  ;;  %v24740_v49 = vld [vmem:[#allocation47_spill] sm:$0xff]  ;;  %v24745_v30 = vld [vmem:[#allocation52_spill] sm:$0xff] }
 0x52d   : > { %v22603_v17 = vpack.c.bf16 %v7368_v42, %v7352_v32  ;;  %v24741_v48 = vld [vmem:[#allocation46_spill] sm:$0xff]  ;;  %v17596_v59 = vld [vmem:[%s24292_s3 + $0x620] ss:$16 sps:$4 sm:$0xff]   ;;  %v17604_v32 = vld [vmem:[%s24292_s3 + $0x644] ss:$16 sps:$4 sm:$0xff]  }
 0x52e   : > { %v17593_v50 = vld [vmem:[%s24292_s3 + $0x608] ss:$16 sps:$4 sm:$0xff]   ;;  %v17601_v55 = vld [vmem:[%s24292_s3 + $0x62c] ss:$16 sps:$4 sm:$0xff]  }
 0x52f   : > { %v24746_v54 = vld [vmem:[#allocation58_spill] sm:$0xff] }
 0x530   : > { %v17599_v39 = vld [vmem:[%s24292_s3 + $0x628] ss:$16 sps:$4 sm:$0xff]   ;;  %v17607_v42 = vld [vmem:[%s24292_s3 + $0x64c] ss:$16 sps:$4 sm:$0xff]  }
 0x531   : > { %11055 = vmatmul.mubr.bf16.gmra.mrb[44].mxu0 %v24735_v5 }
 0x532   : > { %12599 = vmatmul.mubr.bf16.gmra.mrb[44].mxu1 %v24735_v5  ;;  %11064 = vmatprep.mubr.bf16.mxu0 %v24736_v33  ;;  %v17602_v5 = vld [vmem:[%s24292_s3 + $0x640] ss:$16 sps:$4 sm:$0xff]  }
 0x533   : > { %12608 = vmatprep.mubr.bf16.mxu1 %v24736_v33  ;;  %v17605_v33 = vld [vmem:[%s24292_s3 + $0x648] ss:$16 sps:$4 sm:$0xff]  }
 0x539   : > { %11065 = vmatmul.mubr.bf16.gmra.mrb[48].mxu0 %v24737_v43 }
 0x53a   : > { %12609 = vmatmul.mubr.bf16.gmra.mrb[48].mxu1 %v24737_v43  ;;  %11074 = vmatprep.mubr.bf16.mxu0 %v24738_v15  ;;  %v17610_v43 = vld [vmem:[%s24292_s3 + $0x664] ss:$16 sps:$4 sm:$0xff]  }
 0x53b   : > { %12618 = vmatprep.mubr.bf16.mxu1 %v24738_v15  ;;  %v24747_v15 = vld [vmem:[#allocation56_spill] sm:$0xff] }
 0x541   : > { %11075 = vmatmul.mubr.bf16.gmra.mrb[52].mxu0 %v24739_v4 }
 0x542   : > { %12619 = vmatmul.mubr.bf16.gmra.mrb[52].mxu1 %v24739_v4  ;;  %11084 = vmatprep.mubr.bf16.mxu0 %v24740_v49  ;;  %v17613_v4 = vld [vmem:[%s24292_s3 + $0x66c] ss:$16 sps:$4 sm:$0xff]  }
 0x543   : > { %12628 = vmatprep.mubr.bf16.mxu1 %v24740_v49  ;;  %v24748_v49 = vld [vmem:[#allocation62_spill] sm:$0xff] }
 0x549   : > { %11085 = vmatmul.mubr.bf16.gmra.mrb[56].mxu0 %v24741_v48 }
 0x54a   : > { %12629 = vmatmul.mubr.bf16.gmra.mrb[56].mxu1 %v24741_v48  ;;  %11094 = vmatprep.mubr.bf16.mxu0 %v24742_v38  ;;  %v17608_v48 = vld [vmem:[%s24292_s3 + $0x660] ss:$16 sps:$4 sm:$0xff]  }
 0x54b   : > { %12638 = vmatprep.mubr.bf16.mxu1 %v24742_v38  ;;  %v17611_v38 = vld [vmem:[%s24292_s3 + $0x668] ss:$16 sps:$4 sm:$0xff]  }
 0x551   : > { %11095 = vmatmul.mubr.bf16.gmra.mrb[60].mxu0 %v24743_v36 }
 0x552   : > { %12639 = vmatmul.mubr.bf16.gmra.mrb[60].mxu1 %v24743_v36  ;;  %11137 = vmatprep.mubr.bf16.mxu0 %v24744_v14  ;;  %v17616_v36 = vld [vmem:[%s24292_s3 + $0x684] ss:$16 sps:$4 sm:$0xff]  }
 0x553   : > { %12681 = vmatprep.mubr.bf16.mxu1 %v24744_v14  ;;  %v17619_v14 = vld [vmem:[%s24292_s3 + $0x68c] ss:$16 sps:$4 sm:$0xff]  }
 0x559   : > { %11138 = vmatmul.mubr.bf16.vlgmr.msra.gmra.mrb[0].mxu0 %v24745_v30 }
 0x55a   : > { %12682 = vmatmul.mubr.bf16.vlgmr.msra.gmra.mrb[0].mxu1 %v24745_v30  ;;  %11147 = vmatprep.mubr.bf16.mxu0 %v24746_v54  ;;  %v24749_v30 = vld [vmem:[#allocation60_spill] sm:$0xff] }
 0x55b   : > { %11299 = vmatpush1.bf16.msra.mxu0 %v17590_v61  ;;  %12691 = vmatprep.mubr.bf16.mxu1 %v24746_v54  ;;  %v17614_v61 = vld [vmem:[%s24292_s3 + $0x680] ss:$16 sps:$4 sm:$0xff]   ;;  %v24750_v54 = vld [vmem:[#allocation66_spill] sm:$0xff] }
 0x55c   : > { %12843 = vmatpush1.bf16.msra.mxu1 %v17593_v50  ;;  %11300 = vmatprep.subr.bf16.mxu0 %v17598_v12  ;;  %v17617_v50 = vld [vmem:[%s24292_s3 + $0x688] ss:$16 sps:$4 sm:$0xff]   ;;  %v17622_v12 = vld [vmem:[%s24292_s3 + $0x6a4] ss:$16 sps:$4 sm:$0xff]  }
 0x55d   : > { %12844 = vmatprep.subr.bf16.mxu1 %v17601_v55  ;;  %v17625_v55 = vld [vmem:[%s24292_s3 + $0x6ac] ss:$16 sps:$4 sm:$0xff]  }
 0x55f   : > { %11301 = vmatpush1.bf16.msra.mxu0 %v17596_v59  ;;  %v17620_v59 = vld [vmem:[%s24292_s3 + $0x6a0] ss:$16 sps:$4 sm:$0xff]  }
 0x560   : > { %12845 = vmatpush1.bf16.msra.mxu1 %v17599_v39  ;;  %11302 = vmatprep.subr.bf16.mxu0 %v17604_v32  ;;  %v17623_v39 = vld [vmem:[%s24292_s3 + $0x6a8] ss:$16 sps:$4 sm:$0xff]   ;;  %v17628_v32 = vld [vmem:[%s24292_s3 + $0x6c4] ss:$16 sps:$4 sm:$0xff]  }
 0x561   : > { %11148 = vmatmul.mubr.bf16.gmra.mrb[4].mxu0 %v24747_v15  ;;  %12846 = vmatprep.subr.bf16.mxu1 %v17607_v42  ;;  %v17631_v42 = vld [vmem:[%s24292_s3 + $0x6cc] ss:$16 sps:$4 sm:$0xff]  }
 0x562   : > { %12692 = vmatmul.mubr.bf16.gmra.mrb[4].mxu1 %v24747_v15  ;;  %11157 = vmatprep.mubr.bf16.mxu0 %v24748_v49  ;;  %v24751_v15 = vld [vmem:[#allocation64_spill] sm:$0xff] }
 0x563   : > { %12701 = vmatprep.mubr.bf16.mxu1 %v24748_v49  ;;  %11303 = vmatpush1.bf16.msra.mxu0 %v17602_v5  ;;  %v17626_v5 = vld [vmem:[%s24292_s3 + $0x6c0] ss:$16 sps:$4 sm:$0xff]   ;;  %v24752_v49 = vld [vmem:[#allocation70_spill] sm:$0xff] }
 0x564   : > { %12847 = vmatpush1.bf16.msra.mxu1 %v17605_v33  ;;  %11304 = vmatprep.subr.bf16.mxu0 %v17610_v43  ;;  %v17629_v33 = vld [vmem:[%s24292_s3 + $0x6c8] ss:$16 sps:$4 sm:$0xff]   ;;  %v17634_v43 = vld [vmem:[%s24292_s3 + $0x6e4] ss:$16 sps:$4 sm:$0xff]  }
 0x565   : > { %12848 = vmatprep.subr.bf16.mxu1 %v17613_v4  ;;  %v17637_v4 = vld [vmem:[%s24292_s3 + $0x6ec] ss:$16 sps:$4 sm:$0xff]  }
 0x567   : > { %11305 = vmatpush1.bf16.msra.mxu0 %v17608_v48  ;;  %v17632_v48 = vld [vmem:[%s24292_s3 + $0x6e0] ss:$16 sps:$4 sm:$0xff]  }
 0x568   : > { %12849 = vmatpush1.bf16.msra.mxu1 %v17611_v38  ;;  %11306 = vmatprep.subr.bf16.mxu0 %v17616_v36  ;;  %v17635_v38 = vld [vmem:[%s24292_s3 + $0x6e8] ss:$16 sps:$4 sm:$0xff]   ;;  %v17640_v36 = vld [vmem:[%s24292_s3 + $0x704] ss:$16 sps:$4 sm:$0xff]  }
 0x569   : > { %11158 = vmatmul.mubr.bf16.gmra.mrb[8].mxu0 %v24749_v30  ;;  %12850 = vmatprep.subr.bf16.mxu1 %v17619_v14  ;;  %v17643_v14 = vld [vmem:[%s24292_s3 + $0x70c] ss:$16 sps:$4 sm:$0xff]  }
 0x56a   : > { %12702 = vmatmul.mubr.bf16.gmra.mrb[8].mxu1 %v24749_v30  ;;  %11167 = vmatprep.mubr.bf16.mxu0 %v24750_v54  ;;  %v24753_v30 = vld [vmem:[#allocation68_spill] sm:$0xff] }
 0x56b   : > { %12711 = vmatprep.mubr.bf16.mxu1 %v24750_v54  ;;  %11307 = vmatpush1.bf16.msra.mxu0 %v17614_v61  ;;  %v17638_v61 = vld [vmem:[%s24292_s3 + $0x700] ss:$16 sps:$4 sm:$0xff]   ;;  %v24754_v54 = vld [vmem:[#allocation74_spill] sm:$0xff] }
 0x56c   : > { %12851 = vmatpush1.bf16.msra.mxu1 %v17617_v50  ;;  %11308 = vmatprep.subr.bf16.mxu0 %v17622_v12  ;;  %v17641_v50 = vld [vmem:[%s24292_s3 + $0x708] ss:$16 sps:$4 sm:$0xff]   ;;  %v17646_v12 = vld [vmem:[%s24292_s3 + $0x724] ss:$16 sps:$4 sm:$0xff]  }
 0x56d   : > { %12852 = vmatprep.subr.bf16.mxu1 %v17625_v55  ;;  %v17649_v55 = vld [vmem:[%s24292_s3 + $0x72c] ss:$16 sps:$4 sm:$0xff]  }
 0x56f   : > { %11309 = vmatpush1.bf16.msra.mxu0 %v17620_v59  ;;  %v17644_v59 = vld [vmem:[%s24292_s3 + $0x720] ss:$16 sps:$4 sm:$0xff]  }
 0x570   : > { %12853 = vmatpush1.bf16.msra.mxu1 %v17623_v39  ;;  %11310 = vmatprep.subr.bf16.mxu0 %v17628_v32  ;;  %v17647_v39 = vld [vmem:[%s24292_s3 + $0x728] ss:$16 sps:$4 sm:$0xff]   ;;  %v17652_v32 = vld [vmem:[%s24292_s3 + $0x744] ss:$16 sps:$4 sm:$0xff]  }
 0x571   : > { %11168 = vmatmul.mubr.bf16.gmra.mrb[12].mxu0 %v24751_v15  ;;  %12854 = vmatprep.subr.bf16.mxu1 %v17631_v42  ;;  %v17655_v42 = vld [vmem:[%s24292_s3 + $0x74c] ss:$16 sps:$4 sm:$0xff]  }
 0x572   : > { %12712 = vmatmul.mubr.bf16.gmra.mrb[12].mxu1 %v24751_v15  ;;  %11177 = vmatprep.mubr.bf16.mxu0 %v24752_v49  ;;  %v24755_v15 = vld [vmem:[#allocation72_spill] sm:$0xff] }
 0x573   : > { %12721 = vmatprep.mubr.bf16.mxu1 %v24752_v49  ;;  %11311 = vmatpush1.bf16.msra.mxu0 %v17626_v5  ;;  %v17650_v5 = vld [vmem:[%s24292_s3 + $0x740] ss:$16 sps:$4 sm:$0xff]   ;;  %v24756_v49 = vld [vmem:[#allocation78_spill] sm:$0xff] }
 0x574   : > { %12855 = vmatpush1.bf16.msra.mxu1 %v17629_v33  ;;  %11312 = vmatprep.subr.bf16.mxu0 %v17634_v43  ;;  %v17653_v33 = vld [vmem:[%s24292_s3 + $0x748] ss:$16 sps:$4 sm:$0xff]   ;;  %v17658_v43 = vld [vmem:[%s24292_s3 + $0x764] ss:$16 sps:$4 sm:$0xff]  }
 0x575   : > { %12856 = vmatprep.subr.bf16.mxu1 %v17637_v4  ;;  %v17661_v4 = vld [vmem:[%s24292_s3 + $0x76c] ss:$16 sps:$4 sm:$0xff]  }
 0x577   : > { %11313 = vmatpush1.bf16.msra.mxu0 %v17632_v48  ;;  %v17656_v48 = vld [vmem:[%s24292_s3 + $0x760] ss:$16 sps:$4 sm:$0xff]  }
 0x578   : > { %12857 = vmatpush1.bf16.msra.mxu1 %v17635_v38  ;;  %11314 = vmatprep.subr.bf16.mxu0 %v17640_v36  ;;  %v17659_v38 = vld [vmem:[%s24292_s3 + $0x768] ss:$16 sps:$4 sm:$0xff]   ;;  %v17664_v36 = vld [vmem:[%s24292_s3 + $0x784] ss:$16 sps:$4 sm:$0xff]  }
 0x579   : > { %11178 = vmatmul.mubr.bf16.gmra.mrb[16].mxu0 %v24753_v30  ;;  %12858 = vmatprep.subr.bf16.mxu1 %v17643_v14  ;;  %v17667_v14 = vld [vmem:[%s24292_s3 + $0x78c] ss:$16 sps:$4 sm:$0xff]  }
 0x57a   : > { %12722 = vmatmul.mubr.bf16.gmra.mrb[16].mxu1 %v24753_v30  ;;  %11187 = vmatprep.mubr.bf16.mxu0 %v24754_v54  ;;  %v24757_v30 = vld [vmem:[#allocation76_spill] sm:$0xff] }
 0x57b   : > { %12731 = vmatprep.mubr.bf16.mxu1 %v24754_v54  ;;  %11315 = vmatpush1.bf16.msra.mxu0 %v17638_v61  ;;  %v17662_v61 = vld [vmem:[%s24292_s3 + $0x780] ss:$16 sps:$4 sm:$0xff]   ;;  %v24758_v54 = vld [vmem:[#allocation82_spill] sm:$0xff] }
 0x57c   : > { %12859 = vmatpush1.bf16.msra.mxu1 %v17641_v50  ;;  %11316 = vmatprep.subr.bf16.mxu0 %v17646_v12  ;;  %v17665_v50 = vld [vmem:[%s24292_s3 + $0x788] ss:$16 sps:$4 sm:$0xff]   ;;  %v17670_v12 = vld [vmem:[%s24292_s3 + $0x7a4] ss:$16 sps:$4 sm:$0xff]  }
 0x57d   : > { %12860 = vmatprep.subr.bf16.mxu1 %v17649_v55  ;;  %v17673_v55 = vld [vmem:[%s24292_s3 + $0x7ac] ss:$16 sps:$4 sm:$0xff]  }
 0x57f   : > { %11317 = vmatpush1.bf16.msra.mxu0 %v17644_v59  ;;  %v17668_v59 = vld [vmem:[%s24292_s3 + $0x7a0] ss:$16 sps:$4 sm:$0xff]  }
 0x580   : > { %12861 = vmatpush1.bf16.msra.mxu1 %v17647_v39  ;;  %11318 = vmatprep.subr.bf16.mxu0 %v17652_v32  ;;  %v17671_v39 = vld [vmem:[%s24292_s3 + $0x7a8] ss:$16 sps:$4 sm:$0xff]   ;;  %v17676_v32 = vld [vmem:[%s24292_s3 + $0x7c4] ss:$16 sps:$4 sm:$0xff]  }
 0x581   : > { %11188 = vmatmul.mubr.bf16.gmra.mrb[20].mxu0 %v24755_v15  ;;  %12862 = vmatprep.subr.bf16.mxu1 %v17655_v42  ;;  %v17679_v42 = vld [vmem:[%s24292_s3 + $0x7cc] ss:$16 sps:$4 sm:$0xff]  }
 0x582   : > { %12732 = vmatmul.mubr.bf16.gmra.mrb[20].mxu1 %v24755_v15  ;;  %11197 = vmatprep.mubr.bf16.mxu0 %v24756_v49  ;;  %v24759_v15 = vld [vmem:[#allocation80_spill] sm:$0xff] }
 0x583   : > { %12741 = vmatprep.mubr.bf16.mxu1 %v24756_v49  ;;  %11319 = vmatpush1.bf16.msra.mxu0 %v17650_v5  ;;  %v17674_v5 = vld [vmem:[%s24292_s3 + $0x7c0] ss:$16 sps:$4 sm:$0xff]   ;;  %v24760_v49 = vld [vmem:[#allocation86_spill] sm:$0xff] }
 0x584   : > { %12863 = vmatpush1.bf16.msra.mxu1 %v17653_v33  ;;  %11320 = vmatprep.subr.bf16.mxu0 %v17658_v43  ;;  %v17677_v33 = vld [vmem:[%s24292_s3 + $0x7c8] ss:$16 sps:$4 sm:$0xff]   ;;  %v17682_v43 = vld [vmem:[%s24292_s3 + $0x7e4] ss:$16 sps:$4 sm:$0xff]  }
 0x585   : > { %12864 = vmatprep.subr.bf16.mxu1 %v17661_v4  ;;  %v17685_v4 = vld [vmem:[%s24292_s3 + $0x7ec] ss:$16 sps:$4 sm:$0xff]  }
 0x587   : > { %11321 = vmatpush1.bf16.msra.mxu0 %v17656_v48  ;;  %v17680_v48 = vld [vmem:[%s24292_s3 + $0x7e0] ss:$16 sps:$4 sm:$0xff]  }
 0x588   : > { %12865 = vmatpush1.bf16.msra.mxu1 %v17659_v38  ;;  %11322 = vmatprep.subr.bf16.mxu0 %v17664_v36  ;;  %v17683_v38 = vld [vmem:[%s24292_s3 + $0x7e8] ss:$16 sps:$4 sm:$0xff]   ;;  %v17688_v36 = vld [vmem:[%s24292_s3 + $0x804] ss:$16 sps:$4 sm:$0xff]  }
 0x589   : > { %11198 = vmatmul.mubr.bf16.gmra.mrb[24].mxu0 %v24757_v30  ;;  %12866 = vmatprep.subr.bf16.mxu1 %v17667_v14  ;;  %v17691_v14 = vld [vmem:[%s24292_s3 + $0x80c] ss:$16 sps:$4 sm:$0xff]  }
 0x58a   : > { %12742 = vmatmul.mubr.bf16.gmra.mrb[24].mxu1 %v24757_v30  ;;  %11207 = vmatprep.mubr.bf16.mxu0 %v24758_v54  ;;  %v24764_v30 = vld [vmem:[#allocation94_spill] sm:$0xff] }
 0x58b   : > { %12751 = vmatprep.mubr.bf16.mxu1 %v24758_v54  ;;  %11323 = vmatpush1.bf16.msra.mxu0 %v17662_v61  ;;  %v24761_v61 = vld [vmem:[#allocation84_spill] sm:$0xff]  ;;  %v24766_v54 = vld [vmem:[#allocation98_spill] sm:$0xff] }
 0x58c   : > { %12867 = vmatpush1.bf16.msra.mxu1 %v17665_v50  ;;  %11324 = vmatprep.subr.bf16.mxu0 %v17670_v12  ;;  %v24762_v50 = vld [vmem:[#allocation90_spill] sm:$0xff]  ;;  %v24763_v12 = vld [vmem:[#allocation88_spill] sm:$0xff] }
 0x58d   : > { %12868 = vmatprep.subr.bf16.mxu1 %v17673_v55  ;;  %v24765_v55 = vld [vmem:[#allocation92_spill] sm:$0xff] }
 0x58f   : > { %11325 = vmatpush1.bf16.msra.mxu0 %v17668_v59  ;;  %v24767_v59 = vld [vmem:[#allocation96_spill] sm:$0xff] }
 0x590   : > { %12869 = vmatpush1.bf16.msra.mxu1 %v17671_v39  ;;  %11326 = vmatprep.subr.bf16.mxu0 %v17676_v32  ;;  %v17695_v39 = vld [vmem:[%s24292_s3 + $0x828] ss:$16 sps:$4 sm:$0xff]   ;;  %v17700_v32 = vld [vmem:[%s24292_s3 + $0x844] ss:$16 sps:$4 sm:$0xff]  }
 0x591   : > { %11208 = vmatmul.mubr.bf16.gmra.mrb[28].mxu0 %v24759_v15  ;;  %12870 = vmatprep.subr.bf16.mxu1 %v17679_v42  ;;  %v17703_v42 = vld [vmem:[%s24292_s3 + $0x84c] ss:$16 sps:$4 sm:$0xff]  }
 0x592   : > { %12752 = vmatmul.mubr.bf16.gmra.mrb[28].mxu1 %v24759_v15  ;;  %11217 = vmatprep.mubr.bf16.mxu0 %v24760_v49  ;;  %v24771_v15 = vld [vmem:[#allocation57_spill] sm:$0xff] }
 0x593   : > { %12761 = vmatprep.mubr.bf16.mxu1 %v24760_v49  ;;  %11327 = vmatpush1.bf16.msra.mxu0 %v17674_v5  ;;  %v17698_v5 = vld [vmem:[%s24292_s3 + $0x840] ss:$16 sps:$4 sm:$0xff]  }
 0x594   : > { %12871 = vmatpush1.bf16.msra.mxu1 %v17677_v33  ;;  %11328 = vmatprep.subr.bf16.mxu0 %v17682_v43  ;;  %v17701_v33 = vld [vmem:[%s24292_s3 + $0x848] ss:$16 sps:$4 sm:$0xff]   ;;  %v17706_v43 = vld [vmem:[%s24292_s3 + $0x864] ss:$16 sps:$4 sm:$0xff]  }
 0x595   : > { %12872 = vmatprep.subr.bf16.mxu1 %v17685_v4  ;;  %v17709_v4 = vld [vmem:[%s24292_s3 + $0x86c] ss:$16 sps:$4 sm:$0xff]   ;;  %v24772_v49 = vld [vmem:[#allocation63_spill] sm:$0xff] }
 0x597   : > { %11329 = vmatpush1.bf16.msra.mxu0 %v17680_v48  ;;  %v17704_v48 = vld [vmem:[%s24292_s3 + $0x860] ss:$16 sps:$4 sm:$0xff]  }
 0x598   : > { %12873 = vmatpush1.bf16.msra.mxu1 %v17683_v38  ;;  %11491 = vmatprep.subr.bf16.mxu0 %v17688_v36  ;;  %v17707_v38 = vld [vmem:[%s24292_s3 + $0x868] ss:$16 sps:$4 sm:$0xff]   ;;  %v17712_v36 = vld [vmem:[%s24292_s3 + $0x884] ss:$16 sps:$4 sm:$0xff]  }
 0x599   : > { %11218 = vmatmul.mubr.bf16.gmra.mrb[32].mxu0 %v24761_v61  ;;  %13035 = vmatprep.subr.bf16.mxu1 %v17691_v14  ;;  %v17715_v14 = vld [vmem:[%s24292_s3 + $0x88c] ss:$16 sps:$4 sm:$0xff]  }
 0x59a   : > { %12762 = vmatmul.mubr.bf16.gmra.mrb[32].mxu1 %v24761_v61  ;;  %11227 = vmatprep.mubr.bf16.mxu0 %v24762_v50  ;;  %v17710_v61 = vld [vmem:[%s24292_s3 + $0x880] ss:$16 sps:$4 sm:$0xff]  }
 0x59b   : > { %12771 = vmatprep.mubr.bf16.mxu1 %v24762_v50  ;;  %v17713_v50 = vld [vmem:[%s24292_s3 + $0x888] ss:$16 sps:$4 sm:$0xff]  }
 0x5a1   : > { %11228 = vmatmul.mubr.bf16.gmra.mrb[36].mxu0 %v24763_v12 }
 0x5a2   : > { %12772 = vmatmul.mubr.bf16.gmra.mrb[36].mxu1 %v24763_v12  ;;  %11237 = vmatprep.mubr.bf16.mxu0 %v24764_v30  ;;  %v17718_v12 = vld [vmem:[%s24292_s3 + $0x8a4] ss:$16 sps:$4 sm:$0xff]  }
 0x5a3   : > { %12781 = vmatprep.mubr.bf16.mxu1 %v24764_v30  ;;  %v24773_v30 = vld [vmem:[#allocation61_spill] sm:$0xff] }
 0x5a9   : > { %11238 = vmatmul.mubr.bf16.gmra.mrb[40].mxu0 %v24765_v55 }
 0x5aa   : > { %12782 = vmatmul.mubr.bf16.gmra.mrb[40].mxu1 %v24765_v55  ;;  %11247 = vmatprep.mubr.bf16.mxu0 %v24766_v54  ;;  %v17721_v55 = vld [vmem:[%s24292_s3 + $0x8ac] ss:$16 sps:$4 sm:$0xff]  }
 0x5ab   : > { %12791 = vmatprep.mubr.bf16.mxu1 %v24766_v54  ;;  %v24774_v54 = vld [vmem:[#allocation67_spill] sm:$0xff] }
 0x5b1   : > { %11248 = vmatmul.mubr.bf16.gmra.mrb[44].mxu0 %v24767_v59 }
 0x5b2   : > { %12792 = vmatmul.mubr.bf16.gmra.mrb[44].mxu1 %v24767_v59  ;;  %11257 = vmatprep.mubr.bf16.mxu0 %v21046_v19  ;;  %v17716_v59 = vld [vmem:[%s24292_s3 + $0x8a0] ss:$16 sps:$4 sm:$0xff]  }
 0x5b3   : > { %12801 = vmatprep.mubr.bf16.mxu1 %v21046_v19  ;;  %v17686_v19 = vld [vmem:[%s24292_s3 + $0x800] ss:$16 sps:$4 sm:$0xff]  }
 0x5b9   : > { %11258 = vmatmul.mubr.bf16.gmra.mrb[48].mxu0 %v21042_v9 }
 0x5ba   : > { %12802 = vmatmul.mubr.bf16.gmra.mrb[48].mxu1 %v21042_v9  ;;  %11267 = vmatprep.mubr.bf16.mxu0 %v21068_v7  ;;  %v24768_v9 = vld [vmem:[#allocation55_spill] sm:$0xff] }
 0x5bb   : > { %12811 = vmatprep.mubr.bf16.mxu1 %v21068_v7  ;;  %v17694_v7 = vld [vmem:[%s24292_s3 + $0x824] ss:$16 sps:$4 sm:$0xff]  }
 0x5c1   : > { %11268 = vmatmul.mubr.bf16.gmra.mrb[52].mxu0 %v21064_v23 }
 0x5c2   : > { %12812 = vmatmul.mubr.bf16.gmra.mrb[52].mxu1 %v21064_v23  ;;  %11277 = vmatprep.mubr.bf16.mxu0 %v21086_v47  ;;  %v17689_v23 = vld [vmem:[%s24292_s3 + $0x808] ss:$16 sps:$4 sm:$0xff]  }
 0x5c3   : > { %12821 = vmatprep.mubr.bf16.mxu1 %v21086_v47  ;;  %v17697_v47 = vld [vmem:[%s24292_s3 + $0x82c] ss:$16 sps:$4 sm:$0xff]  }
 0x5c9   : > { %11278 = vmatmul.mubr.bf16.gmra.mrb[56].mxu0 %v21082_v51 }
 0x5ca   : > { %12822 = vmatmul.mubr.bf16.gmra.mrb[56].mxu1 %v21082_v51  ;;  %11287 = vmatprep.mubr.bf16.mxu0 %v21104_v60  ;;  %v24769_v51 = vld [vmem:[#allocation53_spill] sm:$0xff] }
 0x5cb   : > { %12831 = vmatprep.mubr.bf16.mxu1 %v21104_v60  ;;  %v17692_v60 = vld [vmem:[%s24292_s3 + $0x820] ss:$16 sps:$4 sm:$0xff]  }
 0x5d1   : > { %11288 = vmatmul.mubr.bf16.gmra.mrb[60].mxu0 %v21100_v58 }
 0x5d2   : > { %12832 = vmatmul.mubr.bf16.gmra.mrb[60].mxu1 %v21100_v58  ;;  %11330 = vmatprep.mubr.bf16.mxu0 %v24768_v9  ;;  %v24770_v58 = vld [vmem:[#allocation59_spill] sm:$0xff] }
 0x5d3   : > { %12874 = vmatprep.mubr.bf16.mxu1 %v24768_v9  ;;  %v17719_v9 = vld [vmem:[%s24292_s3 + $0x8a8] ss:$16 sps:$4 sm:$0xff]  }
 0x5d9   : > { %11331 = vmatmul.mubr.bf16.vlgmr.msra.gmra.mrb[0].mxu0 %v24769_v51 }
 0x5da   : > { %12875 = vmatmul.mubr.bf16.vlgmr.msra.gmra.mrb[0].mxu1 %v24769_v51  ;;  %11340 = vmatprep.mubr.bf16.mxu0 %v24770_v58  ;;  %v17725_v51 = vld [vmem:[%s24292_s3 + $0x8c8] ss:$16 sps:$4 sm:$0xff]  }
 0x5db   : > { %11492 = vmatpush1.bf16.msra.mxu0 %v17686_v19  ;;  %12884 = vmatprep.mubr.bf16.mxu1 %v24770_v58  ;;  %v17724_v19 = vld [vmem:[%s24292_s3 + $0x8c4] ss:$16 sps:$4 sm:$0xff]  }
 0x5dc   : > { %13036 = vmatpush1.bf16.msra.mxu1 %v17689_v23  ;;  %11493 = vmatprep.subr.bf16.mxu0 %v17694_v7  ;;  %v17727_v23 = vld [vmem:[%s24292_s3 + $0x8cc] ss:$16 sps:$4 sm:$0xff]   ;;  %v17722_v7 = vld [vmem:[%s24292_s3 + $0x8c0] ss:$16 sps:$4 sm:$0xff]  }
 0x5dd   : > { %13037 = vmatprep.subr.bf16.mxu1 %v17697_v47  ;;  %v17730_v47 = vld [vmem:[%s24292_s3 + $0x8e4] ss:$16 sps:$4 sm:$0xff]  }
 0x5de   : > { %v24775_v58 = vld [vmem:[#allocation65_spill] sm:$0xff] }
 0x5df   : > { %11494 = vmatpush1.bf16.msra.mxu0 %v17692_v60  ;;  %v17733_v60 = vld [vmem:[%s24292_s3 + $0x8ec] ss:$16 sps:$4 sm:$0xff]  }
 0x5e0   : > { %13038 = vmatpush1.bf16.msra.mxu1 %v17695_v39  ;;  %11495 = vmatprep.subr.bf16.mxu0 %v17700_v32  ;;  %v24776_v39 = vld [vmem:[#allocation71_spill] sm:$0xff] }
 0x5e1   : > { %11341 = vmatmul.mubr.bf16.gmra.mrb[4].mxu0 %v24771_v15  ;;  %13039 = vmatprep.subr.bf16.mxu1 %v17703_v42  ;;  %v17728_v32 = vld [vmem:[%s24292_s3 + $0x8e0] ss:$16 sps:$4 sm:$0xff]   ;;  %v17731_v42 = vld [vmem:[%s24292_s3 + $0x8e8] ss:$16 sps:$4 sm:$0xff]  }
 0x5e2   : > { %12885 = vmatmul.mubr.bf16.gmra.mrb[4].mxu1 %v24771_v15  ;;  %11350 = vmatprep.mubr.bf16.mxu0 %v24772_v49  ;;  %v17737_v15 = vld [vmem:[%s24292_s3 + $0x908] ss:$16 sps:$4 sm:$0xff]  }
 0x5e3   : > { %12894 = vmatprep.mubr.bf16.mxu1 %v24772_v49  ;;  %11496 = vmatpush1.bf16.msra.mxu0 %v17698_v5  ;;  %v17736_v5 = vld [vmem:[%s24292_s3 + $0x904] ss:$16 sps:$4 sm:$0xff]  }
 0x5e4   : > { %13040 = vmatpush1.bf16.msra.mxu1 %v17701_v33  ;;  %11497 = vmatprep.subr.bf16.mxu0 %v17706_v43  ;;  %v17739_v33 = vld [vmem:[%s24292_s3 + $0x90c] ss:$16 sps:$4 sm:$0xff]   ;;  %v17734_v43 = vld [vmem:[%s24292_s3 + $0x900] ss:$16 sps:$4 sm:$0xff]  }
 0x5e5   : > { %13041 = vmatprep.subr.bf16.mxu1 %v17709_v4  ;;  %v17742_v4 = vld [vmem:[%s24292_s3 + $0x924] ss:$16 sps:$4 sm:$0xff]  }
 0x5e6   : > { %v24777_v49 = vld [vmem:[#allocation69_spill] sm:$0xff] }
 0x5e7   : > { %11498 = vmatpush1.bf16.msra.mxu0 %v17704_v48  ;;  %v17745_v48 = vld [vmem:[%s24292_s3 + $0x92c] ss:$16 sps:$4 sm:$0xff]  }
 0x5e8   : > { %13042 = vmatpush1.bf16.msra.mxu1 %v17707_v38  ;;  %11499 = vmatprep.subr.bf16.mxu0 %v17712_v36  ;;  %v24778_v38 = vld [vmem:[#allocation75_spill] sm:$0xff] }
 0x5e9   : > { %11351 = vmatmul.mubr.bf16.gmra.mrb[8].mxu0 %v24773_v30  ;;  %13043 = vmatprep.subr.bf16.mxu1 %v17715_v14  ;;  %v17740_v36 = vld [vmem:[%s24292_s3 + $0x920] ss:$16 sps:$4 sm:$0xff]   ;;  %v17743_v14 = vld [vmem:[%s24292_s3 + $0x928] ss:$16 sps:$4 sm:$0xff]  }
 0x5ea   : > { %12895 = vmatmul.mubr.bf16.gmra.mrb[8].mxu1 %v24773_v30  ;;  %11360 = vmatprep.mubr.bf16.mxu0 %v24774_v54  ;;  %v17749_v30 = vld [vmem:[%s24292_s3 + $0x948] ss:$16 sps:$4 sm:$0xff]  }
 0x5eb   : > { %12904 = vmatprep.mubr.bf16.mxu1 %v24774_v54  ;;  %11500 = vmatpush1.bf16.msra.mxu0 %v17710_v61  ;;  %v17748_v61 = vld [vmem:[%s24292_s3 + $0x944] ss:$16 sps:$4 sm:$0xff]  }
 0x5ec   : > { %13044 = vmatpush1.bf16.msra.mxu1 %v17713_v50  ;;  %11501 = vmatprep.subr.bf16.mxu0 %v17718_v12  ;;  %v17751_v50 = vld [vmem:[%s24292_s3 + $0x94c] ss:$16 sps:$4 sm:$0xff]   ;;  %v17746_v12 = vld [vmem:[%s24292_s3 + $0x940] ss:$16 sps:$4 sm:$0xff]  }
 0x5ed   : > { %13045 = vmatprep.subr.bf16.mxu1 %v17721_v55  ;;  %v17754_v55 = vld [vmem:[%s24292_s3 + $0x964] ss:$16 sps:$4 sm:$0xff]  }
 0x5ee   : > { %v24779_v54 = vld [vmem:[#allocation73_spill] sm:$0xff] }
 0x5ef   : > { %11502 = vmatpush1.bf16.msra.mxu0 %v17716_v59  ;;  %v17757_v59 = vld [vmem:[%s24292_s3 + $0x96c] ss:$16 sps:$4 sm:$0xff]  }
 0x5f0   : > { %13046 = vmatpush1.bf16.msra.mxu1 %v17719_v9  ;;  %11503 = vmatprep.subr.bf16.mxu0 %v17724_v19  ;;  %v24780_v9 = vld [vmem:[#allocation79_spill] sm:$0xff] }
 0x5f1   : > { %11361 = vmatmul.mubr.bf16.gmra.mrb[12].mxu0 %v24775_v58  ;;  %13047 = vmatprep.subr.bf16.mxu1 %v17727_v23  ;;  %v17752_v19 = vld [vmem:[%s24292_s3 + $0x960] ss:$16 sps:$4 sm:$0xff]   ;;  %v17755_v23 = vld [vmem:[%s24292_s3 + $0x968] ss:$16 sps:$4 sm:$0xff]  }
 0x5f2   : > { %12905 = vmatmul.mubr.bf16.gmra.mrb[12].mxu1 %v24775_v58  ;;  %11370 = vmatprep.mubr.bf16.mxu0 %v24776_v39  ;;  %v17761_v58 = vld [vmem:[%s24292_s3 + $0x988] ss:$16 sps:$4 sm:$0xff]  }
 0x5f3   : > { %12914 = vmatprep.mubr.bf16.mxu1 %v24776_v39  ;;  %11504 = vmatpush1.bf16.msra.mxu0 %v17722_v7  ;;  %v17760_v7 = vld [vmem:[%s24292_s3 + $0x984] ss:$16 sps:$4 sm:$0xff]  }
 0x5f4   : > { %13048 = vmatpush1.bf16.msra.mxu1 %v17725_v51  ;;  %11505 = vmatprep.subr.bf16.mxu0 %v17730_v47  ;;  %v17763_v51 = vld [vmem:[%s24292_s3 + $0x98c] ss:$16 sps:$4 sm:$0xff]   ;;  %v17758_v47 = vld [vmem:[%s24292_s3 + $0x980] ss:$16 sps:$4 sm:$0xff]  }
 0x5f5   : > { %13049 = vmatprep.subr.bf16.mxu1 %v17733_v60  ;;  %v17766_v60 = vld [vmem:[%s24292_s3 + $0x9a4] ss:$16 sps:$4 sm:$0xff]  }
 0x5f6   : > { %v24781_v39 = vld [vmem:[#allocation77_spill] sm:$0xff] }
 0x5f7   : > { %11506 = vmatpush1.bf16.msra.mxu0 %v17728_v32  ;;  %v17769_v32 = vld [vmem:[%s24292_s3 + $0x9ac] ss:$16 sps:$4 sm:$0xff]  }
 0x5f8   : > { %13050 = vmatpush1.bf16.msra.mxu1 %v17731_v42  ;;  %11507 = vmatprep.subr.bf16.mxu0 %v17736_v5  ;;  %v24782_v42 = vld [vmem:[#allocation83_spill] sm:$0xff] }
 0x5f9   : > { %11371 = vmatmul.mubr.bf16.gmra.mrb[16].mxu0 %v24777_v49  ;;  %13051 = vmatprep.subr.bf16.mxu1 %v17739_v33  ;;  %v17764_v5 = vld [vmem:[%s24292_s3 + $0x9a0] ss:$16 sps:$4 sm:$0xff]   ;;  %v17767_v33 = vld [vmem:[%s24292_s3 + $0x9a8] ss:$16 sps:$4 sm:$0xff]  }
 0x5fa   : > { %12915 = vmatmul.mubr.bf16.gmra.mrb[16].mxu1 %v24777_v49  ;;  %11380 = vmatprep.mubr.bf16.mxu0 %v24778_v38  ;;  %v17773_v49 = vld [vmem:[%s24292_s3 + $0x9c8] ss:$16 sps:$4 sm:$0xff]  }
 0x5fb   : > { %12924 = vmatprep.mubr.bf16.mxu1 %v24778_v38  ;;  %11508 = vmatpush1.bf16.msra.mxu0 %v17734_v43  ;;  %v17772_v43 = vld [vmem:[%s24292_s3 + $0x9c4] ss:$16 sps:$4 sm:$0xff]  }
 0x5fc   : > { %13052 = vmatpush1.bf16.msra.mxu1 %v17737_v15  ;;  %11509 = vmatprep.subr.bf16.mxu0 %v17742_v4  ;;  %v17775_v15 = vld [vmem:[%s24292_s3 + $0x9cc] ss:$16 sps:$4 sm:$0xff]   ;;  %v17770_v4 = vld [vmem:[%s24292_s3 + $0x9c0] ss:$16 sps:$4 sm:$0xff]  }
 0x5fd   : > { %13053 = vmatprep.subr.bf16.mxu1 %v17745_v48  ;;  %v17778_v48 = vld [vmem:[%s24292_s3 + $0x9e4] ss:$16 sps:$4 sm:$0xff]  }
 0x5fe   : > { %v24783_v38 = vld [vmem:[#allocation81_spill] sm:$0xff] }
 0x5ff   : > { %11510 = vmatpush1.bf16.msra.mxu0 %v17740_v36  ;;  %v17781_v36 = vld [vmem:[%s24292_s3 + $0x9ec] ss:$16 sps:$4 sm:$0xff]  }
 0x600   : > { %13054 = vmatpush1.bf16.msra.mxu1 %v17743_v14  ;;  %11511 = vmatprep.subr.bf16.mxu0 %v17748_v61  ;;  %v24784_v14 = vld [vmem:[#allocation87_spill] sm:$0xff] }
 0x601   : > { %11381 = vmatmul.mubr.bf16.gmra.mrb[20].mxu0 %v24779_v54  ;;  %13055 = vmatprep.subr.bf16.mxu1 %v17751_v50  ;;  %v17776_v61 = vld [vmem:[%s24292_s3 + $0x9e0] ss:$16 sps:$4 sm:$0xff]   ;;  %v17779_v50 = vld [vmem:[%s24292_s3 + $0x9e8] ss:$16 sps:$4 sm:$0xff]  }
 0x602   : > { %12925 = vmatmul.mubr.bf16.gmra.mrb[20].mxu1 %v24779_v54  ;;  %11390 = vmatprep.mubr.bf16.mxu0 %v24780_v9  ;;  %v24786_v54 = vld [vmem:[#allocation91_spill] sm:$0xff] }
 0x603   : > { %12934 = vmatprep.mubr.bf16.mxu1 %v24780_v9  ;;  %11512 = vmatpush1.bf16.msra.mxu0 %v17746_v12  ;;  %v17784_v12 = vld [vmem:[%s24292_s3 + $0xa04] ss:$16 sps:$4 sm:$0xff]  }
 0x604   : > { %13056 = vmatpush1.bf16.msra.mxu1 %v17749_v30  ;;  %11513 = vmatprep.subr.bf16.mxu0 %v17754_v55  ;;  %v17787_v30 = vld [vmem:[%s24292_s3 + $0xa0c] ss:$16 sps:$4 sm:$0xff]   ;;  %v24785_v55 = vld [vmem:[#allocation85_spill] sm:$0xff]  ;;  %v24788_v9 = vld [vmem:[#allocation95_spill] sm:$0xff] }
 0x605   : > { %13057 = vmatprep.subr.bf16.mxu1 %v17757_v59  ;;  %v24787_v59 = vld [vmem:[#allocation89_spill] sm:$0xff] }
 0x607   : > { %11514 = vmatpush1.bf16.msra.mxu0 %v17752_v19  ;;  %v24789_v19 = vld [vmem:[#allocation93_spill] sm:$0xff] }
 0x608   : > { %13058 = vmatpush1.bf16.msra.mxu1 %v17755_v23  ;;  %11515 = vmatprep.subr.bf16.mxu0 %v17760_v7  ;;  %v24790_v23 = vld [vmem:[#allocation99_spill] sm:$0xff]  ;;  %v24791_v7 = vld [vmem:[#allocation97_spill] sm:$0xff] }
 0x609   : > { %11391 = vmatmul.mubr.bf16.gmra.mrb[24].mxu0 %v24781_v39  ;;  %13059 = vmatprep.subr.bf16.mxu1 %v17763_v51  ;;  %v24795_v51 = vld [vmem:[#allocation102_spill] sm:$0xff] }
 0x60a   : > { %12935 = vmatmul.mubr.bf16.gmra.mrb[24].mxu1 %v24781_v39  ;;  %11400 = vmatprep.mubr.bf16.mxu0 %v24782_v42  ;;  %v17791_v39 = vld [vmem:[%s24292_s3 + $0xa28] ss:$16 sps:$4 sm:$0xff]  }
 0x60b   : > { %12944 = vmatprep.mubr.bf16.mxu1 %v24782_v42  ;;  %11516 = vmatpush1.bf16.msra.mxu0 %v17758_v47  ;;  %v17793_v47 = vld [vmem:[%s24292_s3 + $0xa2c] ss:$16 sps:$4 sm:$0xff]  }
 0x60c   : > { %13060 = vmatpush1.bf16.msra.mxu1 %v17761_v58  ;;  %11517 = vmatprep.subr.bf16.mxu0 %v17766_v60  ;;  %v24796_v58 = vld [vmem:[#allocation108_spill] sm:$0xff]  ;;  %v17788_v60 = vld [vmem:[%s24292_s3 + $0xa20] ss:$16 sps:$4 sm:$0xff]  }
 0x60d   : > { %13061 = vmatprep.subr.bf16.mxu1 %v17769_v32  ;;  %v17796_v32 = vld [vmem:[%s24292_s3 + $0xa44] ss:$16 sps:$4 sm:$0xff]   ;;  %v17799_v42 = vld [vmem:[%s24292_s3 + $0xa4c] ss:$16 sps:$4 sm:$0xff]  }
 0x60f   : > { %11518 = vmatpush1.bf16.msra.mxu0 %v17764_v5  ;;  %v17794_v5 = vld [vmem:[%s24292_s3 + $0xa40] ss:$16 sps:$4 sm:$0xff]  }
 0x610   : > { %13062 = vmatpush1.bf16.msra.mxu1 %v17767_v33  ;;  %11519 = vmatprep.subr.bf16.mxu0 %v17772_v43  ;;  %v17797_v33 = vld [vmem:[%s24292_s3 + $0xa48] ss:$16 sps:$4 sm:$0xff]   ;;  %v17802_v43 = vld [vmem:[%s24292_s3 + $0xa64] ss:$16 sps:$4 sm:$0xff]  }
 0x611   : > { %11401 = vmatmul.mubr.bf16.gmra.mrb[28].mxu0 %v24783_v38  ;;  %13063 = vmatprep.subr.bf16.mxu1 %v17775_v15  ;;  %v24797_v15 = vld [vmem:[#allocation106_spill] sm:$0xff] }
 0x612   : > { %12945 = vmatmul.mubr.bf16.gmra.mrb[28].mxu1 %v24783_v38  ;;  %11410 = vmatprep.mubr.bf16.mxu0 %v24784_v14  ;;  %v17803_v38 = vld [vmem:[%s24292_s3 + $0xa68] ss:$16 sps:$4 sm:$0xff]  }
 0x613   : > { %12954 = vmatprep.mubr.bf16.mxu1 %v24784_v14  ;;  %11520 = vmatpush1.bf16.msra.mxu0 %v17770_v4  ;;  %v17805_v4 = vld [vmem:[%s24292_s3 + $0xa6c] ss:$16 sps:$4 sm:$0xff]  }
 0x614   : > { %13064 = vmatpush1.bf16.msra.mxu1 %v17773_v49  ;;  %11521 = vmatprep.subr.bf16.mxu0 %v17778_v48  ;;  %v24798_v49 = vld [vmem:[#allocation112_spill] sm:$0xff]  ;;  %v17800_v48 = vld [vmem:[%s24292_s3 + $0xa60] ss:$16 sps:$4 sm:$0xff]  }
 0x615   : > { %13065 = vmatprep.subr.bf16.mxu1 %v17781_v36  ;;  %v17808_v36 = vld [vmem:[%s24292_s3 + $0xa84] ss:$16 sps:$4 sm:$0xff]   ;;  %v17811_v14 = vld [vmem:[%s24292_s3 + $0xa8c] ss:$16 sps:$4 sm:$0xff]  }
 0x617   : > { %11522 = vmatpush1.bf16.msra.mxu0 %v17776_v61  ;;  %v17806_v61 = vld [vmem:[%s24292_s3 + $0xa80] ss:$16 sps:$4 sm:$0xff]  }
 0x618   : > { %13066 = vmatpush1.bf16.msra.mxu1 %v17779_v50  ;;  %11684 = vmatprep.subr.bf16.mxu0 %v17784_v12  ;;  %v17809_v50 = vld [vmem:[%s24292_s3 + $0xa88] ss:$16 sps:$4 sm:$0xff]   ;;  %v17814_v12 = vld [vmem:[%s24292_s3 + $0xaa4] ss:$16 sps:$4 sm:$0xff]  }
 0x619   : > { %11411 = vmatmul.mubr.bf16.gmra.mrb[32].mxu0 %v24785_v55  ;;  %13228 = vmatprep.subr.bf16.mxu1 %v17787_v30  ;;  %v24799_v30 = vld [vmem:[#allocation110_spill] sm:$0xff] }
 0x61a   : > { %12955 = vmatmul.mubr.bf16.gmra.mrb[32].mxu1 %v24785_v55  ;;  %11420 = vmatprep.mubr.bf16.mxu0 %v24786_v54  ;;  %v17817_v55 = vld [vmem:[%s24292_s3 + $0xaac] ss:$16 sps:$4 sm:$0xff]  }
 0x61b   : > { %12964 = vmatprep.mubr.bf16.mxu1 %v24786_v54  ;;  %v24800_v54 = vld [vmem:[#allocation116_spill] sm:$0xff] }
 0x621   : > { %11421 = vmatmul.mubr.bf16.gmra.mrb[36].mxu0 %v24787_v59 }
 0x622   : > { %12965 = vmatmul.mubr.bf16.gmra.mrb[36].mxu1 %v24787_v59  ;;  %11430 = vmatprep.mubr.bf16.mxu0 %v24788_v9  ;;  %v17812_v59 = vld [vmem:[%s24292_s3 + $0xaa0] ss:$16 sps:$4 sm:$0xff]  }
 0x623   : > { %12974 = vmatprep.mubr.bf16.mxu1 %v24788_v9  ;;  %v17815_v9 = vld [vmem:[%s24292_s3 + $0xaa8] ss:$16 sps:$4 sm:$0xff]  }
 0x629   : > { %11431 = vmatmul.mubr.bf16.gmra.mrb[40].mxu0 %v24789_v19 }
 0x62a   : > { %12975 = vmatmul.mubr.bf16.gmra.mrb[40].mxu1 %v24789_v19  ;;  %11440 = vmatprep.mubr.bf16.mxu0 %v24790_v23  ;;  %v17820_v19 = vld [vmem:[%s24292_s3 + $0xac4] ss:$16 sps:$4 sm:$0xff]  }
 0x62b   : > { %12984 = vmatprep.mubr.bf16.mxu1 %v24790_v23  ;;  %v17823_v23 = vld [vmem:[%s24292_s3 + $0xacc] ss:$16 sps:$4 sm:$0xff]  }
 0x631   : > { %11441 = vmatmul.mubr.bf16.gmra.mrb[44].mxu0 %v24791_v7 }
 0x632   : > { %12985 = vmatmul.mubr.bf16.gmra.mrb[44].mxu1 %v24791_v7  ;;  %11450 = vmatprep.mubr.bf16.mxu0 %v21050_v56  ;;  %v17818_v7 = vld [vmem:[%s24292_s3 + $0xac0] ss:$16 sps:$4 sm:$0xff]  }
 0x633   : > { %12994 = vmatprep.mubr.bf16.mxu1 %v21050_v56  ;;  %v24792_v56 = vld [vmem:[#allocation101_spill] sm:$0xff] }
 0x639   : > { %11451 = vmatmul.mubr.bf16.gmra.mrb[48].mxu0 %v21044_v31 }
 0x63a   : > { %12995 = vmatmul.mubr.bf16.gmra.mrb[48].mxu1 %v21044_v31  ;;  %11460 = vmatprep.mubr.bf16.mxu0 %v21070_v24  ;;  %v24793_v31 = vld [vmem:[#allocation100_spill] sm:$0xff] }
 0x63b   : > { %13004 = vmatprep.mubr.bf16.mxu1 %v21070_v24  ;;  %v24794_v24 = vld [vmem:[#allocation104_spill] sm:$0xff] }
 0x641   : > { %11461 = vmatmul.mubr.bf16.gmra.mrb[52].mxu0 %v21066_v8 }
 0x642   : > { %13005 = vmatmul.mubr.bf16.gmra.mrb[52].mxu1 %v21066_v8  ;;  %11470 = vmatprep.mubr.bf16.mxu0 %v21088_v29  ;;  %v17782_v8 = vld [vmem:[%s24292_s3 + $0xa00] ss:$16 sps:$4 sm:$0xff]  }
 0x643   : > { %13014 = vmatprep.mubr.bf16.mxu1 %v21088_v29  ;;  %v17790_v29 = vld [vmem:[%s24292_s3 + $0xa24] ss:$16 sps:$4 sm:$0xff]  }
 0x649   : > { %11471 = vmatmul.mubr.bf16.gmra.mrb[56].mxu0 %v21084_v22 }
 0x64a   : > { %13015 = vmatmul.mubr.bf16.gmra.mrb[56].mxu1 %v21084_v22  ;;  %11480 = vmatprep.mubr.bf16.mxu0 %v24792_v56  ;;  %v17785_v22 = vld [vmem:[%s24292_s3 + $0xa08] ss:$16 sps:$4 sm:$0xff]  }
 0x64b   : > { %13024 = vmatprep.mubr.bf16.mxu1 %v24792_v56  ;;  %v17821_v56 = vld [vmem:[%s24292_s3 + $0xac8] ss:$16 sps:$4 sm:$0xff]  }
 0x651   : > { %11481 = vmatmul.mubr.bf16.gmra.mrb[60].mxu0 %v24793_v31 }
 0x652   : > { %13025 = vmatmul.mubr.bf16.gmra.mrb[60].mxu1 %v24793_v31  ;;  %11523 = vmatprep.mubr.bf16.mxu0 %v24794_v24  ;;  %v17826_v31 = vld [vmem:[%s24292_s3 + $0xae4] ss:$16 sps:$4 sm:$0xff]  }
 0x653   : > { %13067 = vmatprep.mubr.bf16.mxu1 %v24794_v24  ;;  %v24801_v24 = vld [vmem:[#allocation114_spill] sm:$0xff] }
 0x659   : > { %11524 = vmatmul.mubr.bf16.vlgmr.msra.gmra.mrb[0].mxu0 %v24795_v51 }
 0x65a   : > { %13068 = vmatmul.mubr.bf16.vlgmr.msra.gmra.mrb[0].mxu1 %v24795_v51  ;;  %11533 = vmatprep.mubr.bf16.mxu0 %v24796_v58  ;;  %v17827_v51 = vld [vmem:[%s24292_s3 + $0xae8] ss:$16 sps:$4 sm:$0xff]  }
 0x65b   : > { %11685 = vmatpush1.bf16.msra.mxu0 %v17782_v8  ;;  %13077 = vmatprep.mubr.bf16.mxu1 %v24796_v58  ;;  %v17829_v8 = vld [vmem:[%s24292_s3 + $0xaec] ss:$16 sps:$4 sm:$0xff]  }
 0x65c   : > { %13229 = vmatpush1.bf16.msra.mxu1 %v17785_v22  ;;  %11686 = vmatprep.subr.bf16.mxu0 %v17790_v29  ;;  %v24802_v22 = vld [vmem:[#allocation120_spill] sm:$0xff]  ;;  %v17824_v29 = vld [vmem:[%s24292_s3 + $0xae0] ss:$16 sps:$4 sm:$0xff]  }
 0x65d   : > { %13230 = vmatprep.subr.bf16.mxu1 %v17793_v47  ;;  %v17832_v47 = vld [vmem:[%s24292_s3 + $0xb04] ss:$16 sps:$4 sm:$0xff]   ;;  %v17835_v58 = vld [vmem:[%s24292_s3 + $0xb0c] ss:$16 sps:$4 sm:$0xff]  }
 0x65f   : > { %11687 = vmatpush1.bf16.msra.mxu0 %v17788_v60  ;;  %v17830_v60 = vld [vmem:[%s24292_s3 + $0xb00] ss:$16 sps:$4 sm:$0xff]  }
 0x660   : > { %13231 = vmatpush1.bf16.msra.mxu1 %v17791_v39  ;;  %11688 = vmatprep.subr.bf16.mxu0 %v17796_v32  ;;  %v17833_v39 = vld [vmem:[%s24292_s3 + $0xb08] ss:$16 sps:$4 sm:$0xff]   ;;  %v17838_v32 = vld [vmem:[%s24292_s3 + $0xb24] ss:$16 sps:$4 sm:$0xff]  }
 0x661   : > { %11534 = vmatmul.mubr.bf16.gmra.mrb[4].mxu0 %v24797_v15  ;;  %13232 = vmatprep.subr.bf16.mxu1 %v17799_v42  ;;  %v24803_v42 = vld [vmem:[#allocation118_spill] sm:$0xff] }
 0x662   : > { %13078 = vmatmul.mubr.bf16.gmra.mrb[4].mxu1 %v24797_v15  ;;  %11543 = vmatprep.mubr.bf16.mxu0 %v24798_v49  ;;  %v17839_v15 = vld [vmem:[%s24292_s3 + $0xb28] ss:$16 sps:$4 sm:$0xff]  }
 0x663   : > { %13087 = vmatprep.mubr.bf16.mxu1 %v24798_v49  ;;  %11689 = vmatpush1.bf16.msra.mxu0 %v17794_v5  ;;  %v17841_v5 = vld [vmem:[%s24292_s3 + $0xb2c] ss:$16 sps:$4 sm:$0xff]  }
 0x664   : > { %13233 = vmatpush1.bf16.msra.mxu1 %v17797_v33  ;;  %11690 = vmatprep.subr.bf16.mxu0 %v17802_v43  ;;  %v24804_v33 = vld [vmem:[#allocation124_spill] sm:$0xff]  ;;  %v17836_v43 = vld [vmem:[%s24292_s3 + $0xb20] ss:$16 sps:$4 sm:$0xff]  }
 0x665   : > { %13234 = vmatprep.subr.bf16.mxu1 %v17805_v4  ;;  %v17844_v4 = vld [vmem:[%s24292_s3 + $0xb44] ss:$16 sps:$4 sm:$0xff]   ;;  %v17847_v49 = vld [vmem:[%s24292_s3 + $0xb4c] ss:$16 sps:$4 sm:$0xff]  }
 0x667   : > { %11691 = vmatpush1.bf16.msra.mxu0 %v17800_v48  ;;  %v17842_v48 = vld [vmem:[%s24292_s3 + $0xb40] ss:$16 sps:$4 sm:$0xff]  }
 0x668   : > { %13235 = vmatpush1.bf16.msra.mxu1 %v17803_v38  ;;  %11692 = vmatprep.subr.bf16.mxu0 %v17808_v36  ;;  %v17845_v38 = vld [vmem:[%s24292_s3 + $0xb48] ss:$16 sps:$4 sm:$0xff]   ;;  %v17850_v36 = vld [vmem:[%s24292_s3 + $0xb64] ss:$16 sps:$4 sm:$0xff]  }
 0x669   : > { %11544 = vmatmul.mubr.bf16.gmra.mrb[8].mxu0 %v24799_v30  ;;  %13236 = vmatprep.subr.bf16.mxu1 %v17811_v14  ;;  %v24805_v14 = vld [vmem:[#allocation122_spill] sm:$0xff] }
 0x66a   : > { %13088 = vmatmul.mubr.bf16.gmra.mrb[8].mxu1 %v24799_v30  ;;  %11553 = vmatprep.mubr.bf16.mxu0 %v24800_v54  ;;  %v17851_v30 = vld [vmem:[%s24292_s3 + $0xb68] ss:$16 sps:$4 sm:$0xff]  }
 0x66b   : > { %13097 = vmatprep.mubr.bf16.mxu1 %v24800_v54  ;;  %11693 = vmatpush1.bf16.msra.mxu0 %v17806_v61  ;;  %v17853_v61 = vld [vmem:[%s24292_s3 + $0xb6c] ss:$16 sps:$4 sm:$0xff]  }
 0x66c   : > { %13237 = vmatpush1.bf16.msra.mxu1 %v17809_v50  ;;  %11694 = vmatprep.subr.bf16.mxu0 %v17814_v12  ;;  %v24806_v50 = vld [vmem:[#allocation128_spill] sm:$0xff]  ;;  %v17848_v12 = vld [vmem:[%s24292_s3 + $0xb60] ss:$16 sps:$4 sm:$0xff]  }
 0x66d   : > { %13238 = vmatprep.subr.bf16.mxu1 %v17817_v55  ;;  %v17856_v55 = vld [vmem:[%s24292_s3 + $0xb84] ss:$16 sps:$4 sm:$0xff]   ;;  %v17859_v54 = vld [vmem:[%s24292_s3 + $0xb8c] ss:$16 sps:$4 sm:$0xff]  }
 0x66f   : > { %11695 = vmatpush1.bf16.msra.mxu0 %v17812_v59  ;;  %v17854_v59 = vld [vmem:[%s24292_s3 + $0xb80] ss:$16 sps:$4 sm:$0xff]  }
 0x670   : > { %13239 = vmatpush1.bf16.msra.mxu1 %v17815_v9  ;;  %11696 = vmatprep.subr.bf16.mxu0 %v17820_v19  ;;  %v17857_v9 = vld [vmem:[%s24292_s3 + $0xb88] ss:$16 sps:$4 sm:$0xff]   ;;  %v17862_v19 = vld [vmem:[%s24292_s3 + $0xba4] ss:$16 sps:$4 sm:$0xff]  }
 0x671   : > { %11554 = vmatmul.mubr.bf16.gmra.mrb[12].mxu0 %v24801_v24  ;;  %13240 = vmatprep.subr.bf16.mxu1 %v17823_v23  ;;  %v24807_v23 = vld [vmem:[#allocation126_spill] sm:$0xff] }
 0x672   : > { %13098 = vmatmul.mubr.bf16.gmra.mrb[12].mxu1 %v24801_v24  ;;  %11563 = vmatprep.mubr.bf16.mxu0 %v24802_v22  ;;  %v17863_v24 = vld [vmem:[%s24292_s3 + $0xba8] ss:$16 sps:$4 sm:$0xff]  }
 0x673   : > { %13107 = vmatprep.mubr.bf16.mxu1 %v24802_v22  ;;  %11697 = vmatpush1.bf16.msra.mxu0 %v17818_v7  ;;  %v17865_v7 = vld [vmem:[%s24292_s3 + $0xbac] ss:$16 sps:$4 sm:$0xff]  }
 0x674   : > { %13241 = vmatpush1.bf16.msra.mxu1 %v17821_v56  ;;  %11698 = vmatprep.subr.bf16.mxu0 %v17826_v31  ;;  %v24808_v56 = vld [vmem:[#allocation132_spill] sm:$0xff]  ;;  %v17860_v31 = vld [vmem:[%s24292_s3 + $0xba0] ss:$16 sps:$4 sm:$0xff]  }
 0x675   : > { %13242 = vmatprep.subr.bf16.mxu1 %v17829_v8  ;;  %v17868_v8 = vld [vmem:[%s24292_s3 + $0xbc4] ss:$16 sps:$4 sm:$0xff]   ;;  %v17871_v22 = vld [vmem:[%s24292_s3 + $0xbcc] ss:$16 sps:$4 sm:$0xff]  }
 0x677   : > { %11699 = vmatpush1.bf16.msra.mxu0 %v17824_v29  ;;  %v17866_v29 = vld [vmem:[%s24292_s3 + $0xbc0] ss:$16 sps:$4 sm:$0xff]  }
 0x678   : > { %13243 = vmatpush1.bf16.msra.mxu1 %v17827_v51  ;;  %11700 = vmatprep.subr.bf16.mxu0 %v17832_v47  ;;  %v17869_v51 = vld [vmem:[%s24292_s3 + $0xbc8] ss:$16 sps:$4 sm:$0xff]   ;;  %v17874_v47 = vld [vmem:[%s24292_s3 + $0xbe4] ss:$16 sps:$4 sm:$0xff]  }
 0x679   : > { %11564 = vmatmul.mubr.bf16.gmra.mrb[16].mxu0 %v24803_v42  ;;  %13244 = vmatprep.subr.bf16.mxu1 %v17835_v58  ;;  %v24809_v58 = vld [vmem:[#allocation130_spill] sm:$0xff] }
 0x67a   : > { %13108 = vmatmul.mubr.bf16.gmra.mrb[16].mxu1 %v24803_v42  ;;  %11573 = vmatprep.mubr.bf16.mxu0 %v24804_v33  ;;  %v17875_v42 = vld [vmem:[%s24292_s3 + $0xbe8] ss:$16 sps:$4 sm:$0xff]  }
 0x67b   : > { %13117 = vmatprep.mubr.bf16.mxu1 %v24804_v33  ;;  %11701 = vmatpush1.bf16.msra.mxu0 %v17830_v60  ;;  %v17877_v60 = vld [vmem:[%s24292_s3 + $0xbec] ss:$16 sps:$4 sm:$0xff]  }
 0x67c   : > { %13245 = vmatpush1.bf16.msra.mxu1 %v17833_v39  ;;  %11702 = vmatprep.subr.bf16.mxu0 %v17838_v32  ;;  %v24810_v39 = vld [vmem:[#allocation136_spill] sm:$0xff]  ;;  %v17872_v32 = vld [vmem:[%s24292_s3 + $0xbe0] ss:$16 sps:$4 sm:$0xff]  }
 0x67d   : > { %13246 = vmatprep.subr.bf16.mxu1 %v17841_v5  ;;  %v17880_v5 = vld [vmem:[%s24292_s3 + $0xc04] ss:$16 sps:$4 sm:$0xff]   ;;  %v17883_v33 = vld [vmem:[%s24292_s3 + $0xc0c] ss:$16 sps:$4 sm:$0xff]  }
 0x67f   : > { %11703 = vmatpush1.bf16.msra.mxu0 %v17836_v43  ;;  %v24811_v43 = vld [vmem:[#allocation134_spill] sm:$0xff] }
 0x680   : > { %13247 = vmatpush1.bf16.msra.mxu1 %v17839_v15  ;;  %11704 = vmatprep.subr.bf16.mxu0 %v17844_v4  ;;  %v24812_v15 = vld [vmem:[#allocation140_spill] sm:$0xff]  ;;  %v24813_v4 = vld [vmem:[#allocation138_spill] sm:$0xff] }
 0x681   : > { %11574 = vmatmul.mubr.bf16.gmra.mrb[20].mxu0 %v24805_v14  ;;  %13248 = vmatprep.subr.bf16.mxu1 %v17847_v49  ;;  %v24814_v49 = vld [vmem:[#allocation144_spill] sm:$0xff] }
 0x682   : > { %13118 = vmatmul.mubr.bf16.gmra.mrb[20].mxu1 %v24805_v14  ;;  %11583 = vmatprep.mubr.bf16.mxu0 %v24806_v50  ;;  %v24818_v14 = vld [vmem:[#allocation150_spill] sm:$0xff] }
 0x683   : > { %13127 = vmatprep.mubr.bf16.mxu1 %v24806_v50  ;;  %11705 = vmatpush1.bf16.msra.mxu0 %v17842_v48  ;;  %v24815_v48 = vld [vmem:[#allocation142_spill] sm:$0xff] }
 0x684   : > { %13249 = vmatpush1.bf16.msra.mxu1 %v17845_v38  ;;  %11706 = vmatprep.subr.bf16.mxu0 %v17850_v36  ;;  %v24816_v38 = vld [vmem:[#allocation148_spill] sm:$0xff]  ;;  %v24817_v36 = vld [vmem:[#allocation146_spill] sm:$0xff] }
 0x685   : > { %13250 = vmatprep.subr.bf16.mxu1 %v17853_v61  ;;  %v17884_v61 = vld [vmem:[%s24292_s3 + $0xc20] ss:$16 sps:$4 sm:$0xff]   ;;  %v17887_v50 = vld [vmem:[%s24292_s3 + $0xc28] ss:$16 sps:$4 sm:$0xff]  }
 0x687   : > { %11707 = vmatpush1.bf16.msra.mxu0 %v17848_v12  ;;  %v17892_v12 = vld [vmem:[%s24292_s3 + $0xc44] ss:$16 sps:$4 sm:$0xff]  }
 0x688   : > { %13251 = vmatpush1.bf16.msra.mxu1 %v17851_v30  ;;  %11708 = vmatprep.subr.bf16.mxu0 %v17856_v55  ;;  %v17895_v30 = vld [vmem:[%s24292_s3 + $0xc4c] ss:$16 sps:$4 sm:$0xff]   ;;  %v17890_v55 = vld [vmem:[%s24292_s3 + $0xc40] ss:$16 sps:$4 sm:$0xff]  }
 0x689   : > { %11584 = vmatmul.mubr.bf16.gmra.mrb[24].mxu0 %v24807_v23  ;;  %13252 = vmatprep.subr.bf16.mxu1 %v17859_v54  ;;  %v17893_v54 = vld [vmem:[%s24292_s3 + $0xc48] ss:$16 sps:$4 sm:$0xff]  }
 0x68a   : > { %13128 = vmatmul.mubr.bf16.gmra.mrb[24].mxu1 %v24807_v23  ;;  %11593 = vmatprep.mubr.bf16.mxu0 %v24808_v56  ;;  %v24823_v23 = vld [vmem:[#allocation113_spill] sm:$0xff] }
 0x68b   : > { %13137 = vmatprep.mubr.bf16.mxu1 %v24808_v56  ;;  %11709 = vmatpush1.bf16.msra.mxu0 %v17854_v59  ;;  %v17898_v59 = vld [vmem:[%s24292_s3 + $0xc64] ss:$16 sps:$4 sm:$0xff]   ;;  %v17899_v56 = vld [vmem:[%s24292_s3 + $0xc68] ss:$16 sps:$4 sm:$0xff]  }
 0x68c   : > { %13253 = vmatpush1.bf16.msra.mxu1 %v17857_v9  ;;  %11710 = vmatprep.subr.bf16.mxu0 %v17862_v19  ;;  %v24822_v9 = vld [vmem:[#allocation107_spill] sm:$0xff]  ;;  %v17901_v19 = vld [vmem:[%s24292_s3 + $0xc6c] ss:$16 sps:$4 sm:$0xff]  }
 0x68d   : > { %13254 = vmatprep.subr.bf16.mxu1 %v17865_v7  ;;  %v17896_v7 = vld [vmem:[%s24292_s3 + $0xc60] ss:$16 sps:$4 sm:$0xff]  }
 0x68f   : > { %11711 = vmatpush1.bf16.msra.mxu0 %v17860_v31  ;;  %v17904_v31 = vld [vmem:[%s24292_s3 + $0xc84] ss:$16 sps:$4 sm:$0xff]  }
 0x690   : > { %13255 = vmatpush1.bf16.msra.mxu1 %v17863_v24  ;;  %11712 = vmatprep.subr.bf16.mxu0 %v17868_v8  ;;  %v17907_v24 = vld [vmem:[%s24292_s3 + $0xc8c] ss:$16 sps:$4 sm:$0xff]   ;;  %v17902_v8 = vld [vmem:[%s24292_s3 + $0xc80] ss:$16 sps:$4 sm:$0xff]  }
 0x691   : > { %11594 = vmatmul.mubr.bf16.gmra.mrb[28].mxu0 %v24809_v58  ;;  %13256 = vmatprep.subr.bf16.mxu1 %v17871_v22  ;;  %v17905_v22 = vld [vmem:[%s24292_s3 + $0xc88] ss:$16 sps:$4 sm:$0xff]  }
 0x692   : > { %13138 = vmatmul.mubr.bf16.gmra.mrb[28].mxu1 %v24809_v58  ;;  %11603 = vmatprep.mubr.bf16.mxu0 %v24810_v39  ;;  %v24825_v58 = vld [vmem:[#allocation117_spill] sm:$0xff] }
 0x693   : > { %13147 = vmatprep.mubr.bf16.mxu1 %v24810_v39  ;;  %11713 = vmatpush1.bf16.msra.mxu0 %v17866_v29  ;;  %v17910_v29 = vld [vmem:[%s24292_s3 + $0xca4] ss:$16 sps:$4 sm:$0xff]   ;;  %v17911_v39 = vld [vmem:[%s24292_s3 + $0xca8] ss:$16 sps:$4 sm:$0xff]  }
 0x694   : > { %13257 = vmatpush1.bf16.msra.mxu1 %v17869_v51  ;;  %11714 = vmatprep.subr.bf16.mxu0 %v17874_v47  ;;  %v24824_v51 = vld [vmem:[#allocation111_spill] sm:$0xff]  ;;  %v17913_v47 = vld [vmem:[%s24292_s3 + $0xcac] ss:$16 sps:$4 sm:$0xff]  }
 0x695   : > { %13258 = vmatprep.subr.bf16.mxu1 %v17877_v60  ;;  %v17908_v60 = vld [vmem:[%s24292_s3 + $0xca0] ss:$16 sps:$4 sm:$0xff]  }
 0x697   : > { %11715 = vmatpush1.bf16.msra.mxu0 %v17872_v32  ;;  %v17916_v32 = vld [vmem:[%s24292_s3 + $0xcc4] ss:$16 sps:$4 sm:$0xff]  }
 0x698   : > { %13259 = vmatpush1.bf16.msra.mxu1 %v17875_v42  ;;  %11877 = vmatprep.subr.bf16.mxu0 %v17880_v5  ;;  %v17919_v42 = vld [vmem:[%s24292_s3 + $0xccc] ss:$16 sps:$4 sm:$0xff]   ;;  %v17914_v5 = vld [vmem:[%s24292_s3 + $0xcc0] ss:$16 sps:$4 sm:$0xff]  }
 0x699   : > { %11604 = vmatmul.mubr.bf16.gmra.mrb[32].mxu0 %v24811_v43  ;;  %13421 = vmatprep.subr.bf16.mxu1 %v17883_v33  ;;  %v17917_v33 = vld [vmem:[%s24292_s3 + $0xcc8] ss:$16 sps:$4 sm:$0xff]  }
 0x69a   : > { %13148 = vmatmul.mubr.bf16.gmra.mrb[32].mxu1 %v24811_v43  ;;  %11613 = vmatprep.mubr.bf16.mxu0 %v24812_v15  ;;  %v17922_v43 = vld [vmem:[%s24292_s3 + $0xce4] ss:$16 sps:$4 sm:$0xff]  }
 0x69b   : > { %13157 = vmatprep.mubr.bf16.mxu1 %v24812_v15  ;;  %v24826_v15 = vld [vmem:[#allocation115_spill] sm:$0xff] }
 0x6a1   : > { %11614 = vmatmul.mubr.bf16.gmra.mrb[36].mxu0 %v24813_v4 }
 0x6a2   : > { %13158 = vmatmul.mubr.bf16.gmra.mrb[36].mxu1 %v24813_v4  ;;  %11623 = vmatprep.mubr.bf16.mxu0 %v24814_v49  ;;  %v17925_v4 = vld [vmem:[%s24292_s3 + $0xcec] ss:$16 sps:$4 sm:$0xff]  }
 0x6a3   : > { %13167 = vmatprep.mubr.bf16.mxu1 %v24814_v49  ;;  %v24827_v49 = vld [vmem:[#allocation121_spill] sm:$0xff] }
 0x6a9   : > { %11624 = vmatmul.mubr.bf16.gmra.mrb[40].mxu0 %v24815_v48 }
 0x6aa   : > { %13168 = vmatmul.mubr.bf16.gmra.mrb[40].mxu1 %v24815_v48  ;;  %11633 = vmatprep.mubr.bf16.mxu0 %v24816_v38  ;;  %v17920_v48 = vld [vmem:[%s24292_s3 + $0xce0] ss:$16 sps:$4 sm:$0xff]  }
 0x6ab   : > { %13177 = vmatprep.mubr.bf16.mxu1 %v24816_v38  ;;  %v17923_v38 = vld [vmem:[%s24292_s3 + $0xce8] ss:$16 sps:$4 sm:$0xff]  }
 0x6b1   : > { %11634 = vmatmul.mubr.bf16.gmra.mrb[44].mxu0 %v24817_v36 }
 0x6b2   : > { %13178 = vmatmul.mubr.bf16.gmra.mrb[44].mxu1 %v24817_v36  ;;  %11643 = vmatprep.mubr.bf16.mxu0 %v21760_v10  ;;  %v17928_v36 = vld [vmem:[%s24292_s3 + $0xd04] ss:$16 sps:$4 sm:$0xff]  }
 0x6b3   : > { %13187 = vmatprep.mubr.bf16.mxu1 %v21760_v10  ;;  %v24819_v10 = vld [vmem:[#allocation105_spill] sm:$0xff] }
 0x6b9   : > { %11644 = vmatmul.mubr.bf16.gmra.mrb[48].mxu0 %v24818_v14 }
 0x6ba   : > { %13188 = vmatmul.mubr.bf16.gmra.mrb[48].mxu1 %v24818_v14  ;;  %11653 = vmatprep.mubr.bf16.mxu0 %v21787_v28  ;;  %v17931_v14 = vld [vmem:[%s24292_s3 + $0xd0c] ss:$16 sps:$4 sm:$0xff]  }
 0x6bb   : > { %13197 = vmatprep.mubr.bf16.mxu1 %v21787_v28  ;;  %v17881_v28 = vld [vmem:[%s24292_s3 + $0xc08] ss:$16 sps:$4 sm:$0xff]  }
 0x6c1   : > { %11654 = vmatmul.mubr.bf16.gmra.mrb[52].mxu0 %v21783_v0 }
 0x6c2   : > { %13198 = vmatmul.mubr.bf16.gmra.mrb[52].mxu1 %v21783_v0  ;;  %11663 = vmatprep.mubr.bf16.mxu0 %v21805_v52  ;;  %v17878_v0 = vld [vmem:[%s24292_s3 + $0xc00] ss:$16 sps:$4 sm:$0xff]  }
 0x6c3   : > { %13207 = vmatprep.mubr.bf16.mxu1 %v21805_v52  ;;  %v24820_v52 = vld [vmem:[#allocation103_spill] sm:$0xff] }
 0x6c9   : > { %11664 = vmatmul.mubr.bf16.gmra.mrb[56].mxu0 %v21801_v2 }
 0x6ca   : > { %13208 = vmatmul.mubr.bf16.gmra.mrb[56].mxu1 %v21801_v2  ;;  %11673 = vmatprep.mubr.bf16.mxu0 %v21823_v21  ;;  %v17886_v2 = vld [vmem:[%s24292_s3 + $0xc24] ss:$16 sps:$4 sm:$0xff]  }
 0x6cb   : > { %13217 = vmatprep.mubr.bf16.mxu1 %v21823_v21  ;;  %v24821_v21 = vld [vmem:[#allocation109_spill] sm:$0xff] }
 0x6d1   : > { %11674 = vmatmul.mubr.bf16.gmra.mrb[60].mxu0 %v21819_v41 }
 0x6d2   : > { %13218 = vmatmul.mubr.bf16.gmra.mrb[60].mxu1 %v21819_v41  ;;  %11716 = vmatprep.mubr.bf16.mxu0 %v24819_v10  ;;  %v17889_v41 = vld [vmem:[%s24292_s3 + $0xc2c] ss:$16 sps:$4 sm:$0xff]  }
 0x6d3   : > { %13260 = vmatprep.mubr.bf16.mxu1 %v24819_v10  ;;  %v17926_v10 = vld [vmem:[%s24292_s3 + $0xd00] ss:$16 sps:$4 sm:$0xff]  }
 0x6d9   : > { %11717 = vmatmul.mubr.bf16.vlgmr.msra.gmra.mrb[0].mxu0 %v24820_v52 }
 0x6da   : > { %13261 = vmatmul.mubr.bf16.vlgmr.msra.gmra.mrb[0].mxu1 %v24820_v52  ;;  %11726 = vmatprep.mubr.bf16.mxu0 %v24821_v21  ;;  %v17937_v52 = vld [vmem:[%s24292_s3 + $0xd2c] ss:$16 sps:$4 sm:$0xff]  }
 0x6db   : > { %11878 = vmatpush1.bf16.msra.mxu0 %v17878_v0  ;;  %13270 = vmatprep.mubr.bf16.mxu1 %v24821_v21  ;;  %v17929_v0 = vld [vmem:[%s24292_s3 + $0xd08] ss:$16 sps:$4 sm:$0xff]   ;;  %v17932_v21 = vld [vmem:[%s24292_s3 + $0xd20] ss:$16 sps:$4 sm:$0xff]  }
 0x6dc   : > { %13422 = vmatpush1.bf16.msra.mxu1 %v17881_v28  ;;  %11879 = vmatprep.subr.bf16.mxu0 %v17886_v2  ;;  %v17934_v28 = vld [vmem:[%s24292_s3 + $0xd24] ss:$16 sps:$4 sm:$0xff]  }
 0x6dd   : > { %13423 = vmatprep.subr.bf16.mxu1 %v17889_v41  ;;  %v24828_v2 = vld [vmem:[#allocation119_spill] sm:$0xff]  ;;  %v24829_v41 = vld [vmem:[#allocation125_spill] sm:$0xff] }
 0x6df   : > { %11880 = vmatpush1.bf16.msra.mxu0 %v17884_v61  ;;  %v17935_v61 = vld [vmem:[%s24292_s3 + $0xd28] ss:$16 sps:$4 sm:$0xff]  }
 0x6e0   : > { %13424 = vmatpush1.bf16.msra.mxu1 %v17887_v50  ;;  %11881 = vmatprep.subr.bf16.mxu0 %v17892_v12  ;;  %v17940_v50 = vld [vmem:[%s24292_s3 + $0xd44] ss:$16 sps:$4 sm:$0xff]   ;;  %v17943_v12 = vld [vmem:[%s24292_s3 + $0xd4c] ss:$16 sps:$4 sm:$0xff]  }
 0x6e1   : > { %11727 = vmatmul.mubr.bf16.gmra.mrb[4].mxu0 %v24822_v9  ;;  %13425 = vmatprep.subr.bf16.mxu1 %v17895_v30  ;;  %v17938_v30 = vld [vmem:[%s24292_s3 + $0xd40] ss:$16 sps:$4 sm:$0xff]  }
 0x6e2   : > { %13271 = vmatmul.mubr.bf16.gmra.mrb[4].mxu1 %v24822_v9  ;;  %11736 = vmatprep.mubr.bf16.mxu0 %v24823_v23  ;;  %v17949_v9 = vld [vmem:[%s24292_s3 + $0xd6c] ss:$16 sps:$4 sm:$0xff]  }
 0x6e3   : > { %13280 = vmatprep.mubr.bf16.mxu1 %v24823_v23  ;;  %11882 = vmatpush1.bf16.msra.mxu0 %v17890_v55  ;;  %v17941_v55 = vld [vmem:[%s24292_s3 + $0xd48] ss:$16 sps:$4 sm:$0xff]   ;;  %v17944_v23 = vld [vmem:[%s24292_s3 + $0xd60] ss:$16 sps:$4 sm:$0xff]  }
 0x6e4   : > { %13426 = vmatpush1.bf16.msra.mxu1 %v17893_v54  ;;  %11883 = vmatprep.subr.bf16.mxu0 %v17898_v59  ;;  %v17946_v54 = vld [vmem:[%s24292_s3 + $0xd64] ss:$16 sps:$4 sm:$0xff]  }
 0x6e5   : > { %13427 = vmatprep.subr.bf16.mxu1 %v17901_v19  ;;  %v24830_v59 = vld [vmem:[#allocation123_spill] sm:$0xff]  ;;  %v24831_v19 = vld [vmem:[#allocation129_spill] sm:$0xff] }
 0x6e7   : > { %11884 = vmatpush1.bf16.msra.mxu0 %v17896_v7  ;;  %v17947_v7 = vld [vmem:[%s24292_s3 + $0xd68] ss:$16 sps:$4 sm:$0xff]  }
 0x6e8   : > { %13428 = vmatpush1.bf16.msra.mxu1 %v17899_v56  ;;  %11885 = vmatprep.subr.bf16.mxu0 %v17904_v31  ;;  %v17952_v56 = vld [vmem:[%s24292_s3 + $0xd84] ss:$16 sps:$4 sm:$0xff]   ;;  %v17955_v31 = vld [vmem:[%s24292_s3 + $0xd8c] ss:$16 sps:$4 sm:$0xff]  }
 0x6e9   : > { %11737 = vmatmul.mubr.bf16.gmra.mrb[8].mxu0 %v24824_v51  ;;  %13429 = vmatprep.subr.bf16.mxu1 %v17907_v24  ;;  %v17950_v24 = vld [vmem:[%s24292_s3 + $0xd80] ss:$16 sps:$4 sm:$0xff]  }
 0x6ea   : > { %13281 = vmatmul.mubr.bf16.gmra.mrb[8].mxu1 %v24824_v51  ;;  %11746 = vmatprep.mubr.bf16.mxu0 %v24825_v58  ;;  %v17961_v51 = vld [vmem:[%s24292_s3 + $0xdac] ss:$16 sps:$4 sm:$0xff]  }
 0x6eb   : > { %13290 = vmatprep.mubr.bf16.mxu1 %v24825_v58  ;;  %11886 = vmatpush1.bf16.msra.mxu0 %v17902_v8  ;;  %v17953_v8 = vld [vmem:[%s24292_s3 + $0xd88] ss:$16 sps:$4 sm:$0xff]   ;;  %v17956_v58 = vld [vmem:[%s24292_s3 + $0xda0] ss:$16 sps:$4 sm:$0xff]  }
 0x6ec   : > { %13430 = vmatpush1.bf16.msra.mxu1 %v17905_v22  ;;  %11887 = vmatprep.subr.bf16.mxu0 %v17910_v29  ;;  %v17958_v22 = vld [vmem:[%s24292_s3 + $0xda4] ss:$16 sps:$4 sm:$0xff]  }
 0x6ed   : > { %13431 = vmatprep.subr.bf16.mxu1 %v17913_v47  ;;  %v24832_v29 = vld [vmem:[#allocation127_spill] sm:$0xff]  ;;  %v24833_v47 = vld [vmem:[#allocation133_spill] sm:$0xff] }
 0x6ef   : > { %11888 = vmatpush1.bf16.msra.mxu0 %v17908_v60  ;;  %v17959_v60 = vld [vmem:[%s24292_s3 + $0xda8] ss:$16 sps:$4 sm:$0xff]  }
 0x6f0   : > { %13432 = vmatpush1.bf16.msra.mxu1 %v17911_v39  ;;  %11889 = vmatprep.subr.bf16.mxu0 %v17916_v32  ;;  %v17964_v39 = vld [vmem:[%s24292_s3 + $0xdc4] ss:$16 sps:$4 sm:$0xff]   ;;  %v17967_v32 = vld [vmem:[%s24292_s3 + $0xdcc] ss:$16 sps:$4 sm:$0xff]  }
 0x6f1   : > { %11747 = vmatmul.mubr.bf16.gmra.mrb[12].mxu0 %v24826_v15  ;;  %13433 = vmatprep.subr.bf16.mxu1 %v17919_v42  ;;  %v17962_v42 = vld [vmem:[%s24292_s3 + $0xdc0] ss:$16 sps:$4 sm:$0xff]  }
 0x6f2   : > { %13291 = vmatmul.mubr.bf16.gmra.mrb[12].mxu1 %v24826_v15  ;;  %11756 = vmatprep.mubr.bf16.mxu0 %v24827_v49  ;;  %v17973_v15 = vld [vmem:[%s24292_s3 + $0xdec] ss:$16 sps:$4 sm:$0xff]  }
 0x6f3   : > { %13300 = vmatprep.mubr.bf16.mxu1 %v24827_v49  ;;  %11890 = vmatpush1.bf16.msra.mxu0 %v17914_v5  ;;  %v17965_v5 = vld [vmem:[%s24292_s3 + $0xdc8] ss:$16 sps:$4 sm:$0xff]   ;;  %v17968_v49 = vld [vmem:[%s24292_s3 + $0xde0] ss:$16 sps:$4 sm:$0xff]  }
 0x6f4   : > { %13434 = vmatpush1.bf16.msra.mxu1 %v17917_v33  ;;  %11891 = vmatprep.subr.bf16.mxu0 %v17922_v43  ;;  %v17970_v33 = vld [vmem:[%s24292_s3 + $0xde4] ss:$16 sps:$4 sm:$0xff]  }
 0x6f5   : > { %13435 = vmatprep.subr.bf16.mxu1 %v17925_v4  ;;  %v24834_v43 = vld [vmem:[#allocation131_spill] sm:$0xff]  ;;  %v24835_v4 = vld [vmem:[#allocation137_spill] sm:$0xff] }
 0x6f7   : > { %11892 = vmatpush1.bf16.msra.mxu0 %v17920_v48  ;;  %v17971_v48 = vld [vmem:[%s24292_s3 + $0xde8] ss:$16 sps:$4 sm:$0xff]  }
 0x6f8   : > { %13436 = vmatpush1.bf16.msra.mxu1 %v17923_v38  ;;  %11893 = vmatprep.subr.bf16.mxu0 %v17928_v36  ;;  %v17976_v38 = vld [vmem:[%s24292_s3 + $0xe04] ss:$16 sps:$4 sm:$0xff]   ;;  %v17979_v36 = vld [vmem:[%s24292_s3 + $0xe0c] ss:$16 sps:$4 sm:$0xff]  }
 0x6f9   : > { %11757 = vmatmul.mubr.bf16.gmra.mrb[16].mxu0 %v24828_v2  ;;  %13437 = vmatprep.subr.bf16.mxu1 %v17931_v14  ;;  %v24836_v14 = vld [vmem:[#allocation135_spill] sm:$0xff] }
 0x6fa   : > { %13301 = vmatmul.mubr.bf16.gmra.mrb[16].mxu1 %v24828_v2  ;;  %11766 = vmatprep.mubr.bf16.mxu0 %v24829_v41  ;;  %v24840_v2 = vld [vmem:[#allocation143_spill] sm:$0xff] }
 0x6fb   : > { %13310 = vmatprep.mubr.bf16.mxu1 %v24829_v41  ;;  %11894 = vmatpush1.bf16.msra.mxu0 %v17926_v10  ;;  %v24837_v10 = vld [vmem:[#allocation141_spill] sm:$0xff]  ;;  %v24842_v41 = vld [vmem:[#allocation147_spill] sm:$0xff] }
 0x6fc   : > { %13438 = vmatpush1.bf16.msra.mxu1 %v17929_v0  ;;  %11895 = vmatprep.subr.bf16.mxu0 %v17934_v28  ;;  %v24838_v0 = vld [vmem:[#allocation139_spill] sm:$0xff]  ;;  %v24839_v28 = vld [vmem:[#allocation145_spill] sm:$0xff] }
 0x6fd   : > { %13439 = vmatprep.subr.bf16.mxu1 %v17937_v52  ;;  %v24841_v52 = vld [vmem:[#allocation149_spill] sm:$0xff] }
 0x6ff   : > { %11896 = vmatpush1.bf16.msra.mxu0 %v17932_v21  ;;  %v24843_v21 = vld [vmem:[#allocation152_spill] sm:$0xff] }
 0x700   : > { %13440 = vmatpush1.bf16.msra.mxu1 %v17935_v61  ;;  %11897 = vmatprep.subr.bf16.mxu0 %v17940_v50  ;;  %v24844_v61 = vld [vmem:[#allocation151_spill] sm:$0xff]  ;;  %v24845_v50 = vld [vmem:[#allocation154_spill] sm:$0xff] }
 0x701   : > { %11767 = vmatmul.mubr.bf16.gmra.mrb[20].mxu0 %v24830_v59  ;;  %13441 = vmatprep.subr.bf16.mxu1 %v17943_v12  ;;  %v24846_v12 = vld [vmem:[#allocation153_spill] sm:$0xff] }
 0x702   : > { %13311 = vmatmul.mubr.bf16.gmra.mrb[20].mxu1 %v24830_v59  ;;  %11776 = vmatprep.mubr.bf16.mxu0 %v24831_v19  ;;  %v17988_v59 = vld [vmem:[%s24292_s3 + $0xe44] ss:$16 sps:$4 sm:$0xff]  }
 0x703   : > { %13320 = vmatprep.mubr.bf16.mxu1 %v24831_v19  ;;  %11898 = vmatpush1.bf16.msra.mxu0 %v17938_v30  ;;  %v24847_v30 = vld [vmem:[#allocation155_spill] sm:$0xff] }
 0x704   : > { %13442 = vmatpush1.bf16.msra.mxu1 %v17941_v55  ;;  %11899 = vmatprep.subr.bf16.mxu0 %v17946_v54  ;;  %v17977_v55 = vld [vmem:[%s24292_s3 + $0xe08] ss:$16 sps:$4 sm:$0xff]   ;;  %v17994_v19 = vld [vmem:[%s24292_s3 + $0xe64] ss:$16 sps:$4 sm:$0xff]  }
 0x705   : > { %13443 = vmatprep.subr.bf16.mxu1 %v17949_v9  ;;  %v17983_v54 = vld [vmem:[%s24292_s3 + $0xe28] ss:$16 sps:$4 sm:$0xff]  }
 0x706   : > { %v17989_v9 = vld [vmem:[%s24292_s3 + $0xe48] ss:$16 sps:$4 sm:$0xff]  }
 0x707   : > { %11900 = vmatpush1.bf16.msra.mxu0 %v17944_v23  ;;  %v17997_v23 = vld [vmem:[%s24292_s3 + $0xe6c] ss:$16 sps:$4 sm:$0xff]  }
 0x708   : > { %13444 = vmatpush1.bf16.msra.mxu1 %v17947_v7  ;;  %11901 = vmatprep.subr.bf16.mxu0 %v17952_v56  ;;  %v17992_v7 = vld [vmem:[%s24292_s3 + $0xe60] ss:$16 sps:$4 sm:$0xff]   ;;  %v17995_v56 = vld [vmem:[%s24292_s3 + $0xe68] ss:$16 sps:$4 sm:$0xff]  }
 0x709   : > { %11777 = vmatmul.mubr.bf16.gmra.mrb[24].mxu0 %v24832_v29  ;;  %13445 = vmatprep.subr.bf16.mxu1 %v17955_v31  ;;  %v18000_v31 = vld [vmem:[%s24292_s3 + $0xe84] ss:$16 sps:$4 sm:$0xff]  }
 0x70a   : > { %13321 = vmatmul.mubr.bf16.gmra.mrb[24].mxu1 %v24832_v29  ;;  %11786 = vmatprep.mubr.bf16.mxu0 %v24833_v47  ;;  %v18004_v29 = vld [vmem:[%s24292_s3 + $0xea0] ss:$16 sps:$4 sm:$0xff]  }
 0x70b   : > { %13330 = vmatprep.mubr.bf16.mxu1 %v24833_v47  ;;  %11902 = vmatpush1.bf16.msra.mxu0 %v17950_v24  ;;  %v18001_v24 = vld [vmem:[%s24292_s3 + $0xe88] ss:$16 sps:$4 sm:$0xff]   ;;  %v18012_v47 = vld [vmem:[%s24292_s3 + $0xec4] ss:$16 sps:$4 sm:$0xff]  }
 0x70c   : > { %13446 = vmatpush1.bf16.msra.mxu1 %v17953_v8  ;;  %11903 = vmatprep.subr.bf16.mxu0 %v17958_v22  ;;  %v18006_v8 = vld [vmem:[%s24292_s3 + $0xea4] ss:$16 sps:$4 sm:$0xff]   ;;  %v18009_v22 = vld [vmem:[%s24292_s3 + $0xeac] ss:$16 sps:$4 sm:$0xff]  }
 0x70d   : > { %13447 = vmatprep.subr.bf16.mxu1 %v17961_v51  ;;  %v18007_v51 = vld [vmem:[%s24292_s3 + $0xea8] ss:$16 sps:$4 sm:$0xff]  }
 0x70f   : > { %11904 = vmatpush1.bf16.msra.mxu0 %v17956_v58  ;;  %v18013_v58 = vld [vmem:[%s24292_s3 + $0xec8] ss:$16 sps:$4 sm:$0xff]  }
 0x710   : > { %13448 = vmatpush1.bf16.msra.mxu1 %v17959_v60  ;;  %11905 = vmatprep.subr.bf16.mxu0 %v17964_v39  ;;  %v18018_v60 = vld [vmem:[%s24292_s3 + $0xee4] ss:$16 sps:$4 sm:$0xff]   ;;  %v18021_v39 = vld [vmem:[%s24292_s3 + $0xeec] ss:$16 sps:$4 sm:$0xff]  }
 0x711   : > { %11787 = vmatmul.mubr.bf16.gmra.mrb[28].mxu0 %v24834_v43  ;;  %13449 = vmatprep.subr.bf16.mxu1 %v17967_v32  ;;  %v18016_v32 = vld [vmem:[%s24292_s3 + $0xee0] ss:$16 sps:$4 sm:$0xff]  }
 0x712   : > { %13331 = vmatmul.mubr.bf16.gmra.mrb[28].mxu1 %v24834_v43  ;;  %11796 = vmatprep.mubr.bf16.mxu0 %v24835_v4  ;;  %v18030_v43 = vld [vmem:[%s24292_s3 + $0xf24] ss:$16 sps:$4 sm:$0xff]  }
 0x713   : > { %13340 = vmatprep.mubr.bf16.mxu1 %v24835_v4  ;;  %11906 = vmatpush1.bf16.msra.mxu0 %v17962_v42  ;;  %v18019_v42 = vld [vmem:[%s24292_s3 + $0xee8] ss:$16 sps:$4 sm:$0xff]   ;;  %v18028_v4 = vld [vmem:[%s24292_s3 + $0xf20] ss:$16 sps:$4 sm:$0xff]  }
 0x714   : > { %13450 = vmatpush1.bf16.msra.mxu1 %v17965_v5  ;;  %11907 = vmatprep.subr.bf16.mxu0 %v17970_v33  ;;  %v18024_v5 = vld [vmem:[%s24292_s3 + $0xf04] ss:$16 sps:$4 sm:$0xff]   ;;  %v18025_v33 = vld [vmem:[%s24292_s3 + $0xf08] ss:$16 sps:$4 sm:$0xff]  }
 0x715   : > { %13451 = vmatprep.subr.bf16.mxu1 %v17973_v15  ;;  %v18033_v15 = vld [vmem:[%s24292_s3 + $0xf2c] ss:$16 sps:$4 sm:$0xff]  }
 0x717   : > { %11908 = vmatpush1.bf16.msra.mxu0 %v17968_v49  ;;  %v18031_v49 = vld [vmem:[%s24292_s3 + $0xf28] ss:$16 sps:$4 sm:$0xff]  }
 0x718   : > { %13452 = vmatpush1.bf16.msra.mxu1 %v17971_v48  ;;  %12070 = vmatprep.subr.bf16.mxu0 %v17976_v38  ;;  %v18036_v48 = vld [vmem:[%s24292_s3 + $0xf44] ss:$16 sps:$4 sm:$0xff]   ;;  %v18037_v38 = vld [vmem:[%s24292_s3 + $0xf48] ss:$16 sps:$4 sm:$0xff]  }
 0x719   : > { %11797 = vmatmul.mubr.bf16.gmra.mrb[32].mxu0 %v24836_v14  ;;  %13614 = vmatprep.subr.bf16.mxu1 %v17979_v36  ;;  %v18042_v36 = vld [vmem:[%s24292_s3 + $0xf64] ss:$16 sps:$4 sm:$0xff]  }
 0x71a   : > { %13341 = vmatmul.mubr.bf16.gmra.mrb[32].mxu1 %v24836_v14  ;;  %11806 = vmatprep.mubr.bf16.mxu0 %v24837_v10  ;;  %v18045_v14 = vld [vmem:[%s24292_s3 + $0xf6c] ss:$16 sps:$4 sm:$0xff]  }
 0x71b   : > { %13350 = vmatprep.mubr.bf16.mxu1 %v24837_v10  ;;  %v18040_v10 = vld [vmem:[%s24292_s3 + $0xf60] ss:$16 sps:$4 sm:$0xff]  }
 0x721   : > { %11807 = vmatmul.mubr.bf16.gmra.mrb[36].mxu0 %v24838_v0 }
 0x722   : > { %13351 = vmatmul.mubr.bf16.gmra.mrb[36].mxu1 %v24838_v0  ;;  %11816 = vmatprep.mubr.bf16.mxu0 %v24839_v28  ;;  %v18043_v0 = vld [vmem:[%s24292_s3 + $0xf68] ss:$16 sps:$4 sm:$0xff]  }
 0x723   : > { %13360 = vmatprep.mubr.bf16.mxu1 %v24839_v28  ;;  %v18048_v28 = vld [vmem:[%s24292_s3 + $0xf84] ss:$16 sps:$4 sm:$0xff]  }
 0x729   : > { %11817 = vmatmul.mubr.bf16.gmra.mrb[40].mxu0 %v24840_v2 }
 0x72a   : > { %13361 = vmatmul.mubr.bf16.gmra.mrb[40].mxu1 %v24840_v2  ;;  %11826 = vmatprep.mubr.bf16.mxu0 %v24841_v52  ;;  %v18049_v2 = vld [vmem:[%s24292_s3 + $0xf88] ss:$16 sps:$4 sm:$0xff]  }
 0x72b   : > { %13370 = vmatprep.mubr.bf16.mxu1 %v24841_v52  ;;  %v18054_v52 = vld [vmem:[%s24292_s3 + $0xfa4] ss:$16 sps:$4 sm:$0xff]  }
 0x731   : > { %11827 = vmatmul.mubr.bf16.gmra.mrb[44].mxu0 %v24842_v41 }
 0x732   : > { %13371 = vmatmul.mubr.bf16.gmra.mrb[44].mxu1 %v24842_v41  ;;  %11836 = vmatprep.mubr.bf16.mxu0 %v24843_v21  ;;  %v24848_v41 = vld [vmem:[#allocation9_spill] sm:$0xff] }
 0x733   : > { %13380 = vmatprep.mubr.bf16.mxu1 %v24843_v21  ;;  %v18057_v21 = vld [vmem:[%s24292_s3 + $0xfac] ss:$16 sps:$4 sm:$0xff]  }
 0x739   : > { %11837 = vmatmul.mubr.bf16.gmra.mrb[48].mxu0 %v24844_v61 }
 0x73a   : > { %13381 = vmatmul.mubr.bf16.gmra.mrb[48].mxu1 %v24844_v61  ;;  %11846 = vmatprep.mubr.bf16.mxu0 %v24845_v50  ;;  %v24849_v61 = vld [vmem:[#allocation16_spill] sm:$0xff] }
 0x73b   : > { %13390 = vmatprep.mubr.bf16.mxu1 %v24845_v50  ;;  %v18052_v50 = vld [vmem:[%s24292_s3 + $0xfa0] ss:$16 sps:$4 sm:$0xff]  }
 0x741   : > { %11847 = vmatmul.mubr.bf16.gmra.mrb[52].mxu0 %v24846_v12 }
 0x742   : > { %13391 = vmatmul.mubr.bf16.gmra.mrb[52].mxu1 %v24846_v12  ;;  %11856 = vmatprep.mubr.bf16.mxu0 %v21807_v35  ;;  %v18055_v12 = vld [vmem:[%s24292_s3 + $0xfa8] ss:$16 sps:$4 sm:$0xff]  }
 0x743   : > { %13400 = vmatprep.mubr.bf16.mxu1 %v21807_v35  ;;  %v17974_v35 = vld [vmem:[%s24292_s3 + $0xe00] ss:$16 sps:$4 sm:$0xff]  }
 0x749   : > { %11857 = vmatmul.mubr.bf16.gmra.mrb[56].mxu0 %v24847_v30 }
 0x74a   : > { %13401 = vmatmul.mubr.bf16.gmra.mrb[56].mxu1 %v24847_v30  ;;  %11866 = vmatprep.mubr.bf16.mxu0 %v21825_v62  ;;  %v18060_v30 = vld [vmem:[%s24292_s3 + $0xfc4] ss:$16 sps:$4 sm:$0xff]  }
 0x74b   : > { %13410 = vmatprep.mubr.bf16.mxu1 %v21825_v62  ;;  %v17982_v62 = vld [vmem:[%s24292_s3 + $0xe24] ss:$16 sps:$4 sm:$0xff]  }
 0x751   : > { %11867 = vmatmul.mubr.bf16.gmra.mrb[60].mxu0 %v21821_v45 }
 0x752   : > { %13411 = vmatmul.mubr.bf16.gmra.mrb[60].mxu1 %v21821_v45  ;;  %11909 = vmatprep.mubr.bf16.mxu0 %v22109_v11  ;;  %v17985_v45 = vld [vmem:[%s24292_s3 + $0xe2c] ss:$16 sps:$4 sm:$0xff]  }
 0x753   : > { %13453 = vmatprep.mubr.bf16.mxu1 %v22109_v11  ;;  %v17980_v11 = vld [vmem:[%s24292_s3 + $0xe20] ss:$16 sps:$4 sm:$0xff]  }
 0x759   : > { %11910 = vmatmul.mubr.bf16.vlgmr.msra.gmra.mrb[0].mxu0 %v22104_v63 }
 0x75a   : > { %13454 = vmatmul.mubr.bf16.vlgmr.msra.gmra.mrb[0].mxu1 %v22104_v63  ;;  %11919 = vmatprep.mubr.bf16.mxu0 %v22129_v1  ;;  %v17991_v63 = vld [vmem:[%s24292_s3 + $0xe4c] ss:$16 sps:$4 sm:$0xff]  }
 0x75b   : > { %12071 = vmatpush1.bf16.msra.mxu0 %v17974_v35  ;;  %13463 = vmatprep.mubr.bf16.mxu1 %v22129_v1  ;;  %v17986_v1 = vld [vmem:[%s24292_s3 + $0xe40] ss:$16 sps:$4 sm:$0xff]   ;;  %v18063_v35 = vld [vmem:[%s24292_s3 + $0xfcc] ss:$16 sps:$4 sm:$0xff]  }
 0x75c   : > { %13615 = vmatpush1.bf16.msra.mxu1 %v17977_v55  ;;  %12072 = vmatprep.subr.bf16.mxu0 %v17982_v62  ;;  %v18058_v55 = vld [vmem:[%s24292_s3 + $0xfc0] ss:$16 sps:$4 sm:$0xff]   ;;  %v18061_v62 = vld [vmem:[%s24292_s3 + $0xfc8] ss:$16 sps:$4 sm:$0xff]  }
 0x75d   : > { %13616 = vmatprep.subr.bf16.mxu1 %v17985_v45  ;;  %v18066_v45 = vld [vmem:[%s24292_s3 + $0xfe4] ss:$16 sps:$4 sm:$0xff]  }
 0x75f   : > { %12073 = vmatpush1.bf16.msra.mxu0 %v17980_v11  ;;  %v24850_v11 = vld [vmem:[#allocation14_spill] sm:$0xff] }
 0x760   : > { %13617 = vmatpush1.bf16.msra.mxu1 %v17983_v54  ;;  %12074 = vmatprep.subr.bf16.mxu0 %v17988_v59  ;;  %v18069_v54 = vld [vmem:[%s24292_s3 + $0xfec] ss:$16 sps:$4 sm:$0xff]   ;;  %v24851_v59 = vld [vmem:[#allocation157_spill] sm:$0xff] }
 0x761   : > { %11920 = vmatmul.mubr.bf16.gmra.mrb[4].mxu0 %v22124_v53  ;;  %13618 = vmatprep.subr.bf16.mxu1 %v17991_v63  ;;  %v18064_v63 = vld [vmem:[%s24292_s3 + $0xfe0] ss:$16 sps:$4 sm:$0xff]  }
 0x762   : > { %13464 = vmatmul.mubr.bf16.gmra.mrb[4].mxu1 %v22124_v53  ;;  %11929 = vmatprep.mubr.bf16.mxu0 %v22149_v44  ;;  %v18003_v53 = vld [vmem:[%s24292_s3 + $0xe8c] ss:$16 sps:$4 sm:$0xff]  }
 0x763   : > { %13473 = vmatprep.mubr.bf16.mxu1 %v22149_v44  ;;  %12075 = vmatpush1.bf16.msra.mxu0 %v17986_v1  ;;  %v17998_v44 = vld [vmem:[%s24292_s3 + $0xe80] ss:$16 sps:$4 sm:$0xff]   ;;  %v18067_v1 = vld [vmem:[%s24292_s3 + $0xfe8] ss:$16 sps:$4 sm:$0xff]  }
 0x764   : > { %13619 = vmatpush1.bf16.msra.mxu1 %v17989_v9  ;;  %12076 = vmatprep.subr.bf16.mxu0 %v17994_v19  ;;  %v24852_v9 = vld [vmem:[#allocation15_spill] sm:$0xff] }
 0x765   : > { %13620 = vmatprep.subr.bf16.mxu1 %v17997_v23  ;;  %v24853_v19 = vld [vmem:[#allocation159_spill] sm:$0xff]  ;;  %v24854_v23 = vld [vmem:[#allocation17_spill] sm:$0xff] }
 0x767   : > { %12077 = vmatpush1.bf16.msra.mxu0 %v17992_v7  ;;  %v24855_v7 = vld [vmem:[#allocation161_spill] sm:$0xff] }
 0x768   : > { %13621 = vmatpush1.bf16.msra.mxu1 %v17995_v56  ;;  %12078 = vmatprep.subr.bf16.mxu0 %v18000_v31  ;;  %v24856_v56 = vld [vmem:[#allocation19_spill] sm:$0xff] }
 0x769   : > { %11930 = vmatmul.mubr.bf16.gmra.mrb[8].mxu0 %v22144_v25  ;;  %13622 = vmatprep.subr.bf16.mxu1 %v18003_v53  ;;  %v24857_v31 = vld [vmem:[#allocation163_spill] sm:$0xff]  ;;  %v24858_v53 = vld [vmem:[#allocation21_spill] sm:$0xff] }
 0x76a   : > { %13474 = vmatmul.mubr.bf16.gmra.mrb[8].mxu1 %v22144_v25  ;;  %11939 = vmatprep.mubr.bf16.mxu0 %v22169_v3  ;;  %v18015_v25 = vld [vmem:[%s24292_s3 + $0xecc] ss:$16 sps:$4 sm:$0xff]  }
 0x76b   : > { %13483 = vmatprep.mubr.bf16.mxu1 %v22169_v3  ;;  %12079 = vmatpush1.bf16.msra.mxu0 %v17998_v44  ;;  %v18010_v3 = vld [vmem:[%s24292_s3 + $0xec0] ss:$16 sps:$4 sm:$0xff]  }
 0x76c   : > { %13623 = vmatpush1.bf16.msra.mxu1 %v18001_v24  ;;  %12080 = vmatprep.subr.bf16.mxu0 %v18006_v8  ;;  %v24859_v44 = vld [vmem:[#allocation23_spill] sm:$0xff]  ;;  %v24860_v24 = vld [vmem:[#allocation25_spill] sm:$0xff] }
 0x76d   : > { %13624 = vmatprep.subr.bf16.mxu1 %v18009_v22  ;;  %v24861_v8 = vld [vmem:[#allocation27_spill] sm:$0xff]  ;;  %v24865_v22 = vld [vmem:[#allocation32_spill] sm:$0xff] }
 0x76f   : > { %12081 = vmatpush1.bf16.msra.mxu0 %v18004_v29  ;;  %v24868_v29 = vld [vmem:[#allocation45_spill] sm:$0xff] }
 0x770   : > { %13625 = vmatpush1.bf16.msra.mxu1 %v18007_v51  ;;  %12082 = vmatprep.subr.bf16.mxu0 %v18012_v47  ;;  %v24869_v51 = vld [vmem:[#allocation40_spill] sm:$0xff]  ;;  %v24870_v47 = vld [vmem:[#allocation49_spill] sm:$0xff] }
 0x771   : > { %11940 = vmatmul.mubr.bf16.gmra.mrb[12].mxu0 %v22164_v46  ;;  %13626 = vmatprep.subr.bf16.mxu1 %v18015_v25  ;;  %v24871_v25 = vld [vmem:[#allocation44_spill] sm:$0xff] }
 0x772   : > { %13484 = vmatmul.mubr.bf16.gmra.mrb[12].mxu1 %v22164_v46  ;;  %11949 = vmatprep.mubr.bf16.mxu0 %v22189_v57  ;;  %v18027_v46 = vld [vmem:[%s24292_s3 + $0xf0c] ss:$16 sps:$4 sm:$0xff]  }
 0x773   : > { %13493 = vmatprep.mubr.bf16.mxu1 %v22189_v57  ;;  %12083 = vmatpush1.bf16.msra.mxu0 %v18010_v3  ;;  %v18022_v57 = vld [vmem:[%s24292_s3 + $0xf00] ss:$16 sps:$4 sm:$0xff]   ;;  %v24872_v3 = vld [vmem:[#allocation10_spill] sm:$0xff] }
 0x774   : > { %13627 = vmatpush1.bf16.msra.mxu1 %v18013_v58  ;;  %12084 = vmatprep.subr.bf16.mxu0 %v18018_v60  ;;  %v24873_v58 = vld [vmem:[#allocation48_spill] sm:$0xff]  ;;  %v24874_v60 = vld [vmem:[#allocation11_spill] sm:$0xff] }
 0x775   : > { %13628 = vmatprep.subr.bf16.mxu1 %v18021_v39  ;;  %v24875_v39 = vld [vmem:[#allocation12_spill] sm:$0xff] }
 0x777   : > { %12085 = vmatpush1.bf16.msra.mxu0 %v18016_v32  ;;  %v24876_v32 = vld [vmem:[#allocation156_spill] sm:$0xff] }
 0x778   : > { %13629 = vmatpush1.bf16.msra.mxu1 %v18019_v42  ;;  %12086 = vmatprep.subr.bf16.mxu0 %v18024_v5  ;;  %v24877_v42 = vld [vmem:[#allocation13_spill] sm:$0xff]  ;;  %v24878_v5 = vld [vmem:[#allocation158_spill] sm:$0xff] }
 0x779   : > { %11950 = vmatmul.mubr.bf16.gmra.mrb[16].mxu0 %v22184_v16  ;;  %13630 = vmatprep.subr.bf16.mxu1 %v18027_v46  ;;  %v24879_v46 = vld [vmem:[#allocation18_spill] sm:$0xff] }
 0x77a   : > { %13494 = vmatmul.mubr.bf16.gmra.mrb[16].mxu1 %v22184_v16  ;;  %11959 = vmatprep.mubr.bf16.mxu0 %v22224_v40  ;;  %v18039_v16 = vld [vmem:[%s24292_s3 + $0xf4c] ss:$16 sps:$4 sm:$0xff]  }
 0x77b   : > { %13503 = vmatprep.mubr.bf16.mxu1 %v22224_v40  ;;  %12087 = vmatpush1.bf16.msra.mxu0 %v18022_v57  ;;  %v18034_v40 = vld [vmem:[%s24292_s3 + $0xf40] ss:$16 sps:$4 sm:$0xff]   ;;  %v24880_v57 = vld [vmem:[#allocation160_spill] sm:$0xff] }
 0x77c   : > { %13631 = vmatpush1.bf16.msra.mxu1 %v18025_v33  ;;  %12088 = vmatprep.subr.bf16.mxu0 %v18030_v43  ;;  %v24881_v33 = vld [vmem:[#allocation20_spill] sm:$0xff]  ;;  %v24882_v43 = vld [vmem:[#allocation162_spill] sm:$0xff] }
 0x77d   : > { %13632 = vmatprep.subr.bf16.mxu1 %v18033_v15  ;;  %v24883_v15 = vld [vmem:[#allocation22_spill] sm:$0xff] }
 0x77f   : > { %12089 = vmatpush1.bf16.msra.mxu0 %v18028_v4  ;;  %v24884_v4 = vld [vmem:[#allocation164_spill] sm:$0xff] }
 0x780   : > { %13633 = vmatpush1.bf16.msra.mxu1 %v18031_v49  ;;  %12090 = vmatprep.subr.bf16.mxu0 %v18036_v48  ;;  %v24885_v49 = vld [vmem:[#allocation24_spill] sm:$0xff]  ;;  %v24886_v48 = vld [vmem:[#allocation165_spill] sm:$0xff] }
 0x781   : > { %11960 = vmatmul.mubr.bf16.gmra.mrb[20].mxu0 %v22216_v6  ;;  %13634 = vmatprep.subr.bf16.mxu1 %v18039_v16  ;;  %v24887_v16 = vld [vmem:[#allocation26_spill] sm:$0xff] }
 0x782   : > { %13504 = vmatmul.mubr.bf16.gmra.mrb[20].mxu1 %v22216_v6  ;;  %11969 = vmatprep.mubr.bf16.mxu0 %v22268_v37  ;;  %v18051_v6 = vld [vmem:[%s24292_s3 + $0xf8c] ss:$16 sps:$4 sm:$0xff]  }
 0x783   : > { %13513 = vmatprep.mubr.bf16.mxu1 %v22268_v37  ;;  %12091 = vmatpush1.bf16.msra.mxu0 %v18034_v40  ;;  %v18046_v37 = vld [vmem:[%s24292_s3 + $0xf80] ss:$16 sps:$4 sm:$0xff]   ;;  %v24888_v40 = vld [vmem:[#allocation166_spill] sm:$0xff] }
 0x784   : > { %13635 = vmatpush1.bf16.msra.mxu1 %v18037_v38  ;;  %12092 = vmatprep.subr.bf16.mxu0 %v18042_v36  ;;  %v24889_v38 = vld [vmem:[#allocation28_spill] sm:$0xff]  ;;  %v24890_v36 = vld [vmem:[#allocation167_spill] sm:$0xff] }
 0x785   : > { %13636 = vmatprep.subr.bf16.mxu1 %v18045_v14  ;;  %v24891_v14 = vld [vmem:[#allocation31_spill] sm:$0xff] }
 0x787   : > { %12093 = vmatpush1.bf16.msra.mxu0 %v18040_v10  ;;  %v8137_v10 = vld [vmem:[%s24293_s4] sm:$0xf] }
 0x788   : > { %13637 = vmatpush1.bf16.msra.mxu1 %v18043_v0  ;;  %12094 = vmatprep.subr.bf16.mxu0 %v18048_v28  ;;  %v24892_v0 = vld [vmem:[#allocation5_spill] sm:$0xff] }
 0x789   : > { %11970 = vmatmul.mubr.bf16.gmra.mrb[24].mxu0 %v24848_v41  ;;  %13638 = vmatprep.subr.bf16.mxu1 %v18051_v6  ;;  %v23968_v28 = vrot.slane %v8137_v10, %v24892_v0  ;;  %v24893_v6 = vld [vmem:[#allocation6_spill] sm:$0xff] }
 0x78a   : > { %13514 = vmatmul.mubr.bf16.gmra.mrb[24].mxu1 %v24848_v41  ;;  %11979 = vmatprep.mubr.bf16.mxu0 %v24849_v61 }
 0x78b   : > { %13523 = vmatprep.mubr.bf16.mxu1 %v24849_v61  ;;  %12095 = vmatpush1.bf16.msra.mxu0 %v18046_v37  ;;  %v23971_v37 = vrot.slane %v8137_v10, %v24893_v6 }
 0x78c   : > { %13639 = vmatpush1.bf16.msra.mxu1 %v18049_v2  ;;  %12096 = vmatprep.subr.bf16.mxu0 %v18054_v52  ;;  %v24894_v2 = vld [vmem:[#allocation7_spill] sm:$0xff] }
 0x78d   : > { %13640 = vmatprep.subr.bf16.mxu1 %v18057_v21  ;;  %v23974_v52 = vrot.slane %v8137_v10, %v24894_v2 }
 0x78f   : > { %12097 = vmatpush1.bf16.msra.mxu0 %v18052_v50 }
 0x790   : > { %13641 = vmatpush1.bf16.msra.mxu1 %v18055_v12  ;;  %12098 = vmatprep.subr.bf16.mxu0 %v18060_v30 }
 0x791   : > { %11980 = vmatmul.mubr.bf16.gmra.mrb[28].mxu0 %v24850_v11  ;;  %13642 = vmatprep.subr.bf16.mxu1 %v18063_v35 }
 0x792   : > { %13524 = vmatmul.mubr.bf16.gmra.mrb[28].mxu1 %v24850_v11  ;;  %11989 = vmatprep.mubr.bf16.mxu0 %v24851_v59 }
 0x793   : > { %13533 = vmatprep.mubr.bf16.mxu1 %v24851_v59  ;;  %12099 = vmatpush1.bf16.msra.mxu0 %v18058_v55 }
 0x794   : > { %13643 = vmatpush1.bf16.msra.mxu1 %v18061_v62  ;;  %12100 = vmatprep.subr.bf16.mxu0 %v18066_v45 }
 0x795   : > { %13644 = vmatprep.subr.bf16.mxu1 %v18069_v54 }
 0x797   : > { %12101 = vmatpush1.bf16.msra.mxu0 %v18064_v63 }
 0x798   : > { %13645 = vmatpush1.bf16.msra.mxu1 %v18067_v1 }
 0x799   : > { %11990 = vmatmul.mubr.bf16.gmra.mrb[32].mxu0 %v24852_v9 }
 0x79a   : > { %13534 = vmatmul.mubr.bf16.gmra.mrb[32].mxu1 %v24852_v9  ;;  %11999 = vmatprep.mubr.bf16.mxu0 %v24853_v19 }
 0x79b   : > { %13543 = vmatprep.mubr.bf16.mxu1 %v24853_v19 }
 0x7a1   : > { %12000 = vmatmul.mubr.bf16.gmra.mrb[36].mxu0 %v24854_v23 }
 0x7a2   : > { %13544 = vmatmul.mubr.bf16.gmra.mrb[36].mxu1 %v24854_v23  ;;  %12009 = vmatprep.mubr.bf16.mxu0 %v24855_v7 }
 0x7a3   : > { %13553 = vmatprep.mubr.bf16.mxu1 %v24855_v7 }
 0x7a9   : > { %12010 = vmatmul.mubr.bf16.gmra.mrb[40].mxu0 %v24856_v56 }
 0x7aa   : > { %13554 = vmatmul.mubr.bf16.gmra.mrb[40].mxu1 %v24856_v56  ;;  %12019 = vmatprep.mubr.bf16.mxu0 %v24857_v31 }
 0x7ab   : > { %13563 = vmatprep.mubr.bf16.mxu1 %v24857_v31 }
 0x7b1   : > { %12020 = vmatmul.mubr.bf16.gmra.mrb[44].mxu0 %v24858_v53 }
 0x7b2   : > { %13564 = vmatmul.mubr.bf16.gmra.mrb[44].mxu1 %v24858_v53  ;;  %12029 = vmatprep.mubr.bf16.mxu0 %v22532_v34 }
 0x7b3   : > { %13573 = vmatprep.mubr.bf16.mxu1 %v22532_v34  ;;  %v24862_v34 = vld [vmem:[#allocation33_spill] sm:$0xff] }
 0x7b9   : > { %12030 = vmatmul.mubr.bf16.gmra.mrb[48].mxu0 %v24859_v44 }
 0x7ba   : > { %13574 = vmatmul.mubr.bf16.gmra.mrb[48].mxu1 %v24859_v44  ;;  %12039 = vmatprep.mubr.bf16.mxu0 %v22561_v18 }
 0x7bb   : > { %13583 = vmatprep.mubr.bf16.mxu1 %v22561_v18  ;;  %v24863_v18 = vld [vmem:[#allocation29_spill] sm:$0xff] }
 0x7c1   : > { %12040 = vmatmul.mubr.bf16.gmra.mrb[52].mxu0 %v24860_v24 }
 0x7c2   : > { %13584 = vmatmul.mubr.bf16.gmra.mrb[52].mxu1 %v24860_v24  ;;  %12049 = vmatprep.mubr.bf16.mxu0 %v22581_v20 }
 0x7c3   : > { %13593 = vmatprep.mubr.bf16.mxu1 %v22581_v20  ;;  %v24864_v20 = vld [vmem:[#allocation37_spill] sm:$0xff] }
 0x7c9   : > { %12050 = vmatmul.mubr.bf16.gmra.mrb[56].mxu0 %v24861_v8 }
 0x7ca   : > { %13594 = vmatmul.mubr.bf16.gmra.mrb[56].mxu1 %v24861_v8  ;;  %12059 = vmatprep.mubr.bf16.mxu0 %v22601_v26 }
 0x7cb   : > { %13603 = vmatprep.mubr.bf16.mxu1 %v22601_v26  ;;  %v24866_v26 = vld [vmem:[#allocation41_spill] sm:$0xff] }
 0x7d1   : > { %12060 = vmatmul.mubr.bf16.gmra.mrb[60].mxu0 %v22596_v13 }
 0x7d2   : > { %13604 = vmatmul.mubr.bf16.gmra.mrb[60].mxu1 %v22596_v13  ;;  %12102 = vmatprep.mubr.bf16.mxu0 %v24862_v34  ;;  %v24867_v13 = vld [vmem:[#allocation36_spill] sm:$0xff] }
 0x7d3   : > { %13646 = vmatprep.mubr.bf16.mxu1 %v24862_v34 }
 0x7d9   : > { %12103 = vmatmul.mubr.bf16.vlgmr.msra.gmra.mrb[0].mxu0 %v24863_v18 }
 0x7da   : > { %13647 = vmatmul.mubr.bf16.vlgmr.msra.gmra.mrb[0].mxu1 %v24863_v18  ;;  %12112 = vmatprep.mubr.bf16.mxu0 %v24864_v20 }
 0x7db   : > { %13656 = vmatprep.mubr.bf16.mxu1 %v24864_v20 }
 0x7e1   : > { %12113 = vmatmul.mubr.bf16.gmra.mrb[4].mxu0 %v24865_v22 }
 0x7e2   : > { %13657 = vmatmul.mubr.bf16.gmra.mrb[4].mxu1 %v24865_v22  ;;  %12122 = vmatprep.mubr.bf16.mxu0 %v24866_v26 }
 0x7e3   : > { %13666 = vmatprep.mubr.bf16.mxu1 %v24866_v26 }
 0x7e9   : > { %12123 = vmatmul.mubr.bf16.gmra.mrb[8].mxu0 %v24867_v13 }
 0x7ea   : > { %13667 = vmatmul.mubr.bf16.gmra.mrb[8].mxu1 %v24867_v13  ;;  %12132 = vmatprep.mubr.bf16.mxu0 %v24868_v29 }
 0x7eb   : > { %13676 = vmatprep.mubr.bf16.mxu1 %v24868_v29 }
 0x7f1   : > { %12133 = vmatmul.mubr.bf16.gmra.mrb[12].mxu0 %v24869_v51 }
 0x7f2   : > { %13677 = vmatmul.mubr.bf16.gmra.mrb[12].mxu1 %v24869_v51  ;;  %12142 = vmatprep.mubr.bf16.mxu0 %v24870_v47 }
 0x7f3   : > { %13686 = vmatprep.mubr.bf16.mxu1 %v24870_v47 }
 0x7f9   : > { %12143 = vmatmul.mubr.bf16.gmra.mrb[16].mxu0 %v24871_v25 }
 0x7fa   : > { %13687 = vmatmul.mubr.bf16.gmra.mrb[16].mxu1 %v24871_v25  ;;  %12152 = vmatprep.mubr.bf16.mxu0 %v24872_v3 }
 0x7fb   : > { %13696 = vmatprep.mubr.bf16.mxu1 %v24872_v3 }
 0x801   : > { %12153 = vmatmul.mubr.bf16.gmra.mrb[20].mxu0 %v24873_v58 }
 0x802   : > { %13697 = vmatmul.mubr.bf16.gmra.mrb[20].mxu1 %v24873_v58  ;;  %12162 = vmatprep.mubr.bf16.mxu0 %v24874_v60 }
 0x803   : > { %13706 = vmatprep.mubr.bf16.mxu1 %v24874_v60 }
 0x809   : > { %12163 = vmatmul.mubr.bf16.gmra.mrb[24].mxu0 %v24875_v39 }
 0x80a   : > { %13707 = vmatmul.mubr.bf16.gmra.mrb[24].mxu1 %v24875_v39  ;;  %12172 = vmatprep.mubr.bf16.mxu0 %v24876_v32 }
 0x80b   : > { %13716 = vmatprep.mubr.bf16.mxu1 %v24876_v32 }
 0x811   : > { %12173 = vmatmul.mubr.bf16.gmra.mrb[28].mxu0 %v24877_v42 }
 0x812   : > { %13717 = vmatmul.mubr.bf16.gmra.mrb[28].mxu1 %v24877_v42  ;;  %12182 = vmatprep.mubr.bf16.mxu0 %v24878_v5 }
 0x813   : > { %13726 = vmatprep.mubr.bf16.mxu1 %v24878_v5 }
 0x819   : > { %12183 = vmatmul.mubr.bf16.gmra.mrb[32].mxu0 %v24879_v46 }
 0x81a   : > { %13727 = vmatmul.mubr.bf16.gmra.mrb[32].mxu1 %v24879_v46  ;;  %12192 = vmatprep.mubr.bf16.mxu0 %v24880_v57 }
 0x81b   : > { %13736 = vmatprep.mubr.bf16.mxu1 %v24880_v57 }
 0x821   : > { %12193 = vmatmul.mubr.bf16.gmra.mrb[36].mxu0 %v24881_v33 }
 0x822   : > { %13737 = vmatmul.mubr.bf16.gmra.mrb[36].mxu1 %v24881_v33  ;;  %12202 = vmatprep.mubr.bf16.mxu0 %v24882_v43 }
 0x823   : > { %13746 = vmatprep.mubr.bf16.mxu1 %v24882_v43 }
 0x829   : > { %12203 = vmatmul.mubr.bf16.gmra.mrb[40].mxu0 %v24883_v15 }
 0x82a   : > { %13747 = vmatmul.mubr.bf16.gmra.mrb[40].mxu1 %v24883_v15  ;;  %12212 = vmatprep.mubr.bf16.mxu0 %v24884_v4 }
 0x82b   : > { %13756 = vmatprep.mubr.bf16.mxu1 %v24884_v4 }
 0x831   : > { %12213 = vmatmul.mubr.bf16.gmra.mrb[44].mxu0 %v24885_v49 }
 0x832   : > { %13757 = vmatmul.mubr.bf16.gmra.mrb[44].mxu1 %v24885_v49  ;;  %12222 = vmatprep.mubr.bf16.mxu0 %v24886_v48 }
 0x833   : > { %13766 = vmatprep.mubr.bf16.mxu1 %v24886_v48 }
 0x839   : > { %12223 = vmatmul.mubr.bf16.gmra.mrb[48].mxu0 %v24887_v16 }
 0x83a   : > { %13767 = vmatmul.mubr.bf16.gmra.mrb[48].mxu1 %v24887_v16  ;;  %12232 = vmatprep.mubr.bf16.mxu0 %v24888_v40 }
 0x83b   : > { %13776 = vmatprep.mubr.bf16.mxu1 %v24888_v40 }
 0x841   : > { %12233 = vmatmul.mubr.bf16.gmra.mrb[52].mxu0 %v24889_v38 }
 0x842   : > { %13777 = vmatmul.mubr.bf16.gmra.mrb[52].mxu1 %v24889_v38  ;;  %12242 = vmatprep.mubr.bf16.mxu0 %v24890_v36 }
 0x843   : > { %13786 = vmatprep.mubr.bf16.mxu1 %v24890_v36 }
 0x849   : > { %12243 = vmatmul.mubr.bf16.gmra.mrb[56].mxu0 %v24891_v14 }
 0x84a   : > { %13787 = vmatmul.mubr.bf16.gmra.mrb[56].mxu1 %v24891_v14  ;;  %12252 = vmatprep.mubr.bf16.mxu0 %v22603_v17 }
 0x84b   : > { %13796 = vmatprep.mubr.bf16.mxu1 %v22603_v17  ;;  %v24895_v17 = vld [vmem:[#allocation8_spill] sm:$0xff] }
 0x84c   : > { %v23977_v41 = vrot.slane %v8137_v10, %v24895_v17 }
 0x851   : > { %12253 = vmatmul.mubr.bf16.gmra.mrb[60].mxu0 %v22599_v27 }
 0x852   : > { %13797 = vmatmul.mubr.bf16.gmra.mrb[60].mxu1 %v22599_v27 }
 0x8ac   : > { %v12104_v27 = vpop.f32.mrb[0].mxu0 }
 0x8ad   : > { %v15629_v21 = vadd.f32 %v12104_v27, %v23968_v28  ;;  %v13648_v61 = vpop.f32.mrb[0].mxu1  ;;  %v12106_v50 = vpop.f32.mrb[1].mxu0 }
 0x8ae   : > { %v15693_v12 = vadd.f32 %v13648_v61, %v23971_v37  ;;  %v15630_v30 = vadd.f32 %v12106_v50, %v23974_v52  ;;  %v13650_v35 = vpop.f32.mrb[1].mxu1  ;;  %v12108_v55 = vpop.f32.mrb[2].mxu0 }
 0x8af   : > { %13807 = vst [vmem:[%s23982_s16] sm:$0xff] %v15629_v21  ;;  %v15694_v62 = vadd.f32 %v13650_v35, %v23977_v41  ;;  %v15631_v45 = vadd.f32 %v12108_v55, %v23968_v28  ;;  %v13652_v11 = vpop.f32.mrb[2].mxu1  ;;  %v12110_v54 = vpop.f32.mrb[3].mxu0 }
 0x8b0   : > { %13809 = vst [vmem:[%s23982_s16 + $0x10] sm:$0xff] %v15693_v12  ;;  %13808 = vst [vmem:[%s23982_s16 + $0x8] sm:$0xff] %v15630_v30  ;;  %v15695_v59 = vadd.f32 %v13652_v11, %v23971_v37  ;;  %v15632_v63 = vadd.f32 %v12110_v54, %v23974_v52  ;;  %v13654_v1 = vpop.f32.mrb[3].mxu1 }
 0x8b1   : > { %13810 = vst [vmem:[%s23982_s16 + $0x18] sm:$0xff] %v15694_v62  ;;  %13811 = vst [vmem:[%s23982_s16 + $0x20] sm:$0xff] %v15631_v45  ;;  %v15696_v9 = vadd.f32 %v13654_v1, %v23977_v41 }
 0x8b2   : > { %13813 = vst [vmem:[%s23982_s16 + $0x30] sm:$0xff] %v15695_v59  ;;  %13812 = vst [vmem:[%s23982_s16 + $0x28] sm:$0xff] %v15632_v63 }
 0x8b3   : > { %13814 = vst [vmem:[%s23982_s16 + $0x38] sm:$0xff] %v15696_v9 }
 0x8b4   : > { %v12114_v19 = vpop.f32.mrb[4].mxu0 }
 0x8b5   : > { %v15633_v23 = vadd.f32 %v12114_v19, %v23968_v28  ;;  %v13658_v7 = vpop.f32.mrb[4].mxu1  ;;  %v12116_v56 = vpop.f32.mrb[5].mxu0 }
 0x8b6   : > { %v15697_v31 = vadd.f32 %v13658_v7, %v23971_v37  ;;  %v15634_v53 = vadd.f32 %v12116_v56, %v23974_v52  ;;  %v13660_v44 = vpop.f32.mrb[5].mxu1  ;;  %v12118_v24 = vpop.f32.mrb[6].mxu0 }
 0x8b7   : > { %13815 = vst [vmem:[%s23982_s16 + $0x40] sm:$0xff] %v15633_v23  ;;  %v15698_v8 = vadd.f32 %v13660_v44, %v23977_v41  ;;  %v15635_v34 = vadd.f32 %v12118_v24, %v23968_v28  ;;  %v13662_v18 = vpop.f32.mrb[6].mxu1  ;;  %v12120_v20 = vpop.f32.mrb[7].mxu0 }
 0x8b8   : > { %13817 = vst [vmem:[%s23982_s16 + $0x50] sm:$0xff] %v15697_v31  ;;  %13816 = vst [vmem:[%s23982_s16 + $0x48] sm:$0xff] %v15634_v53  ;;  %v15699_v22 = vadd.f32 %v13662_v18, %v23971_v37  ;;  %v15636_v26 = vadd.f32 %v12120_v20, %v23974_v52  ;;  %v13664_v13 = vpop.f32.mrb[7].mxu1 }
 0x8b9   : > { %13818 = vst [vmem:[%s23982_s16 + $0x58] sm:$0xff] %v15698_v8  ;;  %13819 = vst [vmem:[%s23982_s16 + $0x60] sm:$0xff] %v15635_v34  ;;  %v15700_v29 = vadd.f32 %v13664_v13, %v23977_v41 }
 0x8ba   : > { %13821 = vst [vmem:[%s23982_s16 + $0x70] sm:$0xff] %v15699_v22  ;;  %13820 = vst [vmem:[%s23982_s16 + $0x68] sm:$0xff] %v15636_v26 }
 0x8bb   : > { %13822 = vst [vmem:[%s23982_s16 + $0x78] sm:$0xff] %v15700_v29 }
 0x8bc   : > { %v12124_v51 = vpop.f32.mrb[8].mxu0 }
 0x8bd   : > { %v15637_v47 = vadd.f32 %v12124_v51, %v23968_v28  ;;  %v13668_v25 = vpop.f32.mrb[8].mxu1  ;;  %v12126_v3 = vpop.f32.mrb[9].mxu0 }
 0x8be   : > { %v15701_v58 = vadd.f32 %v13668_v25, %v23971_v37  ;;  %v15638_v60 = vadd.f32 %v12126_v3, %v23974_v52  ;;  %v13670_v39 = vpop.f32.mrb[9].mxu1  ;;  %v12128_v32 = vpop.f32.mrb[10].mxu0 }
 0x8bf   : > { %13823 = vst [vmem:[%s23982_s16 + $0x80] sm:$0xff] %v15637_v47  ;;  %v15702_v42 = vadd.f32 %v13670_v39, %v23977_v41  ;;  %v15639_v5 = vadd.f32 %v12128_v32, %v23968_v28  ;;  %v13672_v46 = vpop.f32.mrb[10].mxu1  ;;  %v12130_v57 = vpop.f32.mrb[11].mxu0 }
 0x8c0   : > { %13825 = vst [vmem:[%s23982_s16 + $0x90] sm:$0xff] %v15701_v58  ;;  %13824 = vst [vmem:[%s23982_s16 + $0x88] sm:$0xff] %v15638_v60  ;;  %v15703_v33 = vadd.f32 %v13672_v46, %v23971_v37  ;;  %v15640_v43 = vadd.f32 %v12130_v57, %v23974_v52  ;;  %v13674_v15 = vpop.f32.mrb[11].mxu1 }
 0x8c1   : > { %13826 = vst [vmem:[%s23982_s16 + $0x98] sm:$0xff] %v15702_v42  ;;  %13827 = vst [vmem:[%s23982_s16 + $0xa0] sm:$0xff] %v15639_v5  ;;  %v15704_v4 = vadd.f32 %v13674_v15, %v23977_v41 }
 0x8c2   : > { %13829 = vst [vmem:[%s23982_s16 + $0xb0] sm:$0xff] %v15703_v33  ;;  %13828 = vst [vmem:[%s23982_s16 + $0xa8] sm:$0xff] %v15640_v43 }
 0x8c3   : > { %13830 = vst [vmem:[%s23982_s16 + $0xb8] sm:$0xff] %v15704_v4 }
 0x8c4   : > { %v12134_v49 = vpop.f32.mrb[12].mxu0 }
 0x8c5   : > { %v15641_v48 = vadd.f32 %v12134_v49, %v23968_v28  ;;  %v13678_v16 = vpop.f32.mrb[12].mxu1  ;;  %v12136_v40 = vpop.f32.mrb[13].mxu0 }
 0x8c6   : > { %v15705_v38 = vadd.f32 %v13678_v16, %v23971_v37  ;;  %v15642_v36 = vadd.f32 %v12136_v40, %v23974_v52  ;;  %v13680_v14 = vpop.f32.mrb[13].mxu1  ;;  %v12138_v10 = vpop.f32.mrb[14].mxu0 }
 0x8c7   : > { %13831 = vst [vmem:[%s23982_s16 + $0xc0] sm:$0xff] %v15641_v48  ;;  %v15706_v0 = vadd.f32 %v13680_v14, %v23977_v41  ;;  %v15643_v6 = vadd.f32 %v12138_v10, %v23968_v28  ;;  %v13682_v2 = vpop.f32.mrb[14].mxu1  ;;  %v12140_v17 = vpop.f32.mrb[15].mxu0 }
 0x8c8   : > { %13833 = vst [vmem:[%s23982_s16 + $0xd0] sm:$0xff] %v15705_v38  ;;  %13832 = vst [vmem:[%s23982_s16 + $0xc8] sm:$0xff] %v15642_v36  ;;  %v15707_v27 = vadd.f32 %v13682_v2, %v23971_v37  ;;  %v15644_v21 = vadd.f32 %v12140_v17, %v23974_v52  ;;  %v13684_v61 = vpop.f32.mrb[15].mxu1 }
 0x8c9   : > { %13834 = vst [vmem:[%s23982_s16 + $0xd8] sm:$0xff] %v15706_v0  ;;  %13835 = vst [vmem:[%s23982_s16 + $0xe0] sm:$0xff] %v15643_v6  ;;  %v15708_v50 = vadd.f32 %v13684_v61, %v23977_v41 }
 0x8ca   : > { %13837 = vst [vmem:[%s23982_s16 + $0xf0] sm:$0xff] %v15707_v27  ;;  %13836 = vst [vmem:[%s23982_s16 + $0xe8] sm:$0xff] %v15644_v21 }
 0x8cb   : > { %13838 = vst [vmem:[%s23982_s16 + $0xf8] sm:$0xff] %v15708_v50 }
 0x8cc   : > { %v12144_v12 = vpop.f32.mrb[16].mxu0 }
 0x8cd   : > { %v15645_v30 = vadd.f32 %v12144_v12, %v23968_v28  ;;  %v13688_v35 = vpop.f32.mrb[16].mxu1  ;;  %v12146_v55 = vpop.f32.mrb[17].mxu0 }
 0x8ce   : > { %v15709_v62 = vadd.f32 %v13688_v35, %v23971_v37  ;;  %v15646_v45 = vadd.f32 %v12146_v55, %v23974_v52  ;;  %v13690_v11 = vpop.f32.mrb[17].mxu1  ;;  %v12148_v54 = vpop.f32.mrb[18].mxu0 }
 0x8cf   : > { %13839 = vst [vmem:[%s23982_s16 + $0x100] sm:$0xff] %v15645_v30  ;;  %v15710_v59 = vadd.f32 %v13690_v11, %v23977_v41  ;;  %v15647_v63 = vadd.f32 %v12148_v54, %v23968_v28  ;;  %v13692_v1 = vpop.f32.mrb[18].mxu1  ;;  %v12150_v9 = vpop.f32.mrb[19].mxu0 }
 0x8d0   : > { %13841 = vst [vmem:[%s23982_s16 + $0x110] sm:$0xff] %v15709_v62  ;;  %13840 = vst [vmem:[%s23982_s16 + $0x108] sm:$0xff] %v15646_v45  ;;  %v15711_v19 = vadd.f32 %v13692_v1, %v23971_v37  ;;  %v15648_v23 = vadd.f32 %v12150_v9, %v23974_v52  ;;  %v13694_v7 = vpop.f32.mrb[19].mxu1 }
 0x8d1   : > { %13842 = vst [vmem:[%s23982_s16 + $0x118] sm:$0xff] %v15710_v59  ;;  %13843 = vst [vmem:[%s23982_s16 + $0x120] sm:$0xff] %v15647_v63  ;;  %v15712_v56 = vadd.f32 %v13694_v7, %v23977_v41 }
 0x8d2   : > { %13845 = vst [vmem:[%s23982_s16 + $0x130] sm:$0xff] %v15711_v19  ;;  %13844 = vst [vmem:[%s23982_s16 + $0x128] sm:$0xff] %v15648_v23 }
 0x8d3   : > { %13846 = vst [vmem:[%s23982_s16 + $0x138] sm:$0xff] %v15712_v56 }
 0x8d4   : > { %v12154_v31 = vpop.f32.mrb[20].mxu0 }
 0x8d5   : > { %v15649_v53 = vadd.f32 %v12154_v31, %v23968_v28  ;;  %v13698_v44 = vpop.f32.mrb[20].mxu1  ;;  %v12156_v24 = vpop.f32.mrb[21].mxu0 }
 0x8d6   : > { %v15713_v8 = vadd.f32 %v13698_v44, %v23971_v37  ;;  %v15650_v34 = vadd.f32 %v12156_v24, %v23974_v52  ;;  %v13700_v18 = vpop.f32.mrb[21].mxu1  ;;  %v12158_v20 = vpop.f32.mrb[22].mxu0 }
 0x8d7   : > { %13847 = vst [vmem:[%s23982_s16 + $0x140] sm:$0xff] %v15649_v53  ;;  %v15714_v22 = vadd.f32 %v13700_v18, %v23977_v41  ;;  %v15651_v26 = vadd.f32 %v12158_v20, %v23968_v28  ;;  %v13702_v13 = vpop.f32.mrb[22].mxu1  ;;  %v12160_v29 = vpop.f32.mrb[23].mxu0 }
 0x8d8   : > { %13849 = vst [vmem:[%s23982_s16 + $0x150] sm:$0xff] %v15713_v8  ;;  %13848 = vst [vmem:[%s23982_s16 + $0x148] sm:$0xff] %v15650_v34  ;;  %v15715_v51 = vadd.f32 %v13702_v13, %v23971_v37  ;;  %v15652_v47 = vadd.f32 %v12160_v29, %v23974_v52  ;;  %v13704_v25 = vpop.f32.mrb[23].mxu1 }
 0x8d9   : > { %13850 = vst [vmem:[%s23982_s16 + $0x158] sm:$0xff] %v15714_v22  ;;  %13851 = vst [vmem:[%s23982_s16 + $0x160] sm:$0xff] %v15651_v26  ;;  %v15716_v3 = vadd.f32 %v13704_v25, %v23977_v41 }
 0x8da   : > { %13853 = vst [vmem:[%s23982_s16 + $0x170] sm:$0xff] %v15715_v51  ;;  %13852 = vst [vmem:[%s23982_s16 + $0x168] sm:$0xff] %v15652_v47 }
 0x8db   : > { %13854 = vst [vmem:[%s23982_s16 + $0x178] sm:$0xff] %v15716_v3 }
 0x8dc   : > { %v12164_v58 = vpop.f32.mrb[24].mxu0 }
 0x8dd   : > { %v15653_v60 = vadd.f32 %v12164_v58, %v23968_v28  ;;  %v13708_v39 = vpop.f32.mrb[24].mxu1  ;;  %v12166_v32 = vpop.f32.mrb[25].mxu0 }
 0x8de   : > { %v15717_v42 = vadd.f32 %v13708_v39, %v23971_v37  ;;  %v15654_v5 = vadd.f32 %v12166_v32, %v23974_v52  ;;  %v13710_v46 = vpop.f32.mrb[25].mxu1  ;;  %v12168_v57 = vpop.f32.mrb[26].mxu0 }
 0x8df   : > { %13855 = vst [vmem:[%s23982_s16 + $0x180] sm:$0xff] %v15653_v60  ;;  %v15718_v33 = vadd.f32 %v13710_v46, %v23977_v41  ;;  %v15655_v43 = vadd.f32 %v12168_v57, %v23968_v28  ;;  %v13712_v15 = vpop.f32.mrb[26].mxu1  ;;  %v12170_v4 = vpop.f32.mrb[27].mxu0 }
 0x8e0   : > { %13857 = vst [vmem:[%s23982_s16 + $0x190] sm:$0xff] %v15717_v42  ;;  %13856 = vst [vmem:[%s23982_s16 + $0x188] sm:$0xff] %v15654_v5  ;;  %v15719_v49 = vadd.f32 %v13712_v15, %v23971_v37  ;;  %v15656_v48 = vadd.f32 %v12170_v4, %v23974_v52  ;;  %v13714_v16 = vpop.f32.mrb[27].mxu1 }
 0x8e1   : > { %13858 = vst [vmem:[%s23982_s16 + $0x198] sm:$0xff] %v15718_v33  ;;  %13859 = vst [vmem:[%s23982_s16 + $0x1a0] sm:$0xff] %v15655_v43  ;;  %v15720_v40 = vadd.f32 %v13714_v16, %v23977_v41 }
 0x8e2   : > { %13861 = vst [vmem:[%s23982_s16 + $0x1b0] sm:$0xff] %v15719_v49  ;;  %13860 = vst [vmem:[%s23982_s16 + $0x1a8] sm:$0xff] %v15656_v48 }
 0x8e3   : > { %13862 = vst [vmem:[%s23982_s16 + $0x1b8] sm:$0xff] %v15720_v40 }
 0x8e4   : > { %v12174_v38 = vpop.f32.mrb[28].mxu0 }
 0x8e5   : > { %v15657_v36 = vadd.f32 %v12174_v38, %v23968_v28  ;;  %v13718_v14 = vpop.f32.mrb[28].mxu1  ;;  %v12176_v10 = vpop.f32.mrb[29].mxu0 }
 0x8e6   : > { %v15721_v0 = vadd.f32 %v13718_v14, %v23971_v37  ;;  %v15658_v6 = vadd.f32 %v12176_v10, %v23974_v52  ;;  %v13720_v2 = vpop.f32.mrb[29].mxu1  ;;  %v12178_v17 = vpop.f32.mrb[30].mxu0 }
 0x8e7   : > { %13863 = vst [vmem:[%s23982_s16 + $0x1c0] sm:$0xff] %v15657_v36  ;;  %v15722_v27 = vadd.f32 %v13720_v2, %v23977_v41  ;;  %v15659_v21 = vadd.f32 %v12178_v17, %v23968_v28  ;;  %v13722_v61 = vpop.f32.mrb[30].mxu1  ;;  %v12180_v50 = vpop.f32.mrb[31].mxu0 }
 0x8e8   : > { %13865 = vst [vmem:[%s23982_s16 + $0x1d0] sm:$0xff] %v15721_v0  ;;  %13864 = vst [vmem:[%s23982_s16 + $0x1c8] sm:$0xff] %v15658_v6  ;;  %v15723_v12 = vadd.f32 %v13722_v61, %v23971_v37  ;;  %v15660_v30 = vadd.f32 %v12180_v50, %v23974_v52  ;;  %v13724_v35 = vpop.f32.mrb[31].mxu1 }
 0x8e9   : > { %13866 = vst [vmem:[%s23982_s16 + $0x1d8] sm:$0xff] %v15722_v27  ;;  %13867 = vst [vmem:[%s23982_s16 + $0x1e0] sm:$0xff] %v15659_v21  ;;  %v15724_v55 = vadd.f32 %v13724_v35, %v23977_v41 }
 0x8ea   : > { %13869 = vst [vmem:[%s23982_s16 + $0x1f0] sm:$0xff] %v15723_v12  ;;  %13868 = vst [vmem:[%s23982_s16 + $0x1e8] sm:$0xff] %v15660_v30 }
 0x8eb   : > { %13870 = vst [vmem:[%s23982_s16 + $0x1f8] sm:$0xff] %v15724_v55 }
 0x8ec   : > { %v12184_v62 = vpop.f32.mrb[32].mxu0 }
 0x8ed   : > { %v15661_v45 = vadd.f32 %v12184_v62, %v23968_v28  ;;  %v13728_v11 = vpop.f32.mrb[32].mxu1  ;;  %v12186_v54 = vpop.f32.mrb[33].mxu0 }
 0x8ee   : > { %v15725_v59 = vadd.f32 %v13728_v11, %v23971_v37  ;;  %v15662_v63 = vadd.f32 %v12186_v54, %v23974_v52  ;;  %v13730_v1 = vpop.f32.mrb[33].mxu1  ;;  %v12188_v9 = vpop.f32.mrb[34].mxu0 }
 0x8ef   : > { %13871 = vst [vmem:[%s23982_s16 + $0x200] sm:$0xff] %v15661_v45  ;;  %v15726_v19 = vadd.f32 %v13730_v1, %v23977_v41  ;;  %v15663_v23 = vadd.f32 %v12188_v9, %v23968_v28  ;;  %v13732_v7 = vpop.f32.mrb[34].mxu1  ;;  %v12190_v56 = vpop.f32.mrb[35].mxu0 }
 0x8f0   : > { %13873 = vst [vmem:[%s23982_s16 + $0x210] sm:$0xff] %v15725_v59  ;;  %13872 = vst [vmem:[%s23982_s16 + $0x208] sm:$0xff] %v15662_v63  ;;  %v15727_v31 = vadd.f32 %v13732_v7, %v23971_v37  ;;  %v15664_v53 = vadd.f32 %v12190_v56, %v23974_v52  ;;  %v13734_v44 = vpop.f32.mrb[35].mxu1 }
 0x8f1   : > { %13874 = vst [vmem:[%s23982_s16 + $0x218] sm:$0xff] %v15726_v19  ;;  %13875 = vst [vmem:[%s23982_s16 + $0x220] sm:$0xff] %v15663_v23  ;;  %v15728_v24 = vadd.f32 %v13734_v44, %v23977_v41 }
 0x8f2   : > { %13877 = vst [vmem:[%s23982_s16 + $0x230] sm:$0xff] %v15727_v31  ;;  %13876 = vst [vmem:[%s23982_s16 + $0x228] sm:$0xff] %v15664_v53 }
 0x8f3   : > { %13878 = vst [vmem:[%s23982_s16 + $0x238] sm:$0xff] %v15728_v24 }
 0x8f4   : > { %v12194_v8 = vpop.f32.mrb[36].mxu0 }
 0x8f5   : > { %v15665_v34 = vadd.f32 %v12194_v8, %v23968_v28  ;;  %v13738_v18 = vpop.f32.mrb[36].mxu1  ;;  %v12196_v20 = vpop.f32.mrb[37].mxu0 }
 0x8f6   : > { %v15729_v22 = vadd.f32 %v13738_v18, %v23971_v37  ;;  %v15666_v26 = vadd.f32 %v12196_v20, %v23974_v52  ;;  %v13740_v13 = vpop.f32.mrb[37].mxu1  ;;  %v12198_v29 = vpop.f32.mrb[38].mxu0 }
 0x8f7   : > { %13879 = vst [vmem:[%s23982_s16 + $0x240] sm:$0xff] %v15665_v34  ;;  %v15730_v51 = vadd.f32 %v13740_v13, %v23977_v41  ;;  %v15667_v47 = vadd.f32 %v12198_v29, %v23968_v28  ;;  %v13742_v25 = vpop.f32.mrb[38].mxu1  ;;  %v12200_v3 = vpop.f32.mrb[39].mxu0 }
 0x8f8   : > { %13881 = vst [vmem:[%s23982_s16 + $0x250] sm:$0xff] %v15729_v22  ;;  %13880 = vst [vmem:[%s23982_s16 + $0x248] sm:$0xff] %v15666_v26  ;;  %v15731_v58 = vadd.f32 %v13742_v25, %v23971_v37  ;;  %v15668_v60 = vadd.f32 %v12200_v3, %v23974_v52  ;;  %v13744_v39 = vpop.f32.mrb[39].mxu1 }
 0x8f9   : > { %13882 = vst [vmem:[%s23982_s16 + $0x258] sm:$0xff] %v15730_v51  ;;  %13883 = vst [vmem:[%s23982_s16 + $0x260] sm:$0xff] %v15667_v47  ;;  %v15732_v32 = vadd.f32 %v13744_v39, %v23977_v41 }
 0x8fa   : > { %13885 = vst [vmem:[%s23982_s16 + $0x270] sm:$0xff] %v15731_v58  ;;  %13884 = vst [vmem:[%s23982_s16 + $0x268] sm:$0xff] %v15668_v60 }
 0x8fb   : > { %13886 = vst [vmem:[%s23982_s16 + $0x278] sm:$0xff] %v15732_v32 }
 0x8fc   : > { %v12204_v42 = vpop.f32.mrb[40].mxu0 }
 0x8fd   : > { %v15669_v5 = vadd.f32 %v12204_v42, %v23968_v28  ;;  %v13748_v46 = vpop.f32.mrb[40].mxu1  ;;  %v12206_v57 = vpop.f32.mrb[41].mxu0 }
 0x8fe   : > { %v15733_v33 = vadd.f32 %v13748_v46, %v23971_v37  ;;  %v15670_v43 = vadd.f32 %v12206_v57, %v23974_v52  ;;  %v13750_v15 = vpop.f32.mrb[41].mxu1  ;;  %v12208_v4 = vpop.f32.mrb[42].mxu0 }
 0x8ff   : > { %13887 = vst [vmem:[%s23982_s16 + $0x280] sm:$0xff] %v15669_v5  ;;  %v15734_v49 = vadd.f32 %v13750_v15, %v23977_v41  ;;  %v15671_v48 = vadd.f32 %v12208_v4, %v23968_v28  ;;  %v13752_v16 = vpop.f32.mrb[42].mxu1  ;;  %v12210_v40 = vpop.f32.mrb[43].mxu0 }
 0x900   : > { %13889 = vst [vmem:[%s23982_s16 + $0x290] sm:$0xff] %v15733_v33  ;;  %13888 = vst [vmem:[%s23982_s16 + $0x288] sm:$0xff] %v15670_v43  ;;  %v15735_v38 = vadd.f32 %v13752_v16, %v23971_v37  ;;  %v15672_v36 = vadd.f32 %v12210_v40, %v23974_v52  ;;  %v13754_v14 = vpop.f32.mrb[43].mxu1 }
 0x901   : > { %13890 = vst [vmem:[%s23982_s16 + $0x298] sm:$0xff] %v15734_v49  ;;  %13891 = vst [vmem:[%s23982_s16 + $0x2a0] sm:$0xff] %v15671_v48  ;;  %v15736_v10 = vadd.f32 %v13754_v14, %v23977_v41 }
 0x902   : > { %13893 = vst [vmem:[%s23982_s16 + $0x2b0] sm:$0xff] %v15735_v38  ;;  %13892 = vst [vmem:[%s23982_s16 + $0x2a8] sm:$0xff] %v15672_v36 }
 0x903   : > { %13894 = vst [vmem:[%s23982_s16 + $0x2b8] sm:$0xff] %v15736_v10 }
 0x904   : > { %v12214_v0 = vpop.f32.mrb[44].mxu0 }
 0x905   : > { %v15673_v6 = vadd.f32 %v12214_v0, %v23968_v28  ;;  %v13758_v2 = vpop.f32.mrb[44].mxu1  ;;  %v12216_v17 = vpop.f32.mrb[45].mxu0 }
 0x906   : > { %v15737_v27 = vadd.f32 %v13758_v2, %v23971_v37  ;;  %v15674_v21 = vadd.f32 %v12216_v17, %v23974_v52  ;;  %v13760_v61 = vpop.f32.mrb[45].mxu1  ;;  %v12218_v50 = vpop.f32.mrb[46].mxu0 }
 0x907   : > { %13895 = vst [vmem:[%s23982_s16 + $0x2c0] sm:$0xff] %v15673_v6  ;;  %v15738_v12 = vadd.f32 %v13760_v61, %v23977_v41  ;;  %v15675_v30 = vadd.f32 %v12218_v50, %v23968_v28  ;;  %v13762_v35 = vpop.f32.mrb[46].mxu1  ;;  %v12220_v55 = vpop.f32.mrb[47].mxu0 }
 0x908   : > { %13897 = vst [vmem:[%s23982_s16 + $0x2d0] sm:$0xff] %v15737_v27  ;;  %13896 = vst [vmem:[%s23982_s16 + $0x2c8] sm:$0xff] %v15674_v21  ;;  %v15739_v62 = vadd.f32 %v13762_v35, %v23971_v37  ;;  %v15676_v45 = vadd.f32 %v12220_v55, %v23974_v52  ;;  %v13764_v11 = vpop.f32.mrb[47].mxu1 }
 0x909   : > { %13898 = vst [vmem:[%s23982_s16 + $0x2d8] sm:$0xff] %v15738_v12  ;;  %13899 = vst [vmem:[%s23982_s16 + $0x2e0] sm:$0xff] %v15675_v30  ;;  %v15740_v54 = vadd.f32 %v13764_v11, %v23977_v41 }
 0x90a   : > { %13901 = vst [vmem:[%s23982_s16 + $0x2f0] sm:$0xff] %v15739_v62  ;;  %13900 = vst [vmem:[%s23982_s16 + $0x2e8] sm:$0xff] %v15676_v45 }
 0x90b   : > { %13902 = vst [vmem:[%s23982_s16 + $0x2f8] sm:$0xff] %v15740_v54 }
 0x90c   : > { %v12224_v59 = vpop.f32.mrb[48].mxu0 }
 0x90d   : > { %v15677_v63 = vadd.f32 %v12224_v59, %v23968_v28  ;;  %v13768_v1 = vpop.f32.mrb[48].mxu1  ;;  %v12226_v9 = vpop.f32.mrb[49].mxu0 }
 0x90e   : > { %v15741_v19 = vadd.f32 %v13768_v1, %v23971_v37  ;;  %v15678_v23 = vadd.f32 %v12226_v9, %v23974_v52  ;;  %v13770_v7 = vpop.f32.mrb[49].mxu1  ;;  %v12228_v56 = vpop.f32.mrb[50].mxu0 }
 0x90f   : > { %13903 = vst [vmem:[%s23982_s16 + $0x300] sm:$0xff] %v15677_v63  ;;  %v15742_v31 = vadd.f32 %v13770_v7, %v23977_v41  ;;  %v15679_v53 = vadd.f32 %v12228_v56, %v23968_v28  ;;  %v13772_v44 = vpop.f32.mrb[50].mxu1  ;;  %v12230_v24 = vpop.f32.mrb[51].mxu0 }
 0x910   : > { %13905 = vst [vmem:[%s23982_s16 + $0x310] sm:$0xff] %v15741_v19  ;;  %13904 = vst [vmem:[%s23982_s16 + $0x308] sm:$0xff] %v15678_v23  ;;  %v15743_v8 = vadd.f32 %v13772_v44, %v23971_v37  ;;  %v15680_v34 = vadd.f32 %v12230_v24, %v23974_v52  ;;  %v13774_v18 = vpop.f32.mrb[51].mxu1 }
 0x911   : > { %13906 = vst [vmem:[%s23982_s16 + $0x318] sm:$0xff] %v15742_v31  ;;  %13907 = vst [vmem:[%s23982_s16 + $0x320] sm:$0xff] %v15679_v53  ;;  %v15744_v20 = vadd.f32 %v13774_v18, %v23977_v41 }
 0x912   : > { %13909 = vst [vmem:[%s23982_s16 + $0x330] sm:$0xff] %v15743_v8  ;;  %13908 = vst [vmem:[%s23982_s16 + $0x328] sm:$0xff] %v15680_v34 }
 0x913   : > { %13910 = vst [vmem:[%s23982_s16 + $0x338] sm:$0xff] %v15744_v20 }
 0x914   : > { %v12234_v22 = vpop.f32.mrb[52].mxu0 }
 0x915   : > { %v15681_v26 = vadd.f32 %v12234_v22, %v23968_v28  ;;  %v13778_v13 = vpop.f32.mrb[52].mxu1  ;;  %v12236_v29 = vpop.f32.mrb[53].mxu0 }
 0x916   : > { %v15745_v51 = vadd.f32 %v13778_v13, %v23971_v37  ;;  %v15682_v47 = vadd.f32 %v12236_v29, %v23974_v52  ;;  %v13780_v25 = vpop.f32.mrb[53].mxu1  ;;  %v12238_v3 = vpop.f32.mrb[54].mxu0 }
 0x917   : > { %13911 = vst [vmem:[%s23982_s16 + $0x340] sm:$0xff] %v15681_v26  ;;  %v15746_v58 = vadd.f32 %v13780_v25, %v23977_v41  ;;  %v15683_v60 = vadd.f32 %v12238_v3, %v23968_v28  ;;  %v13782_v39 = vpop.f32.mrb[54].mxu1  ;;  %v12240_v32 = vpop.f32.mrb[55].mxu0 }
 0x918   : > { %13913 = vst [vmem:[%s23982_s16 + $0x350] sm:$0xff] %v15745_v51  ;;  %13912 = vst [vmem:[%s23982_s16 + $0x348] sm:$0xff] %v15682_v47  ;;  %v15747_v42 = vadd.f32 %v13782_v39, %v23971_v37  ;;  %v15684_v5 = vadd.f32 %v12240_v32, %v23974_v52  ;;  %v13784_v46 = vpop.f32.mrb[55].mxu1 }
 0x919   : > { %13914 = vst [vmem:[%s23982_s16 + $0x358] sm:$0xff] %v15746_v58  ;;  %13915 = vst [vmem:[%s23982_s16 + $0x360] sm:$0xff] %v15683_v60  ;;  %v15748_v57 = vadd.f32 %v13784_v46, %v23977_v41 }
 0x91a   : > { %13917 = vst [vmem:[%s23982_s16 + $0x370] sm:$0xff] %v15747_v42  ;;  %13916 = vst [vmem:[%s23982_s16 + $0x368] sm:$0xff] %v15684_v5 }
 0x91b   : > { %13918 = vst [vmem:[%s23982_s16 + $0x378] sm:$0xff] %v15748_v57 }
 0x91c   : > { %v12244_v33 = vpop.f32.mrb[56].mxu0 }
 0x91d   : > { %v15685_v43 = vadd.f32 %v12244_v33, %v23968_v28  ;;  %v13788_v15 = vpop.f32.mrb[56].mxu1  ;;  %v12246_v4 = vpop.f32.mrb[57].mxu0 }
 0x91e   : > { %v15749_v49 = vadd.f32 %v13788_v15, %v23971_v37  ;;  %v15686_v48 = vadd.f32 %v12246_v4, %v23974_v52  ;;  %v13790_v16 = vpop.f32.mrb[57].mxu1  ;;  %v12248_v40 = vpop.f32.mrb[58].mxu0 }
 0x91f   : > { %13919 = vst [vmem:[%s23982_s16 + $0x380] sm:$0xff] %v15685_v43  ;;  %v15750_v38 = vadd.f32 %v13790_v16, %v23977_v41  ;;  %v15687_v36 = vadd.f32 %v12248_v40, %v23968_v28  ;;  %v13792_v14 = vpop.f32.mrb[58].mxu1  ;;  %v12250_v10 = vpop.f32.mrb[59].mxu0 }
 0x920   : > { %13921 = vst [vmem:[%s23982_s16 + $0x390] sm:$0xff] %v15749_v49  ;;  %13920 = vst [vmem:[%s23982_s16 + $0x388] sm:$0xff] %v15686_v48  ;;  %v15751_v0 = vadd.f32 %v13792_v14, %v23971_v37  ;;  %v15688_v6 = vadd.f32 %v12250_v10, %v23974_v52  ;;  %v13794_v2 = vpop.f32.mrb[59].mxu1 }
 0x921   : > { %13922 = vst [vmem:[%s23982_s16 + $0x398] sm:$0xff] %v15750_v38  ;;  %13923 = vst [vmem:[%s23982_s16 + $0x3a0] sm:$0xff] %v15687_v36  ;;  %v15752_v17 = vadd.f32 %v13794_v2, %v23977_v41 }
 0x922   : > { %13925 = vst [vmem:[%s23982_s16 + $0x3b0] sm:$0xff] %v15751_v0  ;;  %13924 = vst [vmem:[%s23982_s16 + $0x3a8] sm:$0xff] %v15688_v6 }
 0x923   : > { %13926 = vst [vmem:[%s23982_s16 + $0x3b8] sm:$0xff] %v15752_v17 }
 0x924   : > { %v12254_v27 = vpop.f32.mrb[60].mxu0 }
 0x925   : > { %v15689_v21 = vadd.f32 %v12254_v27, %v23968_v28  ;;  %v13798_v61 = vpop.f32.mrb[60].mxu1  ;;  %v12256_v50 = vpop.f32.mrb[61].mxu0 }
 0x926   : > { %v15753_v12 = vadd.f32 %v13798_v61, %v23971_v37  ;;  %v15690_v30 = vadd.f32 %v12256_v50, %v23974_v52  ;;  %v13800_v35 = vpop.f32.mrb[61].mxu1  ;;  %v12258_v55 = vpop.f32.mrb[62].mxu0 }
 0x927   : > { %13927 = vst [vmem:[%s23982_s16 + $0x3c0] sm:$0xff] %v15689_v21  ;;  %v15754_v62 = vadd.f32 %v13800_v35, %v23977_v41  ;;  %v15691_v45 = vadd.f32 %v12258_v55, %v23968_v28  ;;  %v13802_v11 = vpop.f32.mrb[62].mxu1  ;;  %v12260_v54 = vpop.f32.mrb[63].mxu0 }
 0x928   : > { %13929 = vst [vmem:[%s23982_s16 + $0x3d0] sm:$0xff] %v15753_v12  ;;  %13928 = vst [vmem:[%s23982_s16 + $0x3c8] sm:$0xff] %v15690_v30  ;;  %v15755_v59 = vadd.f32 %v13802_v11, %v23971_v37  ;;  %v15692_v63 = vadd.f32 %v12260_v54, %v23974_v52  ;;  %v13804_v1 = vpop.f32.mrb[63].mxu1 }
 0x929   : > { %13930 = vst [vmem:[%s23982_s16 + $0x3d8] sm:$0xff] %v15754_v62  ;;  %13931 = vst [vmem:[%s23982_s16 + $0x3e0] sm:$0xff] %v15691_v45  ;;  %v15756_v28 = vadd.f32 %v13804_v1, %v23977_v41 }
 0x92a   : > { %13933 = vst [vmem:[%s23982_s16 + $0x3f0] sm:$0xff] %v15755_v59  ;;  %13932 = vst [vmem:[%s23982_s16 + $0x3e8] sm:$0xff] %v15692_v63 }
 0x92b   : > { %13934 = vst [vmem:[%s23982_s16 + $0x3f8] sm:$0xff] %v15756_v28 }
 0x92c   : > { %18277 = shalt.err (!%p18274_p3)
}
 0x92d   : > { %s18278_s10 = scalar_lea.hbm %s24236_s23, 16384  ;;  %s18282_s14 = scalar_lea.hbm %s24294_s5, 32768 }
 0x92e   : > { %p18279_p4 = scmp.ne.s32.totalorder %s24236_s23, %s18278_s10  ;;  %p18283_p9 = scmp.lt.u32.totalorder %s24236_s23, %s24294_s5 }
 0x92f   : > { %p18284_p10 = scmp.lt.u32.totalorder %s18282_s14, %s18278_s10  ;;  %p18286_p12 = scmp.lt.u32.totalorder %s18278_s10, %s24236_s23 }
 0x930   : > { %p18280_p7 = pnand %p18279_p4, %p18399_p5 }
 0x931   : > { %p18285_p11 = por %p18284_p10, %p18283_p9 }
 0x932   : > { %p18281_p8 = pneg %p18280_p7 }
 0x933   : > { %p18287_p13 = por %p18286_p12, %p18285_p11 }
 0x935   : > { %p18288_p0 = pnand %p18287_p13, %p18281_p8 }
 0x937   : > { %18291 = shalt.err (!%p18288_p0)
}
 0x938   : > { %s18329_s16 = smov 512   ;;  %s18330_s17 = smov 32  }
 0x939   : > { %17165 = dma.vmem_to_hbm [thread:$0]  (%p18399_p5), %s24238_s25, 16384, %s24236_s23, %s24248_s30, %s18329_s16, %s18329_s16, %s18330_s17  }
 0x93a PF: > { %p17171_p1 = scmp.ge.s32.totalorder %s18326_s21, 2  ;;  %s13965_s22 = sand.u32 1, %s18314_s18  }
 0x93b   : > { %s13966_s26 = scalar_lea.sflag [#allocation3], %s13965_s22 }
 0x93c   : > { %p17168_p2 = pnand %p17171_p1, %p18403_p6 }
 0x93e   : > { %18309 = dma.done.wait (!%p17168_p2), %s13966_s26, 16384  }
 0x93f   : > { %18311 = vsyncadd (!%p17168_p2), %s13966_s26, 4294950912  ;;  %p15_p3 = scmp.ge.s32.totalorder %s18386_s24, 4   ;;  %s24896_s18 = smov %s18318_s19 }
 0x940   : > { %s24897_s19 = smov %s18322_s20  ;;  %s24898_s20 = smov %s18397_s27 }
 0x941   : > { %s24899_s21 = smov %s18386_s24  ;;  %17 = sbr.rel (!%p15_p3) target bundleno = 3 (0x3), region = 75 }
 0x948   :  { %13971 = vsyncpa [#allocation3], 1 }
 0x949   :  { %13973 = vsyncpa [#allocation3 + $0x1], 1 }

</bundles_post_ra>
